<compile_context>
chip_gen: v5e
topology: v5e:2x2
jax: 0.10.0
libtpu: 0.0.40
codegen_flags: <defaults>
</compile_context>

<pallas_src>
import jax
import jax.numpy as jnp
from jax import lax
from jax.experimental import pallas as pl
from jax.experimental.pallas import tpu as pltpu


def _full_vmem_spec(shape):
    """Whole-array VMEM block (grid-less call => index_map takes no args)."""
    return pl.BlockSpec(shape, lambda: (0,) * len(shape))


# ------------------------- fused LSTM + FC kernel ----------------------------
def make_fused_lstm_kernel(num_layers, T, Bp, H, compute_dtype):
    """Build the fused (all layers + classifier head) kernel.

    Ref order (inputs, then output, then scratch):
      x_ref              : (T*Bp, D)     compute_dtype   flattened (time-major) input
      per layer l        : wih (4, D_l, H), whh (4, H, H) compute_dtype
                           b   (4, 1, H)                  float32  (= b_ih + b_hh)
      fc_w               : (H, O)        compute_dtype
      fc_b               : (1, O)        float32
      out_ref            : (Bp, O)       float32
      gx0..gx3 (scratch) : (T*Bp, H)     float32   hoisted per-gate input projections
      seq      (scratch) : (T*Bp, H)     compute_dtype  layer-to-layer activations
    """
    n_in = 1 + 3 * num_layers + 2

    def kernel(*refs):
        x_ref = refs[0]
        layer_refs = [tuple(refs[1 + 3 * l: 4 + 3 * l]) for l in range(num_layers)]
        fc_w_ref = refs[3 * num_layers + 1]
        fc_b_ref = refs[3 * num_layers + 2]
        out_ref = refs[n_in]
        gx_refs = list(refs[n_in + 1: n_in + 5])
        seq_ref = refs[n_in + 5]

        h_last = None
        for l, (wih_ref, whh_ref, b_ref) in enumerate(layer_refs):
            is_last_layer = (l == num_layers - 1)

            # ---- (1) hoisted input projection (+ folded bias), once per layer ----
            # One (T*Bp, D_l) x (D_l, H) matmul per gate at good MXU occupancy;
            # nothing here sits on the serial recurrence.
            inp = x_ref[...] if l == 0 else seq_ref[...]
            for g in range(4):
                gx_refs[g][...] = (
                    jnp.dot(inp, wih_ref[g], preferred_element_type=jnp.float32)
                    + b_ref[g]
                )

            # Keep the small recurrent weights live across the unrolled t loop.
            whh = [whh_ref[g] for g in range(4)]

            # ---- (2) serial recurrence: only h @ W_hh + gate math per step --------
            h = jnp.zeros((Bp, H), jnp.float32)
            c = jnp.zeros((Bp, H), jnp.float32)
            for t in range(T):                      # static T -> fully unrolled
                rows = slice(t * Bp, (t + 1) * Bp)  # 8-aligned static row slice
                h_cd = h.astype(compute_dtype)
                # PyTorch gate order i, f, g, o; gate axis is the leading weight dim,
                # so there is no intra-vreg lane slicing here.
                gates = [
                    gx_refs[g][rows, :]
                    + jnp.dot(h_cd, whh[g], preferred_element_type=jnp.float32)
                    for g in range(4)
                ]
                i_g = jax.nn.sigmoid(gates[0])
                f_g = jax.nn.sigmoid(gates[1])
                g_g = jnp.tanh(gates[2])
                o_g = jax.nn.sigmoid(gates[3])
                c = f_g * c + i_g * g_g
                h = o_g * jnp.tanh(c)
                if not is_last_layer:
                    seq_ref[rows, :] = h.astype(compute_dtype)
            h_last = h

        # ---- (3) fused classifier head on the final hidden state ------------------
        out_ref[...] = (
            jnp.dot(h_last.astype(compute_dtype), fc_w_ref[...],
                    preferred_element_type=jnp.float32)
            + fc_b_ref[...]
        )

    return kernel


# ------------------------------ parameter prep --------------------------------
def init_params(key, input_dim, hidden_dim, layer_dim, output_dim):
    """f32 master params in PyTorch layout (uniform +-1/sqrt(H), like nn.LSTM/nn.Linear)."""
    bound = 1.0 / float(hidden_dim) ** 0.5
    lstm = []
    for layer in range(layer_dim):
        d_in = input_dim if layer == 0 else hidden_dim
        key, k1, k2, k3, k4 = jax.random.split(key, 5)
        w_ih = jax.random.uniform(k1, (4 * hidden_dim, d_in), jnp.float32, -bound, bound)
        w_hh = jax.random.uniform(k2, (4 * hidden_dim, hidden_dim), jnp.float32, -bound, bound)
        b_ih = jax.random.uniform(k3, (4 * hidden_dim,), jnp.float32, -bound, bound)
        b_hh = jax.random.uniform(k4, (4 * hidden_dim,), jnp.float32, -bound, bound)
        lstm.append((w_ih, w_hh, b_ih, b_hh))
    key, k5, k6 = jax.random.split(key, 3)
    fc_w = jax.random.uniform(k5, (output_dim, hidden_dim), jnp.float32, -bound, bound)
    fc_b = jax.random.uniform(k6, (output_dim,), jnp.float32, -bound, bound)
    return {"lstm": lstm, "fc_w": fc_w, "fc_b": fc_b}


def prepare_kernel_params(params, compute_dtype=jnp.bfloat16):
    """Re-layout PyTorch-style weights for the fused kernel.

    Gate axis becomes the leading dim (i, f, g, o); matmul operands are pre-cast to
    `compute_dtype` (bf16 MXU inputs / f32 accumulate); biases stay f32 and are
    pre-combined (b_ih + b_hh) so they are added once in the hoisted projection.
    """
    lstm = []
    for (w_ih, w_hh, b_ih, b_hh) in params["lstm"]:
        H = w_hh.shape[1]
        wih_g = jnp.transpose(w_ih.reshape(4, H, -1), (0, 2, 1)).astype(compute_dtype)
        whh_g = jnp.transpose(w_hh.reshape(4, H, H), (0, 2, 1)).astype(compute_dtype)
        b_g = (b_ih + b_hh).reshape(4, 1, H).astype(jnp.float32)
        lstm.append((wih_g, whh_g, b_g))
    return {
        "lstm": lstm,
        "fc_w": params["fc_w"].T.astype(compute_dtype),             # (H, O)
        "fc_b": params["fc_b"].reshape(1, -1).astype(jnp.float32),  # (1, O)
        "hidden_dim": int(params["lstm"][0][1].shape[1]),
        "compute_dtype": compute_dtype,
    }


# ------------------------------ forward wrapper --------------------------------
def lstm_classifier_forward(x_btd, kparams):
    """x_btd: (B, T, input_dim) (PyTorch batch_first). Returns logits (B, output_dim)."""
    B, T, D = x_btd.shape
    H = kparams["hidden_dim"]
    O = kparams["fc_w"].shape[1]
    cd = kparams["compute_dtype"]
    num_layers = len(kparams["lstm"])

    # Pad batch to a multiple of 8 sublanes; keep activations as flat (T*Bp, D) slabs.
    Bp = ((B + 7) // 8) * 8
    x = jnp.transpose(x_btd, (1, 0, 2))            # (T, B, D)
    if Bp != B:
        x = jnp.pad(x, ((0, 0), (0, Bp - B), (0, 0)))
    x = x.reshape(T * Bp, D).astype(cd)

    inputs = [x]
    in_specs = [_full_vmem_spec(x.shape)]
    for (wih_g, whh_g, b_g) in kparams["lstm"]:
        inputs += [wih_g, whh_g, b_g]
        in_specs += [_full_vmem_spec(wih_g.shape),
                     _full_vmem_spec(whh_g.shape),
                     _full_vmem_spec(b_g.shape)]
    inputs += [kparams["fc_w"], kparams["fc_b"]]
    in_specs += [_full_vmem_spec(kparams["fc_w"].shape),
                 _full_vmem_spec(kparams["fc_b"].shape)]

    kernel = make_fused_lstm_kernel(num_layers, T, Bp, H, cd)
    # TODO(synk): for realistic batch sizes add a leading "parallel" batch-block grid
    #   axis (dimension_semantics=("parallel",)) so v7x's second TensorCore is used;
    #   for realistic hidden sizes (H ~ 1024) tile the per-gate weights along H and set
    #   pltpu.CompilerParams(vmem_limit_bytes=...) to fit v7x's 64 MiB VMEM.
    out_padded = pl.pallas_call(
        kernel,
        out_shape=jax.ShapeDtypeStruct((Bp, O), jnp.float32),
        in_specs=in_specs,
        out_specs=_full_vmem_spec((Bp, O)),
        scratch_shapes=(
            [pltpu.VMEM((T * Bp, H), jnp.float32) for _ in range(4)]  # gx per gate
            + [pltpu.VMEM((T * Bp, H), cd)]                           # layer activations
        ),
    )(*inputs)
    return out_padded[:B]


# ------------------------------ pure-JAX reference -----------------------------
def reference_forward(x_btd, params, matmul_dtype=jnp.float32):
    """PyTorch-semantics reference. With matmul_dtype=bfloat16 it mirrors the kernel's
    rounding points (bf16 matmul inputs, f32 accumulation, f32 gate math)."""
    cast = lambda a: a.astype(matmul_dtype)
    x = jnp.transpose(x_btd, (1, 0, 2)).astype(jnp.float32)   # (T, B, D)
    B = x.shape[1]
    for (w_ih, w_hh, b_ih, b_hh) in params["lstm"]:
        H = w_hh.shape[1]
        wih_t, whh_t = w_ih.T, w_hh.T
        bias = (b_ih + b_hh)[None, :]

        def step(carry, x_t, wih_t=wih_t, whh_t=whh_t, bias=bias, H=H):
            h, c = carry
            gates = (jnp.dot(cast(x_t), cast(wih_t), preferred_element_type=jnp.float32)
                     + jnp.dot(cast(h), cast(whh_t), preferred_element_type=jnp.float32)
                     + bias)
            i = jax.nn.sigmoid(gates[:, 0 * H:1 * H])
            f = jax.nn.sigmoid(gates[:, 1 * H:2 * H])
            g = jnp.tanh(gates[:, 2 * H:3 * H])
            o = jax.nn.sigmoid(gates[:, 3 * H:4 * H])
            c = f * c + i * g
            h = o * jnp.tanh(c)
            return (h, c), h

        init = (jnp.zeros((B, H), jnp.float32), jnp.zeros((B, H), jnp.float32))
        _, x = lax.scan(step, init, x)
    h_last = x[-1]
    return (jnp.dot(cast(h_last), cast(params["fc_w"].T),
                    preferred_element_type=jnp.float32)
            + params["fc_b"][None, :])


if __name__ == "__main__":
    # Small shapes consistent with the module's forward (batch_first (B, T, input_dim)).
    batch, seq_len = 2, 8
    input_dim, hidden_dim, layer_dim, output_dim = 64, 32, 3, 7

    key = jax.random.PRNGKey(0)
    key, kx = jax.random.split(key)
    x = jax.random.normal(kx, (batch, seq_len, input_dim), jnp.float32)

    params = init_params(key, input_dim, hidden_dim, layer_dim, output_dim)
    kparams = prepare_kernel_params(params, compute_dtype=jnp.bfloat16)

    forward = jax.jit(lambda xx: lstm_classifier_forward(xx, kparams))
    out = jax.block_until_ready(forward(x))
    assert out.shape == (batch, output_dim)

    # (a) Numerics-matched reference: identical bf16-matmul-input / f32-accumulate
    #     scheme, so only accumulation order differs -> tight tolerance.
    ref_matched = reference_forward(x, params, matmul_dtype=jnp.bfloat16)
    assert jnp.allclose(out, ref_matched, rtol=2e-3, atol=2e-3), \
        "Pallas output mismatch vs numerics-matched reference"

    # (b) Full-f32 reference (original PyTorch-module semantics): only the bf16 MXU
    #     input rounding separates the two; loose tolerance documents that drift bound.
    ref_f32 = reference_forward(x, params, matmul_dtype=jnp.float32)
    assert jnp.allclose(out, ref_f32, rtol=1e-1, atol=1e-1), \
        "Pallas output drifted too far from the f32 reference"

    print("KERNEL_OK")
</pallas_src>

<mosaic_0001>
module attributes {stable_mosaic.version = 11 : i64} {
  func.func @kernel(%arg0: memref<64x64xbf16, #tpu.memory_space<vmem>>, %arg1: memref<4x64x32xbf16, #tpu.memory_space<vmem>>, %arg2: memref<4x32x32xbf16, #tpu.memory_space<vmem>>, %arg3: memref<4x1x32xf32, #tpu.memory_space<vmem>>, %arg4: memref<4x32x32xbf16, #tpu.memory_space<vmem>>, %arg5: memref<4x32x32xbf16, #tpu.memory_space<vmem>>, %arg6: memref<4x1x32xf32, #tpu.memory_space<vmem>>, %arg7: memref<4x32x32xbf16, #tpu.memory_space<vmem>>, %arg8: memref<4x32x32xbf16, #tpu.memory_space<vmem>>, %arg9: memref<4x1x32xf32, #tpu.memory_space<vmem>>, %arg10: memref<32x7xbf16, #tpu.memory_space<vmem>>, %arg11: memref<1x7xf32, #tpu.memory_space<vmem>>, %arg12: memref<8x7xf32, #tpu.memory_space<vmem>>, %arg13: memref<64x32xf32, #tpu.memory_space<vmem>>, %arg14: memref<64x32xf32, #tpu.memory_space<vmem>>, %arg15: memref<64x32xf32, #tpu.memory_space<vmem>>, %arg16: memref<64x32xf32, #tpu.memory_space<vmem>>, %arg17: memref<64x32xbf16, #tpu.memory_space<vmem>>) attributes {dimension_semantics = [], scalar_prefetch = 0 : i64, scratch_operands = 5 : i64, tpu.core_type = #tpu.core_type<tc>} {
    %c0 = arith.constant 0 : index
    %c0_0 = arith.constant 0 : index
    %0 = vector.load %arg0[%c0, %c0_0] : memref<64x64xbf16, #tpu.memory_space<vmem>>, vector<64x64xbf16>
    %c0_1 = arith.constant 0 : index
    %c0_2 = arith.constant 0 : index
    %c0_3 = arith.constant 0 : index
    %1 = vector.load %arg1[%c0_1, %c0_2, %c0_3] : memref<4x64x32xbf16, #tpu.memory_space<vmem>>, vector<1x64x32xbf16>
    %2 = vector.shape_cast %1 : vector<1x64x32xbf16> to vector<64x32xbf16>
    %cst = arith.constant dense<0.000000e+00> : vector<64x32xf32>
    %3 = tpu.matmul %0, %2, %cst {dimension_numbers = #tpu.dot_dimension_numbers<[1], [0], [0], [1], [0, 0, 1, 1], [], []>} : vector<64x64xbf16>, vector<64x32xbf16>, vector<64x32xf32> -> vector<64x32xf32>
    %c0_4 = arith.constant 0 : index
    %c0_5 = arith.constant 0 : index
    %c0_6 = arith.constant 0 : index
    %4 = vector.load %arg3[%c0_4, %c0_5, %c0_6] : memref<4x1x32xf32, #tpu.memory_space<vmem>>, vector<1x1x32xf32>
    %5 = vector.shape_cast %4 : vector<1x1x32xf32> to vector<1x32xf32>
    %6 = vector.broadcast %5 : vector<1x32xf32> to vector<64x32xf32>
    %7 = arith.addf %3, %6 : vector<64x32xf32>
    %c0_7 = arith.constant 0 : index
    %c0_8 = arith.constant 0 : index
    %8 = vector.load %arg13[%c0_7, %c0_8] : memref<64x32xf32, #tpu.memory_space<vmem>>, vector<64x32xf32>
    tpu.vector_store %arg13[%c0_7, %c0_8], %7 {strides = array<i32>} : memref<64x32xf32, #tpu.memory_space<vmem>>, vector<64x32xf32>,
    %c1 = arith.constant 1 : index
    %c0_9 = arith.constant 0 : index
    %c0_10 = arith.constant 0 : index
    %9 = vector.load %arg1[%c1, %c0_9, %c0_10] : memref<4x64x32xbf16, #tpu.memory_space<vmem>>, vector<1x64x32xbf16>
    %10 = vector.shape_cast %9 : vector<1x64x32xbf16> to vector<64x32xbf16>
    %cst_11 = arith.constant dense<0.000000e+00> : vector<64x32xf32>
    %11 = tpu.matmul %0, %10, %cst_11 {dimension_numbers = #tpu.dot_dimension_numbers<[1], [0], [0], [1], [0, 0, 1, 1], [], []>} : vector<64x64xbf16>, vector<64x32xbf16>, vector<64x32xf32> -> vector<64x32xf32>
    %c1_12 = arith.constant 1 : index
    %c0_13 = arith.constant 0 : index
    %c0_14 = arith.constant 0 : index
    %12 = vector.load %arg3[%c1_12, %c0_13, %c0_14] : memref<4x1x32xf32, #tpu.memory_space<vmem>>, vector<1x1x32xf32>
    %13 = vector.shape_cast %12 : vector<1x1x32xf32> to vector<1x32xf32>
    %14 = vector.broadcast %13 : vector<1x32xf32> to vector<64x32xf32>
    %15 = arith.addf %11, %14 : vector<64x32xf32>
    %c0_15 = arith.constant 0 : index
    %c0_16 = arith.constant 0 : index
    %16 = vector.load %arg14[%c0_15, %c0_16] : memref<64x32xf32, #tpu.memory_space<vmem>>, vector<64x32xf32>
    tpu.vector_store %arg14[%c0_15, %c0_16], %15 {strides = array<i32>} : memref<64x32xf32, #tpu.memory_space<vmem>>, vector<64x32xf32>,
    %c2 = arith.constant 2 : index
    %c0_17 = arith.constant 0 : index
    %c0_18 = arith.constant 0 : index
    %17 = vector.load %arg1[%c2, %c0_17, %c0_18] : memref<4x64x32xbf16, #tpu.memory_space<vmem>>, vector<1x64x32xbf16>
    %18 = vector.shape_cast %17 : vector<1x64x32xbf16> to vector<64x32xbf16>
    %cst_19 = arith.constant dense<0.000000e+00> : vector<64x32xf32>
    %19 = tpu.matmul %0, %18, %cst_19 {dimension_numbers = #tpu.dot_dimension_numbers<[1], [0], [0], [1], [0, 0, 1, 1], [], []>} : vector<64x64xbf16>, vector<64x32xbf16>, vector<64x32xf32> -> vector<64x32xf32>
    %c2_20 = arith.constant 2 : index
    %c0_21 = arith.constant 0 : index
    %c0_22 = arith.constant 0 : index
    %20 = vector.load %arg3[%c2_20, %c0_21, %c0_22] : memref<4x1x32xf32, #tpu.memory_space<vmem>>, vector<1x1x32xf32>
    %21 = vector.shape_cast %20 : vector<1x1x32xf32> to vector<1x32xf32>
    %22 = vector.broadcast %21 : vector<1x32xf32> to vector<64x32xf32>
    %23 = arith.addf %19, %22 : vector<64x32xf32>
    %c0_23 = arith.constant 0 : index
    %c0_24 = arith.constant 0 : index
    %24 = vector.load %arg15[%c0_23, %c0_24] : memref<64x32xf32, #tpu.memory_space<vmem>>, vector<64x32xf32>
    tpu.vector_store %arg15[%c0_23, %c0_24], %23 {strides = array<i32>} : memref<64x32xf32, #tpu.memory_space<vmem>>, vector<64x32xf32>,
    %c3 = arith.constant 3 : index
    %c0_25 = arith.constant 0 : index
    %c0_26 = arith.constant 0 : index
    %25 = vector.load %arg1[%c3, %c0_25, %c0_26] : memref<4x64x32xbf16, #tpu.memory_space<vmem>>, vector<1x64x32xbf16>
    %26 = vector.shape_cast %25 : vector<1x64x32xbf16> to vector<64x32xbf16>
    %cst_27 = arith.constant dense<0.000000e+00> : vector<64x32xf32>
    %27 = tpu.matmul %0, %26, %cst_27 {dimension_numbers = #tpu.dot_dimension_numbers<[1], [0], [0], [1], [0, 0, 1, 1], [], []>} : vector<64x64xbf16>, vector<64x32xbf16>, vector<64x32xf32> -> vector<64x32xf32>
    %c3_28 = arith.constant 3 : index
    %c0_29 = arith.constant 0 : index
    %c0_30 = arith.constant 0 : index
    %28 = vector.load %arg3[%c3_28, %c0_29, %c0_30] : memref<4x1x32xf32, #tpu.memory_space<vmem>>, vector<1x1x32xf32>
    %29 = vector.shape_cast %28 : vector<1x1x32xf32> to vector<1x32xf32>
    %30 = vector.broadcast %29 : vector<1x32xf32> to vector<64x32xf32>
    %31 = arith.addf %27, %30 : vector<64x32xf32>
    %c0_31 = arith.constant 0 : index
    %c0_32 = arith.constant 0 : index
    %32 = vector.load %arg16[%c0_31, %c0_32] : memref<64x32xf32, #tpu.memory_space<vmem>>, vector<64x32xf32>
    tpu.vector_store %arg16[%c0_31, %c0_32], %31 {strides = array<i32>} : memref<64x32xf32, #tpu.memory_space<vmem>>, vector<64x32xf32>,
    %c0_33 = arith.constant 0 : index
    %c0_34 = arith.constant 0 : index
    %c0_35 = arith.constant 0 : index
    %33 = vector.load %arg2[%c0_33, %c0_34, %c0_35] : memref<4x32x32xbf16, #tpu.memory_space<vmem>>, vector<1x32x32xbf16>
    %34 = vector.shape_cast %33 : vector<1x32x32xbf16> to vector<32x32xbf16>
    %c1_36 = arith.constant 1 : index
    %c0_37 = arith.constant 0 : index
    %c0_38 = arith.constant 0 : index
    %35 = vector.load %arg2[%c1_36, %c0_37, %c0_38] : memref<4x32x32xbf16, #tpu.memory_space<vmem>>, vector<1x32x32xbf16>
    %36 = vector.shape_cast %35 : vector<1x32x32xbf16> to vector<32x32xbf16>
    %c2_39 = arith.constant 2 : index
    %c0_40 = arith.constant 0 : index
    %c0_41 = arith.constant 0 : index
    %37 = vector.load %arg2[%c2_39, %c0_40, %c0_41] : memref<4x32x32xbf16, #tpu.memory_space<vmem>>, vector<1x32x32xbf16>
    %38 = vector.shape_cast %37 : vector<1x32x32xbf16> to vector<32x32xbf16>
    %c3_42 = arith.constant 3 : index
    %c0_43 = arith.constant 0 : index
    %c0_44 = arith.constant 0 : index
    %39 = vector.load %arg2[%c3_42, %c0_43, %c0_44] : memref<4x32x32xbf16, #tpu.memory_space<vmem>>, vector<1x32x32xbf16>
    %40 = vector.shape_cast %39 : vector<1x32x32xbf16> to vector<32x32xbf16>
    %cst_45 = arith.constant 0.000000e+00 : f32
    %41 = vector.broadcast %cst_45 : f32 to vector<8x32xf32>
    %cst_46 = arith.constant 0.000000e+00 : f32
    %42 = vector.broadcast %cst_46 : f32 to vector<8x32xf32>
    %43 = arith.truncf %41 : vector<8x32xf32> to vector<8x32xbf16>
    %c0_47 = arith.constant 0 : index
    %c0_48 = arith.constant 0 : index
    %44 = vector.load %arg13[%c0_47, %c0_48] : memref<64x32xf32, #tpu.memory_space<vmem>>, vector<8x32xf32>
    %cst_49 = arith.constant dense<0.000000e+00> : vector<8x32xf32>
    %45 = tpu.matmul %43, %34, %cst_49 {dimension_numbers = #tpu.dot_dimension_numbers<[1], [0], [0], [1], [0, 0, 1, 1], [], []>} : vector<8x32xbf16>, vector<32x32xbf16>, vector<8x32xf32> -> vector<8x32xf32>
    %46 = arith.addf %44, %45 : vector<8x32xf32>
    %c0_50 = arith.constant 0 : index
    %c0_51 = arith.constant 0 : index
    %47 = vector.load %arg14[%c0_50, %c0_51] : memref<64x32xf32, #tpu.memory_space<vmem>>, vector<8x32xf32>
    %cst_52 = arith.constant dense<0.000000e+00> : vector<8x32xf32>
    %48 = tpu.matmul %43, %36, %cst_52 {dimension_numbers = #tpu.dot_dimension_numbers<[1], [0], [0], [1], [0, 0, 1, 1], [], []>} : vector<8x32xbf16>, vector<32x32xbf16>, vector<8x32xf32> -> vector<8x32xf32>
    %49 = arith.addf %47, %48 : vector<8x32xf32>
    %c0_53 = arith.constant 0 : index
    %c0_54 = arith.constant 0 : index
    %50 = vector.load %arg15[%c0_53, %c0_54] : memref<64x32xf32, #tpu.memory_space<vmem>>, vector<8x32xf32>
    %cst_55 = arith.constant dense<0.000000e+00> : vector<8x32xf32>
    %51 = tpu.matmul %43, %38, %cst_55 {dimension_numbers = #tpu.dot_dimension_numbers<[1], [0], [0], [1], [0, 0, 1, 1], [], []>} : vector<8x32xbf16>, vector<32x32xbf16>, vector<8x32xf32> -> vector<8x32xf32>
    %52 = arith.addf %50, %51 : vector<8x32xf32>
    %c0_56 = arith.constant 0 : index
    %c0_57 = arith.constant 0 : index
    %53 = vector.load %arg16[%c0_56, %c0_57] : memref<64x32xf32, #tpu.memory_space<vmem>>, vector<8x32xf32>
    %cst_58 = arith.constant dense<0.000000e+00> : vector<8x32xf32>
    %54 = tpu.matmul %43, %40, %cst_58 {dimension_numbers = #tpu.dot_dimension_numbers<[1], [0], [0], [1], [0, 0, 1, 1], [], []>} : vector<8x32xbf16>, vector<32x32xbf16>, vector<8x32xf32> -> vector<8x32xf32>
    %55 = arith.addf %53, %54 : vector<8x32xf32>
    %56 = arith.negf %46 : vector<8x32xf32>
    %57 = math.exp %56 : vector<8x32xf32>
    %cst_59 = arith.constant 1.000000e+00 : f32
    %58 = vector.broadcast %cst_59 : f32 to vector<8x32xf32>
    %59 = arith.addf %58, %57 : vector<8x32xf32>
    %60 = arith.divf %58, %59 : vector<8x32xf32>
    %61 = arith.negf %49 : vector<8x32xf32>
    %62 = math.exp %61 : vector<8x32xf32>
    %cst_60 = arith.constant 1.000000e+00 : f32
    %63 = vector.broadcast %cst_60 : f32 to vector<8x32xf32>
    %64 = arith.addf %63, %62 : vector<8x32xf32>
    %65 = arith.divf %63, %64 : vector<8x32xf32>
    %66 = math.tanh %52 : vector<8x32xf32>
    %67 = arith.negf %55 : vector<8x32xf32>
    %68 = math.exp %67 : vector<8x32xf32>
    %cst_61 = arith.constant 1.000000e+00 : f32
    %69 = vector.broadcast %cst_61 : f32 to vector<8x32xf32>
    %70 = arith.addf %69, %68 : vector<8x32xf32>
    %71 = arith.divf %69, %70 : vector<8x32xf32>
    %72 = arith.mulf %65, %42 : vector<8x32xf32>
    %73 = arith.mulf %60, %66 : vector<8x32xf32>
    %74 = arith.addf %72, %73 : vector<8x32xf32>
    %75 = math.tanh %74 : vector<8x32xf32>
    %76 = arith.mulf %71, %75 : vector<8x32xf32>
    %77 = arith.truncf %76 : vector<8x32xf32> to vector<8x32xbf16>
    %c0_62 = arith.constant 0 : index
    %c0_63 = arith.constant 0 : index
    %78 = vector.load %arg17[%c0_62, %c0_63] : memref<64x32xbf16, #tpu.memory_space<vmem>>, vector<8x32xbf16>
    tpu.vector_store %arg17[%c0_62, %c0_63], %77 {strides = array<i32>} : memref<64x32xbf16, #tpu.memory_space<vmem>>, vector<8x32xbf16>,
    %79 = arith.truncf %76 : vector<8x32xf32> to vector<8x32xbf16>
    %c8 = arith.constant 8 : index
    %c0_64 = arith.constant 0 : index
    %80 = vector.load %arg13[%c8, %c0_64] : memref<64x32xf32, #tpu.memory_space<vmem>>, vector<8x32xf32>
    %cst_65 = arith.constant dense<0.000000e+00> : vector<8x32xf32>
    %81 = tpu.matmul %79, %34, %cst_65 {dimension_numbers = #tpu.dot_dimension_numbers<[1], [0], [0], [1], [0, 0, 1, 1], [], []>} : vector<8x32xbf16>, vector<32x32xbf16>, vector<8x32xf32> -> vector<8x32xf32>
    %82 = arith.addf %80, %81 : vector<8x32xf32>
    %c8_66 = arith.constant 8 : index
    %c0_67 = arith.constant 0 : index
    %83 = vector.load %arg14[%c8_66, %c0_67] : memref<64x32xf32, #tpu.memory_space<vmem>>, vector<8x32xf32>
    %cst_68 = arith.constant dense<0.000000e+00> : vector<8x32xf32>
    %84 = tpu.matmul %79, %36, %cst_68 {dimension_numbers = #tpu.dot_dimension_numbers<[1], [0], [0], [1], [0, 0, 1, 1], [], []>} : vector<8x32xbf16>, vector<32x32xbf16>, vector<8x32xf32> -> vector<8x32xf32>
    %85 = arith.addf %83, %84 : vector<8x32xf32>
    %c8_69 = arith.constant 8 : index
    %c0_70 = arith.constant 0 : index
    %86 = vector.load %arg15[%c8_69, %c0_70] : memref<64x32xf32, #tpu.memory_space<vmem>>, vector<8x32xf32>
    %cst_71 = arith.constant dense<0.000000e+00> : vector<8x32xf32>
    %87 = tpu.matmul %79, %38, %cst_71 {dimension_numbers = #tpu.dot_dimension_numbers<[1], [0], [0], [1], [0, 0, 1, 1], [], []>} : vector<8x32xbf16>, vector<32x32xbf16>, vector<8x32xf32> -> vector<8x32xf32>
    %88 = arith.addf %86, %87 : vector<8x32xf32>
    %c8_72 = arith.constant 8 : index
    %c0_73 = arith.constant 0 : index
    %89 = vector.load %arg16[%c8_72, %c0_73] : memref<64x32xf32, #tpu.memory_space<vmem>>, vector<8x32xf32>
    %cst_74 = arith.constant dense<0.000000e+00> : vector<8x32xf32>
    %90 = tpu.matmul %79, %40, %cst_74 {dimension_numbers = #tpu.dot_dimension_numbers<[1], [0], [0], [1], [0, 0, 1, 1], [], []>} : vector<8x32xbf16>, vector<32x32xbf16>, vector<8x32xf32> -> vector<8x32xf32>
    %91 = arith.addf %89, %90 : vector<8x32xf32>
    %92 = arith.negf %82 : vector<8x32xf32>
    %93 = math.exp %92 : vector<8x32xf32>
    %cst_75 = arith.constant 1.000000e+00 : f32
    %94 = vector.broadcast %cst_75 : f32 to vector<8x32xf32>
    %95 = arith.addf %94, %93 : vector<8x32xf32>
    %96 = arith.divf %94, %95 : vector<8x32xf32>
    %97 = arith.negf %85 : vector<8x32xf32>
    %98 = math.exp %97 : vector<8x32xf32>
    %cst_76 = arith.constant 1.000000e+00 : f32
    %99 = vector.broadcast %cst_76 : f32 to vector<8x32xf32>
    %100 = arith.addf %99, %98 : vector<8x32xf32>
    %101 = arith.divf %99, %100 : vector<8x32xf32>
    %102 = math.tanh %88 : vector<8x32xf32>
    %103 = arith.negf %91 : vector<8x32xf32>
    %104 = math.exp %103 : vector<8x32xf32>
    %cst_77 = arith.constant 1.000000e+00 : f32
    %105 = vector.broadcast %cst_77 : f32 to vector<8x32xf32>
    %106 = arith.addf %105, %104 : vector<8x32xf32>
    %107 = arith.divf %105, %106 : vector<8x32xf32>
    %108 = arith.mulf %101, %74 : vector<8x32xf32>
    %109 = arith.mulf %96, %102 : vector<8x32xf32>
    %110 = arith.addf %108, %109 : vector<8x32xf32>
    %111 = math.tanh %110 : vector<8x32xf32>
    %112 = arith.mulf %107, %111 : vector<8x32xf32>
    %113 = arith.truncf %112 : vector<8x32xf32> to vector<8x32xbf16>
    %c8_78 = arith.constant 8 : index
    %c0_79 = arith.constant 0 : index
    %114 = vector.load %arg17[%c8_78, %c0_79] : memref<64x32xbf16, #tpu.memory_space<vmem>>, vector<8x32xbf16>
    tpu.vector_store %arg17[%c8_78, %c0_79], %113 {strides = array<i32>} : memref<64x32xbf16, #tpu.memory_space<vmem>>, vector<8x32xbf16>,
    %115 = arith.truncf %112 : vector<8x32xf32> to vector<8x32xbf16>
    %c16 = arith.constant 16 : index
    %c0_80 = arith.constant 0 : index
    %116 = vector.load %arg13[%c16, %c0_80] : memref<64x32xf32, #tpu.memory_space<vmem>>, vector<8x32xf32>
    %cst_81 = arith.constant dense<0.000000e+00> : vector<8x32xf32>
    %117 = tpu.matmul %115, %34, %cst_81 {dimension_numbers = #tpu.dot_dimension_numbers<[1], [0], [0], [1], [0, 0, 1, 1], [], []>} : vector<8x32xbf16>, vector<32x32xbf16>, vector<8x32xf32> -> vector<8x32xf32>
    %118 = arith.addf %116, %117 : vector<8x32xf32>
    %c16_82 = arith.constant 16 : index
    %c0_83 = arith.constant 0 : index
    %119 = vector.load %arg14[%c16_82, %c0_83] : memref<64x32xf32, #tpu.memory_space<vmem>>, vector<8x32xf32>
    %cst_84 = arith.constant dense<0.000000e+00> : vector<8x32xf32>
    %120 = tpu.matmul %115, %36, %cst_84 {dimension_numbers = #tpu.dot_dimension_numbers<[1], [0], [0], [1], [0, 0, 1, 1], [], []>} : vector<8x32xbf16>, vector<32x32xbf16>, vector<8x32xf32> -> vector<8x32xf32>
    %121 = arith.addf %119, %120 : vector<8x32xf32>
    %c16_85 = arith.constant 16 : index
    %c0_86 = arith.constant 0 : index
    %122 = vector.load %arg15[%c16_85, %c0_86] : memref<64x32xf32, #tpu.memory_space<vmem>>, vector<8x32xf32>
    %cst_87 = arith.constant dense<0.000000e+00> : vector<8x32xf32>
    %123 = tpu.matmul %115, %38, %cst_87 {dimension_numbers = #tpu.dot_dimension_numbers<[1], [0], [0], [1], [0, 0, 1, 1], [], []>} : vector<8x32xbf16>, vector<32x32xbf16>, vector<8x32xf32> -> vector<8x32xf32>
    %124 = arith.addf %122, %123 : vector<8x32xf32>
    %c16_88 = arith.constant 16 : index
    %c0_89 = arith.constant 0 : index
    %125 = vector.load %arg16[%c16_88, %c0_89] : memref<64x32xf32, #tpu.memory_space<vmem>>, vector<8x32xf32>
    %cst_90 = arith.constant dense<0.000000e+00> : vector<8x32xf32>
    %126 = tpu.matmul %115, %40, %cst_90 {dimension_numbers = #tpu.dot_dimension_numbers<[1], [0], [0], [1], [0, 0, 1, 1], [], []>} : vector<8x32xbf16>, vector<32x32xbf16>, vector<8x32xf32> -> vector<8x32xf32>
    %127 = arith.addf %125, %126 : vector<8x32xf32>
    %128 = arith.negf %118 : vector<8x32xf32>
    %129 = math.exp %128 : vector<8x32xf32>
    %cst_91 = arith.constant 1.000000e+00 : f32
    %130 = vector.broadcast %cst_91 : f32 to vector<8x32xf32>
    %131 = arith.addf %130, %129 : vector<8x32xf32>
    %132 = arith.divf %130, %131 : vector<8x32xf32>
    %133 = arith.negf %121 : vector<8x32xf32>
    %134 = math.exp %133 : vector<8x32xf32>
    %cst_92 = arith.constant 1.000000e+00 : f32
    %135 = vector.broadcast %cst_92 : f32 to vector<8x32xf32>
    %136 = arith.addf %135, %134 : vector<8x32xf32>
    %137 = arith.divf %135, %136 : vector<8x32xf32>
    %138 = math.tanh %124 : vector<8x32xf32>
    %139 = arith.negf %127 : vector<8x32xf32>
    %140 = math.exp %139 : vector<8x32xf32>
    %cst_93 = arith.constant 1.000000e+00 : f32
    %141 = vector.broadcast %cst_93 : f32 to vector<8x32xf32>
    %142 = arith.addf %141, %140 : vector<8x32xf32>
    %143 = arith.divf %141, %142 : vector<8x32xf32>
    %144 = arith.mulf %137, %110 : vector<8x32xf32>
    %145 = arith.mulf %132, %138 : vector<8x32xf32>
    %146 = arith.addf %144, %145 : vector<8x32xf32>
    %147 = math.tanh %146 : vector<8x32xf32>
    %148 = arith.mulf %143, %147 : vector<8x32xf32>
    %149 = arith.truncf %148 : vector<8x32xf32> to vector<8x32xbf16>
    %c16_94 = arith.constant 16 : index
    %c0_95 = arith.constant 0 : index
    %150 = vector.load %arg17[%c16_94, %c0_95] : memref<64x32xbf16, #tpu.memory_space<vmem>>, vector<8x32xbf16>
    tpu.vector_store %arg17[%c16_94, %c0_95], %149 {strides = array<i32>} : memref<64x32xbf16, #tpu.memory_space<vmem>>, vector<8x32xbf16>,
    %151 = arith.truncf %148 : vector<8x32xf32> to vector<8x32xbf16>
    %c24 = arith.constant 24 : index
    %c0_96 = arith.constant 0 : index
    %152 = vector.load %arg13[%c24, %c0_96] : memref<64x32xf32, #tpu.memory_space<vmem>>, vector<8x32xf32>
    %cst_97 = arith.constant dense<0.000000e+00> : vector<8x32xf32>
    %153 = tpu.matmul %151, %34, %cst_97 {dimension_numbers = #tpu.dot_dimension_numbers<[1], [0], [0], [1], [0, 0, 1, 1], [], []>} : vector<8x32xbf16>, vector<32x32xbf16>, vector<8x32xf32> -> vector<8x32xf32>
    %154 = arith.addf %152, %153 : vector<8x32xf32>
    %c24_98 = arith.constant 24 : index
    %c0_99 = arith.constant 0 : index
    %155 = vector.load %arg14[%c24_98, %c0_99] : memref<64x32xf32, #tpu.memory_space<vmem>>, vector<8x32xf32>
    %cst_100 = arith.constant dense<0.000000e+00> : vector<8x32xf32>
    %156 = tpu.matmul %151, %36, %cst_100 {dimension_numbers = #tpu.dot_dimension_numbers<[1], [0], [0], [1], [0, 0, 1, 1], [], []>} : vector<8x32xbf16>, vector<32x32xbf16>, vector<8x32xf32> -> vector<8x32xf32>
    %157 = arith.addf %155, %156 : vector<8x32xf32>
    %c24_101 = arith.constant 24 : index
    %c0_102 = arith.constant 0 : index
    %158 = vector.load %arg15[%c24_101, %c0_102] : memref<64x32xf32, #tpu.memory_space<vmem>>, vector<8x32xf32>
    %cst_103 = arith.constant dense<0.000000e+00> : vector<8x32xf32>
    %159 = tpu.matmul %151, %38, %cst_103 {dimension_numbers = #tpu.dot_dimension_numbers<[1], [0], [0], [1], [0, 0, 1, 1], [], []>} : vector<8x32xbf16>, vector<32x32xbf16>, vector<8x32xf32> -> vector<8x32xf32>
    %160 = arith.addf %158, %159 : vector<8x32xf32>
    %c24_104 = arith.constant 24 : index
    %c0_105 = arith.constant 0 : index
    %161 = vector.load %arg16[%c24_104, %c0_105] : memref<64x32xf32, #tpu.memory_space<vmem>>, vector<8x32xf32>
    %cst_106 = arith.constant dense<0.000000e+00> : vector<8x32xf32>
    %162 = tpu.matmul %151, %40, %cst_106 {dimension_numbers = #tpu.dot_dimension_numbers<[1], [0], [0], [1], [0, 0, 1, 1], [], []>} : vector<8x32xbf16>, vector<32x32xbf16>, vector<8x32xf32> -> vector<8x32xf32>
    %163 = arith.addf %161, %162 : vector<8x32xf32>
    %164 = arith.negf %154 : vector<8x32xf32>
    %165 = math.exp %164 : vector<8x32xf32>
    %cst_107 = arith.constant 1.000000e+00 : f32
    %166 = vector.broadcast %cst_107 : f32 to vector<8x32xf32>
    %167 = arith.addf %166, %165 : vector<8x32xf32>
    %168 = arith.divf %166, %167 : vector<8x32xf32>
    %169 = arith.negf %157 : vector<8x32xf32>
    %170 = math.exp %169 : vector<8x32xf32>
    %cst_108 = arith.constant 1.000000e+00 : f32
    %171 = vector.broadcast %cst_108 : f32 to vector<8x32xf32>
    %172 = arith.addf %171, %170 : vector<8x32xf32>
    %173 = arith.divf %171, %172 : vector<8x32xf32>
    %174 = math.tanh %160 : vector<8x32xf32>
    %175 = arith.negf %163 : vector<8x32xf32>
    %176 = math.exp %175 : vector<8x32xf32>
    %cst_109 = arith.constant 1.000000e+00 : f32
    %177 = vector.broadcast %cst_109 : f32 to vector<8x32xf32>
    %178 = arith.addf %177, %176 : vector<8x32xf32>
    %179 = arith.divf %177, %178 : vector<8x32xf32>
    %180 = arith.mulf %173, %146 : vector<8x32xf32>
    %181 = arith.mulf %168, %174 : vector<8x32xf32>
    %182 = arith.addf %180, %181 : vector<8x32xf32>
    %183 = math.tanh %182 : vector<8x32xf32>
    %184 = arith.mulf %179, %183 : vector<8x32xf32>
    %185 = arith.truncf %184 : vector<8x32xf32> to vector<8x32xbf16>
    %c24_110 = arith.constant 24 : index
    %c0_111 = arith.constant 0 : index
    %186 = vector.load %arg17[%c24_110, %c0_111] : memref<64x32xbf16, #tpu.memory_space<vmem>>, vector<8x32xbf16>
    tpu.vector_store %arg17[%c24_110, %c0_111], %185 {strides = array<i32>} : memref<64x32xbf16, #tpu.memory_space<vmem>>, vector<8x32xbf16>,
    %187 = arith.truncf %184 : vector<8x32xf32> to vector<8x32xbf16>
    %c32 = arith.constant 32 : index
    %c0_112 = arith.constant 0 : index
    %188 = vector.load %arg13[%c32, %c0_112] : memref<64x32xf32, #tpu.memory_space<vmem>>, vector<8x32xf32>
    %cst_113 = arith.constant dense<0.000000e+00> : vector<8x32xf32>
    %189 = tpu.matmul %187, %34, %cst_113 {dimension_numbers = #tpu.dot_dimension_numbers<[1], [0], [0], [1], [0, 0, 1, 1], [], []>} : vector<8x32xbf16>, vector<32x32xbf16>, vector<8x32xf32> -> vector<8x32xf32>
    %190 = arith.addf %188, %189 : vector<8x32xf32>
    %c32_114 = arith.constant 32 : index
    %c0_115 = arith.constant 0 : index
    %191 = vector.load %arg14[%c32_114, %c0_115] : memref<64x32xf32, #tpu.memory_space<vmem>>, vector<8x32xf32>
    %cst_116 = arith.constant dense<0.000000e+00> : vector<8x32xf32>
    %192 = tpu.matmul %187, %36, %cst_116 {dimension_numbers = #tpu.dot_dimension_numbers<[1], [0], [0], [1], [0, 0, 1, 1], [], []>} : vector<8x32xbf16>, vector<32x32xbf16>, vector<8x32xf32> -> vector<8x32xf32>
    %193 = arith.addf %191, %192 : vector<8x32xf32>
    %c32_117 = arith.constant 32 : index
    %c0_118 = arith.constant 0 : index
    %194 = vector.load %arg15[%c32_117, %c0_118] : memref<64x32xf32, #tpu.memory_space<vmem>>, vector<8x32xf32>
    %cst_119 = arith.constant dense<0.000000e+00> : vector<8x32xf32>
    %195 = tpu.matmul %187, %38, %cst_119 {dimension_numbers = #tpu.dot_dimension_numbers<[1], [0], [0], [1], [0, 0, 1, 1], [], []>} : vector<8x32xbf16>, vector<32x32xbf16>, vector<8x32xf32> -> vector<8x32xf32>
    %196 = arith.addf %194, %195 : vector<8x32xf32>
    %c32_120 = arith.constant 32 : index
    %c0_121 = arith.constant 0 : index
    %197 = vector.load %arg16[%c32_120, %c0_121] : memref<64x32xf32, #tpu.memory_space<vmem>>, vector<8x32xf32>
    %cst_122 = arith.constant dense<0.000000e+00> : vector<8x32xf32>
    %198 = tpu.matmul %187, %40, %cst_122 {dimension_numbers = #tpu.dot_dimension_numbers<[1], [0], [0], [1], [0, 0, 1, 1], [], []>} : vector<8x32xbf16>, vector<32x32xbf16>, vector<8x32xf32> -> vector<8x32xf32>
    %199 = arith.addf %197, %198 : vector<8x32xf32>
    %200 = arith.negf %190 : vector<8x32xf32>
    %201 = math.exp %200 : vector<8x32xf32>
    %cst_123 = arith.constant 1.000000e+00 : f32
    %202 = vector.broadcast %cst_123 : f32 to vector<8x32xf32>
    %203 = arith.addf %202, %201 : vector<8x32xf32>
    %204 = arith.divf %202, %203 : vector<8x32xf32>
    %205 = arith.negf %193 : vector<8x32xf32>
    %206 = math.exp %205 : vector<8x32xf32>
    %cst_124 = arith.constant 1.000000e+00 : f32
    %207 = vector.broadcast %cst_124 : f32 to vector<8x32xf32>
    %208 = arith.addf %207, %206 : vector<8x32xf32>
    %209 = arith.divf %207, %208 : vector<8x32xf32>
    %210 = math.tanh %196 : vector<8x32xf32>
    %211 = arith.negf %199 : vector<8x32xf32>
    %212 = math.exp %211 : vector<8x32xf32>
    %cst_125 = arith.constant 1.000000e+00 : f32
    %213 = vector.broadcast %cst_125 : f32 to vector<8x32xf32>
    %214 = arith.addf %213, %212 : vector<8x32xf32>
    %215 = arith.divf %213, %214 : vector<8x32xf32>
    %216 = arith.mulf %209, %182 : vector<8x32xf32>
    %217 = arith.mulf %204, %210 : vector<8x32xf32>
    %218 = arith.addf %216, %217 : vector<8x32xf32>
    %219 = math.tanh %218 : vector<8x32xf32>
    %220 = arith.mulf %215, %219 : vector<8x32xf32>
    %221 = arith.truncf %220 : vector<8x32xf32> to vector<8x32xbf16>
    %c32_126 = arith.constant 32 : index
    %c0_127 = arith.constant 0 : index
    %222 = vector.load %arg17[%c32_126, %c0_127] : memref<64x32xbf16, #tpu.memory_space<vmem>>, vector<8x32xbf16>
    tpu.vector_store %arg17[%c32_126, %c0_127], %221 {strides = array<i32>} : memref<64x32xbf16, #tpu.memory_space<vmem>>, vector<8x32xbf16>,
    %223 = arith.truncf %220 : vector<8x32xf32> to vector<8x32xbf16>
    %c40 = arith.constant 40 : index
    %c0_128 = arith.constant 0 : index
    %224 = vector.load %arg13[%c40, %c0_128] : memref<64x32xf32, #tpu.memory_space<vmem>>, vector<8x32xf32>
    %cst_129 = arith.constant dense<0.000000e+00> : vector<8x32xf32>
    %225 = tpu.matmul %223, %34, %cst_129 {dimension_numbers = #tpu.dot_dimension_numbers<[1], [0], [0], [1], [0, 0, 1, 1], [], []>} : vector<8x32xbf16>, vector<32x32xbf16>, vector<8x32xf32> -> vector<8x32xf32>
    %226 = arith.addf %224, %225 : vector<8x32xf32>
    %c40_130 = arith.constant 40 : index
    %c0_131 = arith.constant 0 : index
    %227 = vector.load %arg14[%c40_130, %c0_131] : memref<64x32xf32, #tpu.memory_space<vmem>>, vector<8x32xf32>
    %cst_132 = arith.constant dense<0.000000e+00> : vector<8x32xf32>
    %228 = tpu.matmul %223, %36, %cst_132 {dimension_numbers = #tpu.dot_dimension_numbers<[1], [0], [0], [1], [0, 0, 1, 1], [], []>} : vector<8x32xbf16>, vector<32x32xbf16>, vector<8x32xf32> -> vector<8x32xf32>
    %229 = arith.addf %227, %228 : vector<8x32xf32>
    %c40_133 = arith.constant 40 : index
    %c0_134 = arith.constant 0 : index
    %230 = vector.load %arg15[%c40_133, %c0_134] : memref<64x32xf32, #tpu.memory_space<vmem>>, vector<8x32xf32>
    %cst_135 = arith.constant dense<0.000000e+00> : vector<8x32xf32>
    %231 = tpu.matmul %223, %38, %cst_135 {dimension_numbers = #tpu.dot_dimension_numbers<[1], [0], [0], [1], [0, 0, 1, 1], [], []>} : vector<8x32xbf16>, vector<32x32xbf16>, vector<8x32xf32> -> vector<8x32xf32>
    %232 = arith.addf %230, %231 : vector<8x32xf32>
    %c40_136 = arith.constant 40 : index
    %c0_137 = arith.constant 0 : index
    %233 = vector.load %arg16[%c40_136, %c0_137] : memref<64x32xf32, #tpu.memory_space<vmem>>, vector<8x32xf32>
    %cst_138 = arith.constant dense<0.000000e+00> : vector<8x32xf32>
    %234 = tpu.matmul %223, %40, %cst_138 {dimension_numbers = #tpu.dot_dimension_numbers<[1], [0], [0], [1], [0, 0, 1, 1], [], []>} : vector<8x32xbf16>, vector<32x32xbf16>, vector<8x32xf32> -> vector<8x32xf32>
    %235 = arith.addf %233, %234 : vector<8x32xf32>
    %236 = arith.negf %226 : vector<8x32xf32>
    %237 = math.exp %236 : vector<8x32xf32>
    %cst_139 = arith.constant 1.000000e+00 : f32
    %238 = vector.broadcast %cst_139 : f32 to vector<8x32xf32>
    %239 = arith.addf %238, %237 : vector<8x32xf32>
    %240 = arith.divf %238, %239 : vector<8x32xf32>
    %241 = arith.negf %229 : vector<8x32xf32>
    %242 = math.exp %241 : vector<8x32xf32>
    %cst_140 = arith.constant 1.000000e+00 : f32
    %243 = vector.broadcast %cst_140 : f32 to vector<8x32xf32>
    %244 = arith.addf %243, %242 : vector<8x32xf32>
    %245 = arith.divf %243, %244 : vector<8x32xf32>
    %246 = math.tanh %232 : vector<8x32xf32>
    %247 = arith.negf %235 : vector<8x32xf32>
    %248 = math.exp %247 : vector<8x32xf32>
    %cst_141 = arith.constant 1.000000e+00 : f32
    %249 = vector.broadcast %cst_141 : f32 to vector<8x32xf32>
    %250 = arith.addf %249, %248 : vector<8x32xf32>
    %251 = arith.divf %249, %250 : vector<8x32xf32>
    %252 = arith.mulf %245, %218 : vector<8x32xf32>
    %253 = arith.mulf %240, %246 : vector<8x32xf32>
    %254 = arith.addf %252, %253 : vector<8x32xf32>
    %255 = math.tanh %254 : vector<8x32xf32>
    %256 = arith.mulf %251, %255 : vector<8x32xf32>
    %257 = arith.truncf %256 : vector<8x32xf32> to vector<8x32xbf16>
    %c40_142 = arith.constant 40 : index
    %c0_143 = arith.constant 0 : index
    %258 = vector.load %arg17[%c40_142, %c0_143] : memref<64x32xbf16, #tpu.memory_space<vmem>>, vector<8x32xbf16>
    tpu.vector_store %arg17[%c40_142, %c0_143], %257 {strides = array<i32>} : memref<64x32xbf16, #tpu.memory_space<vmem>>, vector<8x32xbf16>,
    %259 = arith.truncf %256 : vector<8x32xf32> to vector<8x32xbf16>
    %c48 = arith.constant 48 : index
    %c0_144 = arith.constant 0 : index
    %260 = vector.load %arg13[%c48, %c0_144] : memref<64x32xf32, #tpu.memory_space<vmem>>, vector<8x32xf32>
    %cst_145 = arith.constant dense<0.000000e+00> : vector<8x32xf32>
    %261 = tpu.matmul %259, %34, %cst_145 {dimension_numbers = #tpu.dot_dimension_numbers<[1], [0], [0], [1], [0, 0, 1, 1], [], []>} : vector<8x32xbf16>, vector<32x32xbf16>, vector<8x32xf32> -> vector<8x32xf32>
    %262 = arith.addf %260, %261 : vector<8x32xf32>
    %c48_146 = arith.constant 48 : index
    %c0_147 = arith.constant 0 : index
    %263 = vector.load %arg14[%c48_146, %c0_147] : memref<64x32xf32, #tpu.memory_space<vmem>>, vector<8x32xf32>
    %cst_148 = arith.constant dense<0.000000e+00> : vector<8x32xf32>
    %264 = tpu.matmul %259, %36, %cst_148 {dimension_numbers = #tpu.dot_dimension_numbers<[1], [0], [0], [1], [0, 0, 1, 1], [], []>} : vector<8x32xbf16>, vector<32x32xbf16>, vector<8x32xf32> -> vector<8x32xf32>
    %265 = arith.addf %263, %264 : vector<8x32xf32>
    %c48_149 = arith.constant 48 : index
    %c0_150 = arith.constant 0 : index
    %266 = vector.load %arg15[%c48_149, %c0_150] : memref<64x32xf32, #tpu.memory_space<vmem>>, vector<8x32xf32>
    %cst_151 = arith.constant dense<0.000000e+00> : vector<8x32xf32>
    %267 = tpu.matmul %259, %38, %cst_151 {dimension_numbers = #tpu.dot_dimension_numbers<[1], [0], [0], [1], [0, 0, 1, 1], [], []>} : vector<8x32xbf16>, vector<32x32xbf16>, vector<8x32xf32> -> vector<8x32xf32>
    %268 = arith.addf %266, %267 : vector<8x32xf32>
    %c48_152 = arith.constant 48 : index
    %c0_153 = arith.constant 0 : index
    %269 = vector.load %arg16[%c48_152, %c0_153] : memref<64x32xf32, #tpu.memory_space<vmem>>, vector<8x32xf32>
    %cst_154 = arith.constant dense<0.000000e+00> : vector<8x32xf32>
    %270 = tpu.matmul %259, %40, %cst_154 {dimension_numbers = #tpu.dot_dimension_numbers<[1], [0], [0], [1], [0, 0, 1, 1], [], []>} : vector<8x32xbf16>, vector<32x32xbf16>, vector<8x32xf32> -> vector<8x32xf32>
    %271 = arith.addf %269, %270 : vector<8x32xf32>
    %272 = arith.negf %262 : vector<8x32xf32>
    %273 = math.exp %272 : vector<8x32xf32>
    %cst_155 = arith.constant 1.000000e+00 : f32
    %274 = vector.broadcast %cst_155 : f32 to vector<8x32xf32>
    %275 = arith.addf %274, %273 : vector<8x32xf32>
    %276 = arith.divf %274, %275 : vector<8x32xf32>
    %277 = arith.negf %265 : vector<8x32xf32>
    %278 = math.exp %277 : vector<8x32xf32>
    %cst_156 = arith.constant 1.000000e+00 : f32
    %279 = vector.broadcast %cst_156 : f32 to vector<8x32xf32>
    %280 = arith.addf %279, %278 : vector<8x32xf32>
    %281 = arith.divf %279, %280 : vector<8x32xf32>
    %282 = math.tanh %268 : vector<8x32xf32>
    %283 = arith.negf %271 : vector<8x32xf32>
    %284 = math.exp %283 : vector<8x32xf32>
    %cst_157 = arith.constant 1.000000e+00 : f32
    %285 = vector.broadcast %cst_157 : f32 to vector<8x32xf32>
    %286 = arith.addf %285, %284 : vector<8x32xf32>
    %287 = arith.divf %285, %286 : vector<8x32xf32>
    %288 = arith.mulf %281, %254 : vector<8x32xf32>
    %289 = arith.mulf %276, %282 : vector<8x32xf32>
    %290 = arith.addf %288, %289 : vector<8x32xf32>
    %291 = math.tanh %290 : vector<8x32xf32>
    %292 = arith.mulf %287, %291 : vector<8x32xf32>
    %293 = arith.truncf %292 : vector<8x32xf32> to vector<8x32xbf16>
    %c48_158 = arith.constant 48 : index
    %c0_159 = arith.constant 0 : index
    %294 = vector.load %arg17[%c48_158, %c0_159] : memref<64x32xbf16, #tpu.memory_space<vmem>>, vector<8x32xbf16>
    tpu.vector_store %arg17[%c48_158, %c0_159], %293 {strides = array<i32>} : memref<64x32xbf16, #tpu.memory_space<vmem>>, vector<8x32xbf16>,
    %295 = arith.truncf %292 : vector<8x32xf32> to vector<8x32xbf16>
    %c56 = arith.constant 56 : index
    %c0_160 = arith.constant 0 : index
    %296 = vector.load %arg13[%c56, %c0_160] : memref<64x32xf32, #tpu.memory_space<vmem>>, vector<8x32xf32>
    %cst_161 = arith.constant dense<0.000000e+00> : vector<8x32xf32>
    %297 = tpu.matmul %295, %34, %cst_161 {dimension_numbers = #tpu.dot_dimension_numbers<[1], [0], [0], [1], [0, 0, 1, 1], [], []>} : vector<8x32xbf16>, vector<32x32xbf16>, vector<8x32xf32> -> vector<8x32xf32>
    %298 = arith.addf %296, %297 : vector<8x32xf32>
    %c56_162 = arith.constant 56 : index
    %c0_163 = arith.constant 0 : index
    %299 = vector.load %arg14[%c56_162, %c0_163] : memref<64x32xf32, #tpu.memory_space<vmem>>, vector<8x32xf32>
    %cst_164 = arith.constant dense<0.000000e+00> : vector<8x32xf32>
    %300 = tpu.matmul %295, %36, %cst_164 {dimension_numbers = #tpu.dot_dimension_numbers<[1], [0], [0], [1], [0, 0, 1, 1], [], []>} : vector<8x32xbf16>, vector<32x32xbf16>, vector<8x32xf32> -> vector<8x32xf32>
    %301 = arith.addf %299, %300 : vector<8x32xf32>
    %c56_165 = arith.constant 56 : index
    %c0_166 = arith.constant 0 : index
    %302 = vector.load %arg15[%c56_165, %c0_166] : memref<64x32xf32, #tpu.memory_space<vmem>>, vector<8x32xf32>
    %cst_167 = arith.constant dense<0.000000e+00> : vector<8x32xf32>
    %303 = tpu.matmul %295, %38, %cst_167 {dimension_numbers = #tpu.dot_dimension_numbers<[1], [0], [0], [1], [0, 0, 1, 1], [], []>} : vector<8x32xbf16>, vector<32x32xbf16>, vector<8x32xf32> -> vector<8x32xf32>
    %304 = arith.addf %302, %303 : vector<8x32xf32>
    %c56_168 = arith.constant 56 : index
    %c0_169 = arith.constant 0 : index
    %305 = vector.load %arg16[%c56_168, %c0_169] : memref<64x32xf32, #tpu.memory_space<vmem>>, vector<8x32xf32>
    %cst_170 = arith.constant dense<0.000000e+00> : vector<8x32xf32>
    %306 = tpu.matmul %295, %40, %cst_170 {dimension_numbers = #tpu.dot_dimension_numbers<[1], [0], [0], [1], [0, 0, 1, 1], [], []>} : vector<8x32xbf16>, vector<32x32xbf16>, vector<8x32xf32> -> vector<8x32xf32>
    %307 = arith.addf %305, %306 : vector<8x32xf32>
    %308 = arith.negf %298 : vector<8x32xf32>
    %309 = math.exp %308 : vector<8x32xf32>
    %cst_171 = arith.constant 1.000000e+00 : f32
    %310 = vector.broadcast %cst_171 : f32 to vector<8x32xf32>
    %311 = arith.addf %310, %309 : vector<8x32xf32>
    %312 = arith.divf %310, %311 : vector<8x32xf32>
    %313 = arith.negf %301 : vector<8x32xf32>
    %314 = math.exp %313 : vector<8x32xf32>
    %cst_172 = arith.constant 1.000000e+00 : f32
    %315 = vector.broadcast %cst_172 : f32 to vector<8x32xf32>
    %316 = arith.addf %315, %314 : vector<8x32xf32>
    %317 = arith.divf %315, %316 : vector<8x32xf32>
    %318 = math.tanh %304 : vector<8x32xf32>
    %319 = arith.negf %307 : vector<8x32xf32>
    %320 = math.exp %319 : vector<8x32xf32>
    %cst_173 = arith.constant 1.000000e+00 : f32
    %321 = vector.broadcast %cst_173 : f32 to vector<8x32xf32>
    %322 = arith.addf %321, %320 : vector<8x32xf32>
    %323 = arith.divf %321, %322 : vector<8x32xf32>
    %324 = arith.mulf %317, %290 : vector<8x32xf32>
    %325 = arith.mulf %312, %318 : vector<8x32xf32>
    %326 = arith.addf %324, %325 : vector<8x32xf32>
    %327 = math.tanh %326 : vector<8x32xf32>
    %328 = arith.mulf %323, %327 : vector<8x32xf32>
    %329 = arith.truncf %328 : vector<8x32xf32> to vector<8x32xbf16>
    %c56_174 = arith.constant 56 : index
    %c0_175 = arith.constant 0 : index
    %330 = vector.load %arg17[%c56_174, %c0_175] : memref<64x32xbf16, #tpu.memory_space<vmem>>, vector<8x32xbf16>
    tpu.vector_store %arg17[%c56_174, %c0_175], %329 {strides = array<i32>} : memref<64x32xbf16, #tpu.memory_space<vmem>>, vector<8x32xbf16>,
    %c0_176 = arith.constant 0 : index
    %c0_177 = arith.constant 0 : index
    %331 = vector.load %arg17[%c0_176, %c0_177] : memref<64x32xbf16, #tpu.memory_space<vmem>>, vector<64x32xbf16>
    %c0_178 = arith.constant 0 : index
    %c0_179 = arith.constant 0 : index
    %c0_180 = arith.constant 0 : index
    %332 = vector.load %arg4[%c0_178, %c0_179, %c0_180] : memref<4x32x32xbf16, #tpu.memory_space<vmem>>, vector<1x32x32xbf16>
    %333 = vector.shape_cast %332 : vector<1x32x32xbf16> to vector<32x32xbf16>
    %cst_181 = arith.constant dense<0.000000e+00> : vector<64x32xf32>
    %334 = tpu.matmul %331, %333, %cst_181 {dimension_numbers = #tpu.dot_dimension_numbers<[1], [0], [0], [1], [0, 0, 1, 1], [], []>} : vector<64x32xbf16>, vector<32x32xbf16>, vector<64x32xf32> -> vector<64x32xf32>
    %c0_182 = arith.constant 0 : index
    %c0_183 = arith.constant 0 : index
    %c0_184 = arith.constant 0 : index
    %335 = vector.load %arg6[%c0_182, %c0_183, %c0_184] : memref<4x1x32xf32, #tpu.memory_space<vmem>>, vector<1x1x32xf32>
    %336 = vector.shape_cast %335 : vector<1x1x32xf32> to vector<1x32xf32>
    %337 = vector.broadcast %336 : vector<1x32xf32> to vector<64x32xf32>
    %338 = arith.addf %334, %337 : vector<64x32xf32>
    %c0_185 = arith.constant 0 : index
    %c0_186 = arith.constant 0 : index
    %339 = vector.load %arg13[%c0_185, %c0_186] : memref<64x32xf32, #tpu.memory_space<vmem>>, vector<64x32xf32>
    tpu.vector_store %arg13[%c0_185, %c0_186], %338 {strides = array<i32>} : memref<64x32xf32, #tpu.memory_space<vmem>>, vector<64x32xf32>,
    %c1_187 = arith.constant 1 : index
    %c0_188 = arith.constant 0 : index
    %c0_189 = arith.constant 0 : index
    %340 = vector.load %arg4[%c1_187, %c0_188, %c0_189] : memref<4x32x32xbf16, #tpu.memory_space<vmem>>, vector<1x32x32xbf16>
    %341 = vector.shape_cast %340 : vector<1x32x32xbf16> to vector<32x32xbf16>
    %cst_190 = arith.constant dense<0.000000e+00> : vector<64x32xf32>
    %342 = tpu.matmul %331, %341, %cst_190 {dimension_numbers = #tpu.dot_dimension_numbers<[1], [0], [0], [1], [0, 0, 1, 1], [], []>} : vector<64x32xbf16>, vector<32x32xbf16>, vector<64x32xf32> -> vector<64x32xf32>
    %c1_191 = arith.constant 1 : index
    %c0_192 = arith.constant 0 : index
    %c0_193 = arith.constant 0 : index
    %343 = vector.load %arg6[%c1_191, %c0_192, %c0_193] : memref<4x1x32xf32, #tpu.memory_space<vmem>>, vector<1x1x32xf32>
    %344 = vector.shape_cast %343 : vector<1x1x32xf32> to vector<1x32xf32>
    %345 = vector.broadcast %344 : vector<1x32xf32> to vector<64x32xf32>
    %346 = arith.addf %342, %345 : vector<64x32xf32>
    %c0_194 = arith.constant 0 : index
    %c0_195 = arith.constant 0 : index
    %347 = vector.load %arg14[%c0_194, %c0_195] : memref<64x32xf32, #tpu.memory_space<vmem>>, vector<64x32xf32>
    tpu.vector_store %arg14[%c0_194, %c0_195], %346 {strides = array<i32>} : memref<64x32xf32, #tpu.memory_space<vmem>>, vector<64x32xf32>,
    %c2_196 = arith.constant 2 : index
    %c0_197 = arith.constant 0 : index
    %c0_198 = arith.constant 0 : index
    %348 = vector.load %arg4[%c2_196, %c0_197, %c0_198] : memref<4x32x32xbf16, #tpu.memory_space<vmem>>, vector<1x32x32xbf16>
    %349 = vector.shape_cast %348 : vector<1x32x32xbf16> to vector<32x32xbf16>
    %cst_199 = arith.constant dense<0.000000e+00> : vector<64x32xf32>
    %350 = tpu.matmul %331, %349, %cst_199 {dimension_numbers = #tpu.dot_dimension_numbers<[1], [0], [0], [1], [0, 0, 1, 1], [], []>} : vector<64x32xbf16>, vector<32x32xbf16>, vector<64x32xf32> -> vector<64x32xf32>
    %c2_200 = arith.constant 2 : index
    %c0_201 = arith.constant 0 : index
    %c0_202 = arith.constant 0 : index
    %351 = vector.load %arg6[%c2_200, %c0_201, %c0_202] : memref<4x1x32xf32, #tpu.memory_space<vmem>>, vector<1x1x32xf32>
    %352 = vector.shape_cast %351 : vector<1x1x32xf32> to vector<1x32xf32>
    %353 = vector.broadcast %352 : vector<1x32xf32> to vector<64x32xf32>
    %354 = arith.addf %350, %353 : vector<64x32xf32>
    %c0_203 = arith.constant 0 : index
    %c0_204 = arith.constant 0 : index
    %355 = vector.load %arg15[%c0_203, %c0_204] : memref<64x32xf32, #tpu.memory_space<vmem>>, vector<64x32xf32>
    tpu.vector_store %arg15[%c0_203, %c0_204], %354 {strides = array<i32>} : memref<64x32xf32, #tpu.memory_space<vmem>>, vector<64x32xf32>,
    %c3_205 = arith.constant 3 : index
    %c0_206 = arith.constant 0 : index
    %c0_207 = arith.constant 0 : index
    %356 = vector.load %arg4[%c3_205, %c0_206, %c0_207] : memref<4x32x32xbf16, #tpu.memory_space<vmem>>, vector<1x32x32xbf16>
    %357 = vector.shape_cast %356 : vector<1x32x32xbf16> to vector<32x32xbf16>
    %cst_208 = arith.constant dense<0.000000e+00> : vector<64x32xf32>
    %358 = tpu.matmul %331, %357, %cst_208 {dimension_numbers = #tpu.dot_dimension_numbers<[1], [0], [0], [1], [0, 0, 1, 1], [], []>} : vector<64x32xbf16>, vector<32x32xbf16>, vector<64x32xf32> -> vector<64x32xf32>
    %c3_209 = arith.constant 3 : index
    %c0_210 = arith.constant 0 : index
    %c0_211 = arith.constant 0 : index
    %359 = vector.load %arg6[%c3_209, %c0_210, %c0_211] : memref<4x1x32xf32, #tpu.memory_space<vmem>>, vector<1x1x32xf32>
    %360 = vector.shape_cast %359 : vector<1x1x32xf32> to vector<1x32xf32>
    %361 = vector.broadcast %360 : vector<1x32xf32> to vector<64x32xf32>
    %362 = arith.addf %358, %361 : vector<64x32xf32>
    %c0_212 = arith.constant 0 : index
    %c0_213 = arith.constant 0 : index
    %363 = vector.load %arg16[%c0_212, %c0_213] : memref<64x32xf32, #tpu.memory_space<vmem>>, vector<64x32xf32>
    tpu.vector_store %arg16[%c0_212, %c0_213], %362 {strides = array<i32>} : memref<64x32xf32, #tpu.memory_space<vmem>>, vector<64x32xf32>,
    %c0_214 = arith.constant 0 : index
    %c0_215 = arith.constant 0 : index
    %c0_216 = arith.constant 0 : index
    %364 = vector.load %arg5[%c0_214, %c0_215, %c0_216] : memref<4x32x32xbf16, #tpu.memory_space<vmem>>, vector<1x32x32xbf16>
    %365 = vector.shape_cast %364 : vector<1x32x32xbf16> to vector<32x32xbf16>
    %c1_217 = arith.constant 1 : index
    %c0_218 = arith.constant 0 : index
    %c0_219 = arith.constant 0 : index
    %366 = vector.load %arg5[%c1_217, %c0_218, %c0_219] : memref<4x32x32xbf16, #tpu.memory_space<vmem>>, vector<1x32x32xbf16>
    %367 = vector.shape_cast %366 : vector<1x32x32xbf16> to vector<32x32xbf16>
    %c2_220 = arith.constant 2 : index
    %c0_221 = arith.constant 0 : index
    %c0_222 = arith.constant 0 : index
    %368 = vector.load %arg5[%c2_220, %c0_221, %c0_222] : memref<4x32x32xbf16, #tpu.memory_space<vmem>>, vector<1x32x32xbf16>
    %369 = vector.shape_cast %368 : vector<1x32x32xbf16> to vector<32x32xbf16>
    %c3_223 = arith.constant 3 : index
    %c0_224 = arith.constant 0 : index
    %c0_225 = arith.constant 0 : index
    %370 = vector.load %arg5[%c3_223, %c0_224, %c0_225] : memref<4x32x32xbf16, #tpu.memory_space<vmem>>, vector<1x32x32xbf16>
    %371 = vector.shape_cast %370 : vector<1x32x32xbf16> to vector<32x32xbf16>
    %cst_226 = arith.constant 0.000000e+00 : f32
    %372 = vector.broadcast %cst_226 : f32 to vector<8x32xf32>
    %cst_227 = arith.constant 0.000000e+00 : f32
    %373 = vector.broadcast %cst_227 : f32 to vector<8x32xf32>
    %374 = arith.truncf %372 : vector<8x32xf32> to vector<8x32xbf16>
    %c0_228 = arith.constant 0 : index
    %c0_229 = arith.constant 0 : index
    %375 = vector.load %arg13[%c0_228, %c0_229] : memref<64x32xf32, #tpu.memory_space<vmem>>, vector<8x32xf32>
    %cst_230 = arith.constant dense<0.000000e+00> : vector<8x32xf32>
    %376 = tpu.matmul %374, %365, %cst_230 {dimension_numbers = #tpu.dot_dimension_numbers<[1], [0], [0], [1], [0, 0, 1, 1], [], []>} : vector<8x32xbf16>, vector<32x32xbf16>, vector<8x32xf32> -> vector<8x32xf32>
    %377 = arith.addf %375, %376 : vector<8x32xf32>
    %c0_231 = arith.constant 0 : index
    %c0_232 = arith.constant 0 : index
    %378 = vector.load %arg14[%c0_231, %c0_232] : memref<64x32xf32, #tpu.memory_space<vmem>>, vector<8x32xf32>
    %cst_233 = arith.constant dense<0.000000e+00> : vector<8x32xf32>
    %379 = tpu.matmul %374, %367, %cst_233 {dimension_numbers = #tpu.dot_dimension_numbers<[1], [0], [0], [1], [0, 0, 1, 1], [], []>} : vector<8x32xbf16>, vector<32x32xbf16>, vector<8x32xf32> -> vector<8x32xf32>
    %380 = arith.addf %378, %379 : vector<8x32xf32>
    %c0_234 = arith.constant 0 : index
    %c0_235 = arith.constant 0 : index
    %381 = vector.load %arg15[%c0_234, %c0_235] : memref<64x32xf32, #tpu.memory_space<vmem>>, vector<8x32xf32>
    %cst_236 = arith.constant dense<0.000000e+00> : vector<8x32xf32>
    %382 = tpu.matmul %374, %369, %cst_236 {dimension_numbers = #tpu.dot_dimension_numbers<[1], [0], [0], [1], [0, 0, 1, 1], [], []>} : vector<8x32xbf16>, vector<32x32xbf16>, vector<8x32xf32> -> vector<8x32xf32>
    %383 = arith.addf %381, %382 : vector<8x32xf32>
    %c0_237 = arith.constant 0 : index
    %c0_238 = arith.constant 0 : index
    %384 = vector.load %arg16[%c0_237, %c0_238] : memref<64x32xf32, #tpu.memory_space<vmem>>, vector<8x32xf32>
    %cst_239 = arith.constant dense<0.000000e+00> : vector<8x32xf32>
    %385 = tpu.matmul %374, %371, %cst_239 {dimension_numbers = #tpu.dot_dimension_numbers<[1], [0], [0], [1], [0, 0, 1, 1], [], []>} : vector<8x32xbf16>, vector<32x32xbf16>, vector<8x32xf32> -> vector<8x32xf32>
    %386 = arith.addf %384, %385 : vector<8x32xf32>
    %387 = arith.negf %377 : vector<8x32xf32>
    %388 = math.exp %387 : vector<8x32xf32>
    %cst_240 = arith.constant 1.000000e+00 : f32
    %389 = vector.broadcast %cst_240 : f32 to vector<8x32xf32>
    %390 = arith.addf %389, %388 : vector<8x32xf32>
    %391 = arith.divf %389, %390 : vector<8x32xf32>
    %392 = arith.negf %380 : vector<8x32xf32>
    %393 = math.exp %392 : vector<8x32xf32>
    %cst_241 = arith.constant 1.000000e+00 : f32
    %394 = vector.broadcast %cst_241 : f32 to vector<8x32xf32>
    %395 = arith.addf %394, %393 : vector<8x32xf32>
    %396 = arith.divf %394, %395 : vector<8x32xf32>
    %397 = math.tanh %383 : vector<8x32xf32>
    %398 = arith.negf %386 : vector<8x32xf32>
    %399 = math.exp %398 : vector<8x32xf32>
    %cst_242 = arith.constant 1.000000e+00 : f32
    %400 = vector.broadcast %cst_242 : f32 to vector<8x32xf32>
    %401 = arith.addf %400, %399 : vector<8x32xf32>
    %402 = arith.divf %400, %401 : vector<8x32xf32>
    %403 = arith.mulf %396, %373 : vector<8x32xf32>
    %404 = arith.mulf %391, %397 : vector<8x32xf32>
    %405 = arith.addf %403, %404 : vector<8x32xf32>
    %406 = math.tanh %405 : vector<8x32xf32>
    %407 = arith.mulf %402, %406 : vector<8x32xf32>
    %408 = arith.truncf %407 : vector<8x32xf32> to vector<8x32xbf16>
    %c0_243 = arith.constant 0 : index
    %c0_244 = arith.constant 0 : index
    %409 = vector.load %arg17[%c0_243, %c0_244] : memref<64x32xbf16, #tpu.memory_space<vmem>>, vector<8x32xbf16>
    tpu.vector_store %arg17[%c0_243, %c0_244], %408 {strides = array<i32>} : memref<64x32xbf16, #tpu.memory_space<vmem>>, vector<8x32xbf16>,
    %410 = arith.truncf %407 : vector<8x32xf32> to vector<8x32xbf16>
    %c8_245 = arith.constant 8 : index
    %c0_246 = arith.constant 0 : index
    %411 = vector.load %arg13[%c8_245, %c0_246] : memref<64x32xf32, #tpu.memory_space<vmem>>, vector<8x32xf32>
    %cst_247 = arith.constant dense<0.000000e+00> : vector<8x32xf32>
    %412 = tpu.matmul %410, %365, %cst_247 {dimension_numbers = #tpu.dot_dimension_numbers<[1], [0], [0], [1], [0, 0, 1, 1], [], []>} : vector<8x32xbf16>, vector<32x32xbf16>, vector<8x32xf32> -> vector<8x32xf32>
    %413 = arith.addf %411, %412 : vector<8x32xf32>
    %c8_248 = arith.constant 8 : index
    %c0_249 = arith.constant 0 : index
    %414 = vector.load %arg14[%c8_248, %c0_249] : memref<64x32xf32, #tpu.memory_space<vmem>>, vector<8x32xf32>
    %cst_250 = arith.constant dense<0.000000e+00> : vector<8x32xf32>
    %415 = tpu.matmul %410, %367, %cst_250 {dimension_numbers = #tpu.dot_dimension_numbers<[1], [0], [0], [1], [0, 0, 1, 1], [], []>} : vector<8x32xbf16>, vector<32x32xbf16>, vector<8x32xf32> -> vector<8x32xf32>
    %416 = arith.addf %414, %415 : vector<8x32xf32>
    %c8_251 = arith.constant 8 : index
    %c0_252 = arith.constant 0 : index
    %417 = vector.load %arg15[%c8_251, %c0_252] : memref<64x32xf32, #tpu.memory_space<vmem>>, vector<8x32xf32>
    %cst_253 = arith.constant dense<0.000000e+00> : vector<8x32xf32>
    %418 = tpu.matmul %410, %369, %cst_253 {dimension_numbers = #tpu.dot_dimension_numbers<[1], [0], [0], [1], [0, 0, 1, 1], [], []>} : vector<8x32xbf16>, vector<32x32xbf16>, vector<8x32xf32> -> vector<8x32xf32>
    %419 = arith.addf %417, %418 : vector<8x32xf32>
    %c8_254 = arith.constant 8 : index
    %c0_255 = arith.constant 0 : index
    %420 = vector.load %arg16[%c8_254, %c0_255] : memref<64x32xf32, #tpu.memory_space<vmem>>, vector<8x32xf32>
    %cst_256 = arith.constant dense<0.000000e+00> : vector<8x32xf32>
    %421 = tpu.matmul %410, %371, %cst_256 {dimension_numbers = #tpu.dot_dimension_numbers<[1], [0], [0], [1], [0, 0, 1, 1], [], []>} : vector<8x32xbf16>, vector<32x32xbf16>, vector<8x32xf32> -> vector<8x32xf32>
    %422 = arith.addf %420, %421 : vector<8x32xf32>
    %423 = arith.negf %413 : vector<8x32xf32>
    %424 = math.exp %423 : vector<8x32xf32>
    %cst_257 = arith.constant 1.000000e+00 : f32
    %425 = vector.broadcast %cst_257 : f32 to vector<8x32xf32>
    %426 = arith.addf %425, %424 : vector<8x32xf32>
    %427 = arith.divf %425, %426 : vector<8x32xf32>
    %428 = arith.negf %416 : vector<8x32xf32>
    %429 = math.exp %428 : vector<8x32xf32>
    %cst_258 = arith.constant 1.000000e+00 : f32
    %430 = vector.broadcast %cst_258 : f32 to vector<8x32xf32>
    %431 = arith.addf %430, %429 : vector<8x32xf32>
    %432 = arith.divf %430, %431 : vector<8x32xf32>
    %433 = math.tanh %419 : vector<8x32xf32>
    %434 = arith.negf %422 : vector<8x32xf32>
    %435 = math.exp %434 : vector<8x32xf32>
    %cst_259 = arith.constant 1.000000e+00 : f32
    %436 = vector.broadcast %cst_259 : f32 to vector<8x32xf32>
    %437 = arith.addf %436, %435 : vector<8x32xf32>
    %438 = arith.divf %436, %437 : vector<8x32xf32>
    %439 = arith.mulf %432, %405 : vector<8x32xf32>
    %440 = arith.mulf %427, %433 : vector<8x32xf32>
    %441 = arith.addf %439, %440 : vector<8x32xf32>
    %442 = math.tanh %441 : vector<8x32xf32>
    %443 = arith.mulf %438, %442 : vector<8x32xf32>
    %444 = arith.truncf %443 : vector<8x32xf32> to vector<8x32xbf16>
    %c8_260 = arith.constant 8 : index
    %c0_261 = arith.constant 0 : index
    %445 = vector.load %arg17[%c8_260, %c0_261] : memref<64x32xbf16, #tpu.memory_space<vmem>>, vector<8x32xbf16>
    tpu.vector_store %arg17[%c8_260, %c0_261], %444 {strides = array<i32>} : memref<64x32xbf16, #tpu.memory_space<vmem>>, vector<8x32xbf16>,
    %446 = arith.truncf %443 : vector<8x32xf32> to vector<8x32xbf16>
    %c16_262 = arith.constant 16 : index
    %c0_263 = arith.constant 0 : index
    %447 = vector.load %arg13[%c16_262, %c0_263] : memref<64x32xf32, #tpu.memory_space<vmem>>, vector<8x32xf32>
    %cst_264 = arith.constant dense<0.000000e+00> : vector<8x32xf32>
    %448 = tpu.matmul %446, %365, %cst_264 {dimension_numbers = #tpu.dot_dimension_numbers<[1], [0], [0], [1], [0, 0, 1, 1], [], []>} : vector<8x32xbf16>, vector<32x32xbf16>, vector<8x32xf32> -> vector<8x32xf32>
    %449 = arith.addf %447, %448 : vector<8x32xf32>
    %c16_265 = arith.constant 16 : index
    %c0_266 = arith.constant 0 : index
    %450 = vector.load %arg14[%c16_265, %c0_266] : memref<64x32xf32, #tpu.memory_space<vmem>>, vector<8x32xf32>
    %cst_267 = arith.constant dense<0.000000e+00> : vector<8x32xf32>
    %451 = tpu.matmul %446, %367, %cst_267 {dimension_numbers = #tpu.dot_dimension_numbers<[1], [0], [0], [1], [0, 0, 1, 1], [], []>} : vector<8x32xbf16>, vector<32x32xbf16>, vector<8x32xf32> -> vector<8x32xf32>
    %452 = arith.addf %450, %451 : vector<8x32xf32>
    %c16_268 = arith.constant 16 : index
    %c0_269 = arith.constant 0 : index
    %453 = vector.load %arg15[%c16_268, %c0_269] : memref<64x32xf32, #tpu.memory_space<vmem>>, vector<8x32xf32>
    %cst_270 = arith.constant dense<0.000000e+00> : vector<8x32xf32>
    %454 = tpu.matmul %446, %369, %cst_270 {dimension_numbers = #tpu.dot_dimension_numbers<[1], [0], [0], [1], [0, 0, 1, 1], [], []>} : vector<8x32xbf16>, vector<32x32xbf16>, vector<8x32xf32> -> vector<8x32xf32>
    %455 = arith.addf %453, %454 : vector<8x32xf32>
    %c16_271 = arith.constant 16 : index
    %c0_272 = arith.constant 0 : index
    %456 = vector.load %arg16[%c16_271, %c0_272] : memref<64x32xf32, #tpu.memory_space<vmem>>, vector<8x32xf32>
    %cst_273 = arith.constant dense<0.000000e+00> : vector<8x32xf32>
    %457 = tpu.matmul %446, %371, %cst_273 {dimension_numbers = #tpu.dot_dimension_numbers<[1], [0], [0], [1], [0, 0, 1, 1], [], []>} : vector<8x32xbf16>, vector<32x32xbf16>, vector<8x32xf32> -> vector<8x32xf32>
    %458 = arith.addf %456, %457 : vector<8x32xf32>
    %459 = arith.negf %449 : vector<8x32xf32>
    %460 = math.exp %459 : vector<8x32xf32>
    %cst_274 = arith.constant 1.000000e+00 : f32
    %461 = vector.broadcast %cst_274 : f32 to vector<8x32xf32>
    %462 = arith.addf %461, %460 : vector<8x32xf32>
    %463 = arith.divf %461, %462 : vector<8x32xf32>
    %464 = arith.negf %452 : vector<8x32xf32>
    %465 = math.exp %464 : vector<8x32xf32>
    %cst_275 = arith.constant 1.000000e+00 : f32
    %466 = vector.broadcast %cst_275 : f32 to vector<8x32xf32>
    %467 = arith.addf %466, %465 : vector<8x32xf32>
    %468 = arith.divf %466, %467 : vector<8x32xf32>
    %469 = math.tanh %455 : vector<8x32xf32>
    %470 = arith.negf %458 : vector<8x32xf32>
    %471 = math.exp %470 : vector<8x32xf32>
    %cst_276 = arith.constant 1.000000e+00 : f32
    %472 = vector.broadcast %cst_276 : f32 to vector<8x32xf32>
    %473 = arith.addf %472, %471 : vector<8x32xf32>
    %474 = arith.divf %472, %473 : vector<8x32xf32>
    %475 = arith.mulf %468, %441 : vector<8x32xf32>
    %476 = arith.mulf %463, %469 : vector<8x32xf32>
    %477 = arith.addf %475, %476 : vector<8x32xf32>
    %478 = math.tanh %477 : vector<8x32xf32>
    %479 = arith.mulf %474, %478 : vector<8x32xf32>
    %480 = arith.truncf %479 : vector<8x32xf32> to vector<8x32xbf16>
    %c16_277 = arith.constant 16 : index
    %c0_278 = arith.constant 0 : index
    %481 = vector.load %arg17[%c16_277, %c0_278] : memref<64x32xbf16, #tpu.memory_space<vmem>>, vector<8x32xbf16>
    tpu.vector_store %arg17[%c16_277, %c0_278], %480 {strides = array<i32>} : memref<64x32xbf16, #tpu.memory_space<vmem>>, vector<8x32xbf16>,
    %482 = arith.truncf %479 : vector<8x32xf32> to vector<8x32xbf16>
    %c24_279 = arith.constant 24 : index
    %c0_280 = arith.constant 0 : index
    %483 = vector.load %arg13[%c24_279, %c0_280] : memref<64x32xf32, #tpu.memory_space<vmem>>, vector<8x32xf32>
    %cst_281 = arith.constant dense<0.000000e+00> : vector<8x32xf32>
    %484 = tpu.matmul %482, %365, %cst_281 {dimension_numbers = #tpu.dot_dimension_numbers<[1], [0], [0], [1], [0, 0, 1, 1], [], []>} : vector<8x32xbf16>, vector<32x32xbf16>, vector<8x32xf32> -> vector<8x32xf32>
    %485 = arith.addf %483, %484 : vector<8x32xf32>
    %c24_282 = arith.constant 24 : index
    %c0_283 = arith.constant 0 : index
    %486 = vector.load %arg14[%c24_282, %c0_283] : memref<64x32xf32, #tpu.memory_space<vmem>>, vector<8x32xf32>
    %cst_284 = arith.constant dense<0.000000e+00> : vector<8x32xf32>
    %487 = tpu.matmul %482, %367, %cst_284 {dimension_numbers = #tpu.dot_dimension_numbers<[1], [0], [0], [1], [0, 0, 1, 1], [], []>} : vector<8x32xbf16>, vector<32x32xbf16>, vector<8x32xf32> -> vector<8x32xf32>
    %488 = arith.addf %486, %487 : vector<8x32xf32>
    %c24_285 = arith.constant 24 : index
    %c0_286 = arith.constant 0 : index
    %489 = vector.load %arg15[%c24_285, %c0_286] : memref<64x32xf32, #tpu.memory_space<vmem>>, vector<8x32xf32>
    %cst_287 = arith.constant dense<0.000000e+00> : vector<8x32xf32>
    %490 = tpu.matmul %482, %369, %cst_287 {dimension_numbers = #tpu.dot_dimension_numbers<[1], [0], [0], [1], [0, 0, 1, 1], [], []>} : vector<8x32xbf16>, vector<32x32xbf16>, vector<8x32xf32> -> vector<8x32xf32>
    %491 = arith.addf %489, %490 : vector<8x32xf32>
    %c24_288 = arith.constant 24 : index
    %c0_289 = arith.constant 0 : index
    %492 = vector.load %arg16[%c24_288, %c0_289] : memref<64x32xf32, #tpu.memory_space<vmem>>, vector<8x32xf32>
    %cst_290 = arith.constant dense<0.000000e+00> : vector<8x32xf32>
    %493 = tpu.matmul %482, %371, %cst_290 {dimension_numbers = #tpu.dot_dimension_numbers<[1], [0], [0], [1], [0, 0, 1, 1], [], []>} : vector<8x32xbf16>, vector<32x32xbf16>, vector<8x32xf32> -> vector<8x32xf32>
    %494 = arith.addf %492, %493 : vector<8x32xf32>
    %495 = arith.negf %485 : vector<8x32xf32>
    %496 = math.exp %495 : vector<8x32xf32>
    %cst_291 = arith.constant 1.000000e+00 : f32
    %497 = vector.broadcast %cst_291 : f32 to vector<8x32xf32>
    %498 = arith.addf %497, %496 : vector<8x32xf32>
    %499 = arith.divf %497, %498 : vector<8x32xf32>
    %500 = arith.negf %488 : vector<8x32xf32>
    %501 = math.exp %500 : vector<8x32xf32>
    %cst_292 = arith.constant 1.000000e+00 : f32
    %502 = vector.broadcast %cst_292 : f32 to vector<8x32xf32>
    %503 = arith.addf %502, %501 : vector<8x32xf32>
    %504 = arith.divf %502, %503 : vector<8x32xf32>
    %505 = math.tanh %491 : vector<8x32xf32>
    %506 = arith.negf %494 : vector<8x32xf32>
    %507 = math.exp %506 : vector<8x32xf32>
    %cst_293 = arith.constant 1.000000e+00 : f32
    %508 = vector.broadcast %cst_293 : f32 to vector<8x32xf32>
    %509 = arith.addf %508, %507 : vector<8x32xf32>
    %510 = arith.divf %508, %509 : vector<8x32xf32>
    %511 = arith.mulf %504, %477 : vector<8x32xf32>
    %512 = arith.mulf %499, %505 : vector<8x32xf32>
    %513 = arith.addf %511, %512 : vector<8x32xf32>
    %514 = math.tanh %513 : vector<8x32xf32>
    %515 = arith.mulf %510, %514 : vector<8x32xf32>
    %516 = arith.truncf %515 : vector<8x32xf32> to vector<8x32xbf16>
    %c24_294 = arith.constant 24 : index
    %c0_295 = arith.constant 0 : index
    %517 = vector.load %arg17[%c24_294, %c0_295] : memref<64x32xbf16, #tpu.memory_space<vmem>>, vector<8x32xbf16>
    tpu.vector_store %arg17[%c24_294, %c0_295], %516 {strides = array<i32>} : memref<64x32xbf16, #tpu.memory_space<vmem>>, vector<8x32xbf16>,
    %518 = arith.truncf %515 : vector<8x32xf32> to vector<8x32xbf16>
    %c32_296 = arith.constant 32 : index
    %c0_297 = arith.constant 0 : index
    %519 = vector.load %arg13[%c32_296, %c0_297] : memref<64x32xf32, #tpu.memory_space<vmem>>, vector<8x32xf32>
    %cst_298 = arith.constant dense<0.000000e+00> : vector<8x32xf32>
    %520 = tpu.matmul %518, %365, %cst_298 {dimension_numbers = #tpu.dot_dimension_numbers<[1], [0], [0], [1], [0, 0, 1, 1], [], []>} : vector<8x32xbf16>, vector<32x32xbf16>, vector<8x32xf32> -> vector<8x32xf32>
    %521 = arith.addf %519, %520 : vector<8x32xf32>
    %c32_299 = arith.constant 32 : index
    %c0_300 = arith.constant 0 : index
    %522 = vector.load %arg14[%c32_299, %c0_300] : memref<64x32xf32, #tpu.memory_space<vmem>>, vector<8x32xf32>
    %cst_301 = arith.constant dense<0.000000e+00> : vector<8x32xf32>
    %523 = tpu.matmul %518, %367, %cst_301 {dimension_numbers = #tpu.dot_dimension_numbers<[1], [0], [0], [1], [0, 0, 1, 1], [], []>} : vector<8x32xbf16>, vector<32x32xbf16>, vector<8x32xf32> -> vector<8x32xf32>
    %524 = arith.addf %522, %523 : vector<8x32xf32>
    %c32_302 = arith.constant 32 : index
    %c0_303 = arith.constant 0 : index
    %525 = vector.load %arg15[%c32_302, %c0_303] : memref<64x32xf32, #tpu.memory_space<vmem>>, vector<8x32xf32>
    %cst_304 = arith.constant dense<0.000000e+00> : vector<8x32xf32>
    %526 = tpu.matmul %518, %369, %cst_304 {dimension_numbers = #tpu.dot_dimension_numbers<[1], [0], [0], [1], [0, 0, 1, 1], [], []>} : vector<8x32xbf16>, vector<32x32xbf16>, vector<8x32xf32> -> vector<8x32xf32>
    %527 = arith.addf %525, %526 : vector<8x32xf32>
    %c32_305 = arith.constant 32 : index
    %c0_306 = arith.constant 0 : index
    %528 = vector.load %arg16[%c32_305, %c0_306] : memref<64x32xf32, #tpu.memory_space<vmem>>, vector<8x32xf32>
    %cst_307 = arith.constant dense<0.000000e+00> : vector<8x32xf32>
    %529 = tpu.matmul %518, %371, %cst_307 {dimension_numbers = #tpu.dot_dimension_numbers<[1], [0], [0], [1], [0, 0, 1, 1], [], []>} : vector<8x32xbf16>, vector<32x32xbf16>, vector<8x32xf32> -> vector<8x32xf32>
    %530 = arith.addf %528, %529 : vector<8x32xf32>
    %531 = arith.negf %521 : vector<8x32xf32>
    %532 = math.exp %531 : vector<8x32xf32>
    %cst_308 = arith.constant 1.000000e+00 : f32
    %533 = vector.broadcast %cst_308 : f32 to vector<8x32xf32>
    %534 = arith.addf %533, %532 : vector<8x32xf32>
    %535 = arith.divf %533, %534 : vector<8x32xf32>
    %536 = arith.negf %524 : vector<8x32xf32>
    %537 = math.exp %536 : vector<8x32xf32>
    %cst_309 = arith.constant 1.000000e+00 : f32
    %538 = vector.broadcast %cst_309 : f32 to vector<8x32xf32>
    %539 = arith.addf %538, %537 : vector<8x32xf32>
    %540 = arith.divf %538, %539 : vector<8x32xf32>
    %541 = math.tanh %527 : vector<8x32xf32>
    %542 = arith.negf %530 : vector<8x32xf32>
    %543 = math.exp %542 : vector<8x32xf32>
    %cst_310 = arith.constant 1.000000e+00 : f32
    %544 = vector.broadcast %cst_310 : f32 to vector<8x32xf32>
    %545 = arith.addf %544, %543 : vector<8x32xf32>
    %546 = arith.divf %544, %545 : vector<8x32xf32>
    %547 = arith.mulf %540, %513 : vector<8x32xf32>
    %548 = arith.mulf %535, %541 : vector<8x32xf32>
    %549 = arith.addf %547, %548 : vector<8x32xf32>
    %550 = math.tanh %549 : vector<8x32xf32>
    %551 = arith.mulf %546, %550 : vector<8x32xf32>
    %552 = arith.truncf %551 : vector<8x32xf32> to vector<8x32xbf16>
    %c32_311 = arith.constant 32 : index
    %c0_312 = arith.constant 0 : index
    %553 = vector.load %arg17[%c32_311, %c0_312] : memref<64x32xbf16, #tpu.memory_space<vmem>>, vector<8x32xbf16>
    tpu.vector_store %arg17[%c32_311, %c0_312], %552 {strides = array<i32>} : memref<64x32xbf16, #tpu.memory_space<vmem>>, vector<8x32xbf16>,
    %554 = arith.truncf %551 : vector<8x32xf32> to vector<8x32xbf16>
    %c40_313 = arith.constant 40 : index
    %c0_314 = arith.constant 0 : index
    %555 = vector.load %arg13[%c40_313, %c0_314] : memref<64x32xf32, #tpu.memory_space<vmem>>, vector<8x32xf32>
    %cst_315 = arith.constant dense<0.000000e+00> : vector<8x32xf32>
    %556 = tpu.matmul %554, %365, %cst_315 {dimension_numbers = #tpu.dot_dimension_numbers<[1], [0], [0], [1], [0, 0, 1, 1], [], []>} : vector<8x32xbf16>, vector<32x32xbf16>, vector<8x32xf32> -> vector<8x32xf32>
    %557 = arith.addf %555, %556 : vector<8x32xf32>
    %c40_316 = arith.constant 40 : index
    %c0_317 = arith.constant 0 : index
    %558 = vector.load %arg14[%c40_316, %c0_317] : memref<64x32xf32, #tpu.memory_space<vmem>>, vector<8x32xf32>
    %cst_318 = arith.constant dense<0.000000e+00> : vector<8x32xf32>
    %559 = tpu.matmul %554, %367, %cst_318 {dimension_numbers = #tpu.dot_dimension_numbers<[1], [0], [0], [1], [0, 0, 1, 1], [], []>} : vector<8x32xbf16>, vector<32x32xbf16>, vector<8x32xf32> -> vector<8x32xf32>
    %560 = arith.addf %558, %559 : vector<8x32xf32>
    %c40_319 = arith.constant 40 : index
    %c0_320 = arith.constant 0 : index
    %561 = vector.load %arg15[%c40_319, %c0_320] : memref<64x32xf32, #tpu.memory_space<vmem>>, vector<8x32xf32>
    %cst_321 = arith.constant dense<0.000000e+00> : vector<8x32xf32>
    %562 = tpu.matmul %554, %369, %cst_321 {dimension_numbers = #tpu.dot_dimension_numbers<[1], [0], [0], [1], [0, 0, 1, 1], [], []>} : vector<8x32xbf16>, vector<32x32xbf16>, vector<8x32xf32> -> vector<8x32xf32>
    %563 = arith.addf %561, %562 : vector<8x32xf32>
    %c40_322 = arith.constant 40 : index
    %c0_323 = arith.constant 0 : index
    %564 = vector.load %arg16[%c40_322, %c0_323] : memref<64x32xf32, #tpu.memory_space<vmem>>, vector<8x32xf32>
    %cst_324 = arith.constant dense<0.000000e+00> : vector<8x32xf32>
    %565 = tpu.matmul %554, %371, %cst_324 {dimension_numbers = #tpu.dot_dimension_numbers<[1], [0], [0], [1], [0, 0, 1, 1], [], []>} : vector<8x32xbf16>, vector<32x32xbf16>, vector<8x32xf32> -> vector<8x32xf32>
    %566 = arith.addf %564, %565 : vector<8x32xf32>
    %567 = arith.negf %557 : vector<8x32xf32>
    %568 = math.exp %567 : vector<8x32xf32>
    %cst_325 = arith.constant 1.000000e+00 : f32
    %569 = vector.broadcast %cst_325 : f32 to vector<8x32xf32>
    %570 = arith.addf %569, %568 : vector<8x32xf32>
    %571 = arith.divf %569, %570 : vector<8x32xf32>
    %572 = arith.negf %560 : vector<8x32xf32>
    %573 = math.exp %572 : vector<8x32xf32>
    %cst_326 = arith.constant 1.000000e+00 : f32
    %574 = vector.broadcast %cst_326 : f32 to vector<8x32xf32>
    %575 = arith.addf %574, %573 : vector<8x32xf32>
    %576 = arith.divf %574, %575 : vector<8x32xf32>
    %577 = math.tanh %563 : vector<8x32xf32>
    %578 = arith.negf %566 : vector<8x32xf32>
    %579 = math.exp %578 : vector<8x32xf32>
    %cst_327 = arith.constant 1.000000e+00 : f32
    %580 = vector.broadcast %cst_327 : f32 to vector<8x32xf32>
    %581 = arith.addf %580, %579 : vector<8x32xf32>
    %582 = arith.divf %580, %581 : vector<8x32xf32>
    %583 = arith.mulf %576, %549 : vector<8x32xf32>
    %584 = arith.mulf %571, %577 : vector<8x32xf32>
    %585 = arith.addf %583, %584 : vector<8x32xf32>
    %586 = math.tanh %585 : vector<8x32xf32>
    %587 = arith.mulf %582, %586 : vector<8x32xf32>
    %588 = arith.truncf %587 : vector<8x32xf32> to vector<8x32xbf16>
    %c40_328 = arith.constant 40 : index
    %c0_329 = arith.constant 0 : index
    %589 = vector.load %arg17[%c40_328, %c0_329] : memref<64x32xbf16, #tpu.memory_space<vmem>>, vector<8x32xbf16>
    tpu.vector_store %arg17[%c40_328, %c0_329], %588 {strides = array<i32>} : memref<64x32xbf16, #tpu.memory_space<vmem>>, vector<8x32xbf16>,
    %590 = arith.truncf %587 : vector<8x32xf32> to vector<8x32xbf16>
    %c48_330 = arith.constant 48 : index
    %c0_331 = arith.constant 0 : index
    %591 = vector.load %arg13[%c48_330, %c0_331] : memref<64x32xf32, #tpu.memory_space<vmem>>, vector<8x32xf32>
    %cst_332 = arith.constant dense<0.000000e+00> : vector<8x32xf32>
    %592 = tpu.matmul %590, %365, %cst_332 {dimension_numbers = #tpu.dot_dimension_numbers<[1], [0], [0], [1], [0, 0, 1, 1], [], []>} : vector<8x32xbf16>, vector<32x32xbf16>, vector<8x32xf32> -> vector<8x32xf32>
    %593 = arith.addf %591, %592 : vector<8x32xf32>
    %c48_333 = arith.constant 48 : index
    %c0_334 = arith.constant 0 : index
    %594 = vector.load %arg14[%c48_333, %c0_334] : memref<64x32xf32, #tpu.memory_space<vmem>>, vector<8x32xf32>
    %cst_335 = arith.constant dense<0.000000e+00> : vector<8x32xf32>
    %595 = tpu.matmul %590, %367, %cst_335 {dimension_numbers = #tpu.dot_dimension_numbers<[1], [0], [0], [1], [0, 0, 1, 1], [], []>} : vector<8x32xbf16>, vector<32x32xbf16>, vector<8x32xf32> -> vector<8x32xf32>
    %596 = arith.addf %594, %595 : vector<8x32xf32>
    %c48_336 = arith.constant 48 : index
    %c0_337 = arith.constant 0 : index
    %597 = vector.load %arg15[%c48_336, %c0_337] : memref<64x32xf32, #tpu.memory_space<vmem>>, vector<8x32xf32>
    %cst_338 = arith.constant dense<0.000000e+00> : vector<8x32xf32>
    %598 = tpu.matmul %590, %369, %cst_338 {dimension_numbers = #tpu.dot_dimension_numbers<[1], [0], [0], [1], [0, 0, 1, 1], [], []>} : vector<8x32xbf16>, vector<32x32xbf16>, vector<8x32xf32> -> vector<8x32xf32>
    %599 = arith.addf %597, %598 : vector<8x32xf32>
    %c48_339 = arith.constant 48 : index
    %c0_340 = arith.constant 0 : index
    %600 = vector.load %arg16[%c48_339, %c0_340] : memref<64x32xf32, #tpu.memory_space<vmem>>, vector<8x32xf32>
    %cst_341 = arith.constant dense<0.000000e+00> : vector<8x32xf32>
    %601 = tpu.matmul %590, %371, %cst_341 {dimension_numbers = #tpu.dot_dimension_numbers<[1], [0], [0], [1], [0, 0, 1, 1], [], []>} : vector<8x32xbf16>, vector<32x32xbf16>, vector<8x32xf32> -> vector<8x32xf32>
    %602 = arith.addf %600, %601 : vector<8x32xf32>
    %603 = arith.negf %593 : vector<8x32xf32>
    %604 = math.exp %603 : vector<8x32xf32>
    %cst_342 = arith.constant 1.000000e+00 : f32
    %605 = vector.broadcast %cst_342 : f32 to vector<8x32xf32>
    %606 = arith.addf %605, %604 : vector<8x32xf32>
    %607 = arith.divf %605, %606 : vector<8x32xf32>
    %608 = arith.negf %596 : vector<8x32xf32>
    %609 = math.exp %608 : vector<8x32xf32>
    %cst_343 = arith.constant 1.000000e+00 : f32
    %610 = vector.broadcast %cst_343 : f32 to vector<8x32xf32>
    %611 = arith.addf %610, %609 : vector<8x32xf32>
    %612 = arith.divf %610, %611 : vector<8x32xf32>
    %613 = math.tanh %599 : vector<8x32xf32>
    %614 = arith.negf %602 : vector<8x32xf32>
    %615 = math.exp %614 : vector<8x32xf32>
    %cst_344 = arith.constant 1.000000e+00 : f32
    %616 = vector.broadcast %cst_344 : f32 to vector<8x32xf32>
    %617 = arith.addf %616, %615 : vector<8x32xf32>
    %618 = arith.divf %616, %617 : vector<8x32xf32>
    %619 = arith.mulf %612, %585 : vector<8x32xf32>
    %620 = arith.mulf %607, %613 : vector<8x32xf32>
    %621 = arith.addf %619, %620 : vector<8x32xf32>
    %622 = math.tanh %621 : vector<8x32xf32>
    %623 = arith.mulf %618, %622 : vector<8x32xf32>
    %624 = arith.truncf %623 : vector<8x32xf32> to vector<8x32xbf16>
    %c48_345 = arith.constant 48 : index
    %c0_346 = arith.constant 0 : index
    %625 = vector.load %arg17[%c48_345, %c0_346] : memref<64x32xbf16, #tpu.memory_space<vmem>>, vector<8x32xbf16>
    tpu.vector_store %arg17[%c48_345, %c0_346], %624 {strides = array<i32>} : memref<64x32xbf16, #tpu.memory_space<vmem>>, vector<8x32xbf16>,
    %626 = arith.truncf %623 : vector<8x32xf32> to vector<8x32xbf16>
    %c56_347 = arith.constant 56 : index
    %c0_348 = arith.constant 0 : index
    %627 = vector.load %arg13[%c56_347, %c0_348] : memref<64x32xf32, #tpu.memory_space<vmem>>, vector<8x32xf32>
    %cst_349 = arith.constant dense<0.000000e+00> : vector<8x32xf32>
    %628 = tpu.matmul %626, %365, %cst_349 {dimension_numbers = #tpu.dot_dimension_numbers<[1], [0], [0], [1], [0, 0, 1, 1], [], []>} : vector<8x32xbf16>, vector<32x32xbf16>, vector<8x32xf32> -> vector<8x32xf32>
    %629 = arith.addf %627, %628 : vector<8x32xf32>
    %c56_350 = arith.constant 56 : index
    %c0_351 = arith.constant 0 : index
    %630 = vector.load %arg14[%c56_350, %c0_351] : memref<64x32xf32, #tpu.memory_space<vmem>>, vector<8x32xf32>
    %cst_352 = arith.constant dense<0.000000e+00> : vector<8x32xf32>
    %631 = tpu.matmul %626, %367, %cst_352 {dimension_numbers = #tpu.dot_dimension_numbers<[1], [0], [0], [1], [0, 0, 1, 1], [], []>} : vector<8x32xbf16>, vector<32x32xbf16>, vector<8x32xf32> -> vector<8x32xf32>
    %632 = arith.addf %630, %631 : vector<8x32xf32>
    %c56_353 = arith.constant 56 : index
    %c0_354 = arith.constant 0 : index
    %633 = vector.load %arg15[%c56_353, %c0_354] : memref<64x32xf32, #tpu.memory_space<vmem>>, vector<8x32xf32>
    %cst_355 = arith.constant dense<0.000000e+00> : vector<8x32xf32>
    %634 = tpu.matmul %626, %369, %cst_355 {dimension_numbers = #tpu.dot_dimension_numbers<[1], [0], [0], [1], [0, 0, 1, 1], [], []>} : vector<8x32xbf16>, vector<32x32xbf16>, vector<8x32xf32> -> vector<8x32xf32>
    %635 = arith.addf %633, %634 : vector<8x32xf32>
    %c56_356 = arith.constant 56 : index
    %c0_357 = arith.constant 0 : index
    %636 = vector.load %arg16[%c56_356, %c0_357] : memref<64x32xf32, #tpu.memory_space<vmem>>, vector<8x32xf32>
    %cst_358 = arith.constant dense<0.000000e+00> : vector<8x32xf32>
    %637 = tpu.matmul %626, %371, %cst_358 {dimension_numbers = #tpu.dot_dimension_numbers<[1], [0], [0], [1], [0, 0, 1, 1], [], []>} : vector<8x32xbf16>, vector<32x32xbf16>, vector<8x32xf32> -> vector<8x32xf32>
    %638 = arith.addf %636, %637 : vector<8x32xf32>
    %639 = arith.negf %629 : vector<8x32xf32>
    %640 = math.exp %639 : vector<8x32xf32>
    %cst_359 = arith.constant 1.000000e+00 : f32
    %641 = vector.broadcast %cst_359 : f32 to vector<8x32xf32>
    %642 = arith.addf %641, %640 : vector<8x32xf32>
    %643 = arith.divf %641, %642 : vector<8x32xf32>
    %644 = arith.negf %632 : vector<8x32xf32>
    %645 = math.exp %644 : vector<8x32xf32>
    %cst_360 = arith.constant 1.000000e+00 : f32
    %646 = vector.broadcast %cst_360 : f32 to vector<8x32xf32>
    %647 = arith.addf %646, %645 : vector<8x32xf32>
    %648 = arith.divf %646, %647 : vector<8x32xf32>
    %649 = math.tanh %635 : vector<8x32xf32>
    %650 = arith.negf %638 : vector<8x32xf32>
    %651 = math.exp %650 : vector<8x32xf32>
    %cst_361 = arith.constant 1.000000e+00 : f32
    %652 = vector.broadcast %cst_361 : f32 to vector<8x32xf32>
    %653 = arith.addf %652, %651 : vector<8x32xf32>
    %654 = arith.divf %652, %653 : vector<8x32xf32>
    %655 = arith.mulf %648, %621 : vector<8x32xf32>
    %656 = arith.mulf %643, %649 : vector<8x32xf32>
    %657 = arith.addf %655, %656 : vector<8x32xf32>
    %658 = math.tanh %657 : vector<8x32xf32>
    %659 = arith.mulf %654, %658 : vector<8x32xf32>
    %660 = arith.truncf %659 : vector<8x32xf32> to vector<8x32xbf16>
    %c56_362 = arith.constant 56 : index
    %c0_363 = arith.constant 0 : index
    %661 = vector.load %arg17[%c56_362, %c0_363] : memref<64x32xbf16, #tpu.memory_space<vmem>>, vector<8x32xbf16>
    tpu.vector_store %arg17[%c56_362, %c0_363], %660 {strides = array<i32>} : memref<64x32xbf16, #tpu.memory_space<vmem>>, vector<8x32xbf16>,
    %c0_364 = arith.constant 0 : index
    %c0_365 = arith.constant 0 : index
    %662 = vector.load %arg17[%c0_364, %c0_365] : memref<64x32xbf16, #tpu.memory_space<vmem>>, vector<64x32xbf16>
    %c0_366 = arith.constant 0 : index
    %c0_367 = arith.constant 0 : index
    %c0_368 = arith.constant 0 : index
    %663 = vector.load %arg7[%c0_366, %c0_367, %c0_368] : memref<4x32x32xbf16, #tpu.memory_space<vmem>>, vector<1x32x32xbf16>
    %664 = vector.shape_cast %663 : vector<1x32x32xbf16> to vector<32x32xbf16>
    %cst_369 = arith.constant dense<0.000000e+00> : vector<64x32xf32>
    %665 = tpu.matmul %662, %664, %cst_369 {dimension_numbers = #tpu.dot_dimension_numbers<[1], [0], [0], [1], [0, 0, 1, 1], [], []>} : vector<64x32xbf16>, vector<32x32xbf16>, vector<64x32xf32> -> vector<64x32xf32>
    %c0_370 = arith.constant 0 : index
    %c0_371 = arith.constant 0 : index
    %c0_372 = arith.constant 0 : index
    %666 = vector.load %arg9[%c0_370, %c0_371, %c0_372] : memref<4x1x32xf32, #tpu.memory_space<vmem>>, vector<1x1x32xf32>
    %667 = vector.shape_cast %666 : vector<1x1x32xf32> to vector<1x32xf32>
    %668 = vector.broadcast %667 : vector<1x32xf32> to vector<64x32xf32>
    %669 = arith.addf %665, %668 : vector<64x32xf32>
    %c0_373 = arith.constant 0 : index
    %c0_374 = arith.constant 0 : index
    %670 = vector.load %arg13[%c0_373, %c0_374] : memref<64x32xf32, #tpu.memory_space<vmem>>, vector<64x32xf32>
    tpu.vector_store %arg13[%c0_373, %c0_374], %669 {strides = array<i32>} : memref<64x32xf32, #tpu.memory_space<vmem>>, vector<64x32xf32>,
    %c1_375 = arith.constant 1 : index
    %c0_376 = arith.constant 0 : index
    %c0_377 = arith.constant 0 : index
    %671 = vector.load %arg7[%c1_375, %c0_376, %c0_377] : memref<4x32x32xbf16, #tpu.memory_space<vmem>>, vector<1x32x32xbf16>
    %672 = vector.shape_cast %671 : vector<1x32x32xbf16> to vector<32x32xbf16>
    %cst_378 = arith.constant dense<0.000000e+00> : vector<64x32xf32>
    %673 = tpu.matmul %662, %672, %cst_378 {dimension_numbers = #tpu.dot_dimension_numbers<[1], [0], [0], [1], [0, 0, 1, 1], [], []>} : vector<64x32xbf16>, vector<32x32xbf16>, vector<64x32xf32> -> vector<64x32xf32>
    %c1_379 = arith.constant 1 : index
    %c0_380 = arith.constant 0 : index
    %c0_381 = arith.constant 0 : index
    %674 = vector.load %arg9[%c1_379, %c0_380, %c0_381] : memref<4x1x32xf32, #tpu.memory_space<vmem>>, vector<1x1x32xf32>
    %675 = vector.shape_cast %674 : vector<1x1x32xf32> to vector<1x32xf32>
    %676 = vector.broadcast %675 : vector<1x32xf32> to vector<64x32xf32>
    %677 = arith.addf %673, %676 : vector<64x32xf32>
    %c0_382 = arith.constant 0 : index
    %c0_383 = arith.constant 0 : index
    %678 = vector.load %arg14[%c0_382, %c0_383] : memref<64x32xf32, #tpu.memory_space<vmem>>, vector<64x32xf32>
    tpu.vector_store %arg14[%c0_382, %c0_383], %677 {strides = array<i32>} : memref<64x32xf32, #tpu.memory_space<vmem>>, vector<64x32xf32>,
    %c2_384 = arith.constant 2 : index
    %c0_385 = arith.constant 0 : index
    %c0_386 = arith.constant 0 : index
    %679 = vector.load %arg7[%c2_384, %c0_385, %c0_386] : memref<4x32x32xbf16, #tpu.memory_space<vmem>>, vector<1x32x32xbf16>
    %680 = vector.shape_cast %679 : vector<1x32x32xbf16> to vector<32x32xbf16>
    %cst_387 = arith.constant dense<0.000000e+00> : vector<64x32xf32>
    %681 = tpu.matmul %662, %680, %cst_387 {dimension_numbers = #tpu.dot_dimension_numbers<[1], [0], [0], [1], [0, 0, 1, 1], [], []>} : vector<64x32xbf16>, vector<32x32xbf16>, vector<64x32xf32> -> vector<64x32xf32>
    %c2_388 = arith.constant 2 : index
    %c0_389 = arith.constant 0 : index
    %c0_390 = arith.constant 0 : index
    %682 = vector.load %arg9[%c2_388, %c0_389, %c0_390] : memref<4x1x32xf32, #tpu.memory_space<vmem>>, vector<1x1x32xf32>
    %683 = vector.shape_cast %682 : vector<1x1x32xf32> to vector<1x32xf32>
    %684 = vector.broadcast %683 : vector<1x32xf32> to vector<64x32xf32>
    %685 = arith.addf %681, %684 : vector<64x32xf32>
    %c0_391 = arith.constant 0 : index
    %c0_392 = arith.constant 0 : index
    %686 = vector.load %arg15[%c0_391, %c0_392] : memref<64x32xf32, #tpu.memory_space<vmem>>, vector<64x32xf32>
    tpu.vector_store %arg15[%c0_391, %c0_392], %685 {strides = array<i32>} : memref<64x32xf32, #tpu.memory_space<vmem>>, vector<64x32xf32>,
    %c3_393 = arith.constant 3 : index
    %c0_394 = arith.constant 0 : index
    %c0_395 = arith.constant 0 : index
    %687 = vector.load %arg7[%c3_393, %c0_394, %c0_395] : memref<4x32x32xbf16, #tpu.memory_space<vmem>>, vector<1x32x32xbf16>
    %688 = vector.shape_cast %687 : vector<1x32x32xbf16> to vector<32x32xbf16>
    %cst_396 = arith.constant dense<0.000000e+00> : vector<64x32xf32>
    %689 = tpu.matmul %662, %688, %cst_396 {dimension_numbers = #tpu.dot_dimension_numbers<[1], [0], [0], [1], [0, 0, 1, 1], [], []>} : vector<64x32xbf16>, vector<32x32xbf16>, vector<64x32xf32> -> vector<64x32xf32>
    %c3_397 = arith.constant 3 : index
    %c0_398 = arith.constant 0 : index
    %c0_399 = arith.constant 0 : index
    %690 = vector.load %arg9[%c3_397, %c0_398, %c0_399] : memref<4x1x32xf32, #tpu.memory_space<vmem>>, vector<1x1x32xf32>
    %691 = vector.shape_cast %690 : vector<1x1x32xf32> to vector<1x32xf32>
    %692 = vector.broadcast %691 : vector<1x32xf32> to vector<64x32xf32>
    %693 = arith.addf %689, %692 : vector<64x32xf32>
    %c0_400 = arith.constant 0 : index
    %c0_401 = arith.constant 0 : index
    %694 = vector.load %arg16[%c0_400, %c0_401] : memref<64x32xf32, #tpu.memory_space<vmem>>, vector<64x32xf32>
    tpu.vector_store %arg16[%c0_400, %c0_401], %693 {strides = array<i32>} : memref<64x32xf32, #tpu.memory_space<vmem>>, vector<64x32xf32>,
    %c0_402 = arith.constant 0 : index
    %c0_403 = arith.constant 0 : index
    %c0_404 = arith.constant 0 : index
    %695 = vector.load %arg8[%c0_402, %c0_403, %c0_404] : memref<4x32x32xbf16, #tpu.memory_space<vmem>>, vector<1x32x32xbf16>
    %696 = vector.shape_cast %695 : vector<1x32x32xbf16> to vector<32x32xbf16>
    %c1_405 = arith.constant 1 : index
    %c0_406 = arith.constant 0 : index
    %c0_407 = arith.constant 0 : index
    %697 = vector.load %arg8[%c1_405, %c0_406, %c0_407] : memref<4x32x32xbf16, #tpu.memory_space<vmem>>, vector<1x32x32xbf16>
    %698 = vector.shape_cast %697 : vector<1x32x32xbf16> to vector<32x32xbf16>
    %c2_408 = arith.constant 2 : index
    %c0_409 = arith.constant 0 : index
    %c0_410 = arith.constant 0 : index
    %699 = vector.load %arg8[%c2_408, %c0_409, %c0_410] : memref<4x32x32xbf16, #tpu.memory_space<vmem>>, vector<1x32x32xbf16>
    %700 = vector.shape_cast %699 : vector<1x32x32xbf16> to vector<32x32xbf16>
    %c3_411 = arith.constant 3 : index
    %c0_412 = arith.constant 0 : index
    %c0_413 = arith.constant 0 : index
    %701 = vector.load %arg8[%c3_411, %c0_412, %c0_413] : memref<4x32x32xbf16, #tpu.memory_space<vmem>>, vector<1x32x32xbf16>
    %702 = vector.shape_cast %701 : vector<1x32x32xbf16> to vector<32x32xbf16>
    %cst_414 = arith.constant 0.000000e+00 : f32
    %703 = vector.broadcast %cst_414 : f32 to vector<8x32xf32>
    %cst_415 = arith.constant 0.000000e+00 : f32
    %704 = vector.broadcast %cst_415 : f32 to vector<8x32xf32>
    %705 = arith.truncf %703 : vector<8x32xf32> to vector<8x32xbf16>
    %c0_416 = arith.constant 0 : index
    %c0_417 = arith.constant 0 : index
    %706 = vector.load %arg13[%c0_416, %c0_417] : memref<64x32xf32, #tpu.memory_space<vmem>>, vector<8x32xf32>
    %cst_418 = arith.constant dense<0.000000e+00> : vector<8x32xf32>
    %707 = tpu.matmul %705, %696, %cst_418 {dimension_numbers = #tpu.dot_dimension_numbers<[1], [0], [0], [1], [0, 0, 1, 1], [], []>} : vector<8x32xbf16>, vector<32x32xbf16>, vector<8x32xf32> -> vector<8x32xf32>
    %708 = arith.addf %706, %707 : vector<8x32xf32>
    %c0_419 = arith.constant 0 : index
    %c0_420 = arith.constant 0 : index
    %709 = vector.load %arg14[%c0_419, %c0_420] : memref<64x32xf32, #tpu.memory_space<vmem>>, vector<8x32xf32>
    %cst_421 = arith.constant dense<0.000000e+00> : vector<8x32xf32>
    %710 = tpu.matmul %705, %698, %cst_421 {dimension_numbers = #tpu.dot_dimension_numbers<[1], [0], [0], [1], [0, 0, 1, 1], [], []>} : vector<8x32xbf16>, vector<32x32xbf16>, vector<8x32xf32> -> vector<8x32xf32>
    %711 = arith.addf %709, %710 : vector<8x32xf32>
    %c0_422 = arith.constant 0 : index
    %c0_423 = arith.constant 0 : index
    %712 = vector.load %arg15[%c0_422, %c0_423] : memref<64x32xf32, #tpu.memory_space<vmem>>, vector<8x32xf32>
    %cst_424 = arith.constant dense<0.000000e+00> : vector<8x32xf32>
    %713 = tpu.matmul %705, %700, %cst_424 {dimension_numbers = #tpu.dot_dimension_numbers<[1], [0], [0], [1], [0, 0, 1, 1], [], []>} : vector<8x32xbf16>, vector<32x32xbf16>, vector<8x32xf32> -> vector<8x32xf32>
    %714 = arith.addf %712, %713 : vector<8x32xf32>
    %c0_425 = arith.constant 0 : index
    %c0_426 = arith.constant 0 : index
    %715 = vector.load %arg16[%c0_425, %c0_426] : memref<64x32xf32, #tpu.memory_space<vmem>>, vector<8x32xf32>
    %cst_427 = arith.constant dense<0.000000e+00> : vector<8x32xf32>
    %716 = tpu.matmul %705, %702, %cst_427 {dimension_numbers = #tpu.dot_dimension_numbers<[1], [0], [0], [1], [0, 0, 1, 1], [], []>} : vector<8x32xbf16>, vector<32x32xbf16>, vector<8x32xf32> -> vector<8x32xf32>
    %717 = arith.addf %715, %716 : vector<8x32xf32>
    %718 = arith.negf %708 : vector<8x32xf32>
    %719 = math.exp %718 : vector<8x32xf32>
    %cst_428 = arith.constant 1.000000e+00 : f32
    %720 = vector.broadcast %cst_428 : f32 to vector<8x32xf32>
    %721 = arith.addf %720, %719 : vector<8x32xf32>
    %722 = arith.divf %720, %721 : vector<8x32xf32>
    %723 = arith.negf %711 : vector<8x32xf32>
    %724 = math.exp %723 : vector<8x32xf32>
    %cst_429 = arith.constant 1.000000e+00 : f32
    %725 = vector.broadcast %cst_429 : f32 to vector<8x32xf32>
    %726 = arith.addf %725, %724 : vector<8x32xf32>
    %727 = arith.divf %725, %726 : vector<8x32xf32>
    %728 = math.tanh %714 : vector<8x32xf32>
    %729 = arith.negf %717 : vector<8x32xf32>
    %730 = math.exp %729 : vector<8x32xf32>
    %cst_430 = arith.constant 1.000000e+00 : f32
    %731 = vector.broadcast %cst_430 : f32 to vector<8x32xf32>
    %732 = arith.addf %731, %730 : vector<8x32xf32>
    %733 = arith.divf %731, %732 : vector<8x32xf32>
    %734 = arith.mulf %727, %704 : vector<8x32xf32>
    %735 = arith.mulf %722, %728 : vector<8x32xf32>
    %736 = arith.addf %734, %735 : vector<8x32xf32>
    %737 = math.tanh %736 : vector<8x32xf32>
    %738 = arith.mulf %733, %737 : vector<8x32xf32>
    %739 = arith.truncf %738 : vector<8x32xf32> to vector<8x32xbf16>
    %c8_431 = arith.constant 8 : index
    %c0_432 = arith.constant 0 : index
    %740 = vector.load %arg13[%c8_431, %c0_432] : memref<64x32xf32, #tpu.memory_space<vmem>>, vector<8x32xf32>
    %cst_433 = arith.constant dense<0.000000e+00> : vector<8x32xf32>
    %741 = tpu.matmul %739, %696, %cst_433 {dimension_numbers = #tpu.dot_dimension_numbers<[1], [0], [0], [1], [0, 0, 1, 1], [], []>} : vector<8x32xbf16>, vector<32x32xbf16>, vector<8x32xf32> -> vector<8x32xf32>
    %742 = arith.addf %740, %741 : vector<8x32xf32>
    %c8_434 = arith.constant 8 : index
    %c0_435 = arith.constant 0 : index
    %743 = vector.load %arg14[%c8_434, %c0_435] : memref<64x32xf32, #tpu.memory_space<vmem>>, vector<8x32xf32>
    %cst_436 = arith.constant dense<0.000000e+00> : vector<8x32xf32>
    %744 = tpu.matmul %739, %698, %cst_436 {dimension_numbers = #tpu.dot_dimension_numbers<[1], [0], [0], [1], [0, 0, 1, 1], [], []>} : vector<8x32xbf16>, vector<32x32xbf16>, vector<8x32xf32> -> vector<8x32xf32>
    %745 = arith.addf %743, %744 : vector<8x32xf32>
    %c8_437 = arith.constant 8 : index
    %c0_438 = arith.constant 0 : index
    %746 = vector.load %arg15[%c8_437, %c0_438] : memref<64x32xf32, #tpu.memory_space<vmem>>, vector<8x32xf32>
    %cst_439 = arith.constant dense<0.000000e+00> : vector<8x32xf32>
    %747 = tpu.matmul %739, %700, %cst_439 {dimension_numbers = #tpu.dot_dimension_numbers<[1], [0], [0], [1], [0, 0, 1, 1], [], []>} : vector<8x32xbf16>, vector<32x32xbf16>, vector<8x32xf32> -> vector<8x32xf32>
    %748 = arith.addf %746, %747 : vector<8x32xf32>
    %c8_440 = arith.constant 8 : index
    %c0_441 = arith.constant 0 : index
    %749 = vector.load %arg16[%c8_440, %c0_441] : memref<64x32xf32, #tpu.memory_space<vmem>>, vector<8x32xf32>
    %cst_442 = arith.constant dense<0.000000e+00> : vector<8x32xf32>
    %750 = tpu.matmul %739, %702, %cst_442 {dimension_numbers = #tpu.dot_dimension_numbers<[1], [0], [0], [1], [0, 0, 1, 1], [], []>} : vector<8x32xbf16>, vector<32x32xbf16>, vector<8x32xf32> -> vector<8x32xf32>
    %751 = arith.addf %749, %750 : vector<8x32xf32>
    %752 = arith.negf %742 : vector<8x32xf32>
    %753 = math.exp %752 : vector<8x32xf32>
    %cst_443 = arith.constant 1.000000e+00 : f32
    %754 = vector.broadcast %cst_443 : f32 to vector<8x32xf32>
    %755 = arith.addf %754, %753 : vector<8x32xf32>
    %756 = arith.divf %754, %755 : vector<8x32xf32>
    %757 = arith.negf %745 : vector<8x32xf32>
    %758 = math.exp %757 : vector<8x32xf32>
    %cst_444 = arith.constant 1.000000e+00 : f32
    %759 = vector.broadcast %cst_444 : f32 to vector<8x32xf32>
    %760 = arith.addf %759, %758 : vector<8x32xf32>
    %761 = arith.divf %759, %760 : vector<8x32xf32>
    %762 = math.tanh %748 : vector<8x32xf32>
    %763 = arith.negf %751 : vector<8x32xf32>
    %764 = math.exp %763 : vector<8x32xf32>
    %cst_445 = arith.constant 1.000000e+00 : f32
    %765 = vector.broadcast %cst_445 : f32 to vector<8x32xf32>
    %766 = arith.addf %765, %764 : vector<8x32xf32>
    %767 = arith.divf %765, %766 : vector<8x32xf32>
    %768 = arith.mulf %761, %736 : vector<8x32xf32>
    %769 = arith.mulf %756, %762 : vector<8x32xf32>
    %770 = arith.addf %768, %769 : vector<8x32xf32>
    %771 = math.tanh %770 : vector<8x32xf32>
    %772 = arith.mulf %767, %771 : vector<8x32xf32>
    %773 = arith.truncf %772 : vector<8x32xf32> to vector<8x32xbf16>
    %c16_446 = arith.constant 16 : index
    %c0_447 = arith.constant 0 : index
    %774 = vector.load %arg13[%c16_446, %c0_447] : memref<64x32xf32, #tpu.memory_space<vmem>>, vector<8x32xf32>
    %cst_448 = arith.constant dense<0.000000e+00> : vector<8x32xf32>
    %775 = tpu.matmul %773, %696, %cst_448 {dimension_numbers = #tpu.dot_dimension_numbers<[1], [0], [0], [1], [0, 0, 1, 1], [], []>} : vector<8x32xbf16>, vector<32x32xbf16>, vector<8x32xf32> -> vector<8x32xf32>
    %776 = arith.addf %774, %775 : vector<8x32xf32>
    %c16_449 = arith.constant 16 : index
    %c0_450 = arith.constant 0 : index
    %777 = vector.load %arg14[%c16_449, %c0_450] : memref<64x32xf32, #tpu.memory_space<vmem>>, vector<8x32xf32>
    %cst_451 = arith.constant dense<0.000000e+00> : vector<8x32xf32>
    %778 = tpu.matmul %773, %698, %cst_451 {dimension_numbers = #tpu.dot_dimension_numbers<[1], [0], [0], [1], [0, 0, 1, 1], [], []>} : vector<8x32xbf16>, vector<32x32xbf16>, vector<8x32xf32> -> vector<8x32xf32>
    %779 = arith.addf %777, %778 : vector<8x32xf32>
    %c16_452 = arith.constant 16 : index
    %c0_453 = arith.constant 0 : index
    %780 = vector.load %arg15[%c16_452, %c0_453] : memref<64x32xf32, #tpu.memory_space<vmem>>, vector<8x32xf32>
    %cst_454 = arith.constant dense<0.000000e+00> : vector<8x32xf32>
    %781 = tpu.matmul %773, %700, %cst_454 {dimension_numbers = #tpu.dot_dimension_numbers<[1], [0], [0], [1], [0, 0, 1, 1], [], []>} : vector<8x32xbf16>, vector<32x32xbf16>, vector<8x32xf32> -> vector<8x32xf32>
    %782 = arith.addf %780, %781 : vector<8x32xf32>
    %c16_455 = arith.constant 16 : index
    %c0_456 = arith.constant 0 : index
    %783 = vector.load %arg16[%c16_455, %c0_456] : memref<64x32xf32, #tpu.memory_space<vmem>>, vector<8x32xf32>
    %cst_457 = arith.constant dense<0.000000e+00> : vector<8x32xf32>
    %784 = tpu.matmul %773, %702, %cst_457 {dimension_numbers = #tpu.dot_dimension_numbers<[1], [0], [0], [1], [0, 0, 1, 1], [], []>} : vector<8x32xbf16>, vector<32x32xbf16>, vector<8x32xf32> -> vector<8x32xf32>
    %785 = arith.addf %783, %784 : vector<8x32xf32>
    %786 = arith.negf %776 : vector<8x32xf32>
    %787 = math.exp %786 : vector<8x32xf32>
    %cst_458 = arith.constant 1.000000e+00 : f32
    %788 = vector.broadcast %cst_458 : f32 to vector<8x32xf32>
    %789 = arith.addf %788, %787 : vector<8x32xf32>
    %790 = arith.divf %788, %789 : vector<8x32xf32>
    %791 = arith.negf %779 : vector<8x32xf32>
    %792 = math.exp %791 : vector<8x32xf32>
    %cst_459 = arith.constant 1.000000e+00 : f32
    %793 = vector.broadcast %cst_459 : f32 to vector<8x32xf32>
    %794 = arith.addf %793, %792 : vector<8x32xf32>
    %795 = arith.divf %793, %794 : vector<8x32xf32>
    %796 = math.tanh %782 : vector<8x32xf32>
    %797 = arith.negf %785 : vector<8x32xf32>
    %798 = math.exp %797 : vector<8x32xf32>
    %cst_460 = arith.constant 1.000000e+00 : f32
    %799 = vector.broadcast %cst_460 : f32 to vector<8x32xf32>
    %800 = arith.addf %799, %798 : vector<8x32xf32>
    %801 = arith.divf %799, %800 : vector<8x32xf32>
    %802 = arith.mulf %795, %770 : vector<8x32xf32>
    %803 = arith.mulf %790, %796 : vector<8x32xf32>
    %804 = arith.addf %802, %803 : vector<8x32xf32>
    %805 = math.tanh %804 : vector<8x32xf32>
    %806 = arith.mulf %801, %805 : vector<8x32xf32>
    %807 = arith.truncf %806 : vector<8x32xf32> to vector<8x32xbf16>
    %c24_461 = arith.constant 24 : index
    %c0_462 = arith.constant 0 : index
    %808 = vector.load %arg13[%c24_461, %c0_462] : memref<64x32xf32, #tpu.memory_space<vmem>>, vector<8x32xf32>
    %cst_463 = arith.constant dense<0.000000e+00> : vector<8x32xf32>
    %809 = tpu.matmul %807, %696, %cst_463 {dimension_numbers = #tpu.dot_dimension_numbers<[1], [0], [0], [1], [0, 0, 1, 1], [], []>} : vector<8x32xbf16>, vector<32x32xbf16>, vector<8x32xf32> -> vector<8x32xf32>
    %810 = arith.addf %808, %809 : vector<8x32xf32>
    %c24_464 = arith.constant 24 : index
    %c0_465 = arith.constant 0 : index
    %811 = vector.load %arg14[%c24_464, %c0_465] : memref<64x32xf32, #tpu.memory_space<vmem>>, vector<8x32xf32>
    %cst_466 = arith.constant dense<0.000000e+00> : vector<8x32xf32>
    %812 = tpu.matmul %807, %698, %cst_466 {dimension_numbers = #tpu.dot_dimension_numbers<[1], [0], [0], [1], [0, 0, 1, 1], [], []>} : vector<8x32xbf16>, vector<32x32xbf16>, vector<8x32xf32> -> vector<8x32xf32>
    %813 = arith.addf %811, %812 : vector<8x32xf32>
    %c24_467 = arith.constant 24 : index
    %c0_468 = arith.constant 0 : index
    %814 = vector.load %arg15[%c24_467, %c0_468] : memref<64x32xf32, #tpu.memory_space<vmem>>, vector<8x32xf32>
    %cst_469 = arith.constant dense<0.000000e+00> : vector<8x32xf32>
    %815 = tpu.matmul %807, %700, %cst_469 {dimension_numbers = #tpu.dot_dimension_numbers<[1], [0], [0], [1], [0, 0, 1, 1], [], []>} : vector<8x32xbf16>, vector<32x32xbf16>, vector<8x32xf32> -> vector<8x32xf32>
    %816 = arith.addf %814, %815 : vector<8x32xf32>
    %c24_470 = arith.constant 24 : index
    %c0_471 = arith.constant 0 : index
    %817 = vector.load %arg16[%c24_470, %c0_471] : memref<64x32xf32, #tpu.memory_space<vmem>>, vector<8x32xf32>
    %cst_472 = arith.constant dense<0.000000e+00> : vector<8x32xf32>
    %818 = tpu.matmul %807, %702, %cst_472 {dimension_numbers = #tpu.dot_dimension_numbers<[1], [0], [0], [1], [0, 0, 1, 1], [], []>} : vector<8x32xbf16>, vector<32x32xbf16>, vector<8x32xf32> -> vector<8x32xf32>
    %819 = arith.addf %817, %818 : vector<8x32xf32>
    %820 = arith.negf %810 : vector<8x32xf32>
    %821 = math.exp %820 : vector<8x32xf32>
    %cst_473 = arith.constant 1.000000e+00 : f32
    %822 = vector.broadcast %cst_473 : f32 to vector<8x32xf32>
    %823 = arith.addf %822, %821 : vector<8x32xf32>
    %824 = arith.divf %822, %823 : vector<8x32xf32>
    %825 = arith.negf %813 : vector<8x32xf32>
    %826 = math.exp %825 : vector<8x32xf32>
    %cst_474 = arith.constant 1.000000e+00 : f32
    %827 = vector.broadcast %cst_474 : f32 to vector<8x32xf32>
    %828 = arith.addf %827, %826 : vector<8x32xf32>
    %829 = arith.divf %827, %828 : vector<8x32xf32>
    %830 = math.tanh %816 : vector<8x32xf32>
    %831 = arith.negf %819 : vector<8x32xf32>
    %832 = math.exp %831 : vector<8x32xf32>
    %cst_475 = arith.constant 1.000000e+00 : f32
    %833 = vector.broadcast %cst_475 : f32 to vector<8x32xf32>
    %834 = arith.addf %833, %832 : vector<8x32xf32>
    %835 = arith.divf %833, %834 : vector<8x32xf32>
    %836 = arith.mulf %829, %804 : vector<8x32xf32>
    %837 = arith.mulf %824, %830 : vector<8x32xf32>
    %838 = arith.addf %836, %837 : vector<8x32xf32>
    %839 = math.tanh %838 : vector<8x32xf32>
    %840 = arith.mulf %835, %839 : vector<8x32xf32>
    %841 = arith.truncf %840 : vector<8x32xf32> to vector<8x32xbf16>
    %c32_476 = arith.constant 32 : index
    %c0_477 = arith.constant 0 : index
    %842 = vector.load %arg13[%c32_476, %c0_477] : memref<64x32xf32, #tpu.memory_space<vmem>>, vector<8x32xf32>
    %cst_478 = arith.constant dense<0.000000e+00> : vector<8x32xf32>
    %843 = tpu.matmul %841, %696, %cst_478 {dimension_numbers = #tpu.dot_dimension_numbers<[1], [0], [0], [1], [0, 0, 1, 1], [], []>} : vector<8x32xbf16>, vector<32x32xbf16>, vector<8x32xf32> -> vector<8x32xf32>
    %844 = arith.addf %842, %843 : vector<8x32xf32>
    %c32_479 = arith.constant 32 : index
    %c0_480 = arith.constant 0 : index
    %845 = vector.load %arg14[%c32_479, %c0_480] : memref<64x32xf32, #tpu.memory_space<vmem>>, vector<8x32xf32>
    %cst_481 = arith.constant dense<0.000000e+00> : vector<8x32xf32>
    %846 = tpu.matmul %841, %698, %cst_481 {dimension_numbers = #tpu.dot_dimension_numbers<[1], [0], [0], [1], [0, 0, 1, 1], [], []>} : vector<8x32xbf16>, vector<32x32xbf16>, vector<8x32xf32> -> vector<8x32xf32>
    %847 = arith.addf %845, %846 : vector<8x32xf32>
    %c32_482 = arith.constant 32 : index
    %c0_483 = arith.constant 0 : index
    %848 = vector.load %arg15[%c32_482, %c0_483] : memref<64x32xf32, #tpu.memory_space<vmem>>, vector<8x32xf32>
    %cst_484 = arith.constant dense<0.000000e+00> : vector<8x32xf32>
    %849 = tpu.matmul %841, %700, %cst_484 {dimension_numbers = #tpu.dot_dimension_numbers<[1], [0], [0], [1], [0, 0, 1, 1], [], []>} : vector<8x32xbf16>, vector<32x32xbf16>, vector<8x32xf32> -> vector<8x32xf32>
    %850 = arith.addf %848, %849 : vector<8x32xf32>
    %c32_485 = arith.constant 32 : index
    %c0_486 = arith.constant 0 : index
    %851 = vector.load %arg16[%c32_485, %c0_486] : memref<64x32xf32, #tpu.memory_space<vmem>>, vector<8x32xf32>
    %cst_487 = arith.constant dense<0.000000e+00> : vector<8x32xf32>
    %852 = tpu.matmul %841, %702, %cst_487 {dimension_numbers = #tpu.dot_dimension_numbers<[1], [0], [0], [1], [0, 0, 1, 1], [], []>} : vector<8x32xbf16>, vector<32x32xbf16>, vector<8x32xf32> -> vector<8x32xf32>
    %853 = arith.addf %851, %852 : vector<8x32xf32>
    %854 = arith.negf %844 : vector<8x32xf32>
    %855 = math.exp %854 : vector<8x32xf32>
    %cst_488 = arith.constant 1.000000e+00 : f32
    %856 = vector.broadcast %cst_488 : f32 to vector<8x32xf32>
    %857 = arith.addf %856, %855 : vector<8x32xf32>
    %858 = arith.divf %856, %857 : vector<8x32xf32>
    %859 = arith.negf %847 : vector<8x32xf32>
    %860 = math.exp %859 : vector<8x32xf32>
    %cst_489 = arith.constant 1.000000e+00 : f32
    %861 = vector.broadcast %cst_489 : f32 to vector<8x32xf32>
    %862 = arith.addf %861, %860 : vector<8x32xf32>
    %863 = arith.divf %861, %862 : vector<8x32xf32>
    %864 = math.tanh %850 : vector<8x32xf32>
    %865 = arith.negf %853 : vector<8x32xf32>
    %866 = math.exp %865 : vector<8x32xf32>
    %cst_490 = arith.constant 1.000000e+00 : f32
    %867 = vector.broadcast %cst_490 : f32 to vector<8x32xf32>
    %868 = arith.addf %867, %866 : vector<8x32xf32>
    %869 = arith.divf %867, %868 : vector<8x32xf32>
    %870 = arith.mulf %863, %838 : vector<8x32xf32>
    %871 = arith.mulf %858, %864 : vector<8x32xf32>
    %872 = arith.addf %870, %871 : vector<8x32xf32>
    %873 = math.tanh %872 : vector<8x32xf32>
    %874 = arith.mulf %869, %873 : vector<8x32xf32>
    %875 = arith.truncf %874 : vector<8x32xf32> to vector<8x32xbf16>
    %c40_491 = arith.constant 40 : index
    %c0_492 = arith.constant 0 : index
    %876 = vector.load %arg13[%c40_491, %c0_492] : memref<64x32xf32, #tpu.memory_space<vmem>>, vector<8x32xf32>
    %cst_493 = arith.constant dense<0.000000e+00> : vector<8x32xf32>
    %877 = tpu.matmul %875, %696, %cst_493 {dimension_numbers = #tpu.dot_dimension_numbers<[1], [0], [0], [1], [0, 0, 1, 1], [], []>} : vector<8x32xbf16>, vector<32x32xbf16>, vector<8x32xf32> -> vector<8x32xf32>
    %878 = arith.addf %876, %877 : vector<8x32xf32>
    %c40_494 = arith.constant 40 : index
    %c0_495 = arith.constant 0 : index
    %879 = vector.load %arg14[%c40_494, %c0_495] : memref<64x32xf32, #tpu.memory_space<vmem>>, vector<8x32xf32>
    %cst_496 = arith.constant dense<0.000000e+00> : vector<8x32xf32>
    %880 = tpu.matmul %875, %698, %cst_496 {dimension_numbers = #tpu.dot_dimension_numbers<[1], [0], [0], [1], [0, 0, 1, 1], [], []>} : vector<8x32xbf16>, vector<32x32xbf16>, vector<8x32xf32> -> vector<8x32xf32>
    %881 = arith.addf %879, %880 : vector<8x32xf32>
    %c40_497 = arith.constant 40 : index
    %c0_498 = arith.constant 0 : index
    %882 = vector.load %arg15[%c40_497, %c0_498] : memref<64x32xf32, #tpu.memory_space<vmem>>, vector<8x32xf32>
    %cst_499 = arith.constant dense<0.000000e+00> : vector<8x32xf32>
    %883 = tpu.matmul %875, %700, %cst_499 {dimension_numbers = #tpu.dot_dimension_numbers<[1], [0], [0], [1], [0, 0, 1, 1], [], []>} : vector<8x32xbf16>, vector<32x32xbf16>, vector<8x32xf32> -> vector<8x32xf32>
    %884 = arith.addf %882, %883 : vector<8x32xf32>
    %c40_500 = arith.constant 40 : index
    %c0_501 = arith.constant 0 : index
    %885 = vector.load %arg16[%c40_500, %c0_501] : memref<64x32xf32, #tpu.memory_space<vmem>>, vector<8x32xf32>
    %cst_502 = arith.constant dense<0.000000e+00> : vector<8x32xf32>
    %886 = tpu.matmul %875, %702, %cst_502 {dimension_numbers = #tpu.dot_dimension_numbers<[1], [0], [0], [1], [0, 0, 1, 1], [], []>} : vector<8x32xbf16>, vector<32x32xbf16>, vector<8x32xf32> -> vector<8x32xf32>
    %887 = arith.addf %885, %886 : vector<8x32xf32>
    %888 = arith.negf %878 : vector<8x32xf32>
    %889 = math.exp %888 : vector<8x32xf32>
    %cst_503 = arith.constant 1.000000e+00 : f32
    %890 = vector.broadcast %cst_503 : f32 to vector<8x32xf32>
    %891 = arith.addf %890, %889 : vector<8x32xf32>
    %892 = arith.divf %890, %891 : vector<8x32xf32>
    %893 = arith.negf %881 : vector<8x32xf32>
    %894 = math.exp %893 : vector<8x32xf32>
    %cst_504 = arith.constant 1.000000e+00 : f32
    %895 = vector.broadcast %cst_504 : f32 to vector<8x32xf32>
    %896 = arith.addf %895, %894 : vector<8x32xf32>
    %897 = arith.divf %895, %896 : vector<8x32xf32>
    %898 = math.tanh %884 : vector<8x32xf32>
    %899 = arith.negf %887 : vector<8x32xf32>
    %900 = math.exp %899 : vector<8x32xf32>
    %cst_505 = arith.constant 1.000000e+00 : f32
    %901 = vector.broadcast %cst_505 : f32 to vector<8x32xf32>
    %902 = arith.addf %901, %900 : vector<8x32xf32>
    %903 = arith.divf %901, %902 : vector<8x32xf32>
    %904 = arith.mulf %897, %872 : vector<8x32xf32>
    %905 = arith.mulf %892, %898 : vector<8x32xf32>
    %906 = arith.addf %904, %905 : vector<8x32xf32>
    %907 = math.tanh %906 : vector<8x32xf32>
    %908 = arith.mulf %903, %907 : vector<8x32xf32>
    %909 = arith.truncf %908 : vector<8x32xf32> to vector<8x32xbf16>
    %c48_506 = arith.constant 48 : index
    %c0_507 = arith.constant 0 : index
    %910 = vector.load %arg13[%c48_506, %c0_507] : memref<64x32xf32, #tpu.memory_space<vmem>>, vector<8x32xf32>
    %cst_508 = arith.constant dense<0.000000e+00> : vector<8x32xf32>
    %911 = tpu.matmul %909, %696, %cst_508 {dimension_numbers = #tpu.dot_dimension_numbers<[1], [0], [0], [1], [0, 0, 1, 1], [], []>} : vector<8x32xbf16>, vector<32x32xbf16>, vector<8x32xf32> -> vector<8x32xf32>
    %912 = arith.addf %910, %911 : vector<8x32xf32>
    %c48_509 = arith.constant 48 : index
    %c0_510 = arith.constant 0 : index
    %913 = vector.load %arg14[%c48_509, %c0_510] : memref<64x32xf32, #tpu.memory_space<vmem>>, vector<8x32xf32>
    %cst_511 = arith.constant dense<0.000000e+00> : vector<8x32xf32>
    %914 = tpu.matmul %909, %698, %cst_511 {dimension_numbers = #tpu.dot_dimension_numbers<[1], [0], [0], [1], [0, 0, 1, 1], [], []>} : vector<8x32xbf16>, vector<32x32xbf16>, vector<8x32xf32> -> vector<8x32xf32>
    %915 = arith.addf %913, %914 : vector<8x32xf32>
    %c48_512 = arith.constant 48 : index
    %c0_513 = arith.constant 0 : index
    %916 = vector.load %arg15[%c48_512, %c0_513] : memref<64x32xf32, #tpu.memory_space<vmem>>, vector<8x32xf32>
    %cst_514 = arith.constant dense<0.000000e+00> : vector<8x32xf32>
    %917 = tpu.matmul %909, %700, %cst_514 {dimension_numbers = #tpu.dot_dimension_numbers<[1], [0], [0], [1], [0, 0, 1, 1], [], []>} : vector<8x32xbf16>, vector<32x32xbf16>, vector<8x32xf32> -> vector<8x32xf32>
    %918 = arith.addf %916, %917 : vector<8x32xf32>
    %c48_515 = arith.constant 48 : index
    %c0_516 = arith.constant 0 : index
    %919 = vector.load %arg16[%c48_515, %c0_516] : memref<64x32xf32, #tpu.memory_space<vmem>>, vector<8x32xf32>
    %cst_517 = arith.constant dense<0.000000e+00> : vector<8x32xf32>
    %920 = tpu.matmul %909, %702, %cst_517 {dimension_numbers = #tpu.dot_dimension_numbers<[1], [0], [0], [1], [0, 0, 1, 1], [], []>} : vector<8x32xbf16>, vector<32x32xbf16>, vector<8x32xf32> -> vector<8x32xf32>
    %921 = arith.addf %919, %920 : vector<8x32xf32>
    %922 = arith.negf %912 : vector<8x32xf32>
    %923 = math.exp %922 : vector<8x32xf32>
    %cst_518 = arith.constant 1.000000e+00 : f32
    %924 = vector.broadcast %cst_518 : f32 to vector<8x32xf32>
    %925 = arith.addf %924, %923 : vector<8x32xf32>
    %926 = arith.divf %924, %925 : vector<8x32xf32>
    %927 = arith.negf %915 : vector<8x32xf32>
    %928 = math.exp %927 : vector<8x32xf32>
    %cst_519 = arith.constant 1.000000e+00 : f32
    %929 = vector.broadcast %cst_519 : f32 to vector<8x32xf32>
    %930 = arith.addf %929, %928 : vector<8x32xf32>
    %931 = arith.divf %929, %930 : vector<8x32xf32>
    %932 = math.tanh %918 : vector<8x32xf32>
    %933 = arith.negf %921 : vector<8x32xf32>
    %934 = math.exp %933 : vector<8x32xf32>
    %cst_520 = arith.constant 1.000000e+00 : f32
    %935 = vector.broadcast %cst_520 : f32 to vector<8x32xf32>
    %936 = arith.addf %935, %934 : vector<8x32xf32>
    %937 = arith.divf %935, %936 : vector<8x32xf32>
    %938 = arith.mulf %931, %906 : vector<8x32xf32>
    %939 = arith.mulf %926, %932 : vector<8x32xf32>
    %940 = arith.addf %938, %939 : vector<8x32xf32>
    %941 = math.tanh %940 : vector<8x32xf32>
    %942 = arith.mulf %937, %941 : vector<8x32xf32>
    %943 = arith.truncf %942 : vector<8x32xf32> to vector<8x32xbf16>
    %c56_521 = arith.constant 56 : index
    %c0_522 = arith.constant 0 : index
    %944 = vector.load %arg13[%c56_521, %c0_522] : memref<64x32xf32, #tpu.memory_space<vmem>>, vector<8x32xf32>
    %cst_523 = arith.constant dense<0.000000e+00> : vector<8x32xf32>
    %945 = tpu.matmul %943, %696, %cst_523 {dimension_numbers = #tpu.dot_dimension_numbers<[1], [0], [0], [1], [0, 0, 1, 1], [], []>} : vector<8x32xbf16>, vector<32x32xbf16>, vector<8x32xf32> -> vector<8x32xf32>
    %946 = arith.addf %944, %945 : vector<8x32xf32>
    %c56_524 = arith.constant 56 : index
    %c0_525 = arith.constant 0 : index
    %947 = vector.load %arg14[%c56_524, %c0_525] : memref<64x32xf32, #tpu.memory_space<vmem>>, vector<8x32xf32>
    %cst_526 = arith.constant dense<0.000000e+00> : vector<8x32xf32>
    %948 = tpu.matmul %943, %698, %cst_526 {dimension_numbers = #tpu.dot_dimension_numbers<[1], [0], [0], [1], [0, 0, 1, 1], [], []>} : vector<8x32xbf16>, vector<32x32xbf16>, vector<8x32xf32> -> vector<8x32xf32>
    %949 = arith.addf %947, %948 : vector<8x32xf32>
    %c56_527 = arith.constant 56 : index
    %c0_528 = arith.constant 0 : index
    %950 = vector.load %arg15[%c56_527, %c0_528] : memref<64x32xf32, #tpu.memory_space<vmem>>, vector<8x32xf32>
    %cst_529 = arith.constant dense<0.000000e+00> : vector<8x32xf32>
    %951 = tpu.matmul %943, %700, %cst_529 {dimension_numbers = #tpu.dot_dimension_numbers<[1], [0], [0], [1], [0, 0, 1, 1], [], []>} : vector<8x32xbf16>, vector<32x32xbf16>, vector<8x32xf32> -> vector<8x32xf32>
    %952 = arith.addf %950, %951 : vector<8x32xf32>
    %c56_530 = arith.constant 56 : index
    %c0_531 = arith.constant 0 : index
    %953 = vector.load %arg16[%c56_530, %c0_531] : memref<64x32xf32, #tpu.memory_space<vmem>>, vector<8x32xf32>
    %cst_532 = arith.constant dense<0.000000e+00> : vector<8x32xf32>
    %954 = tpu.matmul %943, %702, %cst_532 {dimension_numbers = #tpu.dot_dimension_numbers<[1], [0], [0], [1], [0, 0, 1, 1], [], []>} : vector<8x32xbf16>, vector<32x32xbf16>, vector<8x32xf32> -> vector<8x32xf32>
    %955 = arith.addf %953, %954 : vector<8x32xf32>
    %956 = arith.negf %946 : vector<8x32xf32>
    %957 = math.exp %956 : vector<8x32xf32>
    %cst_533 = arith.constant 1.000000e+00 : f32
    %958 = vector.broadcast %cst_533 : f32 to vector<8x32xf32>
    %959 = arith.addf %958, %957 : vector<8x32xf32>
    %960 = arith.divf %958, %959 : vector<8x32xf32>
    %961 = arith.negf %949 : vector<8x32xf32>
    %962 = math.exp %961 : vector<8x32xf32>
    %cst_534 = arith.constant 1.000000e+00 : f32
    %963 = vector.broadcast %cst_534 : f32 to vector<8x32xf32>
    %964 = arith.addf %963, %962 : vector<8x32xf32>
    %965 = arith.divf %963, %964 : vector<8x32xf32>
    %966 = math.tanh %952 : vector<8x32xf32>
    %967 = arith.negf %955 : vector<8x32xf32>
    %968 = math.exp %967 : vector<8x32xf32>
    %cst_535 = arith.constant 1.000000e+00 : f32
    %969 = vector.broadcast %cst_535 : f32 to vector<8x32xf32>
    %970 = arith.addf %969, %968 : vector<8x32xf32>
    %971 = arith.divf %969, %970 : vector<8x32xf32>
    %972 = arith.mulf %965, %940 : vector<8x32xf32>
    %973 = arith.mulf %960, %966 : vector<8x32xf32>
    %974 = arith.addf %972, %973 : vector<8x32xf32>
    %975 = math.tanh %974 : vector<8x32xf32>
    %976 = arith.mulf %971, %975 : vector<8x32xf32>
    %977 = arith.truncf %976 : vector<8x32xf32> to vector<8x32xbf16>
    %c0_536 = arith.constant 0 : index
    %c0_537 = arith.constant 0 : index
    %978 = vector.load %arg10[%c0_536, %c0_537] : memref<32x7xbf16, #tpu.memory_space<vmem>>, vector<32x7xbf16>
    %cst_538 = arith.constant dense<0.000000e+00> : vector<8x7xf32>
    %979 = tpu.matmul %977, %978, %cst_538 {dimension_numbers = #tpu.dot_dimension_numbers<[1], [0], [0], [1], [0, 0, 1, 1], [], []>} : vector<8x32xbf16>, vector<32x7xbf16>, vector<8x7xf32> -> vector<8x7xf32>
    %c0_539 = arith.constant 0 : index
    %c0_540 = arith.constant 0 : index
    %980 = vector.load %arg11[%c0_539, %c0_540] : memref<1x7xf32, #tpu.memory_space<vmem>>, vector<1x7xf32>
    %981 = vector.broadcast %980 : vector<1x7xf32> to vector<8x7xf32>
    %982 = arith.addf %979, %981 : vector<8x7xf32>
    %c0_541 = arith.constant 0 : index
    %c0_542 = arith.constant 0 : index
    %983 = vector.load %arg12[%c0_541, %c0_542] : memref<8x7xf32, #tpu.memory_space<vmem>>, vector<8x7xf32>
    tpu.vector_store %arg12[%c0_541, %c0_542], %982 {strides = array<i32>} : memref<8x7xf32, #tpu.memory_space<vmem>>, vector<8x7xf32>,
    return
  }
}

</mosaic_0001>

<bundles_post_ra>
// kernel: _lambda_.1
= control target key start
LH: loop header
LB: loop body
LE: loop exit
PB: predicated region body
PF: predicated region fallthrough
CT: control target
= control target key end

     0   :  { %17 = vsyncpa [#allocation8], 0  ;;  %s6527_s0 = inlined_call_operand.vmem [shape: bf16[64,64], index: 0, kind: input, shape index: {}]   ;;  %s6528_s1 = inlined_call_operand.hbm [shape: bf16[4,64,32], index: 1, kind: input, shape index: {}]   ;;  %s6529_s2 = inlined_call_operand.hbm [shape: bf16[4,32,32], index: 2, kind: input, shape index: {}]   ;;  %s6530_s3 = inlined_call_operand.hbm [shape: f32[4,1,32], index: 3, kind: input, shape index: {}]   ;;  %s6531_s4 = inlined_call_operand.hbm [shape: bf16[4,32,32], index: 4, kind: input, shape index: {}]   ;;  %s6532_s5 = inlined_call_operand.hbm [shape: bf16[4,32,32], index: 5, kind: input, shape index: {}]   ;;  %s6533_s6 = inlined_call_operand.hbm [shape: f32[4,1,32], index: 6, kind: input, shape index: {}]   ;;  %s6534_s7 = inlined_call_operand.hbm [shape: bf16[4,32,32], index: 7, kind: input, shape index: {}]   ;;  %s6535_s8 = inlined_call_operand.vmem [shape: bf16[4,32,32], index: 8, kind: input, shape index: {}]   ;;  %s6536_s9 = inlined_call_operand.vmem [shape: f32[4,1,32], index: 9, kind: input, shape index: {}]   ;;  %s6537_s10 = inlined_call_operand.vmem [shape: bf16[32,7], index: 10, kind: input, shape index: {}]   ;;  %s6538_s11 = inlined_call_operand.vmem [shape: f32[1,7], index: 11, kind: input, shape index: {}]   ;;  %s6539_s12 = inlined_call_operand.vmem [shape: f32[8,7], index: 12, kind: output, shape index: {}]  }
   0x1   :  { %18 = vsyncpa [#allocation10], 0 }
   0x2   :  { %19 = vsyncpa [#allocation13], 0 }
   0x3   :  { %20 = vsyncpa [#allocation16], 0  ;;  %s40_s23 = sshll.u32 %s6529_s2, 4  ;;  %s5524_s24 = smov [#allocation9]   ;;  %s41_s23 = int_to_ptr.hbm [resolvable:$true] %s40_s23 }
   0x4   :  { %s42_s25 = sshll.u32 %s5524_s24, 4  ;;  %s66_s28 = sshll.u32 %s6531_s4, 4  ;;  %s43_s25 = int_to_ptr.vmem [resolvable:$true] %s42_s25  ;;  %s67_s28 = int_to_ptr.hbm [resolvable:$true] %s66_s28 }
   0x5   :  { %s5525_s29 = smov 64   ;;  %s5526_s30 = smov 4  }
   0x6   :  { %48 = dma.hbm_to_vmem [thread:$0]  %s41_s23, 1024, %s43_s25, [#allocation10], %s5525_s29, %s5525_s29, %s5526_s30  }
   0x7   :  { %s5527_s13 = smov [#allocation12]   ;;  %s92_s16 = sshll.u32 %s6533_s6, 4  ;;  %s93_s16 = int_to_ptr.hbm [resolvable:$true] %s92_s16 }
   0x8   :  { %s68_s14 = sshll.u32 %s5527_s13, 4  ;;  %s5528_s4 = smov [#allocation15]   ;;  %s69_s14 = int_to_ptr.vmem [resolvable:$true] %s68_s14 }
   0x9   :  { %74 = dma.hbm_to_vmem [thread:$0]  %s67_s28, 1024, %s69_s14, [#allocation13], %s5525_s29, %s5525_s29, %s5526_s30  }
   0xa   :  { %s94_s17 = sshll.u32 %s5528_s4, 4  ;;  %s27_s20 = sshll.u32 %s6528_s1, 4  ;;  %s95_s17 = int_to_ptr.vmem [resolvable:$true] %s94_s17  ;;  %s28_s20 = int_to_ptr.hbm [resolvable:$true] %s27_s20 }
   0xb   :  { %s5529_s21 = smov 16   ;;  %s5530_s22 = smov 1  }
   0xc   :  { %100 = dma.hbm_to_vmem [thread:$0]  %s93_s16, 64, %s95_s17, [#allocation16], %s5529_s21, %s5529_s21, %s5530_s22  }
   0xd   :  { %s5531_s23 = smov [#allocation7]   ;;  %s53_s27 = sshll.u32 %s6530_s3, 4  ;;  %s54_s27 = int_to_ptr.hbm [resolvable:$true] %s53_s27 }
   0xe   :  { %s29_s24 = sshll.u32 %s5531_s23, 4  ;;  %s79_s1 = sshll.u32 %s6532_s5, 4  ;;  %s30_s24 = int_to_ptr.vmem [resolvable:$true] %s29_s24  ;;  %s80_s1 = int_to_ptr.hbm [resolvable:$true] %s79_s1 }
   0xf   :  { %35 = dma.hbm_to_vmem [thread:$0]  %s28_s20, 2048, %s30_s24, [#allocation8], %s5525_s29, %s5525_s29, %s5526_s30  }
  0x10   :  { %s5532_s13 = smov [#allocation11]   ;;  %s5533_s2 = smov [#allocation14]  }
  0x11   :  { %s55_s14 = sshll.u32 %s5532_s13, 4  ;;  %s81_s15 = sshll.u32 %s5533_s2, 4  ;;  %s56_s14 = int_to_ptr.vmem [resolvable:$true] %s55_s14  ;;  %s82_s15 = int_to_ptr.vmem [resolvable:$true] %s81_s15 }
  0x12   :  { %61 = dma.hbm_to_vmem [thread:$0]  %s54_s27, 64, %s56_s14, [#allocation10], %s5529_s21, %s5529_s21, %s5530_s22  }
  0x13   :  { %s105_s3 = sshll.u32 %s6534_s7, 4  ;;  %s5534_s17 = smov [#allocation17]   ;;  %s106_s3 = int_to_ptr.hbm [resolvable:$true] %s105_s3 }
  0x14   :  { %87 = dma.hbm_to_vmem [thread:$0]  %s80_s1, 1024, %s82_s15, [#allocation13], %s5525_s29, %s5525_s29, %s5526_s30  }
  0x15   :  { %s107_s18 = sshll.u32 %s5534_s17, 4  ;;  %s108_s18 = int_to_ptr.vmem [resolvable:$true] %s107_s18 }
  0x16   :  { %113 = dma.hbm_to_vmem [thread:$0]  %s106_s3, 1024, %s108_s18, [#allocation16], %s5525_s29, %s5525_s29, %s5526_s30  }
  0x17   :  { %5516 = dma.done.wait [#allocation8], 2048  }
  0x18   :  { %5517 = vsyncadd [#allocation8], 4294965248 }
  0x19   :  { %5518 = dma.done.wait [#allocation10], 1088  }
  0x1a   :  { %5519 = vsyncadd [#allocation10], 4294966208 }
  0x1b   :  { %5520 = dma.done.wait [#allocation13], 2048  }
  0x1c   :  { %5521 = vsyncadd [#allocation13], 4294965248 }
  0x1d   :  { %5522 = dma.done.wait [#allocation16], 1088  }
  0x1e   :  { %5523 = vsyncadd [#allocation16], 4294966208  ;;  %v4852_v0 = vld [vmem:[#allocation7 + $0x18] sm:$0xff]  ;;  %v4851_v4 = vld [vmem:[#allocation7 + $0x10] sm:$0xff]  ;;  %vm215_vm0 = vcmask 523264   ;;  %v5535_v28 = vmov 0  }
  0x1f   :  { %v4856_v1 = vld [vmem:[#allocation7 + $0x38] sm:$0xff]  ;;  %232 = vmatpush.bf16.msra.mxu0 %v4852_v0  ;;  %v4855_v5 = vld [vmem:[#allocation7 + $0x30] sm:$0xff]  ;;  %v4850_v8 = vld [vmem:[#allocation7 + $0x8] sm:$0xff]  ;;  %vm257_vm1 = vcmask 261120   ;;  %vm685_vm14 = vcmask 257024  }
  0x20   :  { %v4860_v2 = vld [vmem:[#allocation7 + $0x58] sm:$0xff]  ;;  %308 = vmatpush.bf16.msra.mxu1 %v4856_v1  ;;  %v4859_v6 = vld [vmem:[#allocation7 + $0x50] sm:$0xff]  ;;  %v4854_v9 = vld [vmem:[#allocation7 + $0x28] sm:$0xff] }
  0x21   :  { %v4864_v3 = vld [vmem:[#allocation7 + $0x78] sm:$0xff]  ;;  %383 = vmatpush.bf16.msra.mxu2 %v4860_v2  ;;  %v4863_v7 = vld [vmem:[#allocation7 + $0x70] sm:$0xff]  ;;  %v4858_v10 = vld [vmem:[#allocation7 + $0x48] sm:$0xff] }
  0x22   :  { %458 = vmatpush.bf16.msra.mxu3 %v4864_v3  ;;  %v4862_v11 = vld [vmem:[#allocation7 + $0x68] sm:$0xff]  ;;  %v4849_v12 = vld [vmem:[#allocation7] sm:$0xff]  ;;  %v5639_v17 = vld [vmem:[#allocation9 + $0x18] sm:$0xff] }
  0x23   :  { %233 = vmatpush.bf16.msra.mxu0 %v4851_v4  ;;  %v4853_v13 = vld [vmem:[#allocation7 + $0x20] sm:$0xff]  ;;  %v5637_v16 = vld [vmem:[#allocation9 + $0x8] sm:$0xff]  ;;  %v5644_v19 = vld [vmem:[#allocation9 + $0x38] sm:$0xff] }
  0x24   :  { %309 = vmatpush.bf16.msra.mxu1 %v4855_v5  ;;  %v4857_v14 = vld [vmem:[#allocation7 + $0x40] sm:$0xff]  ;;  %v5646_v20 = vld [vmem:[#allocation9 + $0x28] sm:$0xff]  ;;  %v5656_v22 = vld [vmem:[#allocation9 + $0x10] sm:$0xff] }
  0x25   :  { %384 = vmatpush.bf16.msra.mxu2 %v4859_v6  ;;  %v4861_v15 = vld [vmem:[#allocation7 + $0x60] sm:$0xff]  ;;  %v5660_v23 = vld [vmem:[#allocation9 + $0x30] sm:$0xff]  ;;  %v4846_v25 = vld [vmem:[%s6527_s0 + $0x8] sm:$0xff] }
  0x26   :  { %459 = vmatpush.bf16.msra.mxu3 %v4863_v7  ;;  %v4845_v18 = vld [vmem:[%s6527_s0] sm:$0xff]  ;;  %v4847_v26 = vld [vmem:[%s6527_s0 + $0x10] sm:$0xff]  ;;  %v4848_v27 = vld [vmem:[%s6527_s0 + $0x18] sm:$0xff] }
  0x27   :  { %234 = vmatpush.bf16.msra.mxu0 %v4850_v8  ;;  %v5654_v21 = vld [vmem:[#allocation9] sm:$0xff] }
  0x28   :  { %310 = vmatpush.bf16.msra.mxu1 %v4854_v9  ;;  %v5662_v24 = vld [vmem:[#allocation9 + $0x20] sm:$0xff] }
  0x29   :  { %385 = vmatpush.bf16.msra.mxu2 %v4858_v10  ;;  %v5709_v29 = vld [vmem:[#allocation11] ss:$0 sm:$0xff]  ;;  %v5711_v30 = vld [vmem:[#allocation11 + $0x1] ss:$0 sm:$0xff]  ;;  %v5717_v35 = vld [vmem:[#allocation11 + $0x2] ss:$0 sm:$0xff] }
  0x2a   :  { %460 = vmatpush.bf16.msra.mxu3 %v4862_v11  ;;  %v5719_v36 = vld [vmem:[#allocation11 + $0x3] ss:$0 sm:$0xff] }
  0x2b   :  { %235 = vmatpush.bf16.msra.mxu0 %v4849_v12 }
  0x2c   :  { %311 = vmatpush.bf16.msra.mxu1 %v4853_v13 }
  0x2d   :  { %386 = vmatpush.bf16.msra.mxu2 %v4857_v14 }
  0x2e   :  { %461 = vmatpush.bf16.msra.mxu3 %v4861_v15  ;;  %4377 = vmatmul.msk.bf16.vlgmr.msra.gmra.mxu0 %vm215_vm0, %v4845_v18 }
  0x2f   :  { %532 = vmatpush.bf16.msrb.mxu0 %v5637_v16  ;;  %4397 = vmatmul.msk.bf16.vlgmr.msra.gmra.mxu1 %vm215_vm0, %v4845_v18 }
  0x30   :  { %559 = vmatpush.bf16.msrb.mxu1 %v5639_v17  ;;  %4417 = vmatmul.msk.bf16.vlgmr.msra.gmra.mxu2 %vm215_vm0, %v4845_v18 }
  0x31   :  { %4437 = vmatmul.msk.bf16.vlgmr.msra.gmra.mxu3 %vm215_vm0, %v4845_v18  ;;  %586 = vmatpush.bf16.msrb.mxu2 %v5646_v20 }
  0x32   :  { %613 = vmatpush.bf16.msrb.mxu3 %v5644_v19 }
  0x33   :  { %533 = vmatpush.bf16.msrb.mxu0 %v5654_v21 }
  0x34   :  { %560 = vmatpush.bf16.msrb.mxu1 %v5656_v22 }
  0x35   :  { %587 = vmatpush.bf16.msrb.mxu2 %v5662_v24 }
  0x36   :  { %614 = vmatpush.bf16.msrb.mxu3 %v5660_v23 }
  0x37   :  { %697 = vmatpush.bf16.msra.mxu0 %v5637_v16 }
  0x38   :  { %712 = vmatpush.bf16.msra.mxu1 %v5639_v17 }
  0x39   :  { %727 = vmatpush.bf16.msra.mxu2 %v5646_v20 }
  0x3a   :  { %742 = vmatpush.bf16.msra.mxu3 %v5644_v19 }
  0x3b   :  { %698 = vmatpush.bf16.msra.mxu0 %v5654_v21 }
  0x3c   :  { %713 = vmatpush.bf16.msra.mxu1 %v5656_v22 }
  0x3d   :  { %728 = vmatpush.bf16.msra.mxu2 %v5662_v24 }
  0x3e   :  { %743 = vmatpush.bf16.msra.mxu3 %v5660_v23  ;;  %4378 = vmatmul.msk.bf16.gmra.mxu0 %vm215_vm0, %v4846_v25 }
  0x3f   :  { %4398 = vmatmul.msk.bf16.gmra.mxu1 %vm215_vm0, %v4846_v25 }
  0x40   :  { %4418 = vmatmul.msk.bf16.gmra.mxu2 %vm215_vm0, %v4846_v25 }
  0x41   :  { %4438 = vmatmul.msk.bf16.gmra.mxu3 %vm215_vm0, %v4846_v25 }
  0x4e   :  { %4379 = vmatmul.msk.bf16.gmra.mxu0 %vm215_vm0, %v4847_v26 }
  0x4f   :  { %4399 = vmatmul.msk.bf16.gmra.mxu1 %vm215_vm0, %v4847_v26 }
  0x50   :  { %4419 = vmatmul.msk.bf16.gmra.mxu2 %vm215_vm0, %v4847_v26 }
  0x51   :  { %4439 = vmatmul.msk.bf16.gmra.mxu3 %vm215_vm0, %v4847_v26 }
  0x5e   :  { %4380 = vmatmul.msk.bf16.gmra.mxu0 %vm215_vm0, %v4848_v27 }
  0x5f   :  { %4400 = vmatmul.msk.bf16.gmra.mxu1 %vm215_vm0, %v4848_v27 }
  0x60   :  { %4420 = vmatmul.msk.bf16.gmra.mxu2 %vm215_vm0, %v4848_v27 }
  0x61   :  { %4440 = vmatmul.msk.bf16.gmra.mxu3 %vm215_vm0, %v4848_v27 }
  0x6e   :  { %534 = vmatmul.bf16.vlgmr.msrb.gmra.mxu0 %v5535_v28 }
  0x6f   :  { %561 = vmatmul.bf16.vlgmr.msrb.gmra.mxu1 %v5535_v28  ;;  %825 = vmatpush.bf16.msrb.mxu0 %v5637_v16 }
  0x70   :  { %588 = vmatmul.bf16.vlgmr.msrb.gmra.mxu2 %v5535_v28  ;;  %840 = vmatpush.bf16.msrb.mxu1 %v5639_v17 }
  0x71   :  { %615 = vmatmul.bf16.vlgmr.msrb.gmra.mxu3 %v5535_v28  ;;  %855 = vmatpush.bf16.msrb.mxu2 %v5646_v20 }
  0x72   :  { %870 = vmatpush.bf16.msrb.mxu3 %v5644_v19 }
  0x73   :  { %826 = vmatpush.bf16.msrb.mxu0 %v5654_v21 }
  0x74   :  { %841 = vmatpush.bf16.msrb.mxu1 %v5656_v22 }
  0x75   :  { %856 = vmatpush.bf16.msrb.mxu2 %v5662_v24 }
  0x76   :  { %871 = vmatpush.bf16.msrb.mxu3 %v5660_v23 }
  0xab   :  { %v237_v31 = vpop.f32.mrf.mxu0 }
  0xac   :  { %v313_v32 = vpop.f32.mrf.mxu1  ;;  %v238_v33 = vadd.f32 %v5709_v29, %v237_v31 }
  0xad   :  { %v314_v34 = vadd.f32 %v5711_v30, %v313_v32 }
  0xae   :  { %258 = vst.msk [vmem:[#allocation2] sm:$0xff] %vm257_vm1, %v238_v33 }
  0xaf   :  { %333 = vst.msk [vmem:[#allocation3] sm:$0xff] %vm257_vm1, %v314_v34 }
  0xb3   :  { %v388_v37 = vpop.f32.mrf.mxu2  ;;  %v239_v41 = vpop.f32.mrf.mxu0 }
  0xb4   :  { %v463_v38 = vpop.f32.mrf.mxu3  ;;  %v389_v39 = vadd.f32 %v5717_v35, %v388_v37  ;;  %v315_v42 = vpop.f32.mrf.mxu1  ;;  %v240_v43 = vadd.f32 %v5709_v29, %v239_v41 }
  0xb5   :  { %v464_v40 = vadd.f32 %v5719_v36, %v463_v38  ;;  %v316_v44 = vadd.f32 %v5711_v30, %v315_v42 }
  0xb6   :  { %408 = vst.msk [vmem:[#allocation4] sm:$0xff] %vm257_vm1, %v389_v39 }
  0xb7   :  { %483 = vst.msk [vmem:[#allocation5] sm:$0xff] %vm257_vm1, %v464_v40 }
  0xb8   :  { %259 = vst.msk [vmem:[#allocation2 + $0x8] sm:$0xff] %vm257_vm1, %v240_v43 }
  0xb9   :  { %334 = vst.msk [vmem:[#allocation3 + $0x8] sm:$0xff] %vm257_vm1, %v316_v44 }
  0xbb   :  { %v390_v45 = vpop.f32.mrf.mxu2  ;;  %v242_v49 = vpop.f32.mrf.mxu0 }
  0xbc   :  { %v465_v46 = vpop.f32.mrf.mxu3  ;;  %v391_v47 = vadd.f32 %v5717_v35, %v390_v45  ;;  %v318_v50 = vpop.f32.mrf.mxu1  ;;  %v243_v51 = vadd.f32 %v5709_v29, %v242_v49 }
  0xbd   :  { %v466_v48 = vadd.f32 %v5719_v36, %v465_v46  ;;  %v319_v52 = vadd.f32 %v5711_v30, %v318_v50  ;;  %v510_v46 = vld [vmem:[#allocation2] sm:$0xff] }
  0xbe   :  { %409 = vst.msk [vmem:[#allocation4 + $0x8] sm:$0xff] %vm257_vm1, %v391_v47 }
  0xbf   :  { %484 = vst.msk [vmem:[#allocation5 + $0x8] sm:$0xff] %vm257_vm1, %v466_v48  ;;  %v540_v48 = vld [vmem:[#allocation3] sm:$0xff] }
  0xc0   :  { %260 = vst.msk [vmem:[#allocation2 + $0x10] sm:$0xff] %vm257_vm1, %v243_v51 }
  0xc1   :  { %335 = vst.msk [vmem:[#allocation3 + $0x10] sm:$0xff] %vm257_vm1, %v319_v52 }
  0xc3   :  { %v393_v53 = vpop.f32.mrf.mxu2  ;;  %v244_v57 = vpop.f32.mrf.mxu0 }
  0xc4   :  { %v468_v54 = vpop.f32.mrf.mxu3  ;;  %v394_v55 = vadd.f32 %v5717_v35, %v393_v53  ;;  %v320_v58 = vpop.f32.mrf.mxu1  ;;  %v245_v59 = vadd.f32 %v5709_v29, %v244_v57  ;;  %v594_v53 = vld [vmem:[#allocation5] sm:$0xff] }
  0xc5   :  { %v469_v56 = vadd.f32 %v5719_v36, %v468_v54  ;;  %v321_v60 = vadd.f32 %v5711_v30, %v320_v58 }
  0xc6   :  { %410 = vst.msk [vmem:[#allocation4 + $0x10] sm:$0xff] %vm257_vm1, %v394_v55 }
  0xc7   :  { %485 = vst.msk [vmem:[#allocation5 + $0x10] sm:$0xff] %vm257_vm1, %v469_v56 }
  0xc8   :  { %261 = vst.msk [vmem:[#allocation2 + $0x18] sm:$0xff] %vm257_vm1, %v245_v59 }
  0xc9   :  { %336 = vst.msk [vmem:[#allocation3 + $0x18] sm:$0xff] %vm257_vm1, %v321_v60 }
  0xcb   :  { %v395_v61 = vpop.f32.mrf.mxu2  ;;  %v247_v1 = vpop.f32.mrf.mxu0 }
  0xcc   :  { %v470_v62 = vpop.f32.mrf.mxu3  ;;  %v396_v63 = vadd.f32 %v5717_v35, %v395_v61  ;;  %v323_v2 = vpop.f32.mrf.mxu1  ;;  %v248_v3 = vadd.f32 %v5709_v29, %v247_v1 }
  0xcd   :  { %v471_v0 = vadd.f32 %v5719_v36, %v470_v62  ;;  %v324_v4 = vadd.f32 %v5711_v30, %v323_v2 }
  0xce   :  { %411 = vst.msk [vmem:[#allocation4 + $0x18] sm:$0xff] %vm257_vm1, %v396_v63 }
  0xcf   :  { %486 = vst.msk [vmem:[#allocation5 + $0x18] sm:$0xff] %vm257_vm1, %v471_v0  ;;  %v567_v0 = vld [vmem:[#allocation4] sm:$0xff] }
  0xd0   :  { %262 = vst.msk [vmem:[#allocation2 + $0x20] sm:$0xff] %vm257_vm1, %v248_v3 }
  0xd1   :  { %337 = vst.msk [vmem:[#allocation3 + $0x20] sm:$0xff] %vm257_vm1, %v324_v4 }
  0xd3   :  { %v398_v5 = vpop.f32.mrf.mxu2  ;;  %v249_v9 = vpop.f32.mrf.mxu0 }
  0xd4   :  { %v473_v6 = vpop.f32.mrf.mxu3  ;;  %v399_v7 = vadd.f32 %v5717_v35, %v398_v5  ;;  %v325_v10 = vpop.f32.mrf.mxu1  ;;  %v250_v11 = vadd.f32 %v5709_v29, %v249_v9 }
  0xd5   :  { %v474_v8 = vadd.f32 %v5719_v36, %v473_v6  ;;  %v326_v12 = vadd.f32 %v5711_v30, %v325_v10 }
  0xd6   :  { %412 = vst.msk [vmem:[#allocation4 + $0x20] sm:$0xff] %vm257_vm1, %v399_v7 }
  0xd7   :  { %487 = vst.msk [vmem:[#allocation5 + $0x20] sm:$0xff] %vm257_vm1, %v474_v8 }
  0xd8   :  { %263 = vst.msk [vmem:[#allocation2 + $0x28] sm:$0xff] %vm257_vm1, %v250_v11 }
  0xd9   :  { %338 = vst.msk [vmem:[#allocation3 + $0x28] sm:$0xff] %vm257_vm1, %v326_v12 }
  0xdb   :  { %v400_v13 = vpop.f32.mrf.mxu2  ;;  %v252_v25 = vpop.f32.mrf.mxu0 }
  0xdc   :  { %v475_v14 = vpop.f32.mrf.mxu3  ;;  %v401_v15 = vadd.f32 %v5717_v35, %v400_v13  ;;  %v328_v26 = vpop.f32.mrf.mxu1  ;;  %v253_v27 = vadd.f32 %v5709_v29, %v252_v25 }
  0xdd   :  { %v476_v18 = vadd.f32 %v5719_v36, %v475_v14  ;;  %v329_v31 = vadd.f32 %v5711_v30, %v328_v26 }
  0xde   :  { %413 = vst.msk [vmem:[#allocation4 + $0x28] sm:$0xff] %vm257_vm1, %v401_v15 }
  0xdf   :  { %488 = vst.msk [vmem:[#allocation5 + $0x28] sm:$0xff] %vm257_vm1, %v476_v18 }
  0xe0   :  { %264 = vst.msk [vmem:[#allocation2 + $0x30] sm:$0xff] %vm257_vm1, %v253_v27 }
  0xe1   :  { %339 = vst.msk [vmem:[#allocation3 + $0x30] sm:$0xff] %vm257_vm1, %v329_v31 }
  0xe3   :  { %v403_v32 = vpop.f32.mrf.mxu2  ;;  %v254_v38 = vpop.f32.mrf.mxu0 }
  0xe4   :  { %v478_v33 = vpop.f32.mrf.mxu3  ;;  %v404_v34 = vadd.f32 %v5717_v35, %v403_v32  ;;  %v330_v39 = vpop.f32.mrf.mxu1  ;;  %v255_v40 = vadd.f32 %v5709_v29, %v254_v38 }
  0xe5   :  { %v479_v37 = vadd.f32 %v5719_v36, %v478_v33  ;;  %v331_v41 = vadd.f32 %v5711_v30, %v330_v39 }
  0xe6   :  { %414 = vst.msk [vmem:[#allocation4 + $0x30] sm:$0xff] %vm257_vm1, %v404_v34 }
  0xe7   :  { %489 = vst.msk [vmem:[#allocation5 + $0x30] sm:$0xff] %vm257_vm1, %v479_v37 }
  0xe8   :  { %265 = vst.msk [vmem:[#allocation2 + $0x38] sm:$0xff] %vm257_vm1, %v255_v40 }
  0xe9   :  { %340 = vst.msk [vmem:[#allocation3 + $0x38] sm:$0xff] %vm257_vm1, %v331_v41 }
  0xeb   :  { %v405_v42 = vpop.f32.mrf.mxu2  ;;  %v535_v47 = vpop.f32.mrf.mxu0 }
  0xec   :  { %v480_v43 = vpop.f32.mrf.mxu3  ;;  %v406_v44 = vadd.f32 %v5717_v35, %v405_v42  ;;  %v562_v29 = vpop.f32.mrf.mxu1  ;;  %v539_v49 = vadd.f32 %v535_v47, %v510_v46 }
  0xed   :  { %v481_v45 = vadd.f32 %v5719_v36, %v480_v43  ;;  %v566_v30 = vadd.f32 %v562_v29, %v540_v48 }
  0xee   :  { %415 = vst.msk [vmem:[#allocation4 + $0x38] sm:$0xff] %vm257_vm1, %v406_v44  ;;  %v4473_v50 = vmul.f32 -1.442695, %v539_v49 }
  0xef   :  { %490 = vst.msk [vmem:[#allocation5 + $0x38] sm:$0xff] %vm257_vm1, %v481_v45  ;;  %v4474_v51 = vmul.f32 -1.442695, %v566_v30 }
  0xf0   :  { %4940 = vpow2.f32 %v4473_v50 }
  0xf1   :  { %4942 = vpow2.f32 %v4474_v51  ;;  %v687_v51 = vld [vmem:[#allocation2 + $0x8] sm:$0xff] }
  0xf3   :  { %v589_v52 = vpop.f32.mrf.mxu2  ;;  %v537_v55 = vpop.f32.mrf.mxu0 }
  0xf4   :  { %v616_v54 = vpop.f32.mrf.mxu3  ;;  %v564_v36 = vpop.f32.mrf.mxu1  ;;  %v593_v3 = vadd.f32 %v589_v52, %v567_v0 }
  0xf5   :  { %v620_v35 = vadd.f32 %v616_v54, %v594_v53  ;;  %v705_v53 = vld [vmem:[#allocation3 + $0x8] sm:$0xff] }
  0xf6   :  { %v4941_v57 = vpop.eup %4940 }
  0xf7   :  { %v4475_v56 = vmul.f32 -1.442695, %v620_v35  ;;  %v4943_v58 = vpop.eup %4942  ;;  %v624_v59 = vadd.f32 1.0, %v4941_v57 }
  0xf8   :  { %v643_v60 = vadd.f32 1.0, %v4943_v58  ;;  %v735_v58 = vld [vmem:[#allocation5 + $0x8] sm:$0xff] }
  0xf9   :  { %4944 = vpow2.f32 %v4475_v56  ;;  %v636_v9 = vand.u32 2147483648, %v624_v59  ;;  %v634_v12 = vand.u32 2147483647, %v624_v59  ;;  %vm630_vm4 = vweird.f32 %v624_v59 }
  0xfa   :  { %4946 = vrcp.f32 %v624_v59  ;;  %v655_v10 = vand.u32 2147483648, %v643_v60  ;;  %v653_v14 = vand.u32 2147483647, %v643_v60  ;;  %vm649_vm5 = vweird.f32 %v643_v60 }
  0xfb   :  { %4948 = vrcp.f32 %v643_v60  ;;  %v591_v62 = vpop.f32.mrf.mxu2  ;;  %v637_v25 = vor.u32 1.1754944e-38, %v636_v9  ;;  %vm635_vm7 = vcmp.eq.f32.partialorder %v634_v12, 8.507059e+37 }
  0xfc   :  { %v618_v61 = vpop.f32.mrf.mxu3  ;;  %v656_v31 = vor.u32 1.1754944e-38, %v655_v10  ;;  %vm654_vm9 = vcmp.eq.f32.partialorder %v653_v14, 8.507059e+37 }
  0xff   :  { %v4945_v63 = vpop.eup %4944 }
 0x100   :  { %v663_v1 = vadd.f32 1.0, %v4945_v63  ;;  %v4947_v2 = vpop.eup %4946 }
 0x101   :  { %v4949_v4 = vpop.eup %4948  ;;  %v626_v5 = vmul.f32 %v4947_v2, %v624_v59  ;;  %vm631_vm2 = vweird.f32 %v4947_v2 }
 0x102   :  { %4950 = vrcp.f32 %v663_v1  ;;  %v645_v6 = vmul.f32 %v4949_v4, %v643_v60  ;;  %vm650_vm3 = vweird.f32 %v4949_v4  ;;  %vm632_vm6 = vmor %vm630_vm4, %vm631_vm2  ;;  %v675_v45 = vand.u32 2147483648, %v663_v1 }
 0x103   :  { %v627_v7 = vsub.f32 1.0, %v626_v5  ;;  %4952 = vtanh.f32 %v593_v3  ;;  %vm651_vm8 = vmor %vm649_vm5, %vm650_vm3  ;;  %vm669_vm11 = vweird.f32 %v663_v1  ;;  %v673_v46 = vand.u32 2147483647, %v663_v1 }
 0x104   :  { %v646_v8 = vsub.f32 1.0, %v645_v6  ;;  %v676_v48 = vor.u32 1.1754944e-38, %v675_v45 }
 0x105   :  { %v628_v11 = vmul.f32 %v4947_v2, %v627_v7  ;;  %vm674_vm13 = vcmp.eq.f32.partialorder %v673_v46, 8.507059e+37  ;;  %v720_v7 = vld [vmem:[#allocation4 + $0x8] sm:$0xff] }
 0x106   :  { %v647_v13 = vmul.f32 %v4949_v4, %v646_v8 }
 0x107   :  { %v629_v18 = vadd.f32 %v4947_v2, %v628_v11 }
 0x108   :  { %v4951_v15 = vpop.eup %4950  ;;  %v648_v26 = vadd.f32 %v4949_v4, %v647_v13 }
 0x109   :  { %v665_v27 = vmul.f32 %v4951_v15, %v663_v1  ;;  %v633_v32 = vsel %vm632_vm6, %v4947_v2, %v629_v18  ;;  %v4953_v33 = vpop.eup %4952  ;;  %vm670_vm10 = vweird.f32 %v4951_v15 }
 0x10a   :  { %v638_v34 = vsel %vm635_vm7, %v637_v25, %v633_v32  ;;  %v652_v37 = vsel %vm651_vm8, %v4949_v4, %v648_v26  ;;  %vm671_vm12 = vmor %vm669_vm11, %vm670_vm10 }
 0x10b   :  { %v666_v38 = vsub.f32 1.0, %v665_v27  ;;  %v657_v39 = vsel %vm654_vm9, %v656_v31, %v652_v37  ;;  %v680_v40 = vmul.f32 %v4953_v33, %v638_v34 }
 0x10c   :  { %v679_v41 = vmul.f32 0.0, %v657_v39 }
 0x10d   :  { %v667_v42 = vmul.f32 %v4951_v15, %v666_v38 }
 0x10e   :  { %v5781_v43 = vadd.f32 %v680_v40, %v679_v41 }
 0x10f   :  { %v668_v44 = vadd.f32 %v4951_v15, %v667_v42 }
 0x110   :  { %4954 = vtanh.f32 %v5781_v43 }
 0x111   :  { %v672_v47 = vsel %vm671_vm12, %v4951_v15, %v668_v44 }
 0x112   :  { %v677_v49 = vsel %vm674_vm13, %v676_v48, %v672_v47 }
 0x116   :  { %v4955_v29 = vpop.eup %4954 }
 0x117   :  { %v683_v30 = vmul.f32 %v4955_v29, %v677_v49 }
 0x119   :  { %v684_v50 = vpack.c.bf16 %v683_v30, %v683_v30 }
 0x11b   :  { %686 = vst.msk [vmem:[#allocation6] sm:$0xf] %vm685_vm14, %v684_v50  ;;  %4476 = vmatmul.msk.bf16.vlgmr.msra.gmra.mxu0 %vm257_vm1, %v684_v50  ;;  %4477 = vmatmul.msk.bf16.vlgmr.msra.gmra.mxu1 %vm257_vm1, %v684_v50 }
 0x11c   :  { %4478 = vmatmul.msk.bf16.vlgmr.msra.gmra.mxu2 %vm257_vm1, %v684_v50  ;;  %4479 = vmatmul.msk.bf16.vlgmr.msra.gmra.mxu3 %vm257_vm1, %v684_v50 }
 0x11d   :  { %953 = vmatpush.bf16.msra.mxu0 %v5637_v16  ;;  %968 = vmatpush.bf16.msra.mxu1 %v5639_v17 }
 0x11e   :  { %998 = vmatpush.bf16.msra.mxu3 %v5644_v19  ;;  %983 = vmatpush.bf16.msra.mxu2 %v5646_v20 }
 0x121   :  { %954 = vmatpush.bf16.msra.mxu0 %v5654_v21  ;;  %969 = vmatpush.bf16.msra.mxu1 %v5656_v22 }
 0x122   :  { %984 = vmatpush.bf16.msra.mxu2 %v5662_v24  ;;  %999 = vmatpush.bf16.msra.mxu3 %v5660_v23 }
 0x198   :  { %v700_v52 = vpop.f32.mrf.mxu0  ;;  %v715_v54 = vpop.f32.mrf.mxu1 }
 0x199   :  { %v704_v35 = vadd.f32 %v700_v52, %v687_v51  ;;  %v719_v55 = vadd.f32 %v715_v54, %v705_v53 }
 0x19b   :  { %v4480_v36 = vmul.f32 -1.442695, %v704_v35  ;;  %v4481_v56 = vmul.f32 -1.442695, %v719_v55 }
 0x19d   :  { %4956 = vpow2.f32 %v4480_v36 }
 0x19e   :  { %4958 = vpow2.f32 %v4481_v56 }
 0x19f   :  { %v730_v57 = vpop.f32.mrf.mxu2  ;;  %v745_v59 = vpop.f32.mrf.mxu3 }
 0x1a0   :  { %v749_v60 = vadd.f32 %v745_v59, %v735_v58  ;;  %v702_v61 = vpop.f32.mrf.mxu0  ;;  %v717_v62 = vpop.f32.mrf.mxu1  ;;  %v734_v10 = vadd.f32 %v730_v57, %v720_v7  ;;  %v833_v58 = vld [vmem:[#allocation3 + $0x10] sm:$0xff] }
 0x1a2   :  { %v4482_v63 = vmul.f32 -1.442695, %v749_v60 }
 0x1a3   :  { %v4957_v0 = vpop.eup %4956 }
 0x1a4   :  { %v4959_v1 = vpop.eup %4958  ;;  %v753_v2 = vadd.f32 1.0, %v4957_v0  ;;  %4960 = vpow2.f32 %v4482_v63 }
 0x1a5   :  { %v772_v3 = vadd.f32 1.0, %v4959_v1  ;;  %v863_v1 = vld [vmem:[#allocation5 + $0x10] sm:$0xff] }
 0x1a6   :  { %4962 = vrcp.f32 %v753_v2  ;;  %v765_v18 = vand.u32 2147483648, %v753_v2  ;;  %v763_v27 = vand.u32 2147483647, %v753_v2  ;;  %vm759_vm2 = vweird.f32 %v753_v2 }
 0x1a7   :  { %4964 = vrcp.f32 %v772_v3  ;;  %v732_v4 = vpop.f32.mrf.mxu2  ;;  %v747_v5 = vpop.f32.mrf.mxu3  ;;  %v784_v25 = vand.u32 2147483648, %v772_v3  ;;  %v782_v32 = vand.u32 2147483647, %v772_v3  ;;  %vm778_vm3 = vweird.f32 %v772_v3 }
 0x1a8   :  { %v766_v37 = vor.u32 1.1754944e-38, %v765_v18  ;;  %vm764_vm6 = vcmp.eq.f32.partialorder %v763_v27, 8.507059e+37 }
 0x1a9   :  { %v785_v40 = vor.u32 1.1754944e-38, %v784_v25  ;;  %vm783_vm7 = vcmp.eq.f32.partialorder %v782_v32, 8.507059e+37 }
 0x1aa   :  { %v4961_v6 = vpop.eup %4960 }
 0x1ab   :  { %v792_v8 = vadd.f32 1.0, %v4961_v6 }
 0x1ac   :  { %v4963_v9 = vpop.eup %4962 }
 0x1ad   :  { %v4965_v11 = vpop.eup %4964  ;;  %v755_v12 = vmul.f32 %v4963_v9, %v753_v2  ;;  %4966 = vrcp.f32 %v792_v8  ;;  %vm760_vm15 = vweird.f32 %v4963_v9  ;;  %v804_v51 = vand.u32 2147483648, %v792_v8 }
 0x1ae   :  { %v774_v13 = vmul.f32 %v4965_v11, %v772_v3  ;;  %4968 = vtanh.f32 %v734_v10  ;;  %vm779_vm0 = vweird.f32 %v4965_v11  ;;  %vm761_vm4 = vmor %vm759_vm2, %vm760_vm15  ;;  %vm798_vm9 = vweird.f32 %v792_v8 }
 0x1af   :  { %v756_v14 = vsub.f32 1.0, %v755_v12  ;;  %vm780_vm5 = vmor %vm778_vm3, %vm779_vm0  ;;  %v802_v52 = vand.u32 2147483647, %v792_v8  ;;  %v805_v54 = vor.u32 1.1754944e-38, %v804_v51 }
 0x1b0   :  { %v775_v15 = vsub.f32 1.0, %v774_v13 }
 0x1b1   :  { %v757_v26 = vmul.f32 %v4963_v9, %v756_v14  ;;  %vm803_vm11 = vcmp.eq.f32.partialorder %v802_v52, 8.507059e+37  ;;  %v848_v14 = vld [vmem:[#allocation4 + $0x10] sm:$0xff] }
 0x1b2   :  { %v776_v31 = vmul.f32 %v4965_v11, %v775_v15 }
 0x1b3   :  { %v4967_v33 = vpop.eup %4966  ;;  %v758_v34 = vadd.f32 %v4963_v9, %v757_v26 }
 0x1b4   :  { %v777_v38 = vadd.f32 %v4965_v11, %v776_v31  ;;  %v794_v39 = vmul.f32 %v4967_v33, %v792_v8  ;;  %v4969_v42 = vpop.eup %4968  ;;  %vm799_vm8 = vweird.f32 %v4967_v33 }
 0x1b5   :  { %v762_v41 = vsel %vm761_vm4, %v4963_v9, %v758_v34  ;;  %vm800_vm10 = vmor %vm798_vm9, %vm799_vm8 }
 0x1b6   :  { %v767_v44 = vsel %vm764_vm6, %v766_v37, %v762_v41  ;;  %v781_v45 = vsel %vm780_vm5, %v4965_v11, %v777_v38  ;;  %v795_v46 = vsub.f32 1.0, %v794_v39 }
 0x1b7   :  { %v786_v47 = vsel %vm783_vm7, %v785_v40, %v781_v45  ;;  %v809_v48 = vmul.f32 %v4969_v42, %v767_v44 }
 0x1b8   :  { %v808_v29 = vmul.f32 %v786_v47, %v5781_v43  ;;  %v796_v49 = vmul.f32 %v4967_v33, %v795_v46  ;;  %v815_v43 = vld [vmem:[#allocation2 + $0x10] sm:$0xff] }
 0x1ba   :  { %v5798_v30 = vadd.f32 %v809_v48, %v808_v29  ;;  %v797_v50 = vadd.f32 %v4967_v33, %v796_v49 }
 0x1bc   :  { %4970 = vtanh.f32 %v5798_v30  ;;  %v801_v53 = vsel %vm800_vm10, %v4967_v33, %v797_v50 }
 0x1bd   :  { %v806_v55 = vsel %vm803_vm11, %v805_v54, %v801_v53 }
 0x1c2   :  { %v4971_v35 = vpop.eup %4970 }
 0x1c3   :  { %v812_v36 = vmul.f32 %v4971_v35, %v806_v55 }
 0x1c5   :  { %v813_v56 = vpack.c.bf16 %v812_v36, %v812_v36 }
 0x1c7   :  { %814 = vst.msk [vmem:[#allocation6 + $0x4] sm:$0xf] %vm685_vm14, %v813_v56  ;;  %4483 = vmatmul.msk.bf16.vlgmr.msrb.gmra.mxu0 %vm257_vm1, %v813_v56  ;;  %4484 = vmatmul.msk.bf16.vlgmr.msrb.gmra.mxu1 %vm257_vm1, %v813_v56 }
 0x1c8   :  { %4485 = vmatmul.msk.bf16.vlgmr.msrb.gmra.mxu2 %vm257_vm1, %v813_v56  ;;  %4486 = vmatmul.msk.bf16.vlgmr.msrb.gmra.mxu3 %vm257_vm1, %v813_v56 }
 0x1c9   :  { %1081 = vmatpush.bf16.msrb.mxu0 %v5637_v16  ;;  %1096 = vmatpush.bf16.msrb.mxu1 %v5639_v17 }
 0x1ca   :  { %1126 = vmatpush.bf16.msrb.mxu3 %v5644_v19  ;;  %1111 = vmatpush.bf16.msrb.mxu2 %v5646_v20 }
 0x1cd   :  { %1082 = vmatpush.bf16.msrb.mxu0 %v5654_v21  ;;  %1097 = vmatpush.bf16.msrb.mxu1 %v5656_v22 }
 0x1ce   :  { %1112 = vmatpush.bf16.msrb.mxu2 %v5662_v24  ;;  %1127 = vmatpush.bf16.msrb.mxu3 %v5660_v23 }
 0x244   :  { %v828_v57 = vpop.f32.mrf.mxu0  ;;  %v843_v59 = vpop.f32.mrf.mxu1 }
 0x245   :  { %v832_v60 = vadd.f32 %v828_v57, %v815_v43  ;;  %v847_v61 = vadd.f32 %v843_v59, %v833_v58 }
 0x247   :  { %v4487_v62 = vmul.f32 -1.442695, %v832_v60  ;;  %v4488_v63 = vmul.f32 -1.442695, %v847_v61 }
 0x249   :  { %4972 = vpow2.f32 %v4487_v62 }
 0x24a   :  { %4974 = vpow2.f32 %v4488_v63 }
 0x24b   :  { %v858_v0 = vpop.f32.mrf.mxu2  ;;  %v873_v2 = vpop.f32.mrf.mxu3 }
 0x24c   :  { %v877_v3 = vadd.f32 %v873_v2, %v863_v1  ;;  %v830_v4 = vpop.f32.mrf.mxu0  ;;  %v845_v5 = vpop.f32.mrf.mxu1  ;;  %v862_v25 = vadd.f32 %v858_v0, %v848_v14  ;;  %v961_v1 = vld [vmem:[#allocation3 + $0x18] sm:$0xff] }
 0x24e   :  { %v4489_v6 = vmul.f32 -1.442695, %v877_v3 }
 0x24f   :  { %v4973_v7 = vpop.eup %4972 }
 0x250   :  { %v4975_v8 = vpop.eup %4974  ;;  %v881_v9 = vadd.f32 1.0, %v4973_v7  ;;  %4976 = vpow2.f32 %v4489_v6 }
 0x251   :  { %v900_v10 = vadd.f32 1.0, %v4975_v8 }
 0x252   :  { %4978 = vrcp.f32 %v881_v9  ;;  %v893_v34 = vand.u32 2147483648, %v881_v9  ;;  %v891_v39 = vand.u32 2147483647, %v881_v9  ;;  %vm887_vm15 = vweird.f32 %v881_v9 }
 0x253   :  { %4980 = vrcp.f32 %v900_v10  ;;  %v860_v11 = vpop.f32.mrf.mxu2  ;;  %v875_v12 = vpop.f32.mrf.mxu3  ;;  %v912_v37 = vand.u32 2147483648, %v900_v10  ;;  %v910_v41 = vand.u32 2147483647, %v900_v10  ;;  %vm906_vm0 = vweird.f32 %v900_v10 }
 0x254   :  { %v894_v45 = vor.u32 1.1754944e-38, %v893_v34  ;;  %vm892_vm4 = vcmp.eq.f32.partialorder %v891_v39, 8.507059e+37 }
 0x255   :  { %v913_v48 = vor.u32 1.1754944e-38, %v912_v37  ;;  %vm911_vm5 = vcmp.eq.f32.partialorder %v910_v41, 8.507059e+37 }
 0x256   :  { %v4977_v13 = vpop.eup %4976 }
 0x257   :  { %v920_v15 = vadd.f32 1.0, %v4977_v13  ;;  %v976_v13 = vld [vmem:[#allocation4 + $0x18] sm:$0xff] }
 0x258   :  { %v4979_v18 = vpop.eup %4978 }
 0x259   :  { %v4981_v26 = vpop.eup %4980  ;;  %v883_v27 = vmul.f32 %v4979_v18, %v881_v9  ;;  %4982 = vrcp.f32 %v920_v15  ;;  %vm888_vm12 = vweird.f32 %v4979_v18  ;;  %v932_v43 = vand.u32 2147483648, %v920_v15 }
 0x25a   :  { %v902_v31 = vmul.f32 %v4981_v26, %v900_v10  ;;  %4984 = vtanh.f32 %v862_v25  ;;  %vm907_vm13 = vweird.f32 %v4981_v26  ;;  %vm889_vm2 = vmor %vm887_vm15, %vm888_vm12  ;;  %vm926_vm7 = vweird.f32 %v920_v15 }
 0x25b   :  { %v884_v32 = vsub.f32 1.0, %v883_v27  ;;  %vm908_vm3 = vmor %vm906_vm0, %vm907_vm13  ;;  %v930_v57 = vand.u32 2147483647, %v920_v15  ;;  %v933_v59 = vor.u32 1.1754944e-38, %v932_v43 }
 0x25c   :  { %v903_v33 = vsub.f32 1.0, %v902_v31 }
 0x25d   :  { %v885_v38 = vmul.f32 %v4979_v18, %v884_v32  ;;  %vm931_vm9 = vcmp.eq.f32.partialorder %v930_v57, 8.507059e+37 }
 0x25e   :  { %v904_v40 = vmul.f32 %v4981_v26, %v903_v33 }
 0x25f   :  { %v4983_v42 = vpop.eup %4982  ;;  %v886_v44 = vadd.f32 %v4979_v18, %v885_v38 }
 0x260   :  { %v905_v46 = vadd.f32 %v4981_v26, %v904_v40  ;;  %v922_v47 = vmul.f32 %v4983_v42, %v920_v15  ;;  %v4985_v49 = vpop.eup %4984  ;;  %vm927_vm6 = vweird.f32 %v4983_v42 }
 0x261   :  { %v890_v29 = vsel %vm889_vm2, %v4979_v18, %v886_v44  ;;  %vm928_vm8 = vmor %vm926_vm7, %vm927_vm6 }
 0x262   :  { %v895_v50 = vsel %vm892_vm4, %v894_v45, %v890_v29  ;;  %v909_v51 = vsel %vm908_vm3, %v4981_v26, %v905_v46  ;;  %v923_v52 = vsub.f32 1.0, %v922_v47 }
 0x263   :  { %v914_v53 = vsel %vm911_vm5, %v913_v48, %v909_v51  ;;  %v937_v54 = vmul.f32 %v4985_v49, %v895_v50 }
 0x264   :  { %v936_v35 = vmul.f32 %v914_v53, %v5798_v30  ;;  %v924_v55 = vmul.f32 %v4983_v42, %v923_v52  ;;  %v943_v30 = vld [vmem:[#allocation2 + $0x18] sm:$0xff] }
 0x266   :  { %v5815_v36 = vadd.f32 %v937_v54, %v936_v35  ;;  %v925_v56 = vadd.f32 %v4983_v42, %v924_v55 }
 0x268   :  { %4986 = vtanh.f32 %v5815_v36  ;;  %v929_v58 = vsel %vm928_vm8, %v4983_v42, %v925_v56 }
 0x269   :  { %v934_v61 = vsel %vm931_vm9, %v933_v59, %v929_v58 }
 0x26e   :  { %v4987_v60 = vpop.eup %4986 }
 0x26f   :  { %v940_v62 = vmul.f32 %v4987_v60, %v934_v61 }
 0x271   :  { %v941_v63 = vpack.c.bf16 %v940_v62, %v940_v62 }
 0x273   :  { %942 = vst.msk [vmem:[#allocation6 + $0x8] sm:$0xf] %vm685_vm14, %v941_v63  ;;  %4490 = vmatmul.msk.bf16.vlgmr.msra.gmra.mxu0 %vm257_vm1, %v941_v63  ;;  %4491 = vmatmul.msk.bf16.vlgmr.msra.gmra.mxu1 %vm257_vm1, %v941_v63 }
 0x274   :  { %4492 = vmatmul.msk.bf16.vlgmr.msra.gmra.mxu2 %vm257_vm1, %v941_v63  ;;  %4493 = vmatmul.msk.bf16.vlgmr.msra.gmra.mxu3 %vm257_vm1, %v941_v63 }
 0x275   :  { %1209 = vmatpush.bf16.msra.mxu0 %v5637_v16  ;;  %1224 = vmatpush.bf16.msra.mxu1 %v5639_v17 }
 0x276   :  { %1254 = vmatpush.bf16.msra.mxu3 %v5644_v19  ;;  %1239 = vmatpush.bf16.msra.mxu2 %v5646_v20  ;;  %v991_v20 = vld [vmem:[#allocation5 + $0x18] sm:$0xff] }
 0x279   :  { %1210 = vmatpush.bf16.msra.mxu0 %v5654_v21  ;;  %1225 = vmatpush.bf16.msra.mxu1 %v5656_v22 }
 0x27a   :  { %1240 = vmatpush.bf16.msra.mxu2 %v5662_v24  ;;  %1255 = vmatpush.bf16.msra.mxu3 %v5660_v23 }
 0x2f0   :  { %v956_v0 = vpop.f32.mrf.mxu0  ;;  %v971_v2 = vpop.f32.mrf.mxu1 }
 0x2f1   :  { %v960_v3 = vadd.f32 %v956_v0, %v943_v30  ;;  %v975_v16 = vadd.f32 %v971_v2, %v961_v1  ;;  %v5843_v30 = vld [vmem:[#allocation9 + $0x18] sm:$0xff]  ;;  %v5849_v1 = vld [vmem:[#allocation9 + $0x28] sm:$0xff]  ;;  %v5852_v2 = vld [vmem:[#allocation9] sm:$0xff] }
 0x2f2   :  { %v5846_v0 = vld [vmem:[#allocation9 + $0x38] sm:$0xff] }
 0x2f3   :  { %v4494_v4 = vmul.f32 -1.442695, %v960_v3  ;;  %v4495_v17 = vmul.f32 -1.442695, %v975_v16  ;;  %v5855_v3 = vld [vmem:[#allocation9 + $0x10] sm:$0xff]  ;;  %v5858_v16 = vld [vmem:[#allocation9 + $0x20] sm:$0xff] }
 0x2f5   :  { %4988 = vpow2.f32 %v4494_v4  ;;  %v5861_v4 = vld [vmem:[#allocation9 + $0x30] sm:$0xff] }
 0x2f6   :  { %4990 = vpow2.f32 %v4495_v17  ;;  %v1071_v17 = vld [vmem:[#allocation2 + $0x20] sm:$0xff] }
 0x2f7   :  { %v986_v19 = vpop.f32.mrf.mxu2  ;;  %v1001_v5 = vpop.f32.mrf.mxu3 }
 0x2f8   :  { %v1005_v21 = vadd.f32 %v1001_v5, %v991_v20  ;;  %v958_v6 = vpop.f32.mrf.mxu0  ;;  %v973_v22 = vpop.f32.mrf.mxu1  ;;  %v990_v18 = vadd.f32 %v986_v19, %v976_v13  ;;  %v1089_v20 = vld [vmem:[#allocation3 + $0x20] sm:$0xff] }
 0x2fa   :  { %v4496_v7 = vmul.f32 -1.442695, %v1005_v21 }
 0x2fb   :  { %v4989_v24 = vpop.eup %4988 }
 0x2fc   :  { %v4991_v8 = vpop.eup %4990  ;;  %v1009_v23 = vadd.f32 1.0, %v4989_v24  ;;  %4992 = vpow2.f32 %v4496_v7 }
 0x2fd   :  { %v1028_v9 = vadd.f32 1.0, %v4991_v8  ;;  %v1119_v8 = vld [vmem:[#allocation5 + $0x20] sm:$0xff] }
 0x2fe   :  { %4994 = vrcp.f32 %v1009_v23  ;;  %v1021_v33 = vand.u32 2147483648, %v1009_v23  ;;  %v1019_v38 = vand.u32 2147483647, %v1009_v23  ;;  %vm1015_vm12 = vweird.f32 %v1009_v23 }
 0x2ff   :  { %4996 = vrcp.f32 %v1028_v9  ;;  %v988_v10 = vpop.f32.mrf.mxu2  ;;  %v1003_v11 = vpop.f32.mrf.mxu3  ;;  %v1040_v34 = vand.u32 2147483648, %v1028_v9  ;;  %v1038_v40 = vand.u32 2147483647, %v1028_v9  ;;  %vm1034_vm13 = vweird.f32 %v1028_v9 }
 0x300   :  { %v1022_v44 = vor.u32 1.1754944e-38, %v1021_v33  ;;  %vm1020_vm2 = vcmp.eq.f32.partialorder %v1019_v38, 8.507059e+37 }
 0x301   :  { %v1041_v47 = vor.u32 1.1754944e-38, %v1040_v34  ;;  %vm1039_vm3 = vcmp.eq.f32.partialorder %v1038_v40, 8.507059e+37 }
 0x302   :  { %v4993_v12 = vpop.eup %4992 }
 0x303   :  { %v1048_v14 = vadd.f32 1.0, %v4993_v12 }
 0x304   :  { %v4995_v15 = vpop.eup %4994 }
 0x305   :  { %v4997_v25 = vpop.eup %4996  ;;  %v1011_v26 = vmul.f32 %v4995_v15, %v1009_v23  ;;  %4998 = vrcp.f32 %v1048_v14  ;;  %vm1016_vm10 = vweird.f32 %v4995_v15  ;;  %v1060_v43 = vand.u32 2147483648, %v1048_v14 }
 0x306   :  { %v1030_v27 = vmul.f32 %v4997_v25, %v1028_v9  ;;  %5000 = vtanh.f32 %v990_v18  ;;  %vm1035_vm11 = vweird.f32 %v4997_v25  ;;  %vm1017_vm15 = vmor %vm1015_vm12, %vm1016_vm10  ;;  %vm1054_vm5 = vweird.f32 %v1048_v14 }
 0x307   :  { %v1012_v31 = vsub.f32 1.0, %v1011_v26  ;;  %vm1036_vm0 = vmor %vm1034_vm13, %vm1035_vm11  ;;  %v1058_v57 = vand.u32 2147483647, %v1048_v14  ;;  %v1061_v59 = vor.u32 1.1754944e-38, %v1060_v43 }
 0x308   :  { %v1031_v32 = vsub.f32 1.0, %v1030_v27 }
 0x309   :  { %v1013_v37 = vmul.f32 %v4995_v15, %v1012_v31  ;;  %vm1059_vm7 = vcmp.eq.f32.partialorder %v1058_v57, 8.507059e+37  ;;  %v1104_v31 = vld [vmem:[#allocation4 + $0x20] sm:$0xff] }
 0x30a   :  { %v1032_v39 = vmul.f32 %v4997_v25, %v1031_v32 }
 0x30b   :  { %v4999_v41 = vpop.eup %4998  ;;  %v1014_v42 = vadd.f32 %v4995_v15, %v1013_v37 }
 0x30c   :  { %v1033_v45 = vadd.f32 %v4997_v25, %v1032_v39  ;;  %v1050_v46 = vmul.f32 %v4999_v41, %v1048_v14  ;;  %v5001_v29 = vpop.eup %5000  ;;  %vm1055_vm4 = vweird.f32 %v4999_v41 }
 0x30d   :  { %v1018_v48 = vsel %vm1017_vm15, %v4995_v15, %v1014_v42  ;;  %vm1056_vm6 = vmor %vm1054_vm5, %vm1055_vm4 }
 0x30e   :  { %v1023_v49 = vsel %vm1020_vm2, %v1022_v44, %v1018_v48  ;;  %v1037_v50 = vsel %vm1036_vm0, %v4997_v25, %v1033_v45  ;;  %v1051_v51 = vsub.f32 1.0, %v1050_v46 }
 0x30f   :  { %v1042_v52 = vsel %vm1039_vm3, %v1041_v47, %v1037_v50  ;;  %v1065_v53 = vmul.f32 %v5001_v29, %v1023_v49 }
 0x310   :  { %v1064_v54 = vmul.f32 %v1042_v52, %v5815_v36  ;;  %v1052_v35 = vmul.f32 %v4999_v41, %v1051_v51  ;;  %v5840_v36 = vld [vmem:[#allocation9 + $0x8] sm:$0xff] }
 0x312   :  { %v5832_v55 = vadd.f32 %v1065_v53, %v1064_v54  ;;  %v1053_v56 = vadd.f32 %v4999_v41, %v1052_v35 }
 0x314   :  { %5002 = vtanh.f32 %v5832_v55  ;;  %v1057_v58 = vsel %vm1056_vm6, %v4999_v41, %v1053_v56 }
 0x315   :  { %v1062_v61 = vsel %vm1059_vm7, %v1061_v59, %v1057_v58 }
 0x31a   :  { %v5003_v60 = vpop.eup %5002 }
 0x31b   :  { %v1068_v62 = vmul.f32 %v5003_v60, %v1062_v61 }
 0x31d   :  { %v1069_v63 = vpack.c.bf16 %v1068_v62, %v1068_v62 }
 0x31f   :  { %1070 = vst.msk [vmem:[#allocation6 + $0xc] sm:$0xf] %vm685_vm14, %v1069_v63  ;;  %4497 = vmatmul.msk.bf16.vlgmr.msrb.gmra.mxu0 %vm257_vm1, %v1069_v63  ;;  %4498 = vmatmul.msk.bf16.vlgmr.msrb.gmra.mxu1 %vm257_vm1, %v1069_v63 }
 0x320   :  { %4499 = vmatmul.msk.bf16.vlgmr.msrb.gmra.mxu2 %vm257_vm1, %v1069_v63  ;;  %4500 = vmatmul.msk.bf16.vlgmr.msrb.gmra.mxu3 %vm257_vm1, %v1069_v63 }
 0x321   :  { %1337 = vmatpush.bf16.msrb.mxu0 %v5840_v36  ;;  %1352 = vmatpush.bf16.msrb.mxu1 %v5843_v30 }
 0x322   :  { %1382 = vmatpush.bf16.msrb.mxu3 %v5846_v0  ;;  %1367 = vmatpush.bf16.msrb.mxu2 %v5849_v1 }
 0x325   :  { %1338 = vmatpush.bf16.msrb.mxu0 %v5852_v2  ;;  %1353 = vmatpush.bf16.msrb.mxu1 %v5855_v3 }
 0x326   :  { %1368 = vmatpush.bf16.msrb.mxu2 %v5858_v16  ;;  %1383 = vmatpush.bf16.msrb.mxu3 %v5861_v4 }
 0x39c   :  { %v1084_v19 = vpop.f32.mrf.mxu0  ;;  %v1099_v5 = vpop.f32.mrf.mxu1 }
 0x39d   :  { %v1088_v21 = vadd.f32 %v1084_v19, %v1071_v17  ;;  %v1103_v6 = vadd.f32 %v1099_v5, %v1089_v20 }
 0x39f   :  { %v4501_v22 = vmul.f32 -1.442695, %v1088_v21  ;;  %v4502_v7 = vmul.f32 -1.442695, %v1103_v6 }
 0x3a1   :  { %5004 = vpow2.f32 %v4501_v22 }
 0x3a2   :  { %5006 = vpow2.f32 %v4502_v7 }
 0x3a3   :  { %v1114_v24 = vpop.f32.mrf.mxu2  ;;  %v1129_v23 = vpop.f32.mrf.mxu3 }
 0x3a4   :  { %v1133_v9 = vadd.f32 %v1129_v23, %v1119_v8  ;;  %v1086_v10 = vpop.f32.mrf.mxu0  ;;  %v1101_v11 = vpop.f32.mrf.mxu1  ;;  %v1118_v34 = vadd.f32 %v1114_v24, %v1104_v31  ;;  %v1217_v8 = vld [vmem:[#allocation3 + $0x28] sm:$0xff] }
 0x3a6   :  { %v4503_v12 = vmul.f32 -1.442695, %v1133_v9 }
 0x3a7   :  { %v5005_v13 = vpop.eup %5004 }
 0x3a8   :  { %v5007_v14 = vpop.eup %5006  ;;  %v1137_v15 = vadd.f32 1.0, %v5005_v13  ;;  %5008 = vpow2.f32 %v4503_v12 }
 0x3a9   :  { %v1156_v18 = vadd.f32 1.0, %v5007_v14 }
 0x3aa   :  { %5010 = vrcp.f32 %v1137_v15  ;;  %v1149_v42 = vand.u32 2147483648, %v1137_v15  ;;  %v1147_v46 = vand.u32 2147483647, %v1137_v15  ;;  %vm1143_vm10 = vweird.f32 %v1137_v15 }
 0x3ab   :  { %5012 = vrcp.f32 %v1156_v18  ;;  %v1116_v25 = vpop.f32.mrf.mxu2  ;;  %v1131_v26 = vpop.f32.mrf.mxu3  ;;  %v1168_v44 = vand.u32 2147483648, %v1156_v18  ;;  %v1166_v48 = vand.u32 2147483647, %v1156_v18  ;;  %vm1162_vm11 = vweird.f32 %v1156_v18 }
 0x3ac   :  { %v1150_v50 = vor.u32 1.1754944e-38, %v1149_v42  ;;  %vm1148_vm15 = vcmp.eq.f32.partialorder %v1147_v46, 8.507059e+37 }
 0x3ad   :  { %v1169_v53 = vor.u32 1.1754944e-38, %v1168_v44  ;;  %vm1167_vm0 = vcmp.eq.f32.partialorder %v1166_v48, 8.507059e+37 }
 0x3ae   :  { %v5009_v27 = vpop.eup %5008 }
 0x3af   :  { %v1176_v32 = vadd.f32 1.0, %v5009_v27  ;;  %v1232_v27 = vld [vmem:[#allocation4 + $0x28] sm:$0xff] }
 0x3b0   :  { %v5011_v33 = vpop.eup %5010 }
 0x3b1   :  { %v5013_v37 = vpop.eup %5012  ;;  %v1139_v38 = vmul.f32 %v5011_v33, %v1137_v15  ;;  %5014 = vrcp.f32 %v1176_v32  ;;  %vm1144_vm8 = vweird.f32 %v5011_v33  ;;  %v1188_v17 = vand.u32 2147483648, %v1176_v32 }
 0x3b2   :  { %v1158_v39 = vmul.f32 %v5013_v37, %v1156_v18  ;;  %5016 = vtanh.f32 %v1118_v34  ;;  %vm1163_vm9 = vweird.f32 %v5013_v37  ;;  %vm1145_vm12 = vmor %vm1143_vm10, %vm1144_vm8  ;;  %vm1182_vm3 = vweird.f32 %v1176_v32 }
 0x3b3   :  { %v1140_v40 = vsub.f32 1.0, %v1139_v38  ;;  %vm1164_vm13 = vmor %vm1162_vm11, %vm1163_vm9  ;;  %v1186_v19 = vand.u32 2147483647, %v1176_v32  ;;  %v1189_v5 = vor.u32 1.1754944e-38, %v1188_v17 }
 0x3b4   :  { %v1159_v41 = vsub.f32 1.0, %v1158_v39 }
 0x3b5   :  { %v1141_v45 = vmul.f32 %v5011_v33, %v1140_v40  ;;  %vm1187_vm5 = vcmp.eq.f32.partialorder %v1186_v19, 8.507059e+37 }
 0x3b6   :  { %v1160_v47 = vmul.f32 %v5013_v37, %v1159_v41 }
 0x3b7   :  { %v5015_v29 = vpop.eup %5014  ;;  %v1142_v49 = vadd.f32 %v5011_v33, %v1141_v45 }
 0x3b8   :  { %v1161_v51 = vadd.f32 %v5013_v37, %v1160_v47  ;;  %v1178_v52 = vmul.f32 %v5015_v29, %v1176_v32  ;;  %v5017_v35 = vpop.eup %5016  ;;  %vm1183_vm2 = vweird.f32 %v5015_v29 }
 0x3b9   :  { %v1146_v54 = vsel %vm1145_vm12, %v5011_v33, %v1142_v49  ;;  %vm1184_vm4 = vmor %vm1182_vm3, %vm1183_vm2 }
 0x3ba   :  { %v1151_v56 = vsel %vm1148_vm15, %v1150_v50, %v1146_v54  ;;  %v1165_v43 = vsel %vm1164_vm13, %v5013_v37, %v1161_v51  ;;  %v1179_v57 = vsub.f32 1.0, %v1178_v52 }
 0x3bb   :  { %v1170_v58 = vsel %vm1167_vm0, %v1169_v53, %v1165_v43  ;;  %v1193_v59 = vmul.f32 %v5017_v35, %v1151_v56 }
 0x3bc   :  { %v1192_v60 = vmul.f32 %v1170_v58, %v5832_v55  ;;  %v1180_v61 = vmul.f32 %v5015_v29, %v1179_v57  ;;  %v1199_v55 = vld [vmem:[#allocation2 + $0x28] sm:$0xff] }
 0x3be   :  { %v5865_v62 = vadd.f32 %v1193_v59, %v1192_v60  ;;  %v1181_v63 = vadd.f32 %v5015_v29, %v1180_v61 }
 0x3c0   :  { %5018 = vtanh.f32 %v5865_v62  ;;  %v1185_v20 = vsel %vm1184_vm4, %v5015_v29, %v1181_v63 }
 0x3c1   :  { %v1190_v6 = vsel %vm1187_vm5, %v1189_v5, %v1185_v20 }
 0x3c6   :  { %v5019_v21 = vpop.eup %5018 }
 0x3c7   :  { %v1196_v22 = vmul.f32 %v5019_v21, %v1190_v6 }
 0x3c9   :  { %v1197_v7 = vpack.c.bf16 %v1196_v22, %v1196_v22 }
 0x3cb   :  { %1198 = vst.msk [vmem:[#allocation6 + $0x10] sm:$0xf] %vm685_vm14, %v1197_v7  ;;  %4504 = vmatmul.msk.bf16.vlgmr.msra.gmra.mxu0 %vm257_vm1, %v1197_v7  ;;  %4505 = vmatmul.msk.bf16.vlgmr.msra.gmra.mxu1 %vm257_vm1, %v1197_v7 }
 0x3cc   :  { %4506 = vmatmul.msk.bf16.vlgmr.msra.gmra.mxu2 %vm257_vm1, %v1197_v7  ;;  %4507 = vmatmul.msk.bf16.vlgmr.msra.gmra.mxu3 %vm257_vm1, %v1197_v7 }
 0x3cd   :  { %1465 = vmatpush.bf16.msra.mxu0 %v5840_v36  ;;  %1480 = vmatpush.bf16.msra.mxu1 %v5843_v30 }
 0x3ce   :  { %1510 = vmatpush.bf16.msra.mxu3 %v5846_v0  ;;  %1495 = vmatpush.bf16.msra.mxu2 %v5849_v1  ;;  %v1247_v1 = vld [vmem:[#allocation5 + $0x28] sm:$0xff] }
 0x3d1   :  { %1466 = vmatpush.bf16.msra.mxu0 %v5852_v2  ;;  %1481 = vmatpush.bf16.msra.mxu1 %v5855_v3 }
 0x3d2   :  { %1496 = vmatpush.bf16.msra.mxu2 %v5858_v16  ;;  %1511 = vmatpush.bf16.msra.mxu3 %v5861_v4 }
 0x448   :  { %v1212_v24 = vpop.f32.mrf.mxu0  ;;  %v1227_v23 = vpop.f32.mrf.mxu1 }
 0x449   :  { %v1216_v9 = vadd.f32 %v1212_v24, %v1199_v55  ;;  %v1231_v36 = vadd.f32 %v1227_v23, %v1217_v8  ;;  %v1345_v24 = vld [vmem:[#allocation3 + $0x30] sm:$0xff] }
 0x44b   :  { %v4508_v10 = vmul.f32 -1.442695, %v1216_v9  ;;  %v4509_v30 = vmul.f32 -1.442695, %v1231_v36 }
 0x44d   :  { %5020 = vpow2.f32 %v4508_v10 }
 0x44e   :  { %5022 = vpow2.f32 %v4509_v30 }
 0x44f   :  { %v1242_v0 = vpop.f32.mrf.mxu2  ;;  %v1257_v11 = vpop.f32.mrf.mxu3 }
 0x450   :  { %v1261_v2 = vadd.f32 %v1257_v11, %v1247_v1  ;;  %v1214_v12 = vpop.f32.mrf.mxu0  ;;  %v1229_v3 = vpop.f32.mrf.mxu1  ;;  %v1246_v33 = vadd.f32 %v1242_v0, %v1232_v27  ;;  %v1375_v0 = vld [vmem:[#allocation5 + $0x30] sm:$0xff] }
 0x451   :  { %v4882_v27 = vld [vmem:[#allocation12 + $0x28] sm:$0xff] }
 0x452   :  { %v4510_v13 = vmul.f32 -1.442695, %v1261_v2 }
 0x453   :  { %v5021_v16 = vpop.eup %5020 }
 0x454   :  { %v5023_v14 = vpop.eup %5022  ;;  %v1265_v4 = vadd.f32 1.0, %v5021_v16  ;;  %5024 = vpow2.f32 %v4510_v13 }
 0x455   :  { %v1284_v15 = vadd.f32 1.0, %v5023_v14 }
 0x456   :  { %5026 = vrcp.f32 %v1265_v4  ;;  %v1277_v41 = vand.u32 2147483648, %v1265_v4  ;;  %v1275_v45 = vand.u32 2147483647, %v1265_v4  ;;  %vm1271_vm8 = vweird.f32 %v1265_v4 }
 0x457   :  { %5028 = vrcp.f32 %v1284_v15  ;;  %v1244_v18 = vpop.f32.mrf.mxu2  ;;  %v1259_v25 = vpop.f32.mrf.mxu3  ;;  %v1296_v42 = vand.u32 2147483648, %v1284_v15  ;;  %v1294_v47 = vand.u32 2147483647, %v1284_v15  ;;  %vm1290_vm9 = vweird.f32 %v1284_v15 }
 0x458   :  { %v1278_v49 = vor.u32 1.1754944e-38, %v1277_v41  ;;  %vm1276_vm12 = vcmp.eq.f32.partialorder %v1275_v45, 8.507059e+37  ;;  %v4878_v25 = vld [vmem:[#allocation12 + $0x8] sm:$0xff] }
 0x459   :  { %v1297_v52 = vor.u32 1.1754944e-38, %v1296_v42  ;;  %vm1295_vm13 = vcmp.eq.f32.partialorder %v1294_v47, 8.507059e+37 }
 0x45a   :  { %v5025_v26 = vpop.eup %5024 }
 0x45b   :  { %v1304_v31 = vadd.f32 1.0, %v5025_v26  ;;  %v4880_v26 = vld [vmem:[#allocation12 + $0x18] sm:$0xff] }
 0x45c   :  { %v5027_v32 = vpop.eup %5026 }
 0x45d   :  { %v5029_v34 = vpop.eup %5028  ;;  %v1267_v37 = vmul.f32 %v5027_v32, %v1265_v4  ;;  %5030 = vrcp.f32 %v1304_v31  ;;  %vm1272_vm6 = vweird.f32 %v5027_v32  ;;  %v1316_v17 = vand.u32 2147483648, %v1304_v31 }
 0x45e   :  { %v1286_v38 = vmul.f32 %v5029_v34, %v1284_v15  ;;  %5032 = vtanh.f32 %v1246_v33  ;;  %vm1291_vm7 = vweird.f32 %v5029_v34  ;;  %vm1273_vm10 = vmor %vm1271_vm8, %vm1272_vm6  ;;  %vm1310_vm0 = vweird.f32 %v1304_v31  ;;  %v4877_v33 = vld [vmem:[#allocation12] sm:$0xff] }
 0x45f   :  { %v1268_v39 = vsub.f32 1.0, %v1267_v37  ;;  %vm1292_vm11 = vmor %vm1290_vm9, %vm1291_vm7  ;;  %v1314_v19 = vand.u32 2147483647, %v1304_v31  ;;  %v1317_v5 = vor.u32 1.1754944e-38, %v1316_v17  ;;  %v1360_v37 = vld [vmem:[#allocation4 + $0x30] sm:$0xff] }
 0x460   :  { %v1287_v40 = vsub.f32 1.0, %v1286_v38 }
 0x461   :  { %v1269_v44 = vmul.f32 %v5027_v32, %v1268_v39  ;;  %vm1315_vm3 = vcmp.eq.f32.partialorder %v1314_v19, 8.507059e+37  ;;  %v4881_v39 = vld [vmem:[#allocation12 + $0x20] sm:$0xff] }
 0x462   :  { %v1288_v46 = vmul.f32 %v5029_v34, %v1287_v40  ;;  %v4883_v40 = vld [vmem:[#allocation12 + $0x30] sm:$0xff] }
 0x463   :  { %v5031_v48 = vpop.eup %5030  ;;  %v1270_v29 = vadd.f32 %v5027_v32, %v1269_v44 }
 0x464   :  { %v1289_v50 = vadd.f32 %v5029_v34, %v1288_v46  ;;  %v1306_v51 = vmul.f32 %v5031_v48, %v1304_v31  ;;  %v5033_v54 = vpop.eup %5032  ;;  %vm1311_vm15 = vweird.f32 %v5031_v48  ;;  %v4884_v31 = vld [vmem:[#allocation12 + $0x38] sm:$0xff] }
 0x465   :  { %v1274_v53 = vsel %vm1273_vm10, %v5027_v32, %v1270_v29  ;;  %vm1312_vm2 = vmor %vm1310_vm0, %vm1311_vm15 }
 0x466   :  { %v1279_v35 = vsel %vm1276_vm12, %v1278_v49, %v1274_v53  ;;  %v1293_v56 = vsel %vm1292_vm11, %v5029_v34, %v1289_v50  ;;  %v1307_v43 = vsub.f32 1.0, %v1306_v51  ;;  %v4879_v34 = vld [vmem:[#allocation12 + $0x10] sm:$0xff] }
 0x467   :  { %v1298_v57 = vsel %vm1295_vm13, %v1297_v52, %v1293_v56  ;;  %v1321_v58 = vmul.f32 %v5033_v54, %v1279_v35 }
 0x468   :  { %v1320_v59 = vmul.f32 %v1298_v57, %v5865_v62  ;;  %v1308_v60 = vmul.f32 %v5031_v48, %v1307_v43  ;;  %v1327_v62 = vld [vmem:[#allocation2 + $0x30] sm:$0xff] }
 0x46a   :  { %v5882_v61 = vadd.f32 %v1321_v58, %v1320_v59  ;;  %v1309_v63 = vadd.f32 %v5031_v48, %v1308_v60 }
 0x46c   :  { %5034 = vtanh.f32 %v5882_v61  ;;  %v1313_v20 = vsel %vm1312_vm2, %v5031_v48, %v1309_v63 }
 0x46d   :  { %v1318_v6 = vsel %vm1315_vm3, %v1317_v5, %v1313_v20 }
 0x472   :  { %v5035_v21 = vpop.eup %5034 }
 0x473   :  { %v1324_v22 = vmul.f32 %v5035_v21, %v1318_v6 }
 0x475   :  { %v1325_v7 = vpack.c.bf16 %v1324_v22, %v1324_v22 }
 0x477   :  { %1326 = vst.msk [vmem:[#allocation6 + $0x14] sm:$0xf] %vm685_vm14, %v1325_v7  ;;  %4511 = vmatmul.msk.bf16.vlgmr.msrb.gmra.mxu0 %vm257_vm1, %v1325_v7  ;;  %4512 = vmatmul.msk.bf16.vlgmr.msrb.gmra.mxu1 %vm257_vm1, %v1325_v7 }
 0x478   :  { %4513 = vmatmul.msk.bf16.vlgmr.msrb.gmra.mxu2 %vm257_vm1, %v1325_v7  ;;  %4514 = vmatmul.msk.bf16.vlgmr.msrb.gmra.mxu3 %vm257_vm1, %v1325_v7 }
 0x479   :  { %1649 = vmatpush.bf16.msrb.mxu0 %v4878_v25  ;;  %1708 = vmatpush.bf16.msrb.mxu1 %v4880_v26 }
 0x47a   :  { %1767 = vmatpush.bf16.msrb.mxu2 %v4882_v27  ;;  %1826 = vmatpush.bf16.msrb.mxu3 %v4884_v31 }
 0x47d   :  { %1650 = vmatpush.bf16.msrb.mxu0 %v4877_v33  ;;  %1709 = vmatpush.bf16.msrb.mxu1 %v4879_v34 }
 0x47e   :  { %1768 = vmatpush.bf16.msrb.mxu2 %v4881_v39  ;;  %1827 = vmatpush.bf16.msrb.mxu3 %v4883_v40  ;;  %v5917_v39 = vld [vmem:[#allocation15 + $0x1] ss:$0 sm:$0xff]  ;;  %v5921_v40 = vld [vmem:[#allocation14 + $0x8] sm:$0xff] }
 0x4f4   :  { %v1340_v55 = vpop.f32.mrf.mxu0  ;;  %v1355_v8 = vpop.f32.mrf.mxu1 }
 0x4f5   :  { %v1344_v23 = vadd.f32 %v1340_v55, %v1327_v62  ;;  %v1359_v9 = vadd.f32 %v1355_v8, %v1345_v24 }
 0x4f7   :  { %v4515_v36 = vmul.f32 -1.442695, %v1344_v23  ;;  %v4516_v10 = vmul.f32 -1.442695, %v1359_v9 }
 0x4f9   :  { %5036 = vpow2.f32 %v4515_v36 }
 0x4fa   :  { %5038 = vpow2.f32 %v4516_v10 }
 0x4fb   :  { %v1370_v30 = vpop.f32.mrf.mxu2  ;;  %v1385_v1 = vpop.f32.mrf.mxu3 }
 0x4fc   :  { %v1389_v11 = vadd.f32 %v1385_v1, %v1375_v0  ;;  %v1342_v2 = vpop.f32.mrf.mxu0  ;;  %v1357_v12 = vpop.f32.mrf.mxu1  ;;  %v1374_v42 = vadd.f32 %v1370_v30, %v1360_v37  ;;  %v4874_v30 = vld [vmem:[#allocation6 + $0x8] sm:$0xff]  ;;  %v4875_v0 = vld [vmem:[#allocation6 + $0x10] sm:$0xff]  ;;  %v1455_v1 = vld [vmem:[#allocation2 + $0x38] sm:$0xff] }
 0x4fd   :  { %v1473_v2 = vld [vmem:[#allocation3 + $0x38] sm:$0xff] }
 0x4fe   :  { %v4517_v3 = vmul.f32 -1.442695, %v1389_v11 }
 0x4ff   :  { %v5037_v13 = vpop.eup %5036 }
 0x500   :  { %v5039_v16 = vpop.eup %5038  ;;  %v1393_v14 = vadd.f32 1.0, %v5037_v13  ;;  %5040 = vpow2.f32 %v4517_v3 }
 0x501   :  { %v1412_v4 = vadd.f32 1.0, %v5039_v16 }
 0x502   :  { %5042 = vrcp.f32 %v1393_v14  ;;  %v1405_v29 = vand.u32 2147483648, %v1393_v14  ;;  %v1403_v51 = vand.u32 2147483647, %v1393_v14  ;;  %vm1399_vm6 = vweird.f32 %v1393_v14 }
 0x503   :  { %5044 = vrcp.f32 %v1412_v4  ;;  %v1372_v15 = vpop.f32.mrf.mxu2  ;;  %v1387_v18 = vpop.f32.mrf.mxu3  ;;  %v1424_v49 = vand.u32 2147483648, %v1412_v4  ;;  %v1422_v53 = vand.u32 2147483647, %v1412_v4  ;;  %vm1418_vm7 = vweird.f32 %v1412_v4 }
 0x504   :  { %v1406_v56 = vor.u32 1.1754944e-38, %v1405_v29  ;;  %vm1404_vm10 = vcmp.eq.f32.partialorder %v1403_v51, 8.507059e+37  ;;  %v1503_v15 = vld [vmem:[#allocation5 + $0x38] sm:$0xff] }
 0x505   :  { %v1425_v58 = vor.u32 1.1754944e-38, %v1424_v49  ;;  %vm1423_vm11 = vcmp.eq.f32.partialorder %v1422_v53, 8.507059e+37  ;;  %v5935_v51 = vld [vmem:[#allocation14 + $0x10] sm:$0xff] }
 0x506   :  { %v5041_v32 = vpop.eup %5040  ;;  %v1488_v53 = vld [vmem:[#allocation4 + $0x38] sm:$0xff] }
 0x507   :  { %v1432_v38 = vadd.f32 1.0, %v5041_v32 }
 0x508   :  { %v5043_v41 = vpop.eup %5042 }
 0x509   :  { %v5045_v44 = vpop.eup %5044  ;;  %v1395_v45 = vmul.f32 %v5043_v41, %v1393_v14  ;;  %5046 = vrcp.f32 %v1432_v38  ;;  %vm1400_vm4 = vweird.f32 %v5043_v41  ;;  %v1444_v62 = vand.u32 2147483648, %v1432_v38 }
 0x50a   :  { %v1414_v46 = vmul.f32 %v5045_v44, %v1412_v4  ;;  %5048 = vtanh.f32 %v1374_v42  ;;  %vm1419_vm5 = vweird.f32 %v5045_v44  ;;  %vm1401_vm8 = vmor %vm1399_vm6, %vm1400_vm4  ;;  %vm1438_vm13 = vweird.f32 %v1432_v38  ;;  %v5925_v42 = vld [vmem:[#allocation14 + $0x38] sm:$0xff] }
 0x50b   :  { %v1396_v47 = vsub.f32 1.0, %v1395_v45  ;;  %vm1420_vm9 = vmor %vm1418_vm7, %vm1419_vm5  ;;  %v1442_v55 = vand.u32 2147483647, %v1432_v38  ;;  %v1445_v8 = vor.u32 1.1754944e-38, %v1444_v62 }
 0x50c   :  { %v1415_v48 = vsub.f32 1.0, %v1414_v46 }
 0x50d   :  { %v1397_v50 = vmul.f32 %v5043_v41, %v1396_v47  ;;  %vm1443_vm0 = vcmp.eq.f32.partialorder %v1442_v55, 8.507059e+37 }
 0x50e   :  { %v1416_v52 = vmul.f32 %v5045_v44, %v1415_v48  ;;  %v5927_v48 = vld [vmem:[#allocation14 + $0x28] sm:$0xff] }
 0x50f   :  { %v5047_v54 = vpop.eup %5046  ;;  %v1398_v35 = vadd.f32 %v5043_v41, %v1397_v50  ;;  %v5933_v50 = vld [vmem:[#allocation14] sm:$0xff] }
 0x510   :  { %v1417_v43 = vadd.f32 %v5045_v44, %v1416_v52  ;;  %v1434_v57 = vmul.f32 %v5047_v54, %v1432_v38  ;;  %v5049_v60 = vpop.eup %5048  ;;  %vm1439_vm12 = vweird.f32 %v5047_v54  ;;  %v5915_v38 = vld [vmem:[#allocation15] ss:$0 sm:$0xff] }
 0x511   :  { %v1402_v59 = vsel %vm1401_vm8, %v5043_v41, %v1398_v35  ;;  %vm1440_vm15 = vmor %vm1438_vm13, %vm1439_vm12  ;;  %v5923_v41 = vld [vmem:[#allocation14 + $0x18] sm:$0xff] }
 0x512   :  { %v1407_v63 = vsel %vm1404_vm10, %v1406_v56, %v1402_v59  ;;  %v1421_v17 = vsel %vm1420_vm9, %v5045_v44, %v1417_v43  ;;  %v1435_v19 = vsub.f32 1.0, %v1434_v57  ;;  %v5945_v57 = vld [vmem:[#allocation15 + $0x2] ss:$0 sm:$0xff] }
 0x513   :  { %v1426_v20 = vsel %vm1423_vm11, %v1425_v58, %v1421_v17  ;;  %v1449_v5 = vmul.f32 %v5049_v60, %v1407_v63  ;;  %v5949_v60 = vld [vmem:[#allocation15 + $0x3] ss:$0 sm:$0xff] }
 0x514   :  { %v1448_v21 = vmul.f32 %v1426_v20, %v5882_v61  ;;  %v1436_v6 = vmul.f32 %v5047_v54, %v1435_v19  ;;  %v4873_v61 = vld [vmem:[#allocation6] sm:$0xff] }
 0x516   :  { %v5891_v22 = vadd.f32 %v1449_v5, %v1448_v21  ;;  %v1437_v7 = vadd.f32 %v5047_v54, %v1436_v6 }
 0x518   :  { %5050 = vtanh.f32 %v5891_v22  ;;  %v1441_v24 = vsel %vm1440_vm15, %v5047_v54, %v1437_v7  ;;  %v5939_v54 = vld [vmem:[#allocation14 + $0x30] sm:$0xff] }
 0x519   :  { %v1446_v9 = vsel %vm1443_vm0, %v1445_v8, %v1441_v24 }
 0x51e   :  { %v5051_v23 = vpop.eup %5050 }
 0x51f   :  { %v1452_v36 = vmul.f32 %v5051_v23, %v1446_v9 }
 0x521   :  { %v1453_v10 = vpack.c.bf16 %v1452_v36, %v1452_v36 }
 0x523   :  { %1454 = vst.msk [vmem:[#allocation6 + $0x18] sm:$0xf] %vm685_vm14, %v1453_v10  ;;  %4518 = vmatmul.msk.bf16.vlgmr.msra.gmra.mxu0 %vm257_vm1, %v1453_v10  ;;  %4519 = vmatmul.msk.bf16.vlgmr.msra.gmra.mxu1 %vm257_vm1, %v1453_v10 }
 0x524   :  { %4520 = vmatmul.msk.bf16.vlgmr.msra.gmra.mxu2 %vm257_vm1, %v1453_v10  ;;  %4521 = vmatmul.msk.bf16.vlgmr.msra.gmra.mxu3 %vm257_vm1, %v1453_v10 }
 0x525   :  { %1895 = vmatpush.bf16.msra.mxu0 %v5921_v40  ;;  %1922 = vmatpush.bf16.msra.mxu1 %v5923_v41 }
 0x526   :  { %1976 = vmatpush.bf16.msra.mxu3 %v5925_v42  ;;  %1949 = vmatpush.bf16.msra.mxu2 %v5927_v48 }
 0x529   :  { %1896 = vmatpush.bf16.msra.mxu0 %v5933_v50  ;;  %1923 = vmatpush.bf16.msra.mxu1 %v5935_v51 }
 0x52a   :  { %1977 = vmatpush.bf16.msra.mxu3 %v5939_v54 }
 0x533   :  { %4549 = vmatmul.msk.bf16.vlgmr.msrb.gmra.mxu0 %vm257_vm1, %v4873_v61  ;;  %4561 = vmatmul.msk.bf16.vlgmr.msrb.gmra.mxu1 %vm257_vm1, %v4873_v61 }
 0x534   :  { %4573 = vmatmul.msk.bf16.vlgmr.msrb.gmra.mxu2 %vm257_vm1, %v4873_v61  ;;  %4585 = vmatmul.msk.bf16.vlgmr.msrb.gmra.mxu3 %vm257_vm1, %v4873_v61 }
 0x535   :  { %2059 = vmatpush.bf16.msrb.mxu0 %v5921_v40  ;;  %2074 = vmatpush.bf16.msrb.mxu1 %v5923_v41 }
 0x536   :  { %2104 = vmatpush.bf16.msrb.mxu3 %v5925_v42 }
 0x539   :  { %2060 = vmatpush.bf16.msrb.mxu0 %v5933_v50  ;;  %2075 = vmatpush.bf16.msrb.mxu1 %v5935_v51 }
 0x53a   :  { %2105 = vmatpush.bf16.msrb.mxu3 %v5939_v54 }
 0x543   :  { %4550 = vmatmul.msk.bf16.gmra.mxu0 %vm257_vm1, %v4874_v30  ;;  %4562 = vmatmul.msk.bf16.gmra.mxu1 %vm257_vm1, %v4874_v30 }
 0x544   :  { %4574 = vmatmul.msk.bf16.gmra.mxu2 %vm257_vm1, %v4874_v30  ;;  %4586 = vmatmul.msk.bf16.gmra.mxu3 %vm257_vm1, %v4874_v30 }
 0x553   :  { %4551 = vmatmul.msk.bf16.gmra.mxu0 %vm257_vm1, %v4875_v0  ;;  %4563 = vmatmul.msk.bf16.gmra.mxu1 %vm257_vm1, %v4875_v0 }
 0x554   :  { %4575 = vmatmul.msk.bf16.gmra.mxu2 %vm257_vm1, %v4875_v0  ;;  %4587 = vmatmul.msk.bf16.gmra.mxu3 %vm257_vm1, %v4875_v0 }
 0x5a0   :  { %v1468_v11 = vpop.f32.mrf.mxu0  ;;  %v1483_v12 = vpop.f32.mrf.mxu1 }
 0x5a1   :  { %v1472_v3 = vadd.f32 %v1468_v11, %v1455_v1  ;;  %v1487_v13 = vadd.f32 %v1483_v12, %v1473_v2  ;;  %v5972_v1 = vld [vmem:[#allocation14 + $0x20] sm:$0xff] }
 0x5a2   :  { %1950 = vmatpush.bf16.msra.mxu2 %v5972_v1 }
 0x5a3   :  { %v4522_v16 = vmul.f32 -1.442695, %v1472_v3  ;;  %v4523_v14 = vmul.f32 -1.442695, %v1487_v13 }
 0x5a5   :  { %5052 = vpow2.f32 %v4522_v16 }
 0x5a6   :  { %5054 = vpow2.f32 %v4523_v14  ;;  %2089 = vmatpush.bf16.msrb.mxu2 %v5927_v48 }
 0x5a7   :  { %v1498_v4 = vpop.f32.mrf.mxu2  ;;  %v1513_v18 = vpop.f32.mrf.mxu3 }
 0x5a8   :  { %v1517_v25 = vadd.f32 %v1513_v18, %v1503_v15  ;;  %v1470_v26 = vpop.f32.mrf.mxu0  ;;  %v1485_v27 = vpop.f32.mrf.mxu1  ;;  %v1502_v35 = vadd.f32 %v1498_v4, %v1488_v53 }
 0x5aa   :  { %v4524_v31 = vmul.f32 -1.442695, %v1517_v25  ;;  %2090 = vmatpush.bf16.msrb.mxu2 %v5972_v1 }
 0x5ab   :  { %v5053_v32 = vpop.eup %5052 }
 0x5ac   :  { %v5055_v33 = vpop.eup %5054  ;;  %v5911_v34 = vadd.f32 1.0, %v5053_v32  ;;  %5056 = vpow2.f32 %v4524_v31 }
 0x5ad   :  { %v5913_v37 = vadd.f32 1.0, %v5055_v33 }
 0x5ae   :  { %5058 = vrcp.f32 %v5911_v34  ;;  %v1531_v19 = vand.u32 2147483647, %v5911_v34  ;;  %v1533_v20 = vand.u32 2147483648, %v5911_v34  ;;  %vm1527_vm4 = vweird.f32 %v5911_v34 }
 0x5af   :  { %5060 = vrcp.f32 %v5913_v37  ;;  %v1500_v44 = vpop.f32.mrf.mxu2  ;;  %v1515_v45 = vpop.f32.mrf.mxu3  ;;  %v1552_v7 = vand.u32 2147483648, %v5913_v37  ;;  %v1550_v61 = vand.u32 2147483647, %v5913_v37  ;;  %vm1546_vm5 = vweird.f32 %v5913_v37 }
 0x5b0   :  { %v1652_v46 = vpop.f32.mrf.mxu0  ;;  %v1711_v47 = vpop.f32.mrf.mxu1  ;;  %v1534_v11 = vor.u32 1.1754944e-38, %v1533_v20  ;;  %vm1532_vm8 = vcmp.eq.f32.partialorder %v1531_v19, 8.507059e+37 }
 0x5b1   :  { %v1653_v29 = vadd.f32 %v5915_v38, %v1652_v46  ;;  %v1712_v49 = vadd.f32 %v5917_v39, %v1711_v47  ;;  %v1553_v13 = vor.u32 1.1754944e-38, %v1552_v7  ;;  %vm1551_vm9 = vcmp.eq.f32.partialorder %v1550_v61, 8.507059e+37 }
 0x5b2   :  { %v5057_v52 = vpop.eup %5056 }
 0x5b3   :  { %v5941_v56 = vadd.f32 1.0, %v5057_v52  ;;  %1672 = vst.msk [vmem:[#allocation2] sm:$0xff] %vm257_vm1, %v1653_v29 }
 0x5b4   :  { %v5059_v43 = vpop.eup %5058  ;;  %1731 = vst.msk [vmem:[#allocation3] sm:$0xff] %vm257_vm1, %v1712_v49 }
 0x5b5   :  { %v5061_v58 = vpop.eup %5060  ;;  %v1523_v59 = vmul.f32 %v5059_v43, %v5911_v34  ;;  %5062 = vrcp.f32 %v5941_v56  ;;  %vm1528_vm2 = vweird.f32 %v5059_v43  ;;  %vm1566_vm11 = vweird.f32 %v5941_v56 }
 0x5b6   :  { %v1542_v63 = vmul.f32 %v5061_v58, %v5913_v37  ;;  %5064 = vtanh.f32 %v1502_v35  ;;  %vm1547_vm3 = vweird.f32 %v5061_v58  ;;  %vm1529_vm6 = vmor %vm1527_vm4, %vm1528_vm2  ;;  %v1570_v49 = vand.u32 2147483647, %v5941_v56 }
 0x5b7   :  { %v1524_v17 = vsub.f32 1.0, %v1523_v59  ;;  %v1770_v5 = vpop.f32.mrf.mxu2  ;;  %v1829_v21 = vpop.f32.mrf.mxu3  ;;  %vm1548_vm7 = vmor %vm1546_vm5, %vm1547_vm3 }
 0x5b8   :  { %v1543_v6 = vsub.f32 1.0, %v1542_v63  ;;  %v1771_v62 = vadd.f32 %v5945_v57, %v1770_v5  ;;  %v1654_v55 = vpop.f32.mrf.mxu0  ;;  %v1713_v24 = vpop.f32.mrf.mxu1  ;;  %v1830_v23 = vadd.f32 %v5949_v60, %v1829_v21  ;;  %vm1571_vm13 = vcmp.eq.f32.partialorder %v1570_v49, 8.507059e+37 }
 0x5b9   :  { %v1525_v8 = vmul.f32 %v5059_v43, %v1524_v17  ;;  %v1655_v9 = vadd.f32 %v5915_v38, %v1654_v55  ;;  %v1714_v36 = vadd.f32 %v5917_v39, %v1713_v24 }
 0x5ba   :  { %v1544_v10 = vmul.f32 %v5061_v58, %v1543_v6  ;;  %1790 = vst.msk [vmem:[#allocation4] sm:$0xff] %vm257_vm1, %v1771_v62 }
 0x5bb   :  { %v5968_v30 = vpop.eup %5062  ;;  %v1526_v0 = vadd.f32 %v5059_v43, %v1525_v8  ;;  %1849 = vst.msk [vmem:[#allocation5] sm:$0xff] %vm257_vm1, %v1830_v23 }
 0x5bc   :  { %v1545_v2 = vadd.f32 %v5061_v58, %v1544_v10  ;;  %v1562_v12 = vmul.f32 %v5968_v30, %v5941_v56  ;;  %1673 = vst.msk [vmem:[#allocation2 + $0x8] sm:$0xff] %vm257_vm1, %v1655_v9  ;;  %v5065_v3 = vpop.eup %5064  ;;  %vm1567_vm10 = vweird.f32 %v5968_v30 }
 0x5bd   :  { %v1530_v16 = vsel %vm1529_vm6, %v5059_v43, %v1526_v0  ;;  %1732 = vst.msk [vmem:[#allocation3 + $0x8] sm:$0xff] %vm257_vm1, %v1714_v36  ;;  %vm1568_vm12 = vmor %vm1566_vm11, %vm1567_vm10 }
 0x5be   :  { %v1535_v14 = vsel %vm1532_vm8, %v1534_v11, %v1530_v16  ;;  %v1549_v4 = vsel %vm1548_vm7, %v5061_v58, %v1545_v2  ;;  %v1563_v15 = vsub.f32 1.0, %v1562_v12 }
 0x5bf   :  { %v1554_v18 = vsel %vm1551_vm9, %v1553_v13, %v1549_v4  ;;  %v1577_v25 = vmul.f32 %v5065_v3, %v1535_v14  ;;  %v1772_v26 = vpop.f32.mrf.mxu2  ;;  %v1831_v27 = vpop.f32.mrf.mxu3 }
 0x5c0   :  { %v1576_v31 = vmul.f32 %v1554_v18, %v5891_v22  ;;  %v1564_v32 = vmul.f32 %v5968_v30, %v1563_v15  ;;  %v1773_v33 = vadd.f32 %v5945_v57, %v1772_v26  ;;  %v1832_v34 = vadd.f32 %v5949_v60, %v1831_v27  ;;  %v1657_v37 = vpop.f32.mrf.mxu0  ;;  %v1716_v44 = vpop.f32.mrf.mxu1 }
 0x5c1   :  { %v1658_v45 = vadd.f32 %v5915_v38, %v1657_v37  ;;  %v1717_v46 = vadd.f32 %v5917_v39, %v1716_v44  ;;  %v1572_v22 = vand.u32 2147483648, %v5941_v56 }
 0x5c2   :  { %v1578_v47 = vadd.f32 %v1577_v25, %v1576_v31  ;;  %1791 = vst.msk [vmem:[#allocation4 + $0x8] sm:$0xff] %vm257_vm1, %v1773_v33  ;;  %v1565_v29 = vadd.f32 %v5968_v30, %v1564_v32 }
 0x5c3   :  { %1850 = vst.msk [vmem:[#allocation5 + $0x8] sm:$0xff] %vm257_vm1, %v1832_v34  ;;  %v1573_v43 = vor.u32 1.1754944e-38, %v1572_v22 }
 0x5c4   :  { %5066 = vtanh.f32 %v1578_v47  ;;  %1674 = vst.msk [vmem:[#allocation2 + $0x10] sm:$0xff] %vm257_vm1, %v1658_v45  ;;  %v1569_v52 = vsel %vm1568_vm12, %v5968_v30, %v1565_v29 }
 0x5c5   :  { %1733 = vst.msk [vmem:[#allocation3 + $0x10] sm:$0xff] %vm257_vm1, %v1717_v46  ;;  %v1574_v5 = vsel %vm1571_vm13, %v1573_v43, %v1569_v52  ;;  %v1876_v52 = vld [vmem:[#allocation2] sm:$0xff] }
 0x5c7   :  { %v1775_v53 = vpop.f32.mrf.mxu2  ;;  %v1834_v35 = vpop.f32.mrf.mxu3 }
 0x5c8   :  { %v1776_v58 = vadd.f32 %v5945_v57, %v1775_v53  ;;  %v1835_v59 = vadd.f32 %v5949_v60, %v1834_v35  ;;  %v1659_v63 = vpop.f32.mrf.mxu0  ;;  %v1718_v17 = vpop.f32.mrf.mxu1  ;;  %v1903_v35 = vld [vmem:[#allocation3] sm:$0xff] }
 0x5c9   :  { %v1660_v19 = vadd.f32 %v5915_v38, %v1659_v63  ;;  %v1719_v20 = vadd.f32 %v5917_v39, %v1718_v17  ;;  %v1957_v17 = vld [vmem:[#allocation5] sm:$0xff] }
 0x5ca   :  { %v5067_v56 = vpop.eup %5066  ;;  %1792 = vst.msk [vmem:[#allocation4 + $0x10] sm:$0xff] %vm257_vm1, %v1776_v58 }
 0x5cb   :  { %v1580_v21 = vmul.f32 %v5067_v56, %v1574_v5  ;;  %1851 = vst.msk [vmem:[#allocation5 + $0x10] sm:$0xff] %vm257_vm1, %v1835_v59 }
 0x5cc   :  { %1675 = vst.msk [vmem:[#allocation2 + $0x18] sm:$0xff] %vm257_vm1, %v1660_v19 }
 0x5cd   :  { %v1581_v6 = vpack.c.bf16 %v1580_v21, %v1580_v21  ;;  %1734 = vst.msk [vmem:[#allocation3 + $0x18] sm:$0xff] %vm257_vm1, %v1719_v20 }
 0x5cf   :  { %1582 = vst.msk [vmem:[#allocation6 + $0x1c] sm:$0xf] %vm685_vm14, %v1581_v6  ;;  %v1777_v7 = vpop.f32.mrf.mxu2  ;;  %v1836_v62 = vpop.f32.mrf.mxu3 }
 0x5d0   :  { %v1778_v55 = vadd.f32 %v5945_v57, %v1777_v7  ;;  %v1837_v24 = vadd.f32 %v5949_v60, %v1836_v62  ;;  %v1662_v8 = vpop.f32.mrf.mxu0  ;;  %v1721_v23 = vpop.f32.mrf.mxu1 }
 0x5d1   :  { %v1663_v9 = vadd.f32 %v5915_v38, %v1662_v8  ;;  %v1722_v36 = vadd.f32 %v5917_v39, %v1721_v23  ;;  %v1930_v8 = vld [vmem:[#allocation4] sm:$0xff] }
 0x5d2   :  { %1793 = vst.msk [vmem:[#allocation4 + $0x18] sm:$0xff] %vm257_vm1, %v1778_v55 }
 0x5d3   :  { %1852 = vst.msk [vmem:[#allocation5 + $0x18] sm:$0xff] %vm257_vm1, %v1837_v24 }
 0x5d4   :  { %1676 = vst.msk [vmem:[#allocation2 + $0x20] sm:$0xff] %vm257_vm1, %v1663_v9 }
 0x5d5   :  { %1735 = vst.msk [vmem:[#allocation3 + $0x20] sm:$0xff] %vm257_vm1, %v1722_v36 }
 0x5d6   :  { %v4876_v10 = vld [vmem:[#allocation6 + $0x18] sm:$0xff] }
 0x5d7   :  { %v1780_v61 = vpop.f32.mrf.mxu2  ;;  %v1839_v30 = vpop.f32.mrf.mxu3  ;;  %4552 = vmatmul.msk.bf16.gmra.mxu0 %vm257_vm1, %v4876_v10  ;;  %4564 = vmatmul.msk.bf16.gmra.mxu1 %vm257_vm1, %v4876_v10 }
 0x5d8   :  { %v1781_v0 = vadd.f32 %v5945_v57, %v1780_v61  ;;  %v1840_v11 = vadd.f32 %v5949_v60, %v1839_v30  ;;  %v1664_v2 = vpop.f32.mrf.mxu0  ;;  %v1723_v12 = vpop.f32.mrf.mxu1  ;;  %4576 = vmatmul.msk.bf16.gmra.mxu2 %vm257_vm1, %v4876_v10  ;;  %4588 = vmatmul.msk.bf16.gmra.mxu3 %vm257_vm1, %v4876_v10 }
 0x5d9   :  { %v1665_v3 = vadd.f32 %v5915_v38, %v1664_v2  ;;  %v1724_v13 = vadd.f32 %v5917_v39, %v1723_v12 }
 0x5da   :  { %1794 = vst.msk [vmem:[#allocation4 + $0x20] sm:$0xff] %vm257_vm1, %v1781_v0 }
 0x5db   :  { %1853 = vst.msk [vmem:[#allocation5 + $0x20] sm:$0xff] %vm257_vm1, %v1840_v11 }
 0x5dc   :  { %1677 = vst.msk [vmem:[#allocation2 + $0x28] sm:$0xff] %vm257_vm1, %v1665_v3 }
 0x5dd   :  { %1736 = vst.msk [vmem:[#allocation3 + $0x28] sm:$0xff] %vm257_vm1, %v1724_v13 }
 0x5df   :  { %v1782_v16 = vpop.f32.mrf.mxu2  ;;  %v1841_v14 = vpop.f32.mrf.mxu3 }
 0x5e0   :  { %v1783_v4 = vadd.f32 %v5945_v57, %v1782_v16  ;;  %v1842_v15 = vadd.f32 %v5949_v60, %v1841_v14 }
 0x5e2   :  { %1795 = vst.msk [vmem:[#allocation4 + $0x28] sm:$0xff] %vm257_vm1, %v1783_v4 }
 0x5e3   :  { %1854 = vst.msk [vmem:[#allocation5 + $0x28] sm:$0xff] %vm257_vm1, %v1842_v15 }
 0x5e7   :  { %1897 = vmatmul.bf16.vlgmr.msra.gmra.mxu0 %v5535_v28  ;;  %1924 = vmatmul.bf16.vlgmr.msra.gmra.mxu1 %v5535_v28 }
 0x5e8   :  { %1951 = vmatmul.bf16.vlgmr.msra.gmra.mxu2 %v5535_v28  ;;  %1978 = vmatmul.bf16.vlgmr.msra.gmra.mxu3 %v5535_v28 }
 0x5e9   :  { %2187 = vmatpush.bf16.msra.mxu0 %v5921_v40  ;;  %2202 = vmatpush.bf16.msra.mxu1 %v5923_v41 }
 0x5ea   :  { %2232 = vmatpush.bf16.msra.mxu3 %v5925_v42  ;;  %2217 = vmatpush.bf16.msra.mxu2 %v5927_v48 }
 0x5ed   :  { %2188 = vmatpush.bf16.msra.mxu0 %v5933_v50  ;;  %2203 = vmatpush.bf16.msra.mxu1 %v5935_v51 }
 0x5ee   :  { %2218 = vmatpush.bf16.msra.mxu2 %v5972_v1  ;;  %2233 = vmatpush.bf16.msra.mxu3 %v5939_v54 }
 0x654   :  { %v1667_v18 = vpop.f32.mrf.mxu0  ;;  %v1726_v25 = vpop.f32.mrf.mxu1 }
 0x655   :  { %v1668_v26 = vadd.f32 %v5915_v38, %v1667_v18  ;;  %v1727_v27 = vadd.f32 %v5917_v39, %v1726_v25 }
 0x657   :  { %1678 = vst.msk [vmem:[#allocation2 + $0x30] sm:$0xff] %vm257_vm1, %v1668_v26 }
 0x658   :  { %1737 = vst.msk [vmem:[#allocation3 + $0x30] sm:$0xff] %vm257_vm1, %v1727_v27 }
 0x65b   :  { %v1785_v31 = vpop.f32.mrf.mxu2  ;;  %v1844_v32 = vpop.f32.mrf.mxu3 }
 0x65c   :  { %v1786_v33 = vadd.f32 %v5945_v57, %v1785_v31  ;;  %v1845_v34 = vadd.f32 %v5949_v60, %v1844_v32  ;;  %v1669_v37 = vpop.f32.mrf.mxu0  ;;  %v1728_v44 = vpop.f32.mrf.mxu1 }
 0x65d   :  { %v1670_v45 = vadd.f32 %v5915_v38, %v1669_v37  ;;  %v1729_v46 = vadd.f32 %v5917_v39, %v1728_v44 }
 0x65e   :  { %1796 = vst.msk [vmem:[#allocation4 + $0x30] sm:$0xff] %vm257_vm1, %v1786_v33 }
 0x65f   :  { %1855 = vst.msk [vmem:[#allocation5 + $0x30] sm:$0xff] %vm257_vm1, %v1845_v34 }
 0x660   :  { %1679 = vst.msk [vmem:[#allocation2 + $0x38] sm:$0xff] %vm257_vm1, %v1670_v45 }
 0x661   :  { %1738 = vst.msk [vmem:[#allocation3 + $0x38] sm:$0xff] %vm257_vm1, %v1729_v46 }
 0x663   :  { %v1787_v47 = vpop.f32.mrf.mxu2  ;;  %v1846_v29 = vpop.f32.mrf.mxu3 }
 0x664   :  { %v1788_v22 = vadd.f32 %v5945_v57, %v1787_v47  ;;  %v1847_v49 = vadd.f32 %v5949_v60, %v1846_v29  ;;  %v1898_v53 = vpop.f32.mrf.mxu0  ;;  %v1925_v38 = vpop.f32.mrf.mxu1 }
 0x665   :  { %v1902_v43 = vadd.f32 %v1898_v53, %v1876_v52  ;;  %v1929_v39 = vadd.f32 %v1925_v38, %v1903_v35 }
 0x666   :  { %1797 = vst.msk [vmem:[#allocation4 + $0x38] sm:$0xff] %vm257_vm1, %v1788_v22 }
 0x667   :  { %1856 = vst.msk [vmem:[#allocation5 + $0x38] sm:$0xff] %vm257_vm1, %v1847_v49  ;;  %v4621_v58 = vmul.f32 -1.442695, %v1902_v43  ;;  %v4622_v59 = vmul.f32 -1.442695, %v1929_v39 }
 0x669   :  { %5068 = vpow2.f32 %v4621_v58 }
 0x66a   :  { %5070 = vpow2.f32 %v4622_v59  ;;  %v2049_v59 = vld [vmem:[#allocation2 + $0x8] sm:$0xff] }
 0x66b   :  { %v1952_v63 = vpop.f32.mrf.mxu2  ;;  %v1979_v19 = vpop.f32.mrf.mxu3 }
 0x66c   :  { %v1983_v57 = vadd.f32 %v1979_v19, %v1957_v17  ;;  %v1900_v20 = vpop.f32.mrf.mxu0  ;;  %v1927_v60 = vpop.f32.mrf.mxu1  ;;  %v1956_v36 = vadd.f32 %v1952_v63, %v1930_v8  ;;  %v2067_v17 = vld [vmem:[#allocation3 + $0x8] sm:$0xff] }
 0x66e   :  { %v4623_v56 = vmul.f32 -1.442695, %v1983_v57 }
 0x66f   :  { %v5069_v5 = vpop.eup %5068 }
 0x670   :  { %v5071_v21 = vpop.eup %5070  ;;  %v1987_v6 = vadd.f32 1.0, %v5069_v5  ;;  %5072 = vpow2.f32 %v4623_v56 }
 0x671   :  { %v2006_v7 = vadd.f32 1.0, %v5071_v21  ;;  %v2097_v21 = vld [vmem:[#allocation5 + $0x8] sm:$0xff] }
 0x672   :  { %5074 = vrcp.f32 %v1987_v6  ;;  %v1999_v2 = vand.u32 2147483648, %v1987_v6  ;;  %v1997_v13 = vand.u32 2147483647, %v1987_v6  ;;  %vm1993_vm2 = vweird.f32 %v1987_v6 }
 0x673   :  { %5076 = vrcp.f32 %v2006_v7  ;;  %v1981_v62 = vpop.f32.mrf.mxu3  ;;  %v1954_v55 = vpop.f32.mrf.mxu2  ;;  %v2018_v12 = vand.u32 2147483648, %v2006_v7  ;;  %v2016_v14 = vand.u32 2147483647, %v2006_v7  ;;  %vm2012_vm3 = vweird.f32 %v2006_v7 }
 0x674   :  { %v2000_v18 = vor.u32 1.1754944e-38, %v1999_v2  ;;  %vm1998_vm5 = vcmp.eq.f32.partialorder %v1997_v13, 8.507059e+37 }
 0x675   :  { %v2019_v27 = vor.u32 1.1754944e-38, %v2018_v12  ;;  %vm2017_vm7 = vcmp.eq.f32.partialorder %v2016_v14, 8.507059e+37 }
 0x676   :  { %v5073_v24 = vpop.eup %5072 }
 0x677   :  { %v2026_v23 = vadd.f32 1.0, %v5073_v24 }
 0x678   :  { %v5075_v9 = vpop.eup %5074 }
 0x679   :  { %v5077_v10 = vpop.eup %5076  ;;  %v1989_v61 = vmul.f32 %v5075_v9, %v1987_v6  ;;  %5078 = vrcp.f32 %v2026_v23  ;;  %vm1994_vm15 = vweird.f32 %v5075_v9  ;;  %v2038_v49 = vand.u32 2147483648, %v2026_v23 }
 0x67a   :  { %v2008_v30 = vmul.f32 %v5077_v10, %v2006_v7  ;;  %5080 = vtanh.f32 %v1956_v36  ;;  %vm2013_vm0 = vweird.f32 %v5077_v10  ;;  %vm1995_vm4 = vmor %vm1993_vm2, %vm1994_vm15  ;;  %vm2032_vm9 = vweird.f32 %v2026_v23 }
 0x67b   :  { %v1990_v0 = vsub.f32 1.0, %v1989_v61  ;;  %vm2014_vm6 = vmor %vm2012_vm3, %vm2013_vm0  ;;  %v2036_v52 = vand.u32 2147483647, %v2026_v23  ;;  %v2039_v35 = vor.u32 1.1754944e-38, %v2038_v49 }
 0x67c   :  { %v2009_v11 = vsub.f32 1.0, %v2008_v30 }
 0x67d   :  { %v1991_v3 = vmul.f32 %v5075_v9, %v1990_v0  ;;  %vm2037_vm11 = vcmp.eq.f32.partialorder %v2036_v52, 8.507059e+37  ;;  %v2082_v0 = vld [vmem:[#allocation4 + $0x8] sm:$0xff] }
 0x67e   :  { %v2010_v16 = vmul.f32 %v5077_v10, %v2009_v11 }
 0x67f   :  { %v5079_v4 = vpop.eup %5078  ;;  %v1992_v15 = vadd.f32 %v5075_v9, %v1991_v3 }
 0x680   :  { %v2011_v25 = vadd.f32 %v5077_v10, %v2010_v16  ;;  %v2028_v26 = vmul.f32 %v5079_v4, %v2026_v23  ;;  %v5081_v32 = vpop.eup %5080  ;;  %vm2033_vm8 = vweird.f32 %v5079_v4 }
 0x681   :  { %v1996_v31 = vsel %vm1995_vm4, %v5075_v9, %v1992_v15  ;;  %vm2034_vm10 = vmor %vm2032_vm9, %vm2033_vm8 }
 0x682   :  { %v2001_v33 = vsel %vm1998_vm5, %v2000_v18, %v1996_v31  ;;  %v2015_v34 = vsel %vm2014_vm6, %v5077_v10, %v2011_v25  ;;  %v2029_v37 = vsub.f32 1.0, %v2028_v26 }
 0x683   :  { %v2020_v44 = vsel %vm2017_vm7, %v2019_v27, %v2015_v34  ;;  %v2043_v45 = vmul.f32 %v5081_v32, %v2001_v33 }
 0x684   :  { %v2042_v46 = vmul.f32 0.0, %v2020_v44  ;;  %v2030_v47 = vmul.f32 %v5079_v4, %v2029_v37 }
 0x686   :  { %v6063_v29 = vadd.f32 %v2043_v45, %v2042_v46  ;;  %v2031_v22 = vadd.f32 %v5079_v4, %v2030_v47 }
 0x688   :  { %5082 = vtanh.f32 %v6063_v29  ;;  %v2035_v53 = vsel %vm2034_vm10, %v5079_v4, %v2031_v22 }
 0x689   :  { %v2040_v43 = vsel %vm2037_vm11, %v2039_v35, %v2035_v53 }
 0x68e   :  { %v5083_v38 = vpop.eup %5082 }
 0x68f   :  { %v2046_v39 = vmul.f32 %v5083_v38, %v2040_v43 }
 0x691   :  { %v2047_v58 = vpack.c.bf16 %v2046_v39, %v2046_v39 }
 0x693   :  { %2048 = vst.msk [vmem:[#allocation6] sm:$0xf] %vm685_vm14, %v2047_v58  ;;  %4624 = vmatmul.msk.bf16.vlgmr.msrb.gmra.mxu0 %vm257_vm1, %v2047_v58  ;;  %4625 = vmatmul.msk.bf16.vlgmr.msrb.gmra.mxu1 %vm257_vm1, %v2047_v58 }
 0x694   :  { %4626 = vmatmul.msk.bf16.vlgmr.msrb.gmra.mxu2 %vm257_vm1, %v2047_v58  ;;  %4627 = vmatmul.msk.bf16.vlgmr.msrb.gmra.mxu3 %vm257_vm1, %v2047_v58 }
 0x695   :  { %2315 = vmatpush.bf16.msrb.mxu0 %v5921_v40  ;;  %2330 = vmatpush.bf16.msrb.mxu1 %v5923_v41 }
 0x696   :  { %2360 = vmatpush.bf16.msrb.mxu3 %v5925_v42  ;;  %2345 = vmatpush.bf16.msrb.mxu2 %v5927_v48 }
 0x699   :  { %2316 = vmatpush.bf16.msrb.mxu0 %v5933_v50  ;;  %2331 = vmatpush.bf16.msrb.mxu1 %v5935_v51 }
 0x69a   :  { %2346 = vmatpush.bf16.msrb.mxu2 %v5972_v1  ;;  %2361 = vmatpush.bf16.msrb.mxu3 %v5939_v54 }
 0x710   :  { %v2062_v63 = vpop.f32.mrf.mxu0  ;;  %v2077_v19 = vpop.f32.mrf.mxu1 }
 0x711   :  { %v2066_v57 = vadd.f32 %v2062_v63, %v2049_v59  ;;  %v2081_v20 = vadd.f32 %v2077_v19, %v2067_v17 }
 0x713   :  { %v4628_v60 = vmul.f32 -1.442695, %v2066_v57  ;;  %v4629_v56 = vmul.f32 -1.442695, %v2081_v20 }
 0x715   :  { %5084 = vpow2.f32 %v4628_v60 }
 0x716   :  { %5086 = vpow2.f32 %v4629_v56 }
 0x717   :  { %v2092_v5 = vpop.f32.mrf.mxu2  ;;  %v2107_v6 = vpop.f32.mrf.mxu3 }
 0x718   :  { %v2111_v7 = vadd.f32 %v2107_v6, %v2097_v21  ;;  %v2064_v62 = vpop.f32.mrf.mxu0  ;;  %v2079_v55 = vpop.f32.mrf.mxu1  ;;  %v2096_v12 = vadd.f32 %v2092_v5, %v2082_v0  ;;  %v2195_v21 = vld [vmem:[#allocation3 + $0x10] sm:$0xff] }
 0x71a   :  { %v4630_v24 = vmul.f32 -1.442695, %v2111_v7 }
 0x71b   :  { %v5085_v8 = vpop.eup %5084 }
 0x71c   :  { %v5087_v23 = vpop.eup %5086  ;;  %v2115_v9 = vadd.f32 1.0, %v5085_v8  ;;  %5088 = vpow2.f32 %v4630_v24 }
 0x71d   :  { %v2134_v36 = vadd.f32 1.0, %v5087_v23  ;;  %v2225_v23 = vld [vmem:[#allocation5 + $0x10] sm:$0xff] }
 0x71e   :  { %5090 = vrcp.f32 %v2115_v9  ;;  %v2127_v15 = vand.u32 2147483648, %v2115_v9  ;;  %v2125_v26 = vand.u32 2147483647, %v2115_v9  ;;  %vm2121_vm15 = vweird.f32 %v2115_v9 }
 0x71f   :  { %5092 = vrcp.f32 %v2134_v36  ;;  %v2094_v10 = vpop.f32.mrf.mxu2  ;;  %v2109_v61 = vpop.f32.mrf.mxu3  ;;  %v2146_v18 = vand.u32 2147483648, %v2134_v36  ;;  %v2144_v31 = vand.u32 2147483647, %v2134_v36  ;;  %vm2140_vm0 = vweird.f32 %v2134_v36 }
 0x720   :  { %v2128_v34 = vor.u32 1.1754944e-38, %v2127_v15  ;;  %vm2126_vm4 = vcmp.eq.f32.partialorder %v2125_v26, 8.507059e+37 }
 0x721   :  { %v2147_v45 = vor.u32 1.1754944e-38, %v2146_v18  ;;  %vm2145_vm5 = vcmp.eq.f32.partialorder %v2144_v31, 8.507059e+37 }
 0x722   :  { %v5089_v30 = vpop.eup %5088 }
 0x723   :  { %v2154_v11 = vadd.f32 1.0, %v5089_v30 }
 0x724   :  { %v5091_v2 = vpop.eup %5090 }
 0x725   :  { %v5093_v3 = vpop.eup %5092  ;;  %v2117_v13 = vmul.f32 %v5091_v2, %v2115_v9  ;;  %5094 = vrcp.f32 %v2154_v11  ;;  %vm2122_vm12 = vweird.f32 %v5091_v2  ;;  %v2166_v59 = vand.u32 2147483648, %v2154_v11 }
 0x726   :  { %v2136_v16 = vmul.f32 %v5093_v3, %v2134_v36  ;;  %5096 = vtanh.f32 %v2096_v12  ;;  %vm2141_vm13 = vweird.f32 %v5093_v3  ;;  %vm2123_vm2 = vmor %vm2121_vm15, %vm2122_vm12  ;;  %vm2160_vm7 = vweird.f32 %v2154_v11 }
 0x727   :  { %v2118_v14 = vsub.f32 1.0, %v2117_v13  ;;  %vm2142_vm3 = vmor %vm2140_vm0, %vm2141_vm13  ;;  %v2164_v63 = vand.u32 2147483647, %v2154_v11  ;;  %v2167_v19 = vor.u32 1.1754944e-38, %v2166_v59 }
 0x728   :  { %v2137_v4 = vsub.f32 1.0, %v2136_v16 }
 0x729   :  { %v2119_v25 = vmul.f32 %v5091_v2, %v2118_v14  ;;  %vm2165_vm9 = vcmp.eq.f32.partialorder %v2164_v63, 8.507059e+37  ;;  %v2210_v14 = vld [vmem:[#allocation4 + $0x10] sm:$0xff] }
 0x72a   :  { %v2138_v27 = vmul.f32 %v5093_v3, %v2137_v4 }
 0x72b   :  { %v5095_v32 = vpop.eup %5094  ;;  %v2120_v33 = vadd.f32 %v5091_v2, %v2119_v25 }
 0x72c   :  { %v2139_v37 = vadd.f32 %v5093_v3, %v2138_v27  ;;  %v2156_v44 = vmul.f32 %v5095_v32, %v2154_v11  ;;  %v5097_v47 = vpop.eup %5096  ;;  %vm2161_vm6 = vweird.f32 %v5095_v32 }
 0x72d   :  { %v2124_v46 = vsel %vm2123_vm2, %v5091_v2, %v2120_v33  ;;  %vm2162_vm8 = vmor %vm2160_vm7, %vm2161_vm6 }
 0x72e   :  { %v2129_v22 = vsel %vm2126_vm4, %v2128_v34, %v2124_v46  ;;  %v2143_v49 = vsel %vm2142_vm3, %v5093_v3, %v2139_v37  ;;  %v2157_v52 = vsub.f32 1.0, %v2156_v44 }
 0x72f   :  { %v2148_v53 = vsel %vm2145_vm5, %v2147_v45, %v2143_v49  ;;  %v2171_v35 = vmul.f32 %v5097_v47, %v2129_v22 }
 0x730   :  { %v2170_v38 = vmul.f32 %v2148_v53, %v6063_v29  ;;  %v2158_v43 = vmul.f32 %v5095_v32, %v2157_v52  ;;  %v2177_v29 = vld [vmem:[#allocation2 + $0x10] sm:$0xff] }
 0x732   :  { %v6080_v39 = vadd.f32 %v2171_v35, %v2170_v38  ;;  %v2159_v58 = vadd.f32 %v5095_v32, %v2158_v43 }
 0x734   :  { %5098 = vtanh.f32 %v6080_v39  ;;  %v2163_v17 = vsel %vm2162_vm8, %v5095_v32, %v2159_v58 }
 0x735   :  { %v2168_v20 = vsel %vm2165_vm9, %v2167_v19, %v2163_v17 }
 0x73a   :  { %v5099_v57 = vpop.eup %5098 }
 0x73b   :  { %v2174_v60 = vmul.f32 %v5099_v57, %v2168_v20 }
 0x73d   :  { %v2175_v56 = vpack.c.bf16 %v2174_v60, %v2174_v60 }
 0x73f   :  { %2176 = vst.msk [vmem:[#allocation6 + $0x4] sm:$0xf] %vm685_vm14, %v2175_v56  ;;  %4631 = vmatmul.msk.bf16.vlgmr.msra.gmra.mxu0 %vm257_vm1, %v2175_v56  ;;  %4632 = vmatmul.msk.bf16.vlgmr.msra.gmra.mxu1 %vm257_vm1, %v2175_v56 }
 0x740   :  { %4633 = vmatmul.msk.bf16.vlgmr.msra.gmra.mxu2 %vm257_vm1, %v2175_v56  ;;  %4634 = vmatmul.msk.bf16.vlgmr.msra.gmra.mxu3 %vm257_vm1, %v2175_v56 }
 0x741   :  { %2443 = vmatpush.bf16.msra.mxu0 %v5921_v40  ;;  %2458 = vmatpush.bf16.msra.mxu1 %v5923_v41 }
 0x742   :  { %2488 = vmatpush.bf16.msra.mxu3 %v5925_v42  ;;  %2473 = vmatpush.bf16.msra.mxu2 %v5927_v48 }
 0x745   :  { %2444 = vmatpush.bf16.msra.mxu0 %v5933_v50  ;;  %2459 = vmatpush.bf16.msra.mxu1 %v5935_v51 }
 0x746   :  { %2474 = vmatpush.bf16.msra.mxu2 %v5972_v1  ;;  %2489 = vmatpush.bf16.msra.mxu3 %v5939_v54 }
 0x7bc   :  { %v2190_v5 = vpop.f32.mrf.mxu0  ;;  %v2205_v6 = vpop.f32.mrf.mxu1 }
 0x7bd   :  { %v2194_v7 = vadd.f32 %v2190_v5, %v2177_v29  ;;  %v2209_v62 = vadd.f32 %v2205_v6, %v2195_v21 }
 0x7bf   :  { %v4635_v55 = vmul.f32 -1.442695, %v2194_v7  ;;  %v4636_v24 = vmul.f32 -1.442695, %v2209_v62 }
 0x7c1   :  { %5100 = vpow2.f32 %v4635_v55 }
 0x7c2   :  { %5102 = vpow2.f32 %v4636_v24 }
 0x7c3   :  { %v2220_v8 = vpop.f32.mrf.mxu2  ;;  %v2235_v9 = vpop.f32.mrf.mxu3 }
 0x7c4   :  { %v2239_v36 = vadd.f32 %v2235_v9, %v2225_v23  ;;  %v2192_v10 = vpop.f32.mrf.mxu0  ;;  %v2207_v61 = vpop.f32.mrf.mxu1  ;;  %v2224_v18 = vadd.f32 %v2220_v8, %v2210_v14  ;;  %v2323_v23 = vld [vmem:[#allocation3 + $0x18] sm:$0xff] }
 0x7c6   :  { %v4637_v30 = vmul.f32 -1.442695, %v2239_v36 }
 0x7c7   :  { %v5101_v0 = vpop.eup %5100 }
 0x7c8   :  { %v5103_v11 = vpop.eup %5102  ;;  %v2243_v2 = vadd.f32 1.0, %v5101_v0  ;;  %5104 = vpow2.f32 %v4637_v30 }
 0x7c9   :  { %v2262_v12 = vadd.f32 1.0, %v5103_v11 }
 0x7ca   :  { %5106 = vrcp.f32 %v2243_v2  ;;  %v2255_v33 = vand.u32 2147483648, %v2243_v2  ;;  %v2253_v44 = vand.u32 2147483647, %v2243_v2  ;;  %vm2249_vm12 = vweird.f32 %v2243_v2 }
 0x7cb   :  { %5108 = vrcp.f32 %v2262_v12  ;;  %v2222_v3 = vpop.f32.mrf.mxu2  ;;  %v2237_v13 = vpop.f32.mrf.mxu3  ;;  %v2274_v34 = vand.u32 2147483648, %v2262_v12  ;;  %v2272_v46 = vand.u32 2147483647, %v2262_v12  ;;  %vm2268_vm13 = vweird.f32 %v2262_v12 }
 0x7cc   :  { %v2256_v49 = vor.u32 1.1754944e-38, %v2255_v33  ;;  %vm2254_vm2 = vcmp.eq.f32.partialorder %v2253_v44, 8.507059e+37 }
 0x7cd   :  { %v2275_v35 = vor.u32 1.1754944e-38, %v2274_v34  ;;  %vm2273_vm3 = vcmp.eq.f32.partialorder %v2272_v46, 8.507059e+37 }
 0x7ce   :  { %v5105_v16 = vpop.eup %5104 }
 0x7cf   :  { %v2282_v4 = vadd.f32 1.0, %v5105_v16  ;;  %v2338_v16 = vld [vmem:[#allocation4 + $0x18] sm:$0xff] }
 0x7d0   :  { %v5107_v15 = vpop.eup %5106 }
 0x7d1   :  { %v5109_v25 = vpop.eup %5108  ;;  %v2245_v26 = vmul.f32 %v5107_v15, %v2243_v2  ;;  %5110 = vrcp.f32 %v2282_v4  ;;  %vm2250_vm10 = vweird.f32 %v5107_v15  ;;  %v2294_v29 = vand.u32 2147483648, %v2282_v4 }
 0x7d2   :  { %v2264_v27 = vmul.f32 %v5109_v25, %v2262_v12  ;;  %5112 = vtanh.f32 %v2224_v18  ;;  %vm2269_vm11 = vweird.f32 %v5109_v25  ;;  %vm2251_vm15 = vmor %vm2249_vm12, %vm2250_vm10  ;;  %vm2288_vm5 = vweird.f32 %v2282_v4 }
 0x7d3   :  { %v2246_v31 = vsub.f32 1.0, %v2245_v26  ;;  %vm2270_vm0 = vmor %vm2268_vm13, %vm2269_vm11  ;;  %v2292_v5 = vand.u32 2147483647, %v2282_v4  ;;  %v2295_v6 = vor.u32 1.1754944e-38, %v2294_v29 }
 0x7d4   :  { %v2265_v32 = vsub.f32 1.0, %v2264_v27 }
 0x7d5   :  { %v2247_v37 = vmul.f32 %v5107_v15, %v2246_v31  ;;  %vm2293_vm7 = vcmp.eq.f32.partialorder %v2292_v5, 8.507059e+37 }
 0x7d6   :  { %v2266_v45 = vmul.f32 %v5109_v25, %v2265_v32 }
 0x7d7   :  { %v5111_v47 = vpop.eup %5110  ;;  %v2248_v22 = vadd.f32 %v5107_v15, %v2247_v37 }
 0x7d8   :  { %v2267_v52 = vadd.f32 %v5109_v25, %v2266_v45  ;;  %v2284_v53 = vmul.f32 %v5111_v47, %v2282_v4  ;;  %v5113_v43 = vpop.eup %5112  ;;  %vm2289_vm4 = vweird.f32 %v5111_v47 }
 0x7d9   :  { %v2252_v38 = vsel %vm2251_vm15, %v5107_v15, %v2248_v22  ;;  %vm2290_vm6 = vmor %vm2288_vm5, %vm2289_vm4 }
 0x7da   :  { %v2257_v58 = vsel %vm2254_vm2, %v2256_v49, %v2252_v38  ;;  %v2271_v59 = vsel %vm2270_vm0, %v5109_v25, %v2267_v52  ;;  %v2285_v63 = vsub.f32 1.0, %v2284_v53 }
 0x7db   :  { %v2276_v17 = vsel %vm2273_vm3, %v2275_v35, %v2271_v59  ;;  %v2299_v19 = vmul.f32 %v5113_v43, %v2257_v58 }
 0x7dc   :  { %v2298_v57 = vmul.f32 %v2276_v17, %v6080_v39  ;;  %v2286_v20 = vmul.f32 %v5111_v47, %v2285_v63  ;;  %v2305_v39 = vld [vmem:[#allocation2 + $0x18] sm:$0xff] }
 0x7de   :  { %v6097_v60 = vadd.f32 %v2299_v19, %v2298_v57  ;;  %v2287_v56 = vadd.f32 %v5111_v47, %v2286_v20 }
 0x7e0   :  { %5114 = vtanh.f32 %v6097_v60  ;;  %v2291_v21 = vsel %vm2290_vm6, %v5111_v47, %v2287_v56 }
 0x7e1   :  { %v2296_v62 = vsel %vm2293_vm7, %v2295_v6, %v2291_v21 }
 0x7e6   :  { %v5115_v7 = vpop.eup %5114 }
 0x7e7   :  { %v2302_v55 = vmul.f32 %v5115_v7, %v2296_v62 }
 0x7e9   :  { %v2303_v24 = vpack.c.bf16 %v2302_v55, %v2302_v55 }
 0x7eb   :  { %2304 = vst.msk [vmem:[#allocation6 + $0x8] sm:$0xf] %vm685_vm14, %v2303_v24  ;;  %4638 = vmatmul.msk.bf16.vlgmr.msrb.gmra.mxu0 %vm257_vm1, %v2303_v24  ;;  %4639 = vmatmul.msk.bf16.vlgmr.msrb.gmra.mxu1 %vm257_vm1, %v2303_v24 }
 0x7ec   :  { %4640 = vmatmul.msk.bf16.vlgmr.msrb.gmra.mxu2 %vm257_vm1, %v2303_v24  ;;  %4641 = vmatmul.msk.bf16.vlgmr.msrb.gmra.mxu3 %vm257_vm1, %v2303_v24 }
 0x7ed   :  { %2571 = vmatpush.bf16.msrb.mxu0 %v5921_v40  ;;  %2586 = vmatpush.bf16.msrb.mxu1 %v5923_v41 }
 0x7ee   :  { %2616 = vmatpush.bf16.msrb.mxu3 %v5925_v42  ;;  %2601 = vmatpush.bf16.msrb.mxu2 %v5927_v48  ;;  %v2353_v48 = vld [vmem:[#allocation5 + $0x18] sm:$0xff] }
 0x7f1   :  { %2572 = vmatpush.bf16.msrb.mxu0 %v5933_v50  ;;  %2587 = vmatpush.bf16.msrb.mxu1 %v5935_v51 }
 0x7f2   :  { %2602 = vmatpush.bf16.msrb.mxu2 %v5972_v1  ;;  %2617 = vmatpush.bf16.msrb.mxu3 %v5939_v54 }
 0x868   :  { %v2318_v8 = vpop.f32.mrf.mxu0  ;;  %v2333_v9 = vpop.f32.mrf.mxu1 }
 0x869   :  { %v2322_v36 = vadd.f32 %v2318_v8, %v2305_v39  ;;  %v2337_v40 = vadd.f32 %v2333_v9, %v2323_v23  ;;  %v6125_v39 = vld [vmem:[#allocation14 + $0x18] sm:$0xff]  ;;  %v6131_v23 = vld [vmem:[#allocation14 + $0x28] sm:$0xff]  ;;  %v6134_v9 = vld [vmem:[#allocation14] sm:$0xff] }
 0x86a   :  { %v6128_v8 = vld [vmem:[#allocation14 + $0x38] sm:$0xff] }
 0x86b   :  { %v4642_v10 = vmul.f32 -1.442695, %v2322_v36  ;;  %v4643_v41 = vmul.f32 -1.442695, %v2337_v40  ;;  %v6137_v36 = vld [vmem:[#allocation14 + $0x10] sm:$0xff]  ;;  %v6140_v40 = vld [vmem:[#allocation14 + $0x20] sm:$0xff] }
 0x86d   :  { %5116 = vpow2.f32 %v4642_v10  ;;  %v6143_v10 = vld [vmem:[#allocation14 + $0x30] sm:$0xff] }
 0x86e   :  { %5118 = vpow2.f32 %v4643_v41  ;;  %v2433_v41 = vld [vmem:[#allocation2 + $0x20] sm:$0xff] }
 0x86f   :  { %v2348_v42 = vpop.f32.mrf.mxu2  ;;  %v2363_v61 = vpop.f32.mrf.mxu3 }
 0x870   :  { %v2367_v50 = vadd.f32 %v2363_v61, %v2353_v48  ;;  %v2320_v30 = vpop.f32.mrf.mxu0  ;;  %v2335_v51 = vpop.f32.mrf.mxu1  ;;  %v2352_v15 = vadd.f32 %v2348_v42, %v2338_v16  ;;  %v2451_v48 = vld [vmem:[#allocation3 + $0x20] sm:$0xff] }
 0x872   :  { %v4644_v0 = vmul.f32 -1.442695, %v2367_v50 }
 0x873   :  { %v5117_v1 = vpop.eup %5116 }
 0x874   :  { %v5119_v11 = vpop.eup %5118  ;;  %v2371_v54 = vadd.f32 1.0, %v5117_v1  ;;  %5120 = vpow2.f32 %v4644_v0 }
 0x875   :  { %v2390_v2 = vadd.f32 1.0, %v5119_v11  ;;  %v2481_v11 = vld [vmem:[#allocation5 + $0x20] sm:$0xff] }
 0x876   :  { %5122 = vrcp.f32 %v2371_v54  ;;  %v2383_v32 = vand.u32 2147483648, %v2371_v54  ;;  %v2381_v37 = vand.u32 2147483647, %v2371_v54  ;;  %vm2377_vm10 = vweird.f32 %v2371_v54 }
 0x877   :  { %5124 = vrcp.f32 %v2390_v2  ;;  %v2350_v12 = vpop.f32.mrf.mxu2  ;;  %v2365_v3 = vpop.f32.mrf.mxu3  ;;  %v2402_v33 = vand.u32 2147483648, %v2390_v2  ;;  %v2400_v45 = vand.u32 2147483647, %v2390_v2  ;;  %vm2396_vm11 = vweird.f32 %v2390_v2 }
 0x878   :  { %v2384_v22 = vor.u32 1.1754944e-38, %v2383_v32  ;;  %vm2382_vm15 = vcmp.eq.f32.partialorder %v2381_v37, 8.507059e+37 }
 0x879   :  { %v2403_v53 = vor.u32 1.1754944e-38, %v2402_v33  ;;  %vm2401_vm0 = vcmp.eq.f32.partialorder %v2400_v45, 8.507059e+37 }
 0x87a   :  { %v5121_v13 = vpop.eup %5120 }
 0x87b   :  { %v2410_v14 = vadd.f32 1.0, %v5121_v13 }
 0x87c   :  { %v5123_v4 = vpop.eup %5122 }
 0x87d   :  { %v5125_v18 = vpop.eup %5124  ;;  %v2373_v25 = vmul.f32 %v5123_v4, %v2371_v54  ;;  %5126 = vrcp.f32 %v2410_v14  ;;  %vm2378_vm8 = vweird.f32 %v5123_v4  ;;  %v2422_v29 = vand.u32 2147483648, %v2410_v14 }
 0x87e   :  { %v2392_v26 = vmul.f32 %v5125_v18, %v2390_v2  ;;  %5128 = vtanh.f32 %v2352_v15  ;;  %vm2397_vm9 = vweird.f32 %v5125_v18  ;;  %vm2379_vm12 = vmor %vm2377_vm10, %vm2378_vm8  ;;  %vm2416_vm3 = vweird.f32 %v2410_v14 }
 0x87f   :  { %v2374_v27 = vsub.f32 1.0, %v2373_v25  ;;  %vm2398_vm13 = vmor %vm2396_vm11, %vm2397_vm9  ;;  %v2420_v5 = vand.u32 2147483647, %v2410_v14  ;;  %v2423_v6 = vor.u32 1.1754944e-38, %v2422_v29 }
 0x880   :  { %v2393_v31 = vsub.f32 1.0, %v2392_v26 }
 0x881   :  { %v2375_v34 = vmul.f32 %v5123_v4, %v2374_v27  ;;  %vm2421_vm5 = vcmp.eq.f32.partialorder %v2420_v5, 8.507059e+37  ;;  %v2466_v27 = vld [vmem:[#allocation4 + $0x20] sm:$0xff] }
 0x882   :  { %v2394_v44 = vmul.f32 %v5125_v18, %v2393_v31 }
 0x883   :  { %v5127_v46 = vpop.eup %5126  ;;  %v2376_v47 = vadd.f32 %v5123_v4, %v2375_v34 }
 0x884   :  { %v2395_v49 = vadd.f32 %v5125_v18, %v2394_v44  ;;  %v2412_v52 = vmul.f32 %v5127_v46, %v2410_v14  ;;  %v5129_v38 = vpop.eup %5128  ;;  %vm2417_vm2 = vweird.f32 %v5127_v46 }
 0x885   :  { %v2380_v35 = vsel %vm2379_vm12, %v5123_v4, %v2376_v47  ;;  %vm2418_vm4 = vmor %vm2416_vm3, %vm2417_vm2 }
 0x886   :  { %v2385_v43 = vsel %vm2382_vm15, %v2384_v22, %v2380_v35  ;;  %v2399_v58 = vsel %vm2398_vm13, %v5125_v18, %v2395_v49  ;;  %v2413_v59 = vsub.f32 1.0, %v2412_v52 }
 0x887   :  { %v2404_v63 = vsel %vm2401_vm0, %v2403_v53, %v2399_v58  ;;  %v2427_v17 = vmul.f32 %v5129_v38, %v2385_v43 }
 0x888   :  { %v2426_v19 = vmul.f32 %v2404_v63, %v6097_v60  ;;  %v2414_v57 = vmul.f32 %v5127_v46, %v2413_v59  ;;  %v6122_v60 = vld [vmem:[#allocation14 + $0x8] sm:$0xff] }
 0x88a   :  { %v6114_v20 = vadd.f32 %v2427_v17, %v2426_v19  ;;  %v2415_v56 = vadd.f32 %v5127_v46, %v2414_v57 }
 0x88c   :  { %5130 = vtanh.f32 %v6114_v20  ;;  %v2419_v21 = vsel %vm2418_vm4, %v5127_v46, %v2415_v56 }
 0x88d   :  { %v2424_v62 = vsel %vm2421_vm5, %v2423_v6, %v2419_v21 }
 0x892   :  { %v5131_v7 = vpop.eup %5130 }
 0x893   :  { %v2430_v55 = vmul.f32 %v5131_v7, %v2424_v62 }
 0x895   :  { %v2431_v24 = vpack.c.bf16 %v2430_v55, %v2430_v55 }
 0x897   :  { %2432 = vst.msk [vmem:[#allocation6 + $0xc] sm:$0xf] %vm685_vm14, %v2431_v24  ;;  %4645 = vmatmul.msk.bf16.vlgmr.msra.gmra.mxu0 %vm257_vm1, %v2431_v24  ;;  %4646 = vmatmul.msk.bf16.vlgmr.msra.gmra.mxu1 %vm257_vm1, %v2431_v24 }
 0x898   :  { %4647 = vmatmul.msk.bf16.vlgmr.msra.gmra.mxu2 %vm257_vm1, %v2431_v24  ;;  %4648 = vmatmul.msk.bf16.vlgmr.msra.gmra.mxu3 %vm257_vm1, %v2431_v24 }
 0x899   :  { %2699 = vmatpush.bf16.msra.mxu0 %v6122_v60  ;;  %2714 = vmatpush.bf16.msra.mxu1 %v6125_v39 }
 0x89a   :  { %2744 = vmatpush.bf16.msra.mxu3 %v6128_v8  ;;  %2729 = vmatpush.bf16.msra.mxu2 %v6131_v23 }
 0x89d   :  { %2700 = vmatpush.bf16.msra.mxu0 %v6134_v9  ;;  %2715 = vmatpush.bf16.msra.mxu1 %v6137_v36 }
 0x89e   :  { %2730 = vmatpush.bf16.msra.mxu2 %v6140_v40  ;;  %2745 = vmatpush.bf16.msra.mxu3 %v6143_v10 }
 0x914   :  { %v2446_v42 = vpop.f32.mrf.mxu0  ;;  %v2461_v61 = vpop.f32.mrf.mxu1 }
 0x915   :  { %v2450_v50 = vadd.f32 %v2446_v42, %v2433_v41  ;;  %v2465_v30 = vadd.f32 %v2461_v61, %v2451_v48 }
 0x917   :  { %v4649_v51 = vmul.f32 -1.442695, %v2450_v50  ;;  %v4650_v0 = vmul.f32 -1.442695, %v2465_v30 }
 0x919   :  { %5132 = vpow2.f32 %v4649_v51 }
 0x91a   :  { %5134 = vpow2.f32 %v4650_v0 }
 0x91b   :  { %v2476_v1 = vpop.f32.mrf.mxu2  ;;  %v2491_v54 = vpop.f32.mrf.mxu3 }
 0x91c   :  { %v2495_v2 = vadd.f32 %v2491_v54, %v2481_v11  ;;  %v2448_v12 = vpop.f32.mrf.mxu0  ;;  %v2463_v3 = vpop.f32.mrf.mxu1  ;;  %v2480_v33 = vadd.f32 %v2476_v1, %v2466_v27  ;;  %v2579_v11 = vld [vmem:[#allocation3 + $0x28] sm:$0xff] }
 0x91e   :  { %v4651_v13 = vmul.f32 -1.442695, %v2495_v2 }
 0x91f   :  { %v5133_v16 = vpop.eup %5132 }
 0x920   :  { %v5135_v14 = vpop.eup %5134  ;;  %v2499_v4 = vadd.f32 1.0, %v5133_v16  ;;  %5136 = vpow2.f32 %v4651_v13 }
 0x921   :  { %v2518_v15 = vadd.f32 1.0, %v5135_v14 }
 0x922   :  { %5138 = vrcp.f32 %v2499_v4  ;;  %v2511_v47 = vand.u32 2147483648, %v2499_v4  ;;  %v2509_v52 = vand.u32 2147483647, %v2499_v4  ;;  %vm2505_vm8 = vweird.f32 %v2499_v4 }
 0x923   :  { %5140 = vrcp.f32 %v2518_v15  ;;  %v2478_v18 = vpop.f32.mrf.mxu2  ;;  %v2493_v25 = vpop.f32.mrf.mxu3  ;;  %v2530_v22 = vand.u32 2147483648, %v2518_v15  ;;  %v2528_v35 = vand.u32 2147483647, %v2518_v15  ;;  %vm2524_vm9 = vweird.f32 %v2518_v15 }
 0x924   :  { %v2512_v58 = vor.u32 1.1754944e-38, %v2511_v47  ;;  %vm2510_vm12 = vcmp.eq.f32.partialorder %v2509_v52, 8.507059e+37 }
 0x925   :  { %v2531_v17 = vor.u32 1.1754944e-38, %v2530_v22  ;;  %vm2529_vm13 = vcmp.eq.f32.partialorder %v2528_v35, 8.507059e+37 }
 0x926   :  { %v5137_v26 = vpop.eup %5136 }
 0x927   :  { %v2538_v31 = vadd.f32 1.0, %v5137_v26  ;;  %v2594_v26 = vld [vmem:[#allocation4 + $0x28] sm:$0xff] }
 0x928   :  { %v5139_v32 = vpop.eup %5138 }
 0x929   :  { %v5141_v34 = vpop.eup %5140  ;;  %v2501_v37 = vmul.f32 %v5139_v32, %v2499_v4  ;;  %5142 = vrcp.f32 %v2538_v31  ;;  %vm2506_vm6 = vweird.f32 %v5139_v32  ;;  %v2550_v41 = vand.u32 2147483648, %v2538_v31 }
 0x92a   :  { %v2520_v44 = vmul.f32 %v5141_v34, %v2518_v15  ;;  %5144 = vtanh.f32 %v2480_v33  ;;  %vm2525_vm7 = vweird.f32 %v5141_v34  ;;  %vm2507_vm10 = vmor %vm2505_vm8, %vm2506_vm6  ;;  %vm2544_vm0 = vweird.f32 %v2538_v31 }
 0x92b   :  { %v2502_v45 = vsub.f32 1.0, %v2501_v37  ;;  %vm2526_vm11 = vmor %vm2524_vm9, %vm2525_vm7  ;;  %v2548_v42 = vand.u32 2147483647, %v2538_v31  ;;  %v2551_v61 = vor.u32 1.1754944e-38, %v2550_v41 }
 0x92c   :  { %v2521_v46 = vsub.f32 1.0, %v2520_v44 }
 0x92d   :  { %v2503_v49 = vmul.f32 %v5139_v32, %v2502_v45  ;;  %vm2549_vm3 = vcmp.eq.f32.partialorder %v2548_v42, 8.507059e+37 }
 0x92e   :  { %v2522_v53 = vmul.f32 %v5141_v34, %v2521_v46 }
 0x92f   :  { %v5143_v38 = vpop.eup %5142  ;;  %v2504_v43 = vadd.f32 %v5139_v32, %v2503_v49 }
 0x930   :  { %v2523_v59 = vadd.f32 %v5141_v34, %v2522_v53  ;;  %v2540_v63 = vmul.f32 %v5143_v38, %v2538_v31  ;;  %v5145_v57 = vpop.eup %5144  ;;  %vm2545_vm15 = vweird.f32 %v5143_v38 }
 0x931   :  { %v2508_v19 = vsel %vm2507_vm10, %v5139_v32, %v2504_v43  ;;  %vm2546_vm2 = vmor %vm2544_vm0, %vm2545_vm15 }
 0x932   :  { %v2513_v56 = vsel %vm2510_vm12, %v2512_v58, %v2508_v19  ;;  %v2527_v29 = vsel %vm2526_vm11, %v5141_v34, %v2523_v59  ;;  %v2541_v5 = vsub.f32 1.0, %v2540_v63 }
 0x933   :  { %v2532_v21 = vsel %vm2529_vm13, %v2531_v17, %v2527_v29  ;;  %v2555_v6 = vmul.f32 %v5145_v57, %v2513_v56 }
 0x934   :  { %v2554_v7 = vmul.f32 %v2532_v21, %v6114_v20  ;;  %v2542_v62 = vmul.f32 %v5143_v38, %v2541_v5  ;;  %v2561_v20 = vld [vmem:[#allocation2 + $0x28] sm:$0xff] }
 0x936   :  { %v6147_v55 = vadd.f32 %v2555_v6, %v2554_v7  ;;  %v2543_v24 = vadd.f32 %v5143_v38, %v2542_v62 }
 0x938   :  { %5146 = vtanh.f32 %v6147_v55  ;;  %v2547_v48 = vsel %vm2546_vm2, %v5143_v38, %v2543_v24 }
 0x939   :  { %v2552_v30 = vsel %vm2549_vm3, %v2551_v61, %v2547_v48 }
 0x93e   :  { %v5147_v50 = vpop.eup %5146 }
 0x93f   :  { %v2558_v51 = vmul.f32 %v5147_v50, %v2552_v30 }
 0x941   :  { %v2559_v0 = vpack.c.bf16 %v2558_v51, %v2558_v51 }
 0x943   :  { %2560 = vst.msk [vmem:[#allocation6 + $0x10] sm:$0xf] %vm685_vm14, %v2559_v0  ;;  %4652 = vmatmul.msk.bf16.vlgmr.msrb.gmra.mxu0 %vm257_vm1, %v2559_v0  ;;  %4653 = vmatmul.msk.bf16.vlgmr.msrb.gmra.mxu1 %vm257_vm1, %v2559_v0 }
 0x944   :  { %4654 = vmatmul.msk.bf16.vlgmr.msrb.gmra.mxu2 %vm257_vm1, %v2559_v0  ;;  %4655 = vmatmul.msk.bf16.vlgmr.msrb.gmra.mxu3 %vm257_vm1, %v2559_v0 }
 0x945   :  { %2827 = vmatpush.bf16.msrb.mxu0 %v6122_v60  ;;  %2842 = vmatpush.bf16.msrb.mxu1 %v6125_v39 }
 0x946   :  { %2872 = vmatpush.bf16.msrb.mxu3 %v6128_v8  ;;  %2857 = vmatpush.bf16.msrb.mxu2 %v6131_v23  ;;  %v2609_v23 = vld [vmem:[#allocation5 + $0x28] sm:$0xff] }
 0x949   :  { %2828 = vmatpush.bf16.msrb.mxu0 %v6134_v9  ;;  %2843 = vmatpush.bf16.msrb.mxu1 %v6137_v36 }
 0x94a   :  { %2858 = vmatpush.bf16.msrb.mxu2 %v6140_v40  ;;  %2873 = vmatpush.bf16.msrb.mxu3 %v6143_v10 }
 0x9c0   :  { %v2574_v1 = vpop.f32.mrf.mxu0  ;;  %v2589_v54 = vpop.f32.mrf.mxu1 }
 0x9c1   :  { %v2578_v2 = vadd.f32 %v2574_v1, %v2561_v20  ;;  %v2593_v60 = vadd.f32 %v2589_v54, %v2579_v11  ;;  %v2707_v1 = vld [vmem:[#allocation3 + $0x30] sm:$0xff] }
 0x9c3   :  { %v4656_v12 = vmul.f32 -1.442695, %v2578_v2  ;;  %v4657_v39 = vmul.f32 -1.442695, %v2593_v60 }
 0x9c5   :  { %5148 = vpow2.f32 %v4656_v12 }
 0x9c6   :  { %5150 = vpow2.f32 %v4657_v39 }
 0x9c7   :  { %v2604_v8 = vpop.f32.mrf.mxu2  ;;  %v2619_v3 = vpop.f32.mrf.mxu3 }
 0x9c8   :  { %v2623_v9 = vadd.f32 %v2619_v3, %v2609_v23  ;;  %v2576_v13 = vpop.f32.mrf.mxu0  ;;  %v2591_v36 = vpop.f32.mrf.mxu1  ;;  %v2608_v32 = vadd.f32 %v2604_v8, %v2594_v26  ;;  %v2737_v8 = vld [vmem:[#allocation5 + $0x30] sm:$0xff] }
 0x9c9   :  { %v4902_v26 = vld [vmem:[#allocation17 + $0x28] sm:$0xff] }
 0x9ca   :  { %v4658_v16 = vmul.f32 -1.442695, %v2623_v9 }
 0x9cb   :  { %v5149_v40 = vpop.eup %5148 }
 0x9cc   :  { %v5151_v14 = vpop.eup %5150  ;;  %v2627_v10 = vadd.f32 1.0, %v5149_v40  ;;  %5152 = vpow2.f32 %v4658_v16 }
 0x9cd   :  { %v2646_v4 = vadd.f32 1.0, %v5151_v14 }
 0x9ce   :  { %5154 = vrcp.f32 %v2627_v10  ;;  %v2639_v46 = vand.u32 2147483648, %v2627_v10  ;;  %v2637_v49 = vand.u32 2147483647, %v2627_v10  ;;  %vm2633_vm6 = vweird.f32 %v2627_v10 }
 0x9cf   :  { %5156 = vrcp.f32 %v2646_v4  ;;  %v2606_v15 = vpop.f32.mrf.mxu2  ;;  %v2621_v18 = vpop.f32.mrf.mxu3  ;;  %v2658_v47 = vand.u32 2147483648, %v2646_v4  ;;  %v2656_v53 = vand.u32 2147483647, %v2646_v4  ;;  %vm2652_vm7 = vweird.f32 %v2646_v4 }
 0x9d0   :  { %v2640_v43 = vor.u32 1.1754944e-38, %v2639_v46  ;;  %vm2638_vm10 = vcmp.eq.f32.partialorder %v2637_v49, 8.507059e+37  ;;  %v4898_v18 = vld [vmem:[#allocation17 + $0x8] sm:$0xff] }
 0x9d1   :  { %v2659_v63 = vor.u32 1.1754944e-38, %v2658_v47  ;;  %vm2657_vm11 = vcmp.eq.f32.partialorder %v2656_v53, 8.507059e+37 }
 0x9d2   :  { %v5153_v25 = vpop.eup %5152 }
 0x9d3   :  { %v2666_v27 = vadd.f32 1.0, %v5153_v25  ;;  %v4900_v25 = vld [vmem:[#allocation17 + $0x18] sm:$0xff] }
 0x9d4   :  { %v5155_v31 = vpop.eup %5154 }
 0x9d5   :  { %v5157_v33 = vpop.eup %5156  ;;  %v2629_v34 = vmul.f32 %v5155_v31, %v2627_v10  ;;  %5158 = vrcp.f32 %v2666_v27  ;;  %vm2634_vm4 = vweird.f32 %v5155_v31  ;;  %v2678_v41 = vand.u32 2147483648, %v2666_v27 }
 0x9d6   :  { %v2648_v37 = vmul.f32 %v5157_v33, %v2646_v4  ;;  %5160 = vtanh.f32 %v2608_v32  ;;  %vm2653_vm5 = vweird.f32 %v5157_v33  ;;  %vm2635_vm8 = vmor %vm2633_vm6, %vm2634_vm4  ;;  %vm2672_vm13 = vweird.f32 %v2666_v27  ;;  %v4897_v32 = vld [vmem:[#allocation17] sm:$0xff] }
 0x9d7   :  { %v2630_v44 = vsub.f32 1.0, %v2629_v34  ;;  %vm2654_vm9 = vmor %vm2652_vm7, %vm2653_vm5  ;;  %v2676_v42 = vand.u32 2147483647, %v2666_v27  ;;  %v2679_v61 = vor.u32 1.1754944e-38, %v2678_v41  ;;  %v2722_v34 = vld [vmem:[#allocation4 + $0x30] sm:$0xff] }
 0x9d8   :  { %v2649_v45 = vsub.f32 1.0, %v2648_v37 }
 0x9d9   :  { %v2631_v22 = vmul.f32 %v5155_v31, %v2630_v44  ;;  %vm2677_vm0 = vcmp.eq.f32.partialorder %v2676_v42, 8.507059e+37  ;;  %v4901_v44 = vld [vmem:[#allocation17 + $0x20] sm:$0xff] }
 0x9da   :  { %v2650_v52 = vmul.f32 %v5157_v33, %v2649_v45  ;;  %v4903_v45 = vld [vmem:[#allocation17 + $0x30] sm:$0xff] }
 0x9db   :  { %v5159_v35 = vpop.eup %5158  ;;  %v2632_v38 = vadd.f32 %v5155_v31, %v2631_v22 }
 0x9dc   :  { %v2651_v58 = vadd.f32 %v5157_v33, %v2650_v52  ;;  %v2668_v59 = vmul.f32 %v5159_v35, %v2666_v27  ;;  %v5161_v19 = vpop.eup %5160  ;;  %vm2673_vm12 = vweird.f32 %v5159_v35  ;;  %v4904_v27 = vld [vmem:[#allocation17 + $0x38] sm:$0xff] }
 0x9dd   :  { %v2636_v17 = vsel %vm2635_vm8, %v5155_v31, %v2632_v38  ;;  %vm2674_vm15 = vmor %vm2672_vm13, %vm2673_vm12 }
 0x9de   :  { %v2641_v57 = vsel %vm2638_vm10, %v2640_v43, %v2636_v17  ;;  %v2655_v56 = vsel %vm2654_vm9, %v5157_v33, %v2651_v58  ;;  %v2669_v29 = vsub.f32 1.0, %v2668_v59  ;;  %v4899_v33 = vld [vmem:[#allocation17 + $0x10] sm:$0xff] }
 0x9df   :  { %v2660_v5 = vsel %vm2657_vm11, %v2659_v63, %v2655_v56  ;;  %v2683_v21 = vmul.f32 %v5161_v19, %v2641_v57 }
 0x9e0   :  { %v2682_v6 = vmul.f32 %v2660_v5, %v6147_v55  ;;  %v2670_v7 = vmul.f32 %v5159_v35, %v2669_v29  ;;  %v2689_v55 = vld [vmem:[#allocation2 + $0x30] sm:$0xff] }
 0x9e2   :  { %v6164_v62 = vadd.f32 %v2683_v21, %v2682_v6  ;;  %v2671_v24 = vadd.f32 %v5159_v35, %v2670_v7 }
 0x9e4   :  { %5162 = vtanh.f32 %v6164_v62  ;;  %v2675_v48 = vsel %vm2674_vm15, %v5159_v35, %v2671_v24 }
 0x9e5   :  { %v2680_v30 = vsel %vm2677_vm0, %v2679_v61, %v2675_v48 }
 0x9ea   :  { %v5163_v50 = vpop.eup %5162 }
 0x9eb   :  { %v2686_v51 = vmul.f32 %v5163_v50, %v2680_v30 }
 0x9ed   :  { %v2687_v0 = vpack.c.bf16 %v2686_v51, %v2686_v51 }
 0x9ef   :  { %2688 = vst.msk [vmem:[#allocation6 + $0x14] sm:$0xf] %vm685_vm14, %v2687_v0  ;;  %4659 = vmatmul.msk.bf16.vlgmr.msra.gmra.mxu0 %vm257_vm1, %v2687_v0  ;;  %4660 = vmatmul.msk.bf16.vlgmr.msra.gmra.mxu1 %vm257_vm1, %v2687_v0 }
 0x9f0   :  { %4661 = vmatmul.msk.bf16.vlgmr.msra.gmra.mxu2 %vm257_vm1, %v2687_v0  ;;  %4662 = vmatmul.msk.bf16.vlgmr.msra.gmra.mxu3 %vm257_vm1, %v2687_v0 }
 0x9f1   :  { %3011 = vmatpush.bf16.msra.mxu0 %v4898_v18  ;;  %3070 = vmatpush.bf16.msra.mxu1 %v4900_v25 }
 0x9f2   :  { %3129 = vmatpush.bf16.msra.mxu2 %v4902_v26  ;;  %3188 = vmatpush.bf16.msra.mxu3 %v4904_v27 }
 0x9f5   :  { %3012 = vmatpush.bf16.msra.mxu0 %v4897_v32  ;;  %3071 = vmatpush.bf16.msra.mxu1 %v4899_v33 }
 0x9f6   :  { %3130 = vmatpush.bf16.msra.mxu2 %v4901_v44  ;;  %3189 = vmatpush.bf16.msra.mxu3 %v4903_v45  ;;  %v6205_v44 = vld [vmem:[%s6536_s9 + $0x1] ss:$0 sm:$0xff]  ;;  %v6212_v45 = vld [vmem:[%s6535_s8 + $0x8] sm:$0xff] }
 0xa6c   :  { %v2702_v20 = vpop.f32.mrf.mxu0  ;;  %v2717_v11 = vpop.f32.mrf.mxu1 }
 0xa6d   :  { %v2706_v54 = vadd.f32 %v2702_v20, %v2689_v55  ;;  %v2721_v2 = vadd.f32 %v2717_v11, %v2707_v1 }
 0xa6f   :  { %v4663_v60 = vmul.f32 -1.442695, %v2706_v54  ;;  %v4664_v12 = vmul.f32 -1.442695, %v2721_v2 }
 0xa71   :  { %5164 = vpow2.f32 %v4663_v60 }
 0xa72   :  { %5166 = vpow2.f32 %v4664_v12 }
 0xa73   :  { %v2732_v39 = vpop.f32.mrf.mxu2  ;;  %v2747_v23 = vpop.f32.mrf.mxu3 }
 0xa74   :  { %v2751_v3 = vadd.f32 %v2747_v23, %v2737_v8  ;;  %v2704_v9 = vpop.f32.mrf.mxu0  ;;  %v2719_v13 = vpop.f32.mrf.mxu1  ;;  %v2736_v47 = vadd.f32 %v2732_v39, %v2722_v34  ;;  %v4894_v39 = vld [vmem:[#allocation6 + $0x8] sm:$0xff]  ;;  %v4895_v8 = vld [vmem:[#allocation6 + $0x10] sm:$0xff]  ;;  %v2817_v23 = vld [vmem:[#allocation2 + $0x38] sm:$0xff] }
 0xa75   :  { %v2835_v9 = vld [vmem:[#allocation3 + $0x38] sm:$0xff] }
 0xa76   :  { %v4665_v36 = vmul.f32 -1.442695, %v2751_v3 }
 0xa77   :  { %v5165_v16 = vpop.eup %5164 }
 0xa78   :  { %v5167_v40 = vpop.eup %5166  ;;  %v2755_v14 = vadd.f32 1.0, %v5165_v16  ;;  %5168 = vpow2.f32 %v4665_v36 }
 0xa79   :  { %v2774_v10 = vadd.f32 1.0, %v5167_v40 }
 0xa7a   :  { %5170 = vrcp.f32 %v2755_v14  ;;  %v2767_v38 = vand.u32 2147483648, %v2755_v14  ;;  %v2765_v59 = vand.u32 2147483647, %v2755_v14  ;;  %vm2761_vm4 = vweird.f32 %v2755_v14 }
 0xa7b   :  { %5172 = vrcp.f32 %v2774_v10  ;;  %v2734_v4 = vpop.f32.mrf.mxu2  ;;  %v2749_v15 = vpop.f32.mrf.mxu3  ;;  %v2786_v43 = vand.u32 2147483648, %v2774_v10  ;;  %v2784_v17 = vand.u32 2147483647, %v2774_v10  ;;  %vm2780_vm5 = vweird.f32 %v2774_v10 }
 0xa7c   :  { %v2768_v56 = vor.u32 1.1754944e-38, %v2767_v38  ;;  %vm2766_vm8 = vcmp.eq.f32.partialorder %v2765_v59, 8.507059e+37  ;;  %v2865_v4 = vld [vmem:[#allocation5 + $0x38] sm:$0xff]  ;;  %v6241_v59 = vld [vmem:[%s6535_s8 + $0x10] sm:$0xff] }
 0xa7d   :  { %v2787_v21 = vor.u32 1.1754944e-38, %v2786_v43  ;;  %vm2785_vm9 = vcmp.eq.f32.partialorder %v2784_v17, 8.507059e+37  ;;  %v2850_v17 = vld [vmem:[#allocation4 + $0x38] sm:$0xff] }
 0xa7e   :  { %v5169_v31 = vpop.eup %5168 }
 0xa7f   :  { %v2794_v37 = vadd.f32 1.0, %v5169_v31 }
 0xa80   :  { %v5171_v46 = vpop.eup %5170 }
 0xa81   :  { %v5173_v22 = vpop.eup %5172  ;;  %v2757_v49 = vmul.f32 %v5171_v46, %v2755_v14  ;;  %5174 = vrcp.f32 %v2794_v37  ;;  %vm2762_vm2 = vweird.f32 %v5171_v46  ;;  %v2806_v55 = vand.u32 2147483648, %v2794_v37 }
 0xa82   :  { %v2776_v52 = vmul.f32 %v5173_v22, %v2774_v10  ;;  %5176 = vtanh.f32 %v2736_v47  ;;  %vm2781_vm3 = vweird.f32 %v5173_v22  ;;  %vm2763_vm6 = vmor %vm2761_vm4, %vm2762_vm2  ;;  %vm2800_vm11 = vweird.f32 %v2794_v37  ;;  %v6222_v47 = vld [vmem:[%s6535_s8 + $0x38] sm:$0xff] }
 0xa83   :  { %v2758_v53 = vsub.f32 1.0, %v2757_v49  ;;  %vm2782_vm7 = vmor %vm2780_vm5, %vm2781_vm3  ;;  %v2804_v20 = vand.u32 2147483647, %v2794_v37  ;;  %v2807_v11 = vor.u32 1.1754944e-38, %v2806_v55 }
 0xa84   :  { %v2777_v35 = vsub.f32 1.0, %v2776_v52 }
 0xa85   :  { %v2759_v58 = vmul.f32 %v5171_v46, %v2758_v53  ;;  %vm2805_vm13 = vcmp.eq.f32.partialorder %v2804_v20, 8.507059e+37 }
 0xa86   :  { %v2778_v63 = vmul.f32 %v5173_v22, %v2777_v35  ;;  %v6227_v35 = vld [vmem:[%s6535_s8 + $0x28] sm:$0xff] }
 0xa87   :  { %v5175_v19 = vpop.eup %5174  ;;  %v2760_v57 = vadd.f32 %v5171_v46, %v2759_v58  ;;  %v6236_v58 = vld [vmem:[%s6535_s8] sm:$0xff] }
 0xa88   :  { %v2779_v29 = vadd.f32 %v5173_v22, %v2778_v63  ;;  %v2796_v5 = vmul.f32 %v5175_v19, %v2794_v37  ;;  %v5177_v7 = vpop.eup %5176  ;;  %vm2801_vm10 = vweird.f32 %v5175_v19  ;;  %v6200_v37 = vld [vmem:[%s6536_s9] ss:$0 sm:$0xff] }
 0xa89   :  { %v2764_v6 = vsel %vm2763_vm6, %v5171_v46, %v2760_v57  ;;  %vm2802_vm12 = vmor %vm2800_vm11, %vm2801_vm10  ;;  %v6217_v46 = vld [vmem:[%s6535_s8 + $0x18] sm:$0xff] }
 0xa8a   :  { %v2769_v24 = vsel %vm2766_vm8, %v2768_v56, %v2764_v6  ;;  %v2783_v41 = vsel %vm2782_vm7, %v5173_v22, %v2779_v29  ;;  %v2797_v42 = vsub.f32 1.0, %v2796_v5  ;;  %v6257_v5 = vld [vmem:[%s6536_s9 + $0x2] ss:$0 sm:$0xff] }
 0xa8b   :  { %v2788_v48 = vsel %vm2785_vm9, %v2787_v21, %v2783_v41  ;;  %v2811_v61 = vmul.f32 %v5177_v7, %v2769_v24  ;;  %v6264_v7 = vld [vmem:[%s6536_s9 + $0x3] ss:$0 sm:$0xff] }
 0xa8c   :  { %v2810_v50 = vmul.f32 %v2788_v48, %v6164_v62  ;;  %v2798_v30 = vmul.f32 %v5175_v19, %v2797_v42  ;;  %v4893_v62 = vld [vmem:[#allocation6] sm:$0xff] }
 0xa8e   :  { %v6173_v51 = vadd.f32 %v2811_v61, %v2810_v50  ;;  %v2799_v0 = vadd.f32 %v5175_v19, %v2798_v30 }
 0xa90   :  { %5178 = vtanh.f32 %v6173_v51  ;;  %v2803_v1 = vsel %vm2802_vm12, %v5175_v19, %v2799_v0  ;;  %v6248_v19 = vld [vmem:[%s6535_s8 + $0x30] sm:$0xff] }
 0xa91   :  { %v2808_v2 = vsel %vm2805_vm13, %v2807_v11, %v2803_v1 }
 0xa96   :  { %v5179_v54 = vpop.eup %5178 }
 0xa97   :  { %v2814_v60 = vmul.f32 %v5179_v54, %v2808_v2 }
 0xa99   :  { %v2815_v12 = vpack.c.bf16 %v2814_v60, %v2814_v60 }
 0xa9b   :  { %2816 = vst.msk [vmem:[#allocation6 + $0x18] sm:$0xf] %vm685_vm14, %v2815_v12  ;;  %4666 = vmatmul.msk.bf16.vlgmr.msrb.gmra.mxu0 %vm257_vm1, %v2815_v12  ;;  %4667 = vmatmul.msk.bf16.vlgmr.msrb.gmra.mxu1 %vm257_vm1, %v2815_v12 }
 0xa9c   :  { %4668 = vmatmul.msk.bf16.vlgmr.msrb.gmra.mxu2 %vm257_vm1, %v2815_v12  ;;  %4669 = vmatmul.msk.bf16.vlgmr.msrb.gmra.mxu3 %vm257_vm1, %v2815_v12 }
 0xa9d   :  { %3257 = vmatpush.bf16.msrb.mxu0 %v6212_v45  ;;  %3284 = vmatpush.bf16.msrb.mxu1 %v6217_v46 }
 0xa9e   :  { %3338 = vmatpush.bf16.msrb.mxu3 %v6222_v47  ;;  %3311 = vmatpush.bf16.msrb.mxu2 %v6227_v35 }
 0xaa1   :  { %3258 = vmatpush.bf16.msrb.mxu0 %v6236_v58  ;;  %3285 = vmatpush.bf16.msrb.mxu1 %v6241_v59 }
 0xaa2   :  { %3339 = vmatpush.bf16.msrb.mxu3 %v6248_v19 }
 0xaab   :  { %4697 = vmatmul.msk.bf16.vlgmr.msra.gmra.mxu0 %vm257_vm1, %v4893_v62  ;;  %4710 = vmatmul.msk.bf16.vlgmr.msra.gmra.mxu1 %vm257_vm1, %v4893_v62 }
 0xaac   :  { %4723 = vmatmul.msk.bf16.vlgmr.msra.gmra.mxu2 %vm257_vm1, %v4893_v62  ;;  %4736 = vmatmul.msk.bf16.vlgmr.msra.gmra.mxu3 %vm257_vm1, %v4893_v62 }
 0xaad   :  { %3420 = vmatpush.bf16.msra.mxu0 %v6212_v45  ;;  %3435 = vmatpush.bf16.msra.mxu1 %v6217_v46 }
 0xaae   :  { %3465 = vmatpush.bf16.msra.mxu3 %v6222_v47 }
 0xab1   :  { %3421 = vmatpush.bf16.msra.mxu0 %v6236_v58  ;;  %3436 = vmatpush.bf16.msra.mxu1 %v6241_v59 }
 0xab2   :  { %3466 = vmatpush.bf16.msra.mxu3 %v6248_v19 }
 0xabb   :  { %4698 = vmatmul.msk.bf16.gmra.mxu0 %vm257_vm1, %v4894_v39  ;;  %4711 = vmatmul.msk.bf16.gmra.mxu1 %vm257_vm1, %v4894_v39 }
 0xabc   :  { %4724 = vmatmul.msk.bf16.gmra.mxu2 %vm257_vm1, %v4894_v39  ;;  %4737 = vmatmul.msk.bf16.gmra.mxu3 %vm257_vm1, %v4894_v39 }
 0xacb   :  { %4699 = vmatmul.msk.bf16.gmra.mxu0 %vm257_vm1, %v4895_v8  ;;  %4712 = vmatmul.msk.bf16.gmra.mxu1 %vm257_vm1, %v4895_v8 }
 0xacc   :  { %4725 = vmatmul.msk.bf16.gmra.mxu2 %vm257_vm1, %v4895_v8  ;;  %4738 = vmatmul.msk.bf16.gmra.mxu3 %vm257_vm1, %v4895_v8 }
 0xb18   :  { %v2830_v3 = vpop.f32.mrf.mxu0  ;;  %v2845_v13 = vpop.f32.mrf.mxu1 }
 0xb19   :  { %v2834_v36 = vadd.f32 %v2830_v3, %v2817_v23  ;;  %v2849_v16 = vadd.f32 %v2845_v13, %v2835_v9  ;;  %v6290_v23 = vld [vmem:[%s6535_s8 + $0x20] sm:$0xff] }
 0xb1a   :  { %3312 = vmatpush.bf16.msrb.mxu2 %v6290_v23 }
 0xb1b   :  { %v4670_v40 = vmul.f32 -1.442695, %v2834_v36  ;;  %v4671_v14 = vmul.f32 -1.442695, %v2849_v16 }
 0xb1d   :  { %5180 = vpow2.f32 %v4670_v40 }
 0xb1e   :  { %5182 = vpow2.f32 %v4671_v14  ;;  %3450 = vmatpush.bf16.msra.mxu2 %v6227_v35 }
 0xb1f   :  { %v2860_v10 = vpop.f32.mrf.mxu2  ;;  %v2875_v15 = vpop.f32.mrf.mxu3 }
 0xb20   :  { %v2879_v18 = vadd.f32 %v2875_v15, %v2865_v4  ;;  %v2832_v25 = vpop.f32.mrf.mxu0  ;;  %v2847_v26 = vpop.f32.mrf.mxu1  ;;  %v2864_v57 = vadd.f32 %v2860_v10, %v2850_v17 }
 0xb22   :  { %v4672_v27 = vmul.f32 -1.442695, %v2879_v18  ;;  %3451 = vmatpush.bf16.msra.mxu2 %v6290_v23 }
 0xb23   :  { %v5181_v31 = vpop.eup %5180 }
 0xb24   :  { %v5183_v32 = vpop.eup %5182  ;;  %v6193_v33 = vadd.f32 1.0, %v5181_v31  ;;  %5184 = vpow2.f32 %v4672_v27 }
 0xb25   :  { %v6195_v34 = vadd.f32 1.0, %v5183_v32 }
 0xb26   :  { %5186 = vrcp.f32 %v6193_v33  ;;  %v2893_v42 = vand.u32 2147483647, %v6193_v33  ;;  %v2895_v48 = vand.u32 2147483648, %v6193_v33  ;;  %vm2889_vm2 = vweird.f32 %v6193_v33 }
 0xb27   :  { %5188 = vrcp.f32 %v6195_v34  ;;  %v2862_v22 = vpop.f32.mrf.mxu2  ;;  %v2877_v49 = vpop.f32.mrf.mxu3  ;;  %v2914_v0 = vand.u32 2147483648, %v6195_v34  ;;  %v2912_v62 = vand.u32 2147483647, %v6195_v34  ;;  %vm2908_vm3 = vweird.f32 %v6195_v34 }
 0xb28   :  { %v3014_v52 = vpop.f32.mrf.mxu0  ;;  %v3073_v53 = vpop.f32.mrf.mxu1  ;;  %v2896_v3 = vor.u32 1.1754944e-38, %v2895_v48  ;;  %vm2894_vm6 = vcmp.eq.f32.partialorder %v2893_v42, 8.507059e+37 }
 0xb29   :  { %v3015_v38 = vadd.f32 %v6200_v37, %v3014_v52  ;;  %v3074_v43 = vadd.f32 %v6205_v44, %v3073_v53  ;;  %v2915_v16 = vor.u32 1.1754944e-38, %v2914_v0  ;;  %vm2913_vm7 = vcmp.eq.f32.partialorder %v2912_v62, 8.507059e+37 }
 0xb2a   :  { %v5185_v63 = vpop.eup %5184 }
 0xb2b   :  { %v6250_v56 = vadd.f32 1.0, %v5185_v63  ;;  %3034 = vst.msk [vmem:[#allocation2] sm:$0xff] %vm257_vm1, %v3015_v38 }
 0xb2c   :  { %v5187_v29 = vpop.eup %5186  ;;  %3093 = vst.msk [vmem:[#allocation3] sm:$0xff] %vm257_vm1, %v3074_v43 }
 0xb2d   :  { %v5189_v21 = vpop.eup %5188  ;;  %v2885_v6 = vmul.f32 %v5187_v29, %v6193_v33  ;;  %5190 = vrcp.f32 %v6250_v56  ;;  %vm2890_vm15 = vweird.f32 %v5187_v29  ;;  %vm2928_vm9 = vweird.f32 %v6250_v56 }
 0xb2e   :  { %v2904_v24 = vmul.f32 %v5189_v21, %v6195_v34  ;;  %5192 = vtanh.f32 %v2864_v57  ;;  %vm2909_vm0 = vweird.f32 %v5189_v21  ;;  %vm2891_vm4 = vmor %vm2889_vm2, %vm2890_vm15  ;;  %v2932_v43 = vand.u32 2147483647, %v6250_v56 }
 0xb2f   :  { %v2886_v41 = vsub.f32 1.0, %v2885_v6  ;;  %v3132_v61 = vpop.f32.mrf.mxu2  ;;  %v3191_v50 = vpop.f32.mrf.mxu3  ;;  %vm2910_vm5 = vmor %vm2908_vm3, %vm2909_vm0 }
 0xb30   :  { %v2905_v30 = vsub.f32 1.0, %v2904_v24  ;;  %v3133_v55 = vadd.f32 %v6257_v5, %v3132_v61  ;;  %v3016_v20 = vpop.f32.mrf.mxu0  ;;  %v3075_v1 = vpop.f32.mrf.mxu1  ;;  %v3192_v54 = vadd.f32 %v6264_v7, %v3191_v50  ;;  %vm2933_vm11 = vcmp.eq.f32.partialorder %v2932_v43, 8.507059e+37 }
 0xb31   :  { %v2887_v11 = vmul.f32 %v5187_v29, %v2886_v41  ;;  %v3017_v2 = vadd.f32 %v6200_v37, %v3016_v20  ;;  %v3076_v60 = vadd.f32 %v6205_v44, %v3075_v1 }
 0xb32   :  { %v2906_v12 = vmul.f32 %v5189_v21, %v2905_v30  ;;  %3152 = vst.msk [vmem:[#allocation4] sm:$0xff] %vm257_vm1, %v3133_v55  ;;  %v3238_v43 = vld [vmem:[#allocation2] sm:$0xff] }
 0xb33   :  { %v6283_v39 = vpop.eup %5190  ;;  %v2888_v8 = vadd.f32 %v5187_v29, %v2887_v11  ;;  %3211 = vst.msk [vmem:[#allocation5] sm:$0xff] %vm257_vm1, %v3192_v54 }
 0xb34   :  { %v2907_v9 = vadd.f32 %v5189_v21, %v2906_v12  ;;  %v2924_v13 = vmul.f32 %v6283_v39, %v6250_v56  ;;  %3035 = vst.msk [vmem:[#allocation2 + $0x8] sm:$0xff] %vm257_vm1, %v3017_v2  ;;  %v5193_v36 = vpop.eup %5192  ;;  %vm2929_vm8 = vweird.f32 %v6283_v39 }
 0xb35   :  { %v2892_v40 = vsel %vm2891_vm4, %v5187_v29, %v2888_v8  ;;  %3094 = vst.msk [vmem:[#allocation3 + $0x8] sm:$0xff] %vm257_vm1, %v3076_v60  ;;  %vm2930_vm10 = vmor %vm2928_vm9, %vm2929_vm8 }
 0xb36   :  { %v2897_v14 = vsel %vm2894_vm6, %v2896_v3, %v2892_v40  ;;  %v2911_v10 = vsel %vm2910_vm5, %v5189_v21, %v2907_v9  ;;  %v2925_v4 = vsub.f32 1.0, %v2924_v13 }
 0xb37   :  { %v2916_v15 = vsel %vm2913_vm7, %v2915_v16, %v2911_v10  ;;  %v2939_v18 = vmul.f32 %v5193_v36, %v2897_v14  ;;  %v3134_v25 = vpop.f32.mrf.mxu2  ;;  %v3193_v26 = vpop.f32.mrf.mxu3 }
 0xb38   :  { %v2938_v27 = vmul.f32 %v2916_v15, %v6173_v51  ;;  %v2926_v31 = vmul.f32 %v6283_v39, %v2925_v4  ;;  %v3135_v32 = vadd.f32 %v6257_v5, %v3134_v25  ;;  %v3194_v33 = vadd.f32 %v6264_v7, %v3193_v26  ;;  %v3019_v34 = vpop.f32.mrf.mxu0  ;;  %v3078_v22 = vpop.f32.mrf.mxu1 }
 0xb39   :  { %v3020_v49 = vadd.f32 %v6200_v37, %v3019_v34  ;;  %v3079_v52 = vadd.f32 %v6205_v44, %v3078_v22  ;;  %v2934_v51 = vand.u32 2147483648, %v6250_v56 }
 0xb3a   :  { %v2940_v53 = vadd.f32 %v2939_v18, %v2938_v27  ;;  %3153 = vst.msk [vmem:[#allocation4 + $0x8] sm:$0xff] %vm257_vm1, %v3135_v32  ;;  %v2927_v38 = vadd.f32 %v6283_v39, %v2926_v31 }
 0xb3b   :  { %3212 = vst.msk [vmem:[#allocation5 + $0x8] sm:$0xff] %vm257_vm1, %v3194_v33  ;;  %v2935_v29 = vor.u32 1.1754944e-38, %v2934_v51 }
 0xb3c   :  { %5194 = vtanh.f32 %v2940_v53  ;;  %3036 = vst.msk [vmem:[#allocation2 + $0x10] sm:$0xff] %vm257_vm1, %v3020_v49  ;;  %v2931_v63 = vsel %vm2930_vm10, %v6283_v39, %v2927_v38 }
 0xb3d   :  { %3095 = vst.msk [vmem:[#allocation3 + $0x10] sm:$0xff] %vm257_vm1, %v3079_v52  ;;  %v2936_v61 = vsel %vm2933_vm11, %v2935_v29, %v2931_v63 }
 0xb3f   :  { %v3137_v17 = vpop.f32.mrf.mxu2  ;;  %v3196_v57 = vpop.f32.mrf.mxu3 }
 0xb40   :  { %v3138_v21 = vadd.f32 %v6257_v5, %v3137_v17  ;;  %v3197_v6 = vadd.f32 %v6264_v7, %v3196_v57  ;;  %v3021_v24 = vpop.f32.mrf.mxu0  ;;  %v3080_v41 = vpop.f32.mrf.mxu1  ;;  %v3265_v17 = vld [vmem:[#allocation3] sm:$0xff] }
 0xb41   :  { %v3022_v42 = vadd.f32 %v6200_v37, %v3021_v24  ;;  %v3081_v48 = vadd.f32 %v6205_v44, %v3080_v41  ;;  %v3319_v24 = vld [vmem:[#allocation5] sm:$0xff] }
 0xb42   :  { %v5195_v56 = vpop.eup %5194  ;;  %3154 = vst.msk [vmem:[#allocation4 + $0x10] sm:$0xff] %vm257_vm1, %v3138_v21 }
 0xb43   :  { %v2942_v50 = vmul.f32 %v5195_v56, %v2936_v61  ;;  %3213 = vst.msk [vmem:[#allocation5 + $0x10] sm:$0xff] %vm257_vm1, %v3197_v6 }
 0xb44   :  { %3037 = vst.msk [vmem:[#allocation2 + $0x18] sm:$0xff] %vm257_vm1, %v3022_v42 }
 0xb45   :  { %v2943_v30 = vpack.c.bf16 %v2942_v50, %v2942_v50  ;;  %3096 = vst.msk [vmem:[#allocation3 + $0x18] sm:$0xff] %vm257_vm1, %v3081_v48 }
 0xb47   :  { %2944 = vst.msk [vmem:[#allocation6 + $0x1c] sm:$0xf] %vm685_vm14, %v2943_v30  ;;  %v3139_v0 = vpop.f32.mrf.mxu2  ;;  %v3198_v55 = vpop.f32.mrf.mxu3 }
 0xb48   :  { %v3140_v20 = vadd.f32 %v6257_v5, %v3139_v0  ;;  %v3199_v1 = vadd.f32 %v6264_v7, %v3198_v55  ;;  %v3024_v11 = vpop.f32.mrf.mxu0  ;;  %v3083_v54 = vpop.f32.mrf.mxu1 }
 0xb49   :  { %v3025_v2 = vadd.f32 %v6200_v37, %v3024_v11  ;;  %v3084_v60 = vadd.f32 %v6205_v44, %v3083_v54 }
 0xb4a   :  { %3155 = vst.msk [vmem:[#allocation4 + $0x18] sm:$0xff] %vm257_vm1, %v3140_v20 }
 0xb4b   :  { %3214 = vst.msk [vmem:[#allocation5 + $0x18] sm:$0xff] %vm257_vm1, %v3199_v1  ;;  %v3292_v1 = vld [vmem:[#allocation4] sm:$0xff] }
 0xb4c   :  { %3038 = vst.msk [vmem:[#allocation2 + $0x20] sm:$0xff] %vm257_vm1, %v3025_v2 }
 0xb4d   :  { %3097 = vst.msk [vmem:[#allocation3 + $0x20] sm:$0xff] %vm257_vm1, %v3084_v60 }
 0xb4e   :  { %v4896_v12 = vld [vmem:[#allocation6 + $0x18] sm:$0xff] }
 0xb4f   :  { %v3142_v62 = vpop.f32.mrf.mxu2  ;;  %v3201_v39 = vpop.f32.mrf.mxu3  ;;  %4700 = vmatmul.msk.bf16.gmra.mxu0 %vm257_vm1, %v4896_v12  ;;  %4713 = vmatmul.msk.bf16.gmra.mxu1 %vm257_vm1, %v4896_v12 }
 0xb50   :  { %v3143_v8 = vadd.f32 %v6257_v5, %v3142_v62  ;;  %v3202_v3 = vadd.f32 %v6264_v7, %v3201_v39  ;;  %v3026_v9 = vpop.f32.mrf.mxu0  ;;  %v3085_v13 = vpop.f32.mrf.mxu1  ;;  %4726 = vmatmul.msk.bf16.gmra.mxu2 %vm257_vm1, %v4896_v12  ;;  %4739 = vmatmul.msk.bf16.gmra.mxu3 %vm257_vm1, %v4896_v12 }
 0xb51   :  { %v3027_v36 = vadd.f32 %v6200_v37, %v3026_v9  ;;  %v3086_v16 = vadd.f32 %v6205_v44, %v3085_v13 }
 0xb52   :  { %3156 = vst.msk [vmem:[#allocation4 + $0x20] sm:$0xff] %vm257_vm1, %v3143_v8 }
 0xb53   :  { %3215 = vst.msk [vmem:[#allocation5 + $0x20] sm:$0xff] %vm257_vm1, %v3202_v3 }
 0xb54   :  { %3039 = vst.msk [vmem:[#allocation2 + $0x28] sm:$0xff] %vm257_vm1, %v3027_v36 }
 0xb55   :  { %3098 = vst.msk [vmem:[#allocation3 + $0x28] sm:$0xff] %vm257_vm1, %v3086_v16 }
 0xb57   :  { %v3144_v40 = vpop.f32.mrf.mxu2  ;;  %v3203_v14 = vpop.f32.mrf.mxu3 }
 0xb58   :  { %v3145_v10 = vadd.f32 %v6257_v5, %v3144_v40  ;;  %v3204_v4 = vadd.f32 %v6264_v7, %v3203_v14 }
 0xb5a   :  { %3157 = vst.msk [vmem:[#allocation4 + $0x28] sm:$0xff] %vm257_vm1, %v3145_v10 }
 0xb5b   :  { %3216 = vst.msk [vmem:[#allocation5 + $0x28] sm:$0xff] %vm257_vm1, %v3204_v4 }
 0xb5f   :  { %3259 = vmatmul.bf16.vlgmr.msrb.gmra.mxu0 %v5535_v28  ;;  %3286 = vmatmul.bf16.vlgmr.msrb.gmra.mxu1 %v5535_v28 }
 0xb60   :  { %3313 = vmatmul.bf16.vlgmr.msrb.gmra.mxu2 %v5535_v28  ;;  %3340 = vmatmul.bf16.vlgmr.msrb.gmra.mxu3 %v5535_v28 }
 0xb61   :  { %3547 = vmatpush.bf16.msrb.mxu0 %v6212_v45  ;;  %3562 = vmatpush.bf16.msrb.mxu1 %v6217_v46 }
 0xb62   :  { %3592 = vmatpush.bf16.msrb.mxu3 %v6222_v47  ;;  %3577 = vmatpush.bf16.msrb.mxu2 %v6227_v35 }
 0xb65   :  { %3548 = vmatpush.bf16.msrb.mxu0 %v6236_v58  ;;  %3563 = vmatpush.bf16.msrb.mxu1 %v6241_v59 }
 0xb66   :  { %3578 = vmatpush.bf16.msrb.mxu2 %v6290_v23  ;;  %3593 = vmatpush.bf16.msrb.mxu3 %v6248_v19 }
 0xbcc   :  { %v3029_v15 = vpop.f32.mrf.mxu0  ;;  %v3088_v18 = vpop.f32.mrf.mxu1 }
 0xbcd   :  { %v3030_v28 = vadd.f32 %v6200_v37, %v3029_v15  ;;  %v3089_v25 = vadd.f32 %v6205_v44, %v3088_v18 }
 0xbcf   :  { %3040 = vst.msk [vmem:[#allocation2 + $0x30] sm:$0xff] %vm257_vm1, %v3030_v28 }
 0xbd0   :  { %3099 = vst.msk [vmem:[#allocation3 + $0x30] sm:$0xff] %vm257_vm1, %v3089_v25 }
 0xbd3   :  { %v3147_v26 = vpop.f32.mrf.mxu2  ;;  %v3206_v27 = vpop.f32.mrf.mxu3 }
 0xbd4   :  { %v3148_v31 = vadd.f32 %v6257_v5, %v3147_v26  ;;  %v3207_v32 = vadd.f32 %v6264_v7, %v3206_v27  ;;  %v3031_v33 = vpop.f32.mrf.mxu0  ;;  %v3090_v34 = vpop.f32.mrf.mxu1 }
 0xbd5   :  { %v3032_v22 = vadd.f32 %v6200_v37, %v3031_v33  ;;  %v3091_v49 = vadd.f32 %v6205_v44, %v3090_v34 }
 0xbd6   :  { %3158 = vst.msk [vmem:[#allocation4 + $0x30] sm:$0xff] %vm257_vm1, %v3148_v31 }
 0xbd7   :  { %3217 = vst.msk [vmem:[#allocation5 + $0x30] sm:$0xff] %vm257_vm1, %v3207_v32 }
 0xbd8   :  { %3041 = vst.msk [vmem:[#allocation2 + $0x38] sm:$0xff] %vm257_vm1, %v3032_v22 }
 0xbd9   :  { %3100 = vst.msk [vmem:[#allocation3 + $0x38] sm:$0xff] %vm257_vm1, %v3091_v49 }
 0xbdb   :  { %v3149_v52 = vpop.f32.mrf.mxu2  ;;  %v3208_v53 = vpop.f32.mrf.mxu3 }
 0xbdc   :  { %v3150_v38 = vadd.f32 %v6257_v5, %v3149_v52  ;;  %v3209_v51 = vadd.f32 %v6264_v7, %v3208_v53  ;;  %v3260_v63 = vpop.f32.mrf.mxu0  ;;  %v3287_v37 = vpop.f32.mrf.mxu1 }
 0xbdd   :  { %v3264_v57 = vadd.f32 %v3260_v63, %v3238_v43  ;;  %v3291_v44 = vadd.f32 %v3287_v37, %v3265_v17 }
 0xbde   :  { %3159 = vst.msk [vmem:[#allocation4 + $0x38] sm:$0xff] %vm257_vm1, %v3150_v38 }
 0xbdf   :  { %3218 = vst.msk [vmem:[#allocation5 + $0x38] sm:$0xff] %vm257_vm1, %v3209_v51  ;;  %v4784_v29 = vmul.f32 -1.442695, %v3264_v57  ;;  %v4785_v21 = vmul.f32 -1.442695, %v3291_v44 }
 0xbe1   :  { %5196 = vpow2.f32 %v4784_v29  ;;  %v3410_v29 = vld [vmem:[#allocation2 + $0x8] sm:$0xff] }
 0xbe2   :  { %5198 = vpow2.f32 %v4785_v21 }
 0xbe3   :  { %v3314_v6 = vpop.f32.mrf.mxu2  ;;  %v3341_v41 = vpop.f32.mrf.mxu3 }
 0xbe4   :  { %v3345_v5 = vadd.f32 %v3341_v41, %v3319_v24  ;;  %v3262_v42 = vpop.f32.mrf.mxu0  ;;  %v3289_v7 = vpop.f32.mrf.mxu1  ;;  %v3318_v2 = vadd.f32 %v3314_v6, %v3292_v1  ;;  %v3428_v6 = vld [vmem:[#allocation3 + $0x8] sm:$0xff] }
 0xbe6   :  { %v4786_v48 = vmul.f32 -1.442695, %v3345_v5 }
 0xbe7   :  { %v5197_v56 = vpop.eup %5196 }
 0xbe8   :  { %v5199_v61 = vpop.eup %5198  ;;  %v3349_v50 = vadd.f32 1.0, %v5197_v56  ;;  %5200 = vpow2.f32 %v4786_v48  ;;  %v3458_v56 = vld [vmem:[#allocation5 + $0x8] sm:$0xff] }
 0xbe9   :  { %v3368_v30 = vadd.f32 1.0, %v5199_v61 }
 0xbea   :  { %5202 = vrcp.f32 %v3349_v50  ;;  %v3361_v3 = vand.u32 2147483648, %v3349_v50  ;;  %v3359_v36 = vand.u32 2147483647, %v3349_v50  ;;  %vm3355_vm13 = vweird.f32 %v3349_v50 }
 0xbeb   :  { %5204 = vrcp.f32 %v3368_v30  ;;  %v3343_v0 = vpop.f32.mrf.mxu3  ;;  %v3316_v55 = vpop.f32.mrf.mxu2  ;;  %v3380_v9 = vand.u32 2147483648, %v3368_v30  ;;  %v3378_v40 = vand.u32 2147483647, %v3368_v30  ;;  %vm3374_vm15 = vweird.f32 %v3368_v30 }
 0xbec   :  { %v3362_v4 = vor.u32 1.1754944e-38, %v3361_v3  ;;  %vm3360_vm2 = vcmp.eq.f32.partialorder %v3359_v36, 8.507059e+37 }
 0xbed   :  { %v3381_v28 = vor.u32 1.1754944e-38, %v3380_v9  ;;  %vm3379_vm4 = vcmp.eq.f32.partialorder %v3378_v40, 8.507059e+37 }
 0xbee   :  { %v5201_v20 = vpop.eup %5200 }
 0xbef   :  { %v3388_v11 = vadd.f32 1.0, %v5201_v20 }
 0xbf0   :  { %v5203_v54 = vpop.eup %5202 }
 0xbf1   :  { %v5205_v60 = vpop.eup %5204  ;;  %v3351_v12 = vmul.f32 %v5203_v54, %v3349_v50  ;;  %5206 = vrcp.f32 %v3388_v11  ;;  %vm3356_vm14 = vweird.f32 %v5203_v54  ;;  %v3400_v38 = vand.u32 2147483648, %v3388_v11 }
 0xbf2   :  { %v3370_v62 = vmul.f32 %v5205_v60, %v3368_v30  ;;  %5208 = vtanh.f32 %v3318_v2  ;;  %vm3375_vm12 = vweird.f32 %v5205_v60  ;;  %vm3357_vm0 = vmor %vm3355_vm13, %vm3356_vm14  ;;  %vm3394_vm6 = vweird.f32 %v3388_v11 }
 0xbf3   :  { %v3352_v39 = vsub.f32 1.0, %v3351_v12  ;;  %vm3376_vm3 = vmor %vm3374_vm15, %vm3375_vm12  ;;  %v3398_v51 = vand.u32 2147483647, %v3388_v11  ;;  %v3401_v63 = vor.u32 1.1754944e-38, %v3400_v38 }
 0xbf4   :  { %v3371_v8 = vsub.f32 1.0, %v3370_v62  ;;  %v3443_v62 = vld [vmem:[#allocation4 + $0x8] sm:$0xff] }
 0xbf5   :  { %v3353_v13 = vmul.f32 %v5203_v54, %v3352_v39  ;;  %vm3399_vm8 = vcmp.eq.f32.partialorder %v3398_v51, 8.507059e+37 }
 0xbf6   :  { %v3372_v16 = vmul.f32 %v5205_v60, %v3371_v8 }
 0xbf7   :  { %v5207_v14 = vpop.eup %5206  ;;  %v3354_v10 = vadd.f32 %v5203_v54, %v3353_v13 }
 0xbf8   :  { %v3373_v15 = vadd.f32 %v5205_v60, %v3372_v16  ;;  %v3390_v18 = vmul.f32 %v5207_v14, %v3388_v11  ;;  %v5209_v26 = vpop.eup %5208  ;;  %vm3395_vm5 = vweird.f32 %v5207_v14 }
 0xbf9   :  { %v3358_v25 = vsel %vm3357_vm0, %v5203_v54, %v3354_v10  ;;  %vm3396_vm7 = vmor %vm3394_vm6, %vm3395_vm5 }
 0xbfa   :  { %v3363_v27 = vsel %vm3360_vm2, %v3362_v4, %v3358_v25  ;;  %v3377_v31 = vsel %vm3376_vm3, %v5205_v60, %v3373_v15  ;;  %v3391_v32 = vsub.f32 1.0, %v3390_v18 }
 0xbfb   :  { %v3382_v33 = vsel %vm3379_vm4, %v3381_v28, %v3377_v31  ;;  %v3405_v34 = vmul.f32 %v5209_v26, %v3363_v27 }
 0xbfc   :  { %v3404_v22 = vmul.f32 0.0, %v3382_v33  ;;  %v3392_v49 = vmul.f32 %v5207_v14, %v3391_v32 }
 0xbfe   :  { %v6381_v52 = vadd.f32 %v3405_v34, %v3404_v22  ;;  %v3393_v53 = vadd.f32 %v5207_v14, %v3392_v49 }
 0xc00   :  { %5210 = vtanh.f32 %v6381_v52  ;;  %v3397_v43 = vsel %vm3396_vm7, %v5207_v14, %v3393_v53 }
 0xc01   :  { %v3402_v37 = vsel %vm3399_vm8, %v3401_v63, %v3397_v43 }
 0xc06   :  { %v5211_v17 = vpop.eup %5210 }
 0xc07   :  { %v3408_v57 = vmul.f32 %v5211_v17, %v3402_v37 }
 0xc09   :  { %v3409_v44 = vpack.c.bf16 %v3408_v57, %v3408_v57 }
 0xc0b   :  { %4787 = vmatmul.msk.bf16.vlgmr.msra.gmra.mxu0 %vm257_vm1, %v3409_v44  ;;  %4788 = vmatmul.msk.bf16.vlgmr.msra.gmra.mxu1 %vm257_vm1, %v3409_v44 }
 0xc0c   :  { %4789 = vmatmul.msk.bf16.vlgmr.msra.gmra.mxu2 %vm257_vm1, %v3409_v44  ;;  %4790 = vmatmul.msk.bf16.vlgmr.msra.gmra.mxu3 %vm257_vm1, %v3409_v44 }
 0xc0d   :  { %3674 = vmatpush.bf16.msra.mxu0 %v6212_v45  ;;  %3689 = vmatpush.bf16.msra.mxu1 %v6217_v46 }
 0xc0e   :  { %3719 = vmatpush.bf16.msra.mxu3 %v6222_v47  ;;  %3704 = vmatpush.bf16.msra.mxu2 %v6227_v35 }
 0xc11   :  { %3675 = vmatpush.bf16.msra.mxu0 %v6236_v58  ;;  %3690 = vmatpush.bf16.msra.mxu1 %v6241_v59 }
 0xc12   :  { %3705 = vmatpush.bf16.msra.mxu2 %v6290_v23  ;;  %3720 = vmatpush.bf16.msra.mxu3 %v6248_v19 }
 0xc88   :  { %v3423_v21 = vpop.f32.mrf.mxu0  ;;  %v3438_v24 = vpop.f32.mrf.mxu1 }
 0xc89   :  { %v3427_v41 = vadd.f32 %v3423_v21, %v3410_v29  ;;  %v3442_v5 = vadd.f32 %v3438_v24, %v3428_v6 }
 0xc8b   :  { %v4791_v42 = vmul.f32 -1.442695, %v3427_v41  ;;  %v4792_v7 = vmul.f32 -1.442695, %v3442_v5 }
 0xc8d   :  { %5212 = vpow2.f32 %v4791_v42 }
 0xc8e   :  { %5214 = vpow2.f32 %v4792_v7 }
 0xc8f   :  { %v3453_v48 = vpop.f32.mrf.mxu2  ;;  %v3468_v61 = vpop.f32.mrf.mxu3 }
 0xc90   :  { %v3472_v50 = vadd.f32 %v3468_v61, %v3458_v56  ;;  %v3425_v30 = vpop.f32.mrf.mxu0  ;;  %v3440_v0 = vpop.f32.mrf.mxu1  ;;  %v3457_v3 = vadd.f32 %v3453_v48, %v3443_v62  ;;  %v3555_v48 = vld [vmem:[#allocation3 + $0x10] sm:$0xff] }
 0xc92   :  { %v4793_v55 = vmul.f32 -1.442695, %v3472_v50 }
 0xc93   :  { %v5213_v20 = vpop.eup %5212 }
 0xc94   :  { %v5215_v1 = vpop.eup %5214  ;;  %v3476_v11 = vadd.f32 1.0, %v5213_v20  ;;  %5216 = vpow2.f32 %v4793_v55  ;;  %v3585_v20 = vld [vmem:[#allocation5 + $0x10] sm:$0xff] }
 0xc95   :  { %v3495_v54 = vadd.f32 1.0, %v5215_v1 }
 0xc96   :  { %5218 = vrcp.f32 %v3476_v11  ;;  %v3488_v14 = vand.u32 2147483648, %v3476_v11  ;;  %v3486_v15 = vand.u32 2147483647, %v3476_v11  ;;  %vm3482_vm11 = vweird.f32 %v3476_v11 }
 0xc97   :  { %5220 = vrcp.f32 %v3495_v54  ;;  %v3455_v2 = vpop.f32.mrf.mxu2  ;;  %v3470_v60 = vpop.f32.mrf.mxu3  ;;  %v3507_v10 = vand.u32 2147483648, %v3495_v54  ;;  %v3505_v28 = vand.u32 2147483647, %v3495_v54  ;;  %vm3501_vm14 = vweird.f32 %v3495_v54 }
 0xc98   :  { %v3489_v27 = vor.u32 1.1754944e-38, %v3488_v14  ;;  %vm3487_vm15 = vcmp.eq.f32.partialorder %v3486_v15, 8.507059e+37 }
 0xc99   :  { %v3508_v33 = vor.u32 1.1754944e-38, %v3507_v10  ;;  %vm3506_vm0 = vcmp.eq.f32.partialorder %v3505_v28, 8.507059e+37 }
 0xc9a   :  { %v5217_v12 = vpop.eup %5216 }
 0xc9b   :  { %v3515_v39 = vadd.f32 1.0, %v5217_v12 }
 0xc9c   :  { %v5219_v8 = vpop.eup %5218 }
 0xc9d   :  { %v5221_v9 = vpop.eup %5220  ;;  %v3478_v13 = vmul.f32 %v5219_v8, %v3476_v11  ;;  %5222 = vrcp.f32 %v3515_v39  ;;  %vm3483_vm9 = vweird.f32 %v5219_v8  ;;  %v3527_v44 = vand.u32 2147483648, %v3515_v39 }
 0xc9e   :  { %v3497_v36 = vmul.f32 %v5221_v9, %v3495_v54  ;;  %5224 = vtanh.f32 %v3457_v3  ;;  %vm3502_vm10 = vweird.f32 %v5221_v9  ;;  %vm3484_vm12 = vmor %vm3482_vm11, %vm3483_vm9  ;;  %vm3521_vm3 = vweird.f32 %v3515_v39 }
 0xc9f   :  { %v3479_v16 = vsub.f32 1.0, %v3478_v13  ;;  %vm3503_vm13 = vmor %vm3501_vm14, %vm3502_vm10  ;;  %v3525_v29 = vand.u32 2147483647, %v3515_v39  ;;  %v3528_v6 = vor.u32 1.1754944e-38, %v3527_v44 }
 0xca0   :  { %v3498_v40 = vsub.f32 1.0, %v3497_v36  ;;  %v3570_v36 = vld [vmem:[#allocation4 + $0x10] sm:$0xff] }
 0xca1   :  { %v3480_v4 = vmul.f32 %v5219_v8, %v3479_v16  ;;  %vm3526_vm5 = vcmp.eq.f32.partialorder %v3525_v29, 8.507059e+37 }
 0xca2   :  { %v3499_v18 = vmul.f32 %v5221_v9, %v3498_v40 }
 0xca3   :  { %v5223_v25 = vpop.eup %5222  ;;  %v3481_v26 = vadd.f32 %v5219_v8, %v3480_v4 }
 0xca4   :  { %v3500_v31 = vadd.f32 %v5221_v9, %v3499_v18  ;;  %v3517_v32 = vmul.f32 %v5223_v25, %v3515_v39  ;;  %v5225_v22 = vpop.eup %5224  ;;  %vm3522_vm2 = vweird.f32 %v5223_v25 }
 0xca5   :  { %v3485_v34 = vsel %vm3484_vm12, %v5219_v8, %v3481_v26  ;;  %vm3523_vm4 = vmor %vm3521_vm3, %vm3522_vm2 }
 0xca6   :  { %v3490_v49 = vsel %vm3487_vm15, %v3489_v27, %v3485_v34  ;;  %v3504_v53 = vsel %vm3503_vm13, %v5221_v9, %v3500_v31  ;;  %v3518_v38 = vsub.f32 1.0, %v3517_v32 }
 0xca7   :  { %v3509_v51 = vsel %vm3506_vm0, %v3508_v33, %v3504_v53  ;;  %v3532_v43 = vmul.f32 %v5225_v22, %v3490_v49 }
 0xca8   :  { %v3531_v63 = vmul.f32 %v3509_v51, %v6381_v52  ;;  %v3519_v17 = vmul.f32 %v5223_v25, %v3518_v38  ;;  %v3537_v52 = vld [vmem:[#allocation2 + $0x10] sm:$0xff] }
 0xcaa   :  { %v6397_v37 = vadd.f32 %v3532_v43, %v3531_v63  ;;  %v3520_v57 = vadd.f32 %v5223_v25, %v3519_v17 }
 0xcac   :  { %5226 = vtanh.f32 %v6397_v37  ;;  %v3524_v21 = vsel %vm3523_vm4, %v5223_v25, %v3520_v57 }
 0xcad   :  { %v3529_v41 = vsel %vm3526_vm5, %v3528_v6, %v3524_v21 }
 0xcb2   :  { %v5227_v24 = vpop.eup %5226 }
 0xcb3   :  { %v3535_v5 = vmul.f32 %v5227_v24, %v3529_v41 }
 0xcb5   :  { %v3536_v42 = vpack.c.bf16 %v3535_v5, %v3535_v5 }
 0xcb7   :  { %4794 = vmatmul.msk.bf16.vlgmr.msrb.gmra.mxu0 %vm257_vm1, %v3536_v42  ;;  %4795 = vmatmul.msk.bf16.vlgmr.msrb.gmra.mxu1 %vm257_vm1, %v3536_v42 }
 0xcb8   :  { %4796 = vmatmul.msk.bf16.vlgmr.msrb.gmra.mxu2 %vm257_vm1, %v3536_v42  ;;  %4797 = vmatmul.msk.bf16.vlgmr.msrb.gmra.mxu3 %vm257_vm1, %v3536_v42 }
 0xcb9   :  { %3801 = vmatpush.bf16.msrb.mxu0 %v6212_v45  ;;  %3816 = vmatpush.bf16.msrb.mxu1 %v6217_v46 }
 0xcba   :  { %3846 = vmatpush.bf16.msrb.mxu3 %v6222_v47  ;;  %3831 = vmatpush.bf16.msrb.mxu2 %v6227_v35 }
 0xcbd   :  { %3802 = vmatpush.bf16.msrb.mxu0 %v6236_v58  ;;  %3817 = vmatpush.bf16.msrb.mxu1 %v6241_v59 }
 0xcbe   :  { %3832 = vmatpush.bf16.msrb.mxu2 %v6290_v23  ;;  %3847 = vmatpush.bf16.msrb.mxu3 %v6248_v19 }
 0xd34   :  { %v3550_v7 = vpop.f32.mrf.mxu0  ;;  %v3565_v56 = vpop.f32.mrf.mxu1 }
 0xd35   :  { %v3554_v61 = vadd.f32 %v3550_v7, %v3537_v52  ;;  %v3569_v50 = vadd.f32 %v3565_v56, %v3555_v48 }
 0xd37   :  { %v4798_v30 = vmul.f32 -1.442695, %v3554_v61  ;;  %v4799_v0 = vmul.f32 -1.442695, %v3569_v50 }
 0xd39   :  { %5228 = vpow2.f32 %v4798_v30 }
 0xd3a   :  { %5230 = vpow2.f32 %v4799_v0 }
 0xd3b   :  { %v3580_v55 = vpop.f32.mrf.mxu2  ;;  %v3595_v1 = vpop.f32.mrf.mxu3 }
 0xd3c   :  { %v3599_v11 = vadd.f32 %v3595_v1, %v3585_v20  ;;  %v3552_v54 = vpop.f32.mrf.mxu0  ;;  %v3567_v2 = vpop.f32.mrf.mxu1  ;;  %v3584_v14 = vadd.f32 %v3580_v55, %v3570_v36  ;;  %v3682_v55 = vld [vmem:[#allocation3 + $0x18] sm:$0xff] }
 0xd3e   :  { %v4800_v60 = vmul.f32 -1.442695, %v3599_v11 }
 0xd3f   :  { %v5229_v12 = vpop.eup %5228 }
 0xd40   :  { %v5231_v62 = vpop.eup %5230  ;;  %v3603_v39 = vadd.f32 1.0, %v5229_v12  ;;  %5232 = vpow2.f32 %v4800_v60 }
 0xd41   :  { %v3622_v8 = vadd.f32 1.0, %v5231_v62 }
 0xd42   :  { %5234 = vrcp.f32 %v3603_v39  ;;  %v3615_v25 = vand.u32 2147483648, %v3603_v39  ;;  %v3613_v31 = vand.u32 2147483647, %v3603_v39  ;;  %vm3609_vm8 = vweird.f32 %v3603_v39 }
 0xd43   :  { %5236 = vrcp.f32 %v3622_v8  ;;  %v3582_v3 = vpop.f32.mrf.mxu2  ;;  %v3597_v9 = vpop.f32.mrf.mxu3  ;;  %v3634_v26 = vand.u32 2147483648, %v3622_v8  ;;  %v3632_v33 = vand.u32 2147483647, %v3622_v8  ;;  %vm3628_vm9 = vweird.f32 %v3622_v8 }
 0xd44   :  { %v3616_v49 = vor.u32 1.1754944e-38, %v3615_v25  ;;  %vm3614_vm14 = vcmp.eq.f32.partialorder %v3613_v31, 8.507059e+37 }
 0xd45   :  { %v3635_v51 = vor.u32 1.1754944e-38, %v3634_v26  ;;  %vm3633_vm12 = vcmp.eq.f32.partialorder %v3632_v33, 8.507059e+37 }
 0xd46   :  { %v5233_v13 = vpop.eup %5232 }
 0xd47   :  { %v3642_v16 = vadd.f32 1.0, %v5233_v13  ;;  %v3697_v13 = vld [vmem:[#allocation4 + $0x18] sm:$0xff] }
 0xd48   :  { %v5235_v40 = vpop.eup %5234 }
 0xd49   :  { %v5237_v10 = vpop.eup %5236  ;;  %v3605_v4 = vmul.f32 %v5235_v40, %v3603_v39  ;;  %5238 = vrcp.f32 %v3642_v16  ;;  %vm3610_vm6 = vweird.f32 %v5235_v40  ;;  %v3654_v42 = vand.u32 2147483648, %v3642_v16 }
 0xd4a   :  { %v3624_v15 = vmul.f32 %v5237_v10, %v3622_v8  ;;  %5240 = vtanh.f32 %v3584_v14  ;;  %vm3629_vm7 = vweird.f32 %v5237_v10  ;;  %vm3611_vm10 = vmor %vm3609_vm8, %vm3610_vm6  ;;  %vm3648_vm15 = vweird.f32 %v3642_v16 }
 0xd4b   :  { %v3606_v18 = vsub.f32 1.0, %v3605_v4  ;;  %vm3630_vm11 = vmor %vm3628_vm9, %vm3629_vm7  ;;  %v3652_v52 = vand.u32 2147483647, %v3642_v16  ;;  %v3655_v48 = vor.u32 1.1754944e-38, %v3654_v42 }
 0xd4c   :  { %v3625_v28 = vsub.f32 1.0, %v3624_v15 }
 0xd4d   :  { %v3607_v27 = vmul.f32 %v5235_v40, %v3606_v18  ;;  %vm3653_vm2 = vcmp.eq.f32.partialorder %v3652_v52, 8.507059e+37 }
 0xd4e   :  { %v3626_v32 = vmul.f32 %v5237_v10, %v3625_v28 }
 0xd4f   :  { %v5239_v34 = vpop.eup %5238  ;;  %v3608_v22 = vadd.f32 %v5235_v40, %v3607_v27 }
 0xd50   :  { %v3627_v53 = vadd.f32 %v5237_v10, %v3626_v32  ;;  %v3644_v38 = vmul.f32 %v5239_v34, %v3642_v16  ;;  %v5241_v63 = vpop.eup %5240  ;;  %vm3649_vm13 = vweird.f32 %v5239_v34 }
 0xd51   :  { %v3612_v43 = vsel %vm3611_vm10, %v5235_v40, %v3608_v22  ;;  %vm3650_vm0 = vmor %vm3648_vm15, %vm3649_vm13 }
 0xd52   :  { %v3617_v17 = vsel %vm3614_vm14, %v3616_v49, %v3612_v43  ;;  %v3631_v57 = vsel %vm3630_vm11, %v5237_v10, %v3627_v53  ;;  %v3645_v44 = vsub.f32 1.0, %v3644_v38 }
 0xd53   :  { %v3636_v29 = vsel %vm3633_vm12, %v3635_v51, %v3631_v57  ;;  %v3659_v21 = vmul.f32 %v5241_v63, %v3617_v17 }
 0xd54   :  { %v3658_v6 = vmul.f32 %v3636_v29, %v6397_v37  ;;  %v3646_v24 = vmul.f32 %v5239_v34, %v3645_v44  ;;  %v3664_v37 = vld [vmem:[#allocation2 + $0x18] sm:$0xff] }
 0xd56   :  { %v6413_v41 = vadd.f32 %v3659_v21, %v3658_v6  ;;  %v3647_v5 = vadd.f32 %v5239_v34, %v3646_v24 }
 0xd58   :  { %5242 = vtanh.f32 %v6413_v41  ;;  %v3651_v7 = vsel %vm3650_vm0, %v5239_v34, %v3647_v5 }
 0xd59   :  { %v3656_v61 = vsel %vm3653_vm2, %v3655_v48, %v3651_v7 }
 0xd5e   :  { %v5243_v56 = vpop.eup %5242 }
 0xd5f   :  { %v3662_v50 = vmul.f32 %v5243_v56, %v3656_v61 }
 0xd61   :  { %v3663_v30 = vpack.c.bf16 %v3662_v50, %v3662_v50 }
 0xd63   :  { %4801 = vmatmul.msk.bf16.vlgmr.msra.gmra.mxu0 %vm257_vm1, %v3663_v30  ;;  %4802 = vmatmul.msk.bf16.vlgmr.msra.gmra.mxu1 %vm257_vm1, %v3663_v30 }
 0xd64   :  { %4803 = vmatmul.msk.bf16.vlgmr.msra.gmra.mxu2 %vm257_vm1, %v3663_v30  ;;  %4804 = vmatmul.msk.bf16.vlgmr.msra.gmra.mxu3 %vm257_vm1, %v3663_v30 }
 0xd65   :  { %3928 = vmatpush.bf16.msra.mxu0 %v6212_v45  ;;  %3943 = vmatpush.bf16.msra.mxu1 %v6217_v46 }
 0xd66   :  { %3973 = vmatpush.bf16.msra.mxu3 %v6222_v47  ;;  %3958 = vmatpush.bf16.msra.mxu2 %v6227_v35  ;;  %v3712_v35 = vld [vmem:[#allocation5 + $0x18] sm:$0xff] }
 0xd69   :  { %3929 = vmatpush.bf16.msra.mxu0 %v6236_v58  ;;  %3944 = vmatpush.bf16.msra.mxu1 %v6241_v59 }
 0xd6a   :  { %3959 = vmatpush.bf16.msra.mxu2 %v6290_v23  ;;  %3974 = vmatpush.bf16.msra.mxu3 %v6248_v19 }
 0xde0   :  { %v3677_v0 = vpop.f32.mrf.mxu0  ;;  %v3692_v20 = vpop.f32.mrf.mxu1 }
 0xde1   :  { %v3681_v1 = vadd.f32 %v3677_v0, %v3664_v37  ;;  %v3696_v45 = vadd.f32 %v3692_v20, %v3682_v55  ;;  %v6445_v37 = vld [vmem:[%s6535_s8 + $0x18] sm:$0xff]  ;;  %v6457_v55 = vld [vmem:[%s6535_s8 + $0x28] sm:$0xff]  ;;  %v6463_v20 = vld [vmem:[%s6535_s8] sm:$0xff] }
 0xde2   :  { %v6451_v0 = vld [vmem:[%s6535_s8 + $0x38] sm:$0xff] }
 0xde3   :  { %v4805_v11 = vmul.f32 -1.442695, %v3681_v1  ;;  %v4806_v46 = vmul.f32 -1.442695, %v3696_v45  ;;  %v6469_v1 = vld [vmem:[%s6535_s8 + $0x10] sm:$0xff] }
 0xde4   :  { %v6476_v45 = vld [vmem:[%s6535_s8 + $0x30] sm:$0xff] }
 0xde5   :  { %5244 = vpow2.f32 %v4805_v11  ;;  %v3791_v11 = vld [vmem:[#allocation2 + $0x20] sm:$0xff] }
 0xde6   :  { %5246 = vpow2.f32 %v4806_v46 }
 0xde7   :  { %v3707_v47 = vpop.f32.mrf.mxu2  ;;  %v3722_v54 = vpop.f32.mrf.mxu3 }
 0xde8   :  { %v3726_v58 = vadd.f32 %v3722_v54, %v3712_v35  ;;  %v3679_v2 = vpop.f32.mrf.mxu0  ;;  %v3694_v59 = vpop.f32.mrf.mxu1  ;;  %v3711_v40 = vadd.f32 %v3707_v47, %v3697_v13  ;;  %v3809_v47 = vld [vmem:[#allocation3 + $0x20] sm:$0xff] }
 0xdea   :  { %v4807_v60 = vmul.f32 -1.442695, %v3726_v58 }
 0xdeb   :  { %v5245_v12 = vpop.eup %5244 }
 0xdec   :  { %v5247_v62 = vpop.eup %5246  ;;  %v3730_v19 = vadd.f32 1.0, %v5245_v12  ;;  %5248 = vpow2.f32 %v4807_v60  ;;  %v3839_v12 = vld [vmem:[#allocation5 + $0x20] sm:$0xff] }
 0xded   :  { %v3749_v39 = vadd.f32 1.0, %v5247_v62 }
 0xdee   :  { %5250 = vrcp.f32 %v3730_v19  ;;  %v3742_v28 = vand.u32 2147483648, %v3730_v19  ;;  %v3740_v27 = vand.u32 2147483647, %v3730_v19  ;;  %vm3736_vm5 = vweird.f32 %v3730_v19 }
 0xdef   :  { %5252 = vrcp.f32 %v3749_v39  ;;  %v3709_v8 = vpop.f32.mrf.mxu2  ;;  %v3724_v3 = vpop.f32.mrf.mxu3  ;;  %v3761_v25 = vand.u32 2147483648, %v3749_v39  ;;  %v3759_v32 = vand.u32 2147483647, %v3749_v39  ;;  %vm3755_vm6 = vweird.f32 %v3749_v39 }
 0xdf0   :  { %v3743_v22 = vor.u32 1.1754944e-38, %v3742_v28  ;;  %vm3741_vm9 = vcmp.eq.f32.partialorder %v3740_v27, 8.507059e+37 }
 0xdf1   :  { %v3762_v38 = vor.u32 1.1754944e-38, %v3761_v25  ;;  %vm3760_vm10 = vcmp.eq.f32.partialorder %v3759_v32, 8.507059e+37 }
 0xdf2   :  { %v5249_v9 = vpop.eup %5248 }
 0xdf3   :  { %v3769_v36 = vadd.f32 1.0, %v5249_v9 }
 0xdf4   :  { %v5251_v16 = vpop.eup %5250 }
 0xdf5   :  { %v5253_v14 = vpop.eup %5252  ;;  %v3732_v10 = vmul.f32 %v5251_v16, %v3730_v19  ;;  %5254 = vrcp.f32 %v3769_v36  ;;  %vm3737_vm3 = vweird.f32 %v5251_v16  ;;  %v3781_v42 = vand.u32 2147483648, %v3769_v36 }
 0xdf6   :  { %v3751_v4 = vmul.f32 %v5253_v14, %v3749_v39  ;;  %5256 = vtanh.f32 %v3711_v40  ;;  %vm3756_vm4 = vweird.f32 %v5253_v14  ;;  %vm3738_vm7 = vmor %vm3736_vm5, %vm3737_vm3  ;;  %vm3775_vm14 = vweird.f32 %v3769_v36 }
 0xdf7   :  { %v3733_v15 = vsub.f32 1.0, %v3732_v10  ;;  %vm3757_vm8 = vmor %vm3755_vm6, %vm3756_vm4  ;;  %v3779_v52 = vand.u32 2147483647, %v3769_v36  ;;  %v3782_v48 = vor.u32 1.1754944e-38, %v3781_v42  ;;  %v3824_v10 = vld [vmem:[#allocation4 + $0x20] sm:$0xff] }
 0xdf8   :  { %v3752_v18 = vsub.f32 1.0, %v3751_v4 }
 0xdf9   :  { %v3734_v26 = vmul.f32 %v5251_v16, %v3733_v15  ;;  %vm3780_vm13 = vcmp.eq.f32.partialorder %v3779_v52, 8.507059e+37 }
 0xdfa   :  { %v3753_v31 = vmul.f32 %v5253_v14, %v3752_v18 }
 0xdfb   :  { %v5255_v33 = vpop.eup %5254  ;;  %v3735_v34 = vadd.f32 %v5251_v16, %v3734_v26 }
 0xdfc   :  { %v3754_v49 = vadd.f32 %v5253_v14, %v3753_v31  ;;  %v3771_v53 = vmul.f32 %v5255_v33, %v3769_v36  ;;  %v5257_v43 = vpop.eup %5256  ;;  %vm3776_vm11 = vweird.f32 %v5255_v33 }
 0xdfd   :  { %v3739_v51 = vsel %vm3738_vm7, %v5251_v16, %v3735_v34  ;;  %vm3777_vm12 = vmor %vm3775_vm14, %vm3776_vm11 }
 0xdfe   :  { %v3744_v63 = vsel %vm3741_vm9, %v3743_v22, %v3739_v51  ;;  %v3758_v17 = vsel %vm3757_vm8, %v5253_v14, %v3754_v49  ;;  %v3772_v57 = vsub.f32 1.0, %v3771_v53 }
 0xdff   :  { %v3763_v44 = vsel %vm3760_vm10, %v3762_v38, %v3758_v17  ;;  %v3786_v29 = vmul.f32 %v5257_v43, %v3744_v63 }
 0xe00   :  { %v3785_v21 = vmul.f32 %v3763_v44, %v6413_v41  ;;  %v3773_v6 = vmul.f32 %v5255_v33, %v3772_v57  ;;  %v6439_v41 = vld [vmem:[%s6535_s8 + $0x8] sm:$0xff] }
 0xe02   :  { %v6429_v24 = vadd.f32 %v3786_v29, %v3785_v21  ;;  %v3774_v5 = vadd.f32 %v5255_v33, %v3773_v6 }
 0xe04   :  { %5258 = vtanh.f32 %v6429_v24  ;;  %v3778_v7 = vsel %vm3777_vm12, %v5255_v33, %v3774_v5 }
 0xe05   :  { %v3783_v61 = vsel %vm3780_vm13, %v3782_v48, %v3778_v7 }
 0xe0a   :  { %v5259_v56 = vpop.eup %5258 }
 0xe0b   :  { %v3789_v50 = vmul.f32 %v5259_v56, %v3783_v61 }
 0xe0d   :  { %v3790_v30 = vpack.c.bf16 %v3789_v50, %v3789_v50 }
 0xe0f   :  { %4808 = vmatmul.msk.bf16.vlgmr.msrb.gmra.mxu0 %vm257_vm1, %v3790_v30  ;;  %4809 = vmatmul.msk.bf16.vlgmr.msrb.gmra.mxu1 %vm257_vm1, %v3790_v30 }
 0xe10   :  { %4810 = vmatmul.msk.bf16.vlgmr.msrb.gmra.mxu2 %vm257_vm1, %v3790_v30  ;;  %4811 = vmatmul.msk.bf16.vlgmr.msrb.gmra.mxu3 %vm257_vm1, %v3790_v30 }
 0xe11   :  { %4055 = vmatpush.bf16.msrb.mxu0 %v6439_v41  ;;  %4070 = vmatpush.bf16.msrb.mxu1 %v6445_v37 }
 0xe12   :  { %4100 = vmatpush.bf16.msrb.mxu3 %v6451_v0  ;;  %4085 = vmatpush.bf16.msrb.mxu2 %v6457_v55 }
 0xe15   :  { %4056 = vmatpush.bf16.msrb.mxu0 %v6463_v20  ;;  %4071 = vmatpush.bf16.msrb.mxu1 %v6469_v1 }
 0xe16   :  { %4086 = vmatpush.bf16.msrb.mxu2 %v6290_v23  ;;  %4101 = vmatpush.bf16.msrb.mxu3 %v6476_v45 }
 0xe8c   :  { %v3804_v46 = vpop.f32.mrf.mxu0  ;;  %v3819_v35 = vpop.f32.mrf.mxu1 }
 0xe8d   :  { %v3808_v54 = vadd.f32 %v3804_v46, %v3791_v11  ;;  %v3823_v58 = vadd.f32 %v3819_v35, %v3809_v47 }
 0xe8f   :  { %v4812_v2 = vmul.f32 -1.442695, %v3808_v54  ;;  %v4813_v59 = vmul.f32 -1.442695, %v3823_v58 }
 0xe91   :  { %5260 = vpow2.f32 %v4812_v2  ;;  %v3918_v2 = vld [vmem:[#allocation2 + $0x28] sm:$0xff] }
 0xe92   :  { %5262 = vpow2.f32 %v4813_v59 }
 0xe93   :  { %v3834_v60 = vpop.f32.mrf.mxu2  ;;  %v3849_v23 = vpop.f32.mrf.mxu3 }
 0xe94   :  { %v3853_v62 = vadd.f32 %v3849_v23, %v3839_v12  ;;  %v3806_v19 = vpop.f32.mrf.mxu0  ;;  %v3821_v39 = vpop.f32.mrf.mxu1  ;;  %v3838_v18 = vadd.f32 %v3834_v60, %v3824_v10 }
 0xe96   :  { %v4814_v8 = vmul.f32 -1.442695, %v3853_v62 }
 0xe97   :  { %v5261_v3 = vpop.eup %5260 }
 0xe98   :  { %v5263_v9 = vpop.eup %5262  ;;  %v3857_v13 = vadd.f32 1.0, %v5261_v3  ;;  %5264 = vpow2.f32 %v4814_v8 }
 0xe99   :  { %v3876_v36 = vadd.f32 1.0, %v5263_v9 }
 0xe9a   :  { %5266 = vrcp.f32 %v3857_v13  ;;  %v3869_v32 = vand.u32 2147483648, %v3857_v13  ;;  %v3867_v22 = vand.u32 2147483647, %v3857_v13  ;;  %vm3863_vm2 = vweird.f32 %v3857_v13 }
 0xe9b   :  { %5268 = vrcp.f32 %v3876_v36  ;;  %v3836_v16 = vpop.f32.mrf.mxu2  ;;  %v3851_v40 = vpop.f32.mrf.mxu3  ;;  %v3888_v33 = vand.u32 2147483648, %v3876_v36  ;;  %v3886_v53 = vand.u32 2147483647, %v3876_v36  ;;  %vm3882_vm3 = vweird.f32 %v3876_v36 }
 0xe9c   :  { %v3870_v43 = vor.u32 1.1754944e-38, %v3869_v32  ;;  %vm3868_vm6 = vcmp.eq.f32.partialorder %v3867_v22, 8.507059e+37 }
 0xe9d   :  { %v3889_v57 = vor.u32 1.1754944e-38, %v3888_v33  ;;  %vm3887_vm7 = vcmp.eq.f32.partialorder %v3886_v53, 8.507059e+37 }
 0xe9e   :  { %v5265_v14 = vpop.eup %5264 }
 0xe9f   :  { %v3896_v4 = vadd.f32 1.0, %v5265_v14  ;;  %v3951_v14 = vld [vmem:[#allocation4 + $0x28] sm:$0xff] }
 0xea0   :  { %v5267_v15 = vpop.eup %5266 }
 0xea1   :  { %v5269_v28 = vpop.eup %5268  ;;  %v3859_v25 = vmul.f32 %v5267_v15, %v3857_v13  ;;  %5270 = vrcp.f32 %v3896_v4  ;;  %vm3864_vm15 = vweird.f32 %v5267_v15  ;;  %v3908_v50 = vand.u32 2147483648, %v3896_v4 }
 0xea2   :  { %v3878_v26 = vmul.f32 %v5269_v28, %v3876_v36  ;;  %5272 = vtanh.f32 %v3838_v18  ;;  %vm3883_vm0 = vweird.f32 %v5269_v28  ;;  %vm3865_vm4 = vmor %vm3863_vm2, %vm3864_vm15  ;;  %vm3902_vm9 = vweird.f32 %v3896_v4 }
 0xea3   :  { %v3860_v27 = vsub.f32 1.0, %v3859_v25  ;;  %vm3884_vm5 = vmor %vm3882_vm3, %vm3883_vm0  ;;  %v3906_v30 = vand.u32 2147483647, %v3896_v4  ;;  %v3909_v46 = vor.u32 1.1754944e-38, %v3908_v50 }
 0xea4   :  { %v3879_v31 = vsub.f32 1.0, %v3878_v26 }
 0xea5   :  { %v3861_v34 = vmul.f32 %v5267_v15, %v3860_v27  ;;  %vm3907_vm11 = vcmp.eq.f32.partialorder %v3906_v30, 8.507059e+37 }
 0xea6   :  { %v3880_v49 = vmul.f32 %v5269_v28, %v3879_v31 }
 0xea7   :  { %v5271_v38 = vpop.eup %5270  ;;  %v3862_v51 = vadd.f32 %v5267_v15, %v3861_v34 }
 0xea8   :  { %v3881_v63 = vadd.f32 %v5269_v28, %v3880_v49  ;;  %v3898_v17 = vmul.f32 %v5271_v38, %v3896_v4  ;;  %v5273_v29 = vpop.eup %5272  ;;  %vm3903_vm8 = vweird.f32 %v5271_v38 }
 0xea9   :  { %v3866_v44 = vsel %vm3865_vm4, %v5267_v15, %v3862_v51  ;;  %vm3904_vm10 = vmor %vm3902_vm9, %vm3903_vm8 }
 0xeaa   :  { %v3871_v21 = vsel %vm3868_vm6, %v3870_v43, %v3866_v44  ;;  %v3885_v6 = vsel %vm3884_vm5, %v5269_v28, %v3881_v63  ;;  %v3899_v5 = vsub.f32 1.0, %v3898_v17 }
 0xeab   :  { %v3890_v42 = vsel %vm3887_vm7, %v3889_v57, %v3885_v6  ;;  %v3913_v52 = vmul.f32 %v5273_v29, %v3871_v21 }
 0xeac   :  { %v3912_v7 = vmul.f32 %v3890_v42, %v6429_v24  ;;  %v3900_v48 = vmul.f32 %v5271_v38, %v3899_v5  ;;  %v5347_v24 = vld [vmem:[%s6535_s8 + $0x20] sm:$0xff] }
 0xeae   :  { %v6480_v56 = vadd.f32 %v3913_v52, %v3912_v7  ;;  %v3901_v61 = vadd.f32 %v5271_v38, %v3900_v48 }
 0xeb0   :  { %5274 = vtanh.f32 %v6480_v56  ;;  %v3905_v11 = vsel %vm3904_vm10, %v5271_v38, %v3901_v61 }
 0xeb1   :  { %v3910_v35 = vsel %vm3907_vm11, %v3909_v46, %v3905_v11 }
 0xeb6   :  { %v5275_v47 = vpop.eup %5274 }
 0xeb7   :  { %v3916_v54 = vmul.f32 %v5275_v47, %v3910_v35 }
 0xeb9   :  { %v3917_v58 = vpack.c.bf16 %v3916_v54, %v3916_v54 }
 0xebb   :  { %4815 = vmatmul.msk.bf16.vlgmr.msra.gmra.mxu0 %vm257_vm1, %v3917_v58  ;;  %4816 = vmatmul.msk.bf16.vlgmr.msra.gmra.mxu1 %vm257_vm1, %v3917_v58 }
 0xebc   :  { %4817 = vmatmul.msk.bf16.vlgmr.msra.gmra.mxu2 %vm257_vm1, %v3917_v58  ;;  %4818 = vmatmul.msk.bf16.vlgmr.msra.gmra.mxu3 %vm257_vm1, %v3917_v58 }
 0xebd   :  { %4182 = vmatpush.bf16.msra.mxu0 %v6439_v41  ;;  %4197 = vmatpush.bf16.msra.mxu1 %v6445_v37  ;;  %v3936_v41 = vld [vmem:[#allocation3 + $0x28] sm:$0xff] }
 0xebe   :  { %4227 = vmatpush.bf16.msra.mxu3 %v6451_v0  ;;  %4212 = vmatpush.bf16.msra.mxu2 %v6457_v55 }
 0xec1   :  { %4183 = vmatpush.bf16.msra.mxu0 %v6463_v20  ;;  %4198 = vmatpush.bf16.msra.mxu1 %v6469_v1  ;;  %v3966_v20 = vld [vmem:[#allocation5 + $0x28] sm:$0xff] }
 0xec2   :  { %4213 = vmatpush.bf16.msra.mxu2 %v5347_v24  ;;  %4228 = vmatpush.bf16.msra.mxu3 %v6476_v45 }
 0xf38   :  { %v3931_v59 = vpop.f32.mrf.mxu0  ;;  %v3946_v60 = vpop.f32.mrf.mxu1 }
 0xf39   :  { %v3935_v37 = vadd.f32 %v3931_v59, %v3918_v2  ;;  %v3950_v12 = vadd.f32 %v3946_v60, %v3936_v41  ;;  %v4063_v2 = vld [vmem:[#allocation3 + $0x30] sm:$0xff] }
 0xf3b   :  { %v4819_v0 = vmul.f32 -1.442695, %v3935_v37  ;;  %v4820_v23 = vmul.f32 -1.442695, %v3950_v12 }
 0xf3d   :  { %5276 = vpow2.f32 %v4819_v0 }
 0xf3e   :  { %5278 = vpow2.f32 %v4820_v23  ;;  %v4093_v23 = vld [vmem:[#allocation5 + $0x30] sm:$0xff] }
 0xf3f   :  { %v3961_v55 = vpop.f32.mrf.mxu2  ;;  %v3976_v1 = vpop.f32.mrf.mxu3 }
 0xf40   :  { %v3980_v62 = vadd.f32 %v3976_v1, %v3966_v20  ;;  %v3933_v19 = vpop.f32.mrf.mxu0  ;;  %v3948_v39 = vpop.f32.mrf.mxu1  ;;  %v3965_v15 = vadd.f32 %v3961_v55, %v3951_v14 }
 0xf42   :  { %v4821_v8 = vmul.f32 -1.442695, %v3980_v62 }
 0xf43   :  { %v5277_v3 = vpop.eup %5276 }
 0xf44   :  { %v5279_v9 = vpop.eup %5278  ;;  %v3984_v45 = vadd.f32 1.0, %v5277_v3  ;;  %5280 = vpow2.f32 %v4821_v8 }
 0xf45   :  { %v4003_v13 = vadd.f32 1.0, %v5279_v9 }
 0xf46   :  { %5282 = vrcp.f32 %v3984_v45  ;;  %v3996_v31 = vand.u32 2147483648, %v3984_v45  ;;  %v3994_v34 = vand.u32 2147483647, %v3984_v45  ;;  %vm3990_vm13 = vweird.f32 %v3984_v45 }
 0xf47   :  { %5284 = vrcp.f32 %v4003_v13  ;;  %v3963_v36 = vpop.f32.mrf.mxu2  ;;  %v3978_v16 = vpop.f32.mrf.mxu3  ;;  %v4015_v32 = vand.u32 2147483648, %v4003_v13  ;;  %v4013_v49 = vand.u32 2147483647, %v4003_v13  ;;  %vm4009_vm15 = vweird.f32 %v4003_v13 }
 0xf48   :  { %v3997_v51 = vor.u32 1.1754944e-38, %v3996_v31  ;;  %vm3995_vm3 = vcmp.eq.f32.partialorder %v3994_v34, 8.507059e+37  ;;  %v4078_v16 = vld [vmem:[#allocation4 + $0x30] sm:$0xff] }
 0xf49   :  { %v4016_v17 = vor.u32 1.1754944e-38, %v4015_v32  ;;  %vm4014_vm4 = vcmp.eq.f32.partialorder %v4013_v49, 8.507059e+37 }
 0xf4a   :  { %v5281_v40 = vpop.eup %5280 }
 0xf4b   :  { %v4023_v10 = vadd.f32 1.0, %v5281_v40 }
 0xf4c   :  { %v5283_v4 = vpop.eup %5282 }
 0xf4d   :  { %v5285_v18 = vpop.eup %5284  ;;  %v3986_v28 = vmul.f32 %v5283_v4, %v3984_v45  ;;  %5286 = vrcp.f32 %v4023_v10  ;;  %vm3991_vm14 = vweird.f32 %v5283_v4  ;;  %v4035_v50 = vand.u32 2147483648, %v4023_v10 }
 0xf4e   :  { %v4005_v25 = vmul.f32 %v5285_v18, %v4003_v13  ;;  %5288 = vtanh.f32 %v3965_v15  ;;  %vm4010_vm12 = vweird.f32 %v5285_v18  ;;  %vm3992_vm0 = vmor %vm3990_vm13, %vm3991_vm14  ;;  %vm4029_vm6 = vweird.f32 %v4023_v10 }
 0xf4f   :  { %v3987_v26 = vsub.f32 1.0, %v3986_v28  ;;  %vm4011_vm2 = vmor %vm4009_vm15, %vm4010_vm12  ;;  %v4033_v30 = vand.u32 2147483647, %v4023_v10  ;;  %v4036_v46 = vor.u32 1.1754944e-38, %v4035_v50 }
 0xf50   :  { %v4006_v27 = vsub.f32 1.0, %v4005_v25 }
 0xf51   :  { %v3988_v33 = vmul.f32 %v5283_v4, %v3987_v26  ;;  %vm4034_vm8 = vcmp.eq.f32.partialorder %v4033_v30, 8.507059e+37 }
 0xf52   :  { %v4007_v22 = vmul.f32 %v5285_v18, %v4006_v27 }
 0xf53   :  { %v5287_v53 = vpop.eup %5286  ;;  %v3989_v38 = vadd.f32 %v5283_v4, %v3988_v33 }
 0xf54   :  { %v4008_v43 = vadd.f32 %v5285_v18, %v4007_v22  ;;  %v4025_v63 = vmul.f32 %v5287_v53, %v4023_v10  ;;  %v5289_v44 = vpop.eup %5288  ;;  %vm4030_vm5 = vweird.f32 %v5287_v53 }
 0xf55   :  { %v3993_v57 = vsel %vm3992_vm0, %v5283_v4, %v3989_v38  ;;  %vm4031_vm7 = vmor %vm4029_vm6, %vm4030_vm5 }
 0xf56   :  { %v3998_v29 = vsel %vm3995_vm3, %v3997_v51, %v3993_v57  ;;  %v4012_v21 = vsel %vm4011_vm2, %v5285_v18, %v4008_v43  ;;  %v4026_v6 = vsub.f32 1.0, %v4025_v63 }
 0xf57   :  { %v4017_v5 = vsel %vm4014_vm4, %v4016_v17, %v4012_v21  ;;  %v4040_v42 = vmul.f32 %v5289_v44, %v3998_v29 }
 0xf58   :  { %v4039_v52 = vmul.f32 %v4017_v5, %v6480_v56  ;;  %v4027_v7 = vmul.f32 %v5287_v53, %v4026_v6  ;;  %v4045_v56 = vld [vmem:[#allocation2 + $0x30] sm:$0xff] }
 0xf5a   :  { %v6498_v48 = vadd.f32 %v4040_v42, %v4039_v52  ;;  %v4028_v61 = vadd.f32 %v5287_v53, %v4027_v7 }
 0xf5c   :  { %5290 = vtanh.f32 %v6498_v48  ;;  %v4032_v11 = vsel %vm4031_vm7, %v5287_v53, %v4028_v61 }
 0xf5d   :  { %v4037_v35 = vsel %vm4034_vm8, %v4036_v46, %v4032_v11 }
 0xf62   :  { %v5291_v47 = vpop.eup %5290 }
 0xf63   :  { %v4043_v54 = vmul.f32 %v5291_v47, %v4037_v35 }
 0xf65   :  { %v4044_v58 = vpack.c.bf16 %v4043_v54, %v4043_v54 }
 0xf67   :  { %4822 = vmatmul.msk.bf16.vlgmr.msrb.gmra.mxu0 %vm257_vm1, %v4044_v58  ;;  %4823 = vmatmul.msk.bf16.vlgmr.msrb.gmra.mxu1 %vm257_vm1, %v4044_v58 }
 0xf68   :  { %4824 = vmatmul.msk.bf16.vlgmr.msrb.gmra.mxu2 %vm257_vm1, %v4044_v58  ;;  %4825 = vmatmul.msk.bf16.vlgmr.msrb.gmra.mxu3 %vm257_vm1, %v4044_v58 }
 0xfe4   :  { %v4058_v24 = vpop.f32.mrf.mxu0  ;;  %v4073_v59 = vpop.f32.mrf.mxu1 }
 0xfe5   :  { %v4062_v41 = vadd.f32 %v4058_v24, %v4045_v56  ;;  %v4077_v60 = vadd.f32 %v4073_v59, %v4063_v2  ;;  %v4190_v56 = vld [vmem:[#allocation3 + $0x38] sm:$0xff] }
 0xfe7   :  { %v4826_v37 = vmul.f32 -1.442695, %v4062_v41  ;;  %v4827_v12 = vmul.f32 -1.442695, %v4077_v60 }
 0xfe9   :  { %5292 = vpow2.f32 %v4826_v37  ;;  %v4914_v37 = vld [vmem:[%s6537_s10 + $0x8] sm:$0xff] }
 0xfea   :  { %5294 = vpow2.f32 %v4827_v12  ;;  %4328 = vmatpush.bf16.msrb.mxu0 %v4914_v37 }
 0xfeb   :  { %v4088_v0 = vpop.f32.mrf.mxu2  ;;  %v4103_v55 = vpop.f32.mrf.mxu3 }
 0xfec   :  { %v4107_v20 = vadd.f32 %v4103_v55, %v4093_v23  ;;  %v4060_v1 = vpop.f32.mrf.mxu0  ;;  %v4075_v62 = vpop.f32.mrf.mxu1  ;;  %v4092_v10 = vadd.f32 %v4088_v0, %v4078_v16  ;;  %v4220_v0 = vld [vmem:[#allocation5 + $0x38] sm:$0xff]  ;;  %v4913_v55 = vld [vmem:[%s6537_s10] sm:$0xff] }
 0xfed   :  { %v4205_v16 = vld [vmem:[#allocation4 + $0x38] sm:$0xff] }
 0xfee   :  { %v4828_v19 = vmul.f32 -1.442695, %v4107_v20  ;;  %4329 = vmatpush.bf16.msrb.mxu0 %v4913_v55 }
 0xfef   :  { %v5293_v39 = vpop.eup %5292 }
 0xff0   :  { %v5295_v8 = vpop.eup %5294  ;;  %v4111_v3 = vadd.f32 1.0, %v5293_v39  ;;  %5296 = vpow2.f32 %v4828_v19 }
 0xff1   :  { %v4130_v9 = vadd.f32 1.0, %v5295_v8 }
 0xff2   :  { %5298 = vrcp.f32 %v4111_v3  ;;  %v4123_v26 = vand.u32 2147483648, %v4111_v3  ;;  %v4121_v32 = vand.u32 2147483647, %v4111_v3  ;;  %vm4117_vm11 = vweird.f32 %v4111_v3 }
 0xff3   :  { %5300 = vrcp.f32 %v4130_v9  ;;  %v4090_v45 = vpop.f32.mrf.mxu2  ;;  %v4105_v13 = vpop.f32.mrf.mxu3  ;;  %v4142_v27 = vand.u32 2147483648, %v4130_v9  ;;  %v4140_v34 = vand.u32 2147483647, %v4130_v9  ;;  %vm4136_vm14 = vweird.f32 %v4130_v9 }
 0xff4   :  { %v4124_v53 = vor.u32 1.1754944e-38, %v4123_v26  ;;  %vm4122_vm15 = vcmp.eq.f32.partialorder %v4121_v32, 8.507059e+37 }
 0xff5   :  { %v4143_v43 = vor.u32 1.1754944e-38, %v4142_v27  ;;  %vm4141_vm0 = vcmp.eq.f32.partialorder %v4140_v34, 8.507059e+37 }
 0xff6   :  { %v5297_v36 = vpop.eup %5296 }
 0xff7   :  { %v4150_v40 = vadd.f32 1.0, %v5297_v36 }
 0xff8   :  { %v5299_v14 = vpop.eup %5298 }
 0xff9   :  { %v5301_v4 = vpop.eup %5300  ;;  %v4113_v15 = vmul.f32 %v5299_v14, %v4111_v3  ;;  %5302 = vrcp.f32 %v4150_v40  ;;  %vm4118_vm9 = vweird.f32 %v5299_v14  ;;  %v4162_v61 = vand.u32 2147483648, %v4150_v40 }
 0xffa   :  { %v4132_v18 = vmul.f32 %v5301_v4, %v4130_v9  ;;  %5304 = vtanh.f32 %v4092_v10  ;;  %vm4137_vm10 = vweird.f32 %v5301_v4  ;;  %vm4119_vm12 = vmor %vm4117_vm11, %vm4118_vm9  ;;  %vm4156_vm3 = vweird.f32 %v4150_v40 }
 0xffb   :  { %v4114_v28 = vsub.f32 1.0, %v4113_v15  ;;  %vm4138_vm13 = vmor %vm4136_vm14, %vm4137_vm10  ;;  %v4160_v50 = vand.u32 2147483647, %v4150_v40  ;;  %v4163_v11 = vor.u32 1.1754944e-38, %v4162_v61 }
 0xffc   :  { %v4133_v25 = vsub.f32 1.0, %v4132_v18 }
 0xffd   :  { %v4115_v31 = vmul.f32 %v5299_v14, %v4114_v28  ;;  %vm4161_vm5 = vcmp.eq.f32.partialorder %v4160_v50, 8.507059e+37 }
 0xffe   :  { %v4134_v33 = vmul.f32 %v5301_v4, %v4133_v25 }
 0xfff   :  { %v5303_v22 = vpop.eup %5302  ;;  %v4116_v49 = vadd.f32 %v5299_v14, %v4115_v31 }
0x1000   :  { %v4135_v38 = vadd.f32 %v5301_v4, %v4134_v33  ;;  %v4152_v51 = vmul.f32 %v5303_v22, %v4150_v40  ;;  %v5305_v17 = vpop.eup %5304  ;;  %vm4157_vm2 = vweird.f32 %v5303_v22 }
0x1001   :  { %v4120_v63 = vsel %vm4119_vm12, %v5299_v14, %v4116_v49  ;;  %vm4158_vm4 = vmor %vm4156_vm3, %vm4157_vm2  ;;  %vm4335_vm3 = vcmask 56320  }
0x1002   :  { %v4125_v57 = vsel %vm4122_vm15, %v4124_v53, %v4120_v63  ;;  %v4139_v44 = vsel %vm4138_vm13, %v5301_v4, %v4135_v38  ;;  %v4153_v29 = vsub.f32 1.0, %v4152_v51 }
0x1003   :  { %v4144_v21 = vsel %vm4141_vm0, %v4143_v43, %v4139_v44  ;;  %v4167_v6 = vmul.f32 %v5305_v17, %v4125_v57 }
0x1004   :  { %v4166_v5 = vmul.f32 %v4144_v21, %v6498_v48  ;;  %v4154_v42 = vmul.f32 %v5303_v22, %v4153_v29  ;;  %v4172_v48 = vld [vmem:[#allocation2 + $0x38] sm:$0xff] }
0x1006   :  { %v6506_v52 = vadd.f32 %v4167_v6, %v4166_v5  ;;  %v4155_v7 = vadd.f32 %v5303_v22, %v4154_v42 }
0x1008   :  { %5306 = vtanh.f32 %v6506_v52  ;;  %v4159_v30 = vsel %vm4158_vm4, %v5303_v22, %v4155_v7 }
0x1009   :  { %v4164_v47 = vsel %vm4161_vm5, %v4163_v11, %v4159_v30 }
0x100e   :  { %v5307_v46 = vpop.eup %5306 }
0x100f   :  { %v4170_v35 = vmul.f32 %v5307_v46, %v4164_v47 }
0x1011   :  { %v4171_v54 = vpack.c.bf16 %v4170_v35, %v4170_v35 }
0x1013   :  { %4829 = vmatmul.msk.bf16.vlgmr.msra.gmra.mxu0 %vm257_vm1, %v4171_v54  ;;  %4830 = vmatmul.msk.bf16.vlgmr.msra.gmra.mxu1 %vm257_vm1, %v4171_v54 }
0x1014   :  { %4831 = vmatmul.msk.bf16.vlgmr.msra.gmra.mxu2 %vm257_vm1, %v4171_v54  ;;  %4832 = vmatmul.msk.bf16.vlgmr.msra.gmra.mxu3 %vm257_vm1, %v4171_v54 }
0x1090   :  { %v4185_v58 = vpop.f32.mrf.mxu0  ;;  %v4200_v24 = vpop.f32.mrf.mxu1 }
0x1091   :  { %v4189_v2 = vadd.f32 %v4185_v58, %v4172_v48  ;;  %v4204_v59 = vadd.f32 %v4200_v24, %v4190_v56 }
0x1093   :  { %v4833_v41 = vmul.f32 -1.442695, %v4189_v2  ;;  %v4834_v60 = vmul.f32 -1.442695, %v4204_v59 }
0x1095   :  { %5308 = vpow2.f32 %v4833_v41 }
0x1096   :  { %5310 = vpow2.f32 %v4834_v60 }
0x1097   :  { %v4215_v12 = vpop.f32.mrf.mxu2  ;;  %v4230_v23 = vpop.f32.mrf.mxu3 }
0x1098   :  { %v4234_v20 = vadd.f32 %v4230_v23, %v4220_v0  ;;  %v4187_v1 = vpop.f32.mrf.mxu0  ;;  %v4202_v62 = vpop.f32.mrf.mxu1  ;;  %v4219_v10 = vadd.f32 %v4215_v12, %v4205_v16 }
0x109a   :  { %v4835_v19 = vmul.f32 -1.442695, %v4234_v20 }
0x109b   :  { %v5309_v39 = vpop.eup %5308 }
0x109c   :  { %v5311_v8 = vpop.eup %5310  ;;  %v4238_v3 = vadd.f32 1.0, %v5309_v39  ;;  %5312 = vpow2.f32 %v4835_v19 }
0x109d   :  { %v4257_v9 = vadd.f32 1.0, %v5311_v8 }
0x109e   :  { %5314 = vrcp.f32 %v4238_v3  ;;  %v4250_v26 = vand.u32 2147483648, %v4238_v3  ;;  %v4248_v32 = vand.u32 2147483647, %v4238_v3  ;;  %vm4244_vm8 = vweird.f32 %v4238_v3 }
0x109f   :  { %5316 = vrcp.f32 %v4257_v9  ;;  %v4217_v45 = vpop.f32.mrf.mxu2  ;;  %v4232_v13 = vpop.f32.mrf.mxu3  ;;  %v4269_v27 = vand.u32 2147483648, %v4257_v9  ;;  %v4267_v34 = vand.u32 2147483647, %v4257_v9  ;;  %vm4263_vm9 = vweird.f32 %v4257_v9 }
0x10a0   :  { %v4251_v53 = vor.u32 1.1754944e-38, %v4250_v26  ;;  %vm4249_vm14 = vcmp.eq.f32.partialorder %v4248_v32, 8.507059e+37 }
0x10a1   :  { %v4270_v43 = vor.u32 1.1754944e-38, %v4269_v27  ;;  %vm4268_vm12 = vcmp.eq.f32.partialorder %v4267_v34, 8.507059e+37 }
0x10a2   :  { %v5313_v36 = vpop.eup %5312 }
0x10a3   :  { %v4277_v40 = vadd.f32 1.0, %v5313_v36 }
0x10a4   :  { %v5315_v14 = vpop.eup %5314 }
0x10a5   :  { %v5317_v4 = vpop.eup %5316  ;;  %v4240_v15 = vmul.f32 %v5315_v14, %v4238_v3  ;;  %5318 = vrcp.f32 %v4277_v40  ;;  %vm4245_vm6 = vweird.f32 %v5315_v14  ;;  %v4289_v50 = vand.u32 2147483648, %v4277_v40 }
0x10a6   :  { %v4259_v18 = vmul.f32 %v5317_v4, %v4257_v9  ;;  %5320 = vtanh.f32 %v4219_v10  ;;  %vm4264_vm7 = vweird.f32 %v5317_v4  ;;  %vm4246_vm10 = vmor %vm4244_vm8, %vm4245_vm6  ;;  %vm4283_vm15 = vweird.f32 %v4277_v40 }
0x10a7   :  { %v4241_v28 = vsub.f32 1.0, %v4240_v15  ;;  %vm4265_vm11 = vmor %vm4263_vm9, %vm4264_vm7  ;;  %v4287_v30 = vand.u32 2147483647, %v4277_v40  ;;  %v4290_v46 = vor.u32 1.1754944e-38, %v4289_v50 }
0x10a8   :  { %v4260_v25 = vsub.f32 1.0, %v4259_v18 }
0x10a9   :  { %v4242_v31 = vmul.f32 %v5315_v14, %v4241_v28  ;;  %vm4288_vm2 = vcmp.eq.f32.partialorder %v4287_v30, 8.507059e+37 }
0x10aa   :  { %v4261_v33 = vmul.f32 %v5317_v4, %v4260_v25 }
0x10ab   :  { %v5319_v22 = vpop.eup %5318  ;;  %v4243_v49 = vadd.f32 %v5315_v14, %v4242_v31 }
0x10ac   :  { %v4262_v38 = vadd.f32 %v5317_v4, %v4261_v33  ;;  %v4279_v51 = vmul.f32 %v5319_v22, %v4277_v40  ;;  %v5321_v17 = vpop.eup %5320  ;;  %vm4284_vm13 = vweird.f32 %v5319_v22 }
0x10ad   :  { %v4247_v63 = vsel %vm4246_vm10, %v5315_v14, %v4243_v49  ;;  %vm4285_vm0 = vmor %vm4283_vm15, %vm4284_vm13 }
0x10ae   :  { %v4252_v57 = vsel %vm4249_vm14, %v4251_v53, %v4247_v63  ;;  %v4266_v44 = vsel %vm4265_vm11, %v5317_v4, %v4262_v38  ;;  %v4280_v29 = vsub.f32 1.0, %v4279_v51 }
0x10af   :  { %v4271_v21 = vsel %vm4268_vm12, %v4270_v43, %v4266_v44  ;;  %v4294_v6 = vmul.f32 %v5321_v17, %v4252_v57 }
0x10b0   :  { %v4293_v5 = vmul.f32 %v4271_v21, %v6506_v52  ;;  %v4281_v42 = vmul.f32 %v5319_v22, %v4280_v29  ;;  %v4939_v52 = vld [vmem:[%s6538_s11] ss:$0 sm:$0xff] }
0x10b2   :  { %v4295_v7 = vadd.f32 %v4294_v6, %v4293_v5  ;;  %v4282_v61 = vadd.f32 %v5319_v22, %v4281_v42 }
0x10b4   :  { %5322 = vtanh.f32 %v4295_v7  ;;  %v4286_v11 = vsel %vm4285_vm0, %v5319_v22, %v4282_v61 }
0x10b5   :  { %v4291_v35 = vsel %vm4288_vm2, %v4290_v46, %v4286_v11 }
0x10ba   :  { %v5323_v47 = vpop.eup %5322 }
0x10bb   :  { %v4297_v54 = vmul.f32 %v5323_v47, %v4291_v35 }
0x10bd   :  { %v4298_v48 = vpack.c.bf16 %v4297_v54, %v4297_v54 }
0x10bf   :  { %4844 = vmatmul.msk.bf16.vlgmr.msrb.gmra.mxu0 %vm257_vm1, %v4298_v48 }
0x113c   :  { %v4331_v58 = vpop.f32.mrf.mxu0 }
0x113d   :  { %v4332_v56 = vadd.f32 %v4939_v52, %v4331_v58 }
0x113f   :  { %4336 = vst.msk [vmem:[%s6539_s12] sm:$0xff] %vm4335_vm3, %v4332_v56 }
0x1144   :  { %v4333_v24 = vpop.f32.mrf.mxu0 }
0x1145   :  { %4341 = vsyncpa [#allocation8], 1 }
0x1146   :  { %4342 = vsyncpa [#allocation10], 1 }
0x1147   :  { %4343 = vsyncpa [#allocation13], 1 }
0x1148   :  { %4344 = vsyncpa [#allocation16], 1 }

</bundles_post_ra>
